<compile_context>
chip_gen: v7x
topology: tpu7x:2x2x1
jax: 0.10.0
libtpu: 0.0.40
codegen_flags: <defaults>
</compile_context>

<pallas_src>
import functools

import jax
import jax.numpy as jnp
import numpy as np
from jax import lax
from jax.experimental import pallas as pl
from jax.experimental.pallas import tpu as pltpu


def _fused_woq_kernel(act_ref, qw_ref, sc_ref, szp_ref, pmat_ref, bias_ref,
                      add1_ref, add2_ref, out_ref, ares_ref, wcache_ref, *,
                      group_size, n_col_blocks, cache_w):
    phase = pl.program_id(1)
    j = pl.program_id(2)
    tn = out_ref.shape[-1]

    def dequant_tile():
        # nibble s of packed row p (bits 4s..4s+3) holds the uint4 weight of K-row 8*p+s
        qw = qw_ref[...]                                     # (K//8, tn) int32
        kp = qw.shape[0]
        k_rows = kp * 8
        ng = k_rows // group_size
        shifts = lax.broadcasted_iota(jnp.int32, (1, 8, 1), 1) * 4    # 8-element pattern
        nib = (qw[:, None, :] >> shifts) & 0xF               # (K//8, 8, tn) int32
        q = nib.reshape(k_rows, tn).reshape(ng, group_size, tn)
        q = q.astype(jnp.float32).astype(jnp.bfloat16)
        # zero point folded out (group-sum correction matmul below); scale-only dequant
        # with an implicit per-group broadcast -> one bf16 multiply per weight element.
        w = q * sc_ref[...][:, None, :]
        return w.reshape(k_rows, tn)                         # (K, tn) bf16

    def corrected_matmul(x_bf16, w_bf16):
        # x @ Wdequant == x @ (q*s) - (x @ P) @ (s*z)
        acc = jnp.dot(x_bf16, w_bf16, preferred_element_type=jnp.float32)
        gsum = jnp.dot(x_bf16, pmat_ref[...], preferred_element_type=jnp.float32)
        corr = jnp.dot(gsum, szp_ref[...], preferred_element_type=jnp.float32)
        return acc - corr

    @pl.when(phase == 0)
    def _first_linear():
        w = dequant_tile()
        if cache_w:
            wcache_ref[j] = w                                # dequantized once, reused
        acc = corrected_matmul(act_ref[...], w)
        ares = acc + bias_ref[...] + add1_ref[...] + add2_ref[...]
        # store this column block of add_res in the row-resident f32 scratch
        # (static slices only, gated on the grid index).
        for jj in range(n_col_blocks):
            @pl.when(j == jj)
            def _(jj=jj):
                ares_ref[:, jj * tn:(jj + 1) * tn] = ares

    @pl.when(phase == 1)
    def _second_linear():
        ares_full = ares_ref[...]                            # (tm, K) f32
        if cache_w:
            w = wcache_ref[j]
        else:
            w = dequant_tile()                               # fallback for very large K*N
        acc = corrected_matmul(ares_full.astype(jnp.bfloat16), w)
        y_plus = acc + bias_ref[...] + add1_ref[...]
        ares_tile = ares_full[:, 0:tn]
        for jj in range(1, n_col_blocks):
            ares_tile = jnp.where(j == jj,
                                  ares_full[:, jj * tn:(jj + 1) * tn], ares_tile)
        out_ref[...] = (ares_tile * y_plus).astype(out_ref.dtype)


def _pick_tiles(M, K, N):
    tm = M if M <= 256 else next((c for c in (256, 128, 64, 32, 16, 8) if M % c == 0), M)
    # lane-dense column tiles; cap the per-step int32 unpack temporary (K*tn*4 B) ~2 MiB
    tn = next((c for c in (1024, 512, 256, 128)
               if N % c == 0 and K * c * 4 <= (2 << 20)), None)
    if tn is None:
        tn = 128 if N % 128 == 0 else N
    return tm, tn


def _woq_linear_add_sequential(inp, qweight, woq_scales, woq_qzeros, woq_bias,
                               add1, add2, group_size):
    M, K = inp.shape
    kp, N = qweight.shape
    assert kp * 8 == K, "packed qweight must hold 8 K-rows per int32 word"
    assert K == N, "sequential WOQ-linear chain requires in_features == out_features"
    assert K % group_size == 0 and group_size % 8 == 0
    ng = K // group_size
    assert woq_scales.shape == (ng, N) and woq_qzeros.shape == (ng, N)

    tm, tn = _pick_tiles(M, K, N)
    assert M % tm == 0 and N % tn == 0
    ni, nj = M // tm, N // tn
    # cache the dequantized bf16 weights between the two phases when they fit
    # comfortably in VMEM (otherwise re-dequantize in phase 1, e.g. huge K*N on v7x).
    cache_w = (K * N * 2) <= (8 << 20)

    act_bf16 = inp.astype(jnp.bfloat16)
    sc_bf16 = woq_scales.astype(jnp.bfloat16)
    szp_f32 = woq_scales.astype(jnp.float32) * woq_qzeros.astype(jnp.float32)
    pmat = (jnp.arange(K, dtype=jnp.int32)[:, None] // group_size
            == jnp.arange(ng, dtype=jnp.int32)[None, :]).astype(jnp.bfloat16)
    bias2d = woq_bias.astype(jnp.float32).reshape(1, N)
    add1_f = add1.astype(jnp.float32)
    add2_f = add2.astype(jnp.float32)

    def col_idx(i, p, j):
        # weights / scales are only read while dequantizing: with the VMEM weight
        # cache, freeze their block index during phase 1 so no DMA is re-issued.
        if cache_w:
            return (0, j + p * (nj - 1 - j))
        return (0, j)

    kernel = functools.partial(_fused_woq_kernel, group_size=group_size,
                               n_col_blocks=nj, cache_w=cache_w)

    bytes_accessed = (M * K * 2 + K * N // 2 + ng * N * 6 + K * ng * 2
                      + N * 4 + 2 * M * N * 4 + M * N * 4)

    return pl.pallas_call(
        kernel,
        out_shape=jax.ShapeDtypeStruct((M, N), jnp.float32),
        grid_spec=pltpu.PrefetchScalarGridSpec(
            num_scalar_prefetch=0,
            grid=(ni, 2, nj),
            in_specs=[
                pl.BlockSpec((tm, K), lambda i, p, j: (i, 0)),    # activations (bf16)
                pl.BlockSpec((kp, tn), col_idx),                  # packed int4 weights
                pl.BlockSpec((ng, tn), col_idx),                  # per-group scales (bf16)
                pl.BlockSpec((ng, tn), lambda i, p, j: (0, j)),   # scales*zeros (f32)
                pl.BlockSpec((K, ng), lambda i, p, j: (0, 0)),    # group indicator (bf16)
                pl.BlockSpec((1, tn), lambda i, p, j: (0, j)),    # bias
                pl.BlockSpec((tm, tn), lambda i, p, j: (i, j)),   # add1 (both phases)
                pl.BlockSpec((tm, tn), lambda i, p, j: (i, j)),   # add2 (phase 0 only)
            ],
            # phase 0 pins the output block index at (i, 0): no write-back of untouched
            # buffers; phase 1 walks j and each HBM block is written exactly once.
            out_specs=pl.BlockSpec((tm, tn), lambda i, p, j: (i, j * p)),
            scratch_shapes=[
                pltpu.VMEM((tm, N), jnp.float32),                 # row-resident add_res
                pltpu.VMEM((nj, K, tn) if cache_w else (1, 8, 128), jnp.bfloat16),
            ],
        ),
        compiler_params=pltpu.CompilerParams(
            dimension_semantics=("parallel", "arbitrary", "arbitrary"),
            vmem_limit_bytes=32 * 1024 * 1024,
        ),
        cost_estimate=pl.CostEstimate(flops=4 * M * K * N, transcendentals=0,
                                      bytes_accessed=bytes_accessed),
    )(act_bf16, qweight, sc_bf16, szp_f32, pmat, bias2d, add1_f, add2_f)


woq_linear_add_sequential = jax.jit(_woq_linear_add_sequential, static_argnums=(7,))


if __name__ == "__main__":
    # tokens, in_features == out_features (sequential chain), group size
    M, K, N, G = 16, 1024, 1024, 32
    n_groups = K // G
    kp = K // 8

    key = jax.random.PRNGKey(0)
    k_inp, k_q, k_s, k_z, k_b, k_a1, k_a2 = jax.random.split(key, 7)

    inp = jax.random.normal(k_inp, (M, K), dtype=jnp.float32)
    q_int = jax.random.randint(k_q, (K, N), 0, 16, dtype=jnp.int32)        # uint4 values
    woq_scales = jax.random.uniform(k_s, (n_groups, N), dtype=jnp.float32,
                                    minval=0.01, maxval=0.05)
    woq_qzeros = jax.random.randint(k_z, (n_groups, N), 0, 16, dtype=jnp.int32)
    woq_bias = jax.random.normal(k_b, (N,), dtype=jnp.float32)
    add1 = jax.random.normal(k_a1, (M, N), dtype=jnp.float32)
    add2 = jax.random.normal(k_a2, (M, N), dtype=jnp.float32)

    # Pack 8 consecutive K rows per int32: nibble s of packed row p = logical row 8p + s.
    q_np = np.asarray(q_int).astype(np.uint32)
    packed = np.zeros((kp, N), dtype=np.uint32)
    for s in range(8):
        packed |= q_np[s::8, :] << np.uint32(4 * s)
    qweight = jnp.asarray(packed.view(np.int32))

    out = woq_linear_add_sequential(inp, qweight, woq_scales, woq_qzeros,
                                    woq_bias, add1, add2, G)
    out = np.asarray(jax.block_until_ready(out))

    # Exact f32 reference for the same sequential semantics.
    scales_exp = np.repeat(np.asarray(woq_scales), G, axis=0)
    zeros_exp = np.repeat(np.asarray(woq_qzeros).astype(np.float32), G, axis=0)
    w_ref = (np.asarray(q_int).astype(np.float32) - zeros_exp) * scales_exp
    woq_ref = np.asarray(inp) @ w_ref + np.asarray(woq_bias)[None, :]
    add_res_ref = woq_ref + np.asarray(add1) + np.asarray(add2)
    y_ref = add_res_ref @ w_ref + np.asarray(woq_bias)[None, :]
    ref = add_res_ref * (y_ref + np.asarray(add1))

    # Norm-relative check (bf16 MXU operands / bf16 dequant, f32 accumulation).
    err = float(np.max(np.abs(out - ref)))
    tol = 2e-2 * float(np.max(np.abs(ref))) + 1e-2
    assert err <= tol, (err, tol)

    print("KERNEL_OK")
</pallas_src>

<mosaic_0001>
module attributes {stable_mosaic.version = 11 : i64} {
  func.func @_fused_woq_kernel(%arg0: i32, %arg1: i32, %arg2: i32, %arg3: memref<16x1024xbf16, #tpu.memory_space<vmem>>, %arg4: memref<128x512xi32, #tpu.memory_space<vmem>>, %arg5: memref<32x512xbf16, #tpu.memory_space<vmem>>, %arg6: memref<32x512xf32, #tpu.memory_space<vmem>>, %arg7: memref<1024x32xbf16, #tpu.memory_space<vmem>>, %arg8: memref<1x512xf32, #tpu.memory_space<vmem>>, %arg9: memref<16x512xf32, #tpu.memory_space<vmem>>, %arg10: memref<16x512xf32, #tpu.memory_space<vmem>>, %arg11: memref<16x512xf32, #tpu.memory_space<vmem>>, %arg12: memref<16x1024xf32, #tpu.memory_space<vmem>>, %arg13: memref<2x1024x512xbf16, #tpu.memory_space<vmem>>) attributes {dimension_semantics = [#tpu.dimension_semantics<parallel>, #tpu.dimension_semantics<arbitrary>, #tpu.dimension_semantics<arbitrary>], iteration_bounds = array<i64: 1, 2, 2>, scalar_prefetch = 0 : i64, scratch_operands = 2 : i64, tpu.core_type = #tpu.core_type<tc>, window_params = [{transform_indices = @transform_0, window_bounds = array<i64: 16, 1024>}, {transform_indices = @transform_1, window_bounds = array<i64: 128, 512>}, {transform_indices = @transform_2, window_bounds = array<i64: 32, 512>}, {transform_indices = @transform_3, window_bounds = array<i64: 32, 512>}, {pipeline_mode = #tpu.pipeline_mode<synchronous>, transform_indices = @transform_4, window_bounds = array<i64: 1024, 32>}, {transform_indices = @transform_5, window_bounds = array<i64: 1, 512>}, {transform_indices = @transform_6, window_bounds = array<i64: 16, 512>}, {transform_indices = @transform_7, window_bounds = array<i64: 16, 512>}, {transform_indices = @transform_8, window_bounds = array<i64: 16, 512>}]} {
    %c0_i32 = arith.constant 0 : i32
    %0 = arith.cmpi eq, %arg1, %c0_i32 : i32
    %1 = arith.extui %0 : i1 to i32
    %c0_i32_0 = arith.constant 0 : i32
    %2 = arith.cmpi ne, %1, %c0_i32_0 : i32
    scf.if %2 {
      %c0 = arith.constant 0 : index
      %c0_2 = arith.constant 0 : index
      %6 = vector.load %arg4[%c0, %c0_2] : memref<128x512xi32, #tpu.memory_space<vmem>>, vector<128x512xi32>
      %7 = tpu.iota {dimensions = array<i32: 1>} : vector<1x8x1xi32>
      %c4_i32 = arith.constant 4 : i32
      %8 = vector.broadcast %c4_i32 : i32 to vector<1x8x1xi32>
      %9 = arith.muli %7, %8 : vector<1x8x1xi32>
      %10 = vector.shape_cast %6 : vector<128x512xi32> to vector<128x1x512xi32>
      %11 = vector.broadcast %10 : vector<128x1x512xi32> to vector<128x8x512xi32>
      %12 = vector.broadcast %9 : vector<1x8x1xi32> to vector<128x8x512xi32>
      %13 = arith.shrsi %11, %12 : vector<128x8x512xi32>
      %c15_i32 = arith.constant 15 : i32
      %14 = vector.broadcast %c15_i32 : i32 to vector<128x8x512xi32>
      %15 = arith.andi %13, %14 : vector<128x8x512xi32>
      %16 = vector.shape_cast %15 : vector<128x8x512xi32> to vector<1024x512xi32>
      %17 = vector.shape_cast %16 : vector<1024x512xi32> to vector<32x32x512xi32>
      %18 = arith.sitofp %17 : vector<32x32x512xi32> to vector<32x32x512xf32>
      %19 = arith.truncf %18 : vector<32x32x512xf32> to vector<32x32x512xbf16>
      %c0_3 = arith.constant 0 : index
      %c0_4 = arith.constant 0 : index
      %20 = vector.load %arg5[%c0_3, %c0_4] : memref<32x512xbf16, #tpu.memory_space<vmem>>, vector<32x512xbf16>
      %21 = vector.shape_cast %20 : vector<32x512xbf16> to vector<32x1x512xbf16>
      %22 = vector.broadcast %21 : vector<32x1x512xbf16> to vector<32x32x512xbf16>
      %23 = arith.mulf %19, %22 : vector<32x32x512xbf16>
      %24 = vector.shape_cast %23 : vector<32x32x512xbf16> to vector<1024x512xbf16>
      %25 = arith.index_cast %arg2 : i32 to index
      %c0_5 = arith.constant 0 : index
      %c0_6 = arith.constant 0 : index
      %26 = vector.load %arg13[%25, %c0_5, %c0_6] : memref<2x1024x512xbf16, #tpu.memory_space<vmem>>, vector<1x1024x512xbf16>
      %27 = vector.shape_cast %26 : vector<1x1024x512xbf16> to vector<1024x512xbf16>
      %28 = vector.shape_cast %24 : vector<1024x512xbf16> to vector<1x1024x512xbf16>
      tpu.vector_store %arg13[%25, %c0_5, %c0_6], %28 {strides = array<i32>} : memref<2x1024x512xbf16, #tpu.memory_space<vmem>>, vector<1x1024x512xbf16>,
      %c0_7 = arith.constant 0 : index
      %c0_8 = arith.constant 0 : index
      %29 = vector.load %arg3[%c0_7, %c0_8] : memref<16x1024xbf16, #tpu.memory_space<vmem>>, vector<16x1024xbf16>
      %cst = arith.constant dense<0.000000e+00> : vector<16x512xf32>
      %30 = tpu.matmul %29, %24, %cst {dimension_numbers = #tpu.dot_dimension_numbers<[1], [0], [0], [1], [0, 0, 1, 1], [], []>} : vector<16x1024xbf16>, vector<1024x512xbf16>, vector<16x512xf32> -> vector<16x512xf32>
      %c0_9 = arith.constant 0 : index
      %c0_10 = arith.constant 0 : index
      %31 = vector.load %arg7[%c0_9, %c0_10] : memref<1024x32xbf16, #tpu.memory_space<vmem>>, vector<1024x32xbf16>
      %cst_11 = arith.constant dense<0.000000e+00> : vector<16x32xf32>
      %32 = tpu.matmul %29, %31, %cst_11 {dimension_numbers = #tpu.dot_dimension_numbers<[1], [0], [0], [1], [0, 0, 1, 1], [], []>} : vector<16x1024xbf16>, vector<1024x32xbf16>, vector<16x32xf32> -> vector<16x32xf32>
      %c0_12 = arith.constant 0 : index
      %c0_13 = arith.constant 0 : index
      %33 = vector.load %arg6[%c0_12, %c0_13] : memref<32x512xf32, #tpu.memory_space<vmem>>, vector<32x512xf32>
      %cst_14 = arith.constant dense<0.000000e+00> : vector<16x512xf32>
      %34 = tpu.matmul %32, %33, %cst_14 {dimension_numbers = #tpu.dot_dimension_numbers<[1], [0], [0], [1], [0, 0, 1, 1], [], []>} : vector<16x32xf32>, vector<32x512xf32>, vector<16x512xf32> -> vector<16x512xf32>
      %35 = arith.subf %30, %34 : vector<16x512xf32>
      %c0_15 = arith.constant 0 : index
      %c0_16 = arith.constant 0 : index
      %36 = vector.load %arg8[%c0_15, %c0_16] : memref<1x512xf32, #tpu.memory_space<vmem>>, vector<1x512xf32>
      %37 = vector.broadcast %36 : vector<1x512xf32> to vector<16x512xf32>
      %38 = arith.addf %35, %37 : vector<16x512xf32>
      %c0_17 = arith.constant 0 : index
      %c0_18 = arith.constant 0 : index
      %39 = vector.load %arg9[%c0_17, %c0_18] : memref<16x512xf32, #tpu.memory_space<vmem>>, vector<16x512xf32>
      %40 = arith.addf %38, %39 : vector<16x512xf32>
      %c0_19 = arith.constant 0 : index
      %c0_20 = arith.constant 0 : index
      %41 = vector.load %arg10[%c0_19, %c0_20] : memref<16x512xf32, #tpu.memory_space<vmem>>, vector<16x512xf32>
      %42 = arith.addf %40, %41 : vector<16x512xf32>
      %c0_i32_21 = arith.constant 0 : i32
      %43 = arith.cmpi eq, %arg2, %c0_i32_21 : i32
      %44 = arith.extui %43 : i1 to i32
      %c0_i32_22 = arith.constant 0 : i32
      %45 = arith.cmpi ne, %44, %c0_i32_22 : i32
      scf.if %45 {
        %c0_25 = arith.constant 0 : index
        %c0_26 = arith.constant 0 : index
        %49 = vector.load %arg12[%c0_25, %c0_26] : memref<16x1024xf32, #tpu.memory_space<vmem>>, vector<16x512xf32>
        tpu.vector_store %arg12[%c0_25, %c0_26], %42 {strides = array<i32>} : memref<16x1024xf32, #tpu.memory_space<vmem>>, vector<16x512xf32>,
      } else {
      }
      %c1_i32_23 = arith.constant 1 : i32
      %46 = arith.cmpi eq, %arg2, %c1_i32_23 : i32
      %47 = arith.extui %46 : i1 to i32
      %c0_i32_24 = arith.constant 0 : i32
      %48 = arith.cmpi ne, %47, %c0_i32_24 : i32
      scf.if %48 {
        %c0_25 = arith.constant 0 : index
        %c512 = arith.constant 512 : index
        %49 = vector.load %arg12[%c0_25, %c512] : memref<16x1024xf32, #tpu.memory_space<vmem>>, vector<16x512xf32>
        tpu.vector_store %arg12[%c0_25, %c512], %42 {strides = array<i32>} : memref<16x1024xf32, #tpu.memory_space<vmem>>, vector<16x512xf32>,
      } else {
      }
    } else {
    }
    %c1_i32 = arith.constant 1 : i32
    %3 = arith.cmpi eq, %arg1, %c1_i32 : i32
    %4 = arith.extui %3 : i1 to i32
    %c0_i32_1 = arith.constant 0 : i32
    %5 = arith.cmpi ne, %4, %c0_i32_1 : i32
    scf.if %5 {
      %c0 = arith.constant 0 : index
      %c0_2 = arith.constant 0 : index
      %6 = vector.load %arg12[%c0, %c0_2] : memref<16x1024xf32, #tpu.memory_space<vmem>>, vector<16x1024xf32>
      %7 = arith.index_cast %arg2 : i32 to index
      %c0_3 = arith.constant 0 : index
      %c0_4 = arith.constant 0 : index
      %8 = vector.load %arg13[%7, %c0_3, %c0_4] : memref<2x1024x512xbf16, #tpu.memory_space<vmem>>, vector<1x1024x512xbf16>
      %9 = vector.shape_cast %8 : vector<1x1024x512xbf16> to vector<1024x512xbf16>
      %10 = arith.truncf %6 : vector<16x1024xf32> to vector<16x1024xbf16>
      %cst = arith.constant dense<0.000000e+00> : vector<16x512xf32>
      %11 = tpu.matmul %10, %9, %cst {dimension_numbers = #tpu.dot_dimension_numbers<[1], [0], [0], [1], [0, 0, 1, 1], [], []>} : vector<16x1024xbf16>, vector<1024x512xbf16>, vector<16x512xf32> -> vector<16x512xf32>
      %c0_5 = arith.constant 0 : index
      %c0_6 = arith.constant 0 : index
      %12 = vector.load %arg7[%c0_5, %c0_6] : memref<1024x32xbf16, #tpu.memory_space<vmem>>, vector<1024x32xbf16>
      %cst_7 = arith.constant dense<0.000000e+00> : vector<16x32xf32>
      %13 = tpu.matmul %10, %12, %cst_7 {dimension_numbers = #tpu.dot_dimension_numbers<[1], [0], [0], [1], [0, 0, 1, 1], [], []>} : vector<16x1024xbf16>, vector<1024x32xbf16>, vector<16x32xf32> -> vector<16x32xf32>
      %c0_8 = arith.constant 0 : index
      %c0_9 = arith.constant 0 : index
      %14 = vector.load %arg6[%c0_8, %c0_9] : memref<32x512xf32, #tpu.memory_space<vmem>>, vector<32x512xf32>
      %cst_10 = arith.constant dense<0.000000e+00> : vector<16x512xf32>
      %15 = tpu.matmul %13, %14, %cst_10 {dimension_numbers = #tpu.dot_dimension_numbers<[1], [0], [0], [1], [0, 0, 1, 1], [], []>} : vector<16x32xf32>, vector<32x512xf32>, vector<16x512xf32> -> vector<16x512xf32>
      %16 = arith.subf %11, %15 : vector<16x512xf32>
      %c0_11 = arith.constant 0 : index
      %c0_12 = arith.constant 0 : index
      %17 = vector.load %arg8[%c0_11, %c0_12] : memref<1x512xf32, #tpu.memory_space<vmem>>, vector<1x512xf32>
      %18 = vector.broadcast %17 : vector<1x512xf32> to vector<16x512xf32>
      %19 = arith.addf %16, %18 : vector<16x512xf32>
      %c0_13 = arith.constant 0 : index
      %c0_14 = arith.constant 0 : index
      %20 = vector.load %arg9[%c0_13, %c0_14] : memref<16x512xf32, #tpu.memory_space<vmem>>, vector<16x512xf32>
      %21 = arith.addf %19, %20 : vector<16x512xf32>
      %22 = vector.extract_strided_slice %6 {offsets = [0, 0], sizes = [16, 512], strides = [1, 1]} : vector<16x1024xf32> to vector<16x512xf32>
      %c1_i32_15 = arith.constant 1 : i32
      %23 = arith.cmpi eq, %arg2, %c1_i32_15 : i32
      %24 = vector.extract_strided_slice %6 {offsets = [0, 512], sizes = [16, 512], strides = [1, 1]} : vector<16x1024xf32> to vector<16x512xf32>
      %25 = arith.select %23, %24, %22 : vector<16x512xf32>
      %26 = arith.mulf %25, %21 : vector<16x512xf32>
      %c0_16 = arith.constant 0 : index
      %c0_17 = arith.constant 0 : index
      %27 = vector.load %arg11[%c0_16, %c0_17] : memref<16x512xf32, #tpu.memory_space<vmem>>, vector<16x512xf32>
      tpu.vector_store %arg11[%c0_16, %c0_17], %26 {strides = array<i32>} : memref<16x512xf32, #tpu.memory_space<vmem>>, vector<16x512xf32>,
    } else {
    }
    return
  }
  func.func @transform_0(%arg0: i32, %arg1: i32, %arg2: i32) -> (i32, i32) {
    %c0_i32 = arith.constant 0 : i32
    %c0_i32_0 = arith.constant 0 : i32
    return %arg0, %c0_i32 : i32, i32
  }
  func.func @transform_1(%arg0: i32, %arg1: i32, %arg2: i32) -> (i32, i32) {
    %c1_i32 = arith.constant 1 : i32
    %0 = arith.subi %c1_i32, %arg2 : i32
    %1 = arith.muli %arg1, %0 : i32
    %2 = arith.addi %arg2, %1 : i32
    %c0_i32 = arith.constant 0 : i32
    %c0_i32_0 = arith.constant 0 : i32
    return %c0_i32, %2 : i32, i32
  }
  func.func @transform_2(%arg0: i32, %arg1: i32, %arg2: i32) -> (i32, i32) {
    %c1_i32 = arith.constant 1 : i32
    %0 = arith.subi %c1_i32, %arg2 : i32
    %1 = arith.muli %arg1, %0 : i32
    %2 = arith.addi %arg2, %1 : i32
    %c0_i32 = arith.constant 0 : i32
    %c0_i32_0 = arith.constant 0 : i32
    return %c0_i32, %2 : i32, i32
  }
  func.func @transform_3(%arg0: i32, %arg1: i32, %arg2: i32) -> (i32, i32) {
    %c0_i32 = arith.constant 0 : i32
    %c0_i32_0 = arith.constant 0 : i32
    return %c0_i32, %arg2 : i32, i32
  }
  func.func @transform_4(%arg0: i32, %arg1: i32, %arg2: i32) -> (i32, i32) {
    %c0_i32 = arith.constant 0 : i32
    %c0_i32_0 = arith.constant 0 : i32
    %c0_i32_1 = arith.constant 0 : i32
    return %c0_i32, %c0_i32_0 : i32, i32
  }
  func.func @transform_5(%arg0: i32, %arg1: i32, %arg2: i32) -> (i32, i32) {
    %c0_i32 = arith.constant 0 : i32
    %c0_i32_0 = arith.constant 0 : i32
    return %c0_i32, %arg2 : i32, i32
  }
  func.func @transform_6(%arg0: i32, %arg1: i32, %arg2: i32) -> (i32, i32) {
    %c0_i32 = arith.constant 0 : i32
    return %arg0, %arg2 : i32, i32
  }
  func.func @transform_7(%arg0: i32, %arg1: i32, %arg2: i32) -> (i32, i32) {
    %c0_i32 = arith.constant 0 : i32
    return %arg0, %arg2 : i32, i32
  }
  func.func @transform_8(%arg0: i32, %arg1: i32, %arg2: i32) -> (i32, i32) {
    %0 = arith.muli %arg2, %arg1 : i32
    %c0_i32 = arith.constant 0 : i32
    return %arg0, %0 : i32, i32
  }
}

</mosaic_0001>

<bundles_post_ra>
// kernel: _woq_linear_add_sequential.1
= control target key start
LH: loop header
LB: loop body
LE: loop exit
PB: predicated region body
PF: predicated region fallthrough
CT: control target
= control target key end

     0   :  { %s16056_s0 = inlined_call_operand.vmem [shape: bf16[16,1024], index: 0, kind: input, shape index: {}]   ;;  %s16057_s1 = inlined_call_operand.vmem [shape: s32[128,1024], index: 1, kind: input, shape index: {}]   ;;  %s16058_s2 = inlined_call_operand.vmem [shape: bf16[32,1024], index: 2, kind: input, shape index: {}]   ;;  %s16059_s3 = inlined_call_operand.vmem [shape: f32[32,1024], index: 3, kind: input, shape index: {}]   ;;  %s16060_s4 = inlined_call_operand.vmem [shape: bf16[1024,32], index: 4, kind: input, shape index: {}]   ;;  %s16061_s5 = inlined_call_operand.vmem [shape: f32[1,1024], index: 5, kind: input, shape index: {}]   ;;  %s16062_s6 = inlined_call_operand.vmem [shape: f32[16,1024], index: 6, kind: input, shape index: {}]   ;;  %s16063_s7 = inlined_call_operand.vmem [shape: f32[16,1024], index: 7, kind: input, shape index: {}]   ;;  %s16064_s8 = inlined_call_operand.hbm [shape: f32[16,1024], index: 8, kind: output, shape index: {}]  }
   0x1   :  { %16074 = sst [smem:[#allocation16_spill]] %s16056_s0 }
   0x2   :  { %16075 = sst [smem:[#allocation17_spill]] %s16057_s1 }
   0x3   :  { %16076 = sst [smem:[#allocation18_spill]] %s16058_s2 }
   0x4   :  { %16077 = sst [smem:[#allocation19_spill]] %s16059_s3 }
   0x5   :  { %16078 = sst [smem:[#allocation20_spill]] %s16060_s4 }
   0x6   :  { %16079 = sst [smem:[#allocation21_spill]] %s16061_s5 }
   0x7   :  { %16080 = sst [smem:[#allocation22_spill]] %s16062_s6 }
   0x8   :  { %16081 = sst [smem:[#allocation23_spill]] %s16063_s7 }
   0x9   :  { %16082 = sst [smem:[#allocation24_spill]] %s16064_s8 }
   0xa   :  { %13 = vsyncpa [#allocation10], 0 }
   0xb   :  { %15 = vsyncpa [#allocation10 + $0x1], 0  ;;  %s12036_s27 = smov 0   ;;  %s12038_s28 = smov 0  }
   0xc   :  { %s12040_s29 = smov 0   ;;  %s12042_s30 = smov 0  }
   0xd   :  { %s12044_s9 = smov 0   ;;  %s12046_s10 = smov 0  }
   0xe   :  { %s12048_s11 = smov 0   ;;  %s12050_s12 = smov 0  }
   0xf   :  { %s12052_s13 = smov 0   ;;  %s12054_s14 = smov 0  }
  0x10   :  { %s12056_s15 = smov 0   ;;  %s12058_s16 = smov 0  }
  0x11 LB: > { %16083 = sst [smem:[#allocation12_spill]] %s11966_s12  ;;  %s33_s19 = sadd.s32 1, %s11974_s14  ;;  %s11982_s16 = sphi %s12058_s16, %s21_s16   ;;  %s11978_s15 = sphi %s12056_s15, %s16115_s15   ;;  %s11974_s14 = sphi %s12054_s14, %s16124_s14   ;;  %s11970_s13 = sphi %s12052_s13, %s16114_s13   ;;  %s11966_s12 = sphi %s12050_s12, %s16123_s12   ;;  %s11962_s11 = sphi %s12048_s11, %s16122_s11   ;;  %s11958_s10 = sphi %s12046_s10, %s16121_s10   ;;  %s11954_s9 = sphi %s12044_s9, %s16120_s9   ;;  %s11950_s30 = sphi %s12042_s30, %s16119_s30   ;;  %s11946_s29 = sphi %s12040_s29, %s16118_s29   ;;  %s11942_s28 = sphi %s12038_s28, %s16117_s28   ;;  %s11938_s27 = sphi %s12036_s27, %s16116_s27  }
  0x12   : > { %16084 = sst [smem:[#allocation13_spill]] %s11970_s13  ;;  %s36_s20 = sadd.s32 1, %s11978_s15 }
  0x13   : > { %16085 = sst [smem:[#allocation14_spill]] %s11978_s15  ;;  %p34_p0 = scmp.ge.s32.totalorder %s33_s19, 2 }
  0x14   : > { %s70_s21 = ssub.s32 1, %s11974_s14  ;;  %s79_s23 = sadd.s32 1, %s11962_s11 }
  0x15   : > { %s71_s22 = smul.u32 %s11978_s15, %s70_s21  ;;  %s16126_s19 = smov (%p34_p0, %s33_s19), 0 }
  0x16   : > { %s16128_s20 = smov (!%p34_p0, %s36_s20), %s11978_s15  ;;  %s73_s25 = ssub.s32 1, %s16126_s19 }
  0x17   : > { %s12107_s24 = sadd.s32 %s11974_s14, %s71_s22  ;;  %p38_p1 = scmp.ge.s32.totalorder %s16128_s20, 2 }
  0x18   : > { %p86_p2 = scmp.ne.s32.totalorder %s11962_s11, %s11958_s10  ;;  %p87_p3 = scmp.eq.s32.totalorder %s11982_s16, 0 }
  0x19   : > { %s134_s26 = ssub.s32 %s11974_s14, %s16126_s19  ;;  %s16130_s20 = smov (%p38_p1, %s16128_s20), 0 }
  0x1a   : > { %16086 = sst [smem:[#allocation15_spill]] %s16130_s20  ;;  %p12119_p4 = por %p87_p3, %p86_p2 }
  0x1b   : > { %p135_p5 = scmp.eq.s32.totalorder %s134_s26, 0  ;;  %s74_s22 = smul.u32 %s73_s25, %s16130_s20 }
  0x1c   : > { %s137_s18 = sadd.s32 1, %s11954_s9  ;;  %p144_p6 = scmp.ne.s32.totalorder %s11954_s9, %s11950_s30 }
  0x1d   : > { %s12126_s17 = scalar_select %p135_p5, %s11954_s9, %s137_s18  }
  0x1e   : > { %s75_s8 = sadd.s32 %s74_s22, %s16126_s19  ;;  %s263_s0 = smul.u32 %s11974_s14, %s11978_s15 }
  0x1f   : > { %s76_s4 = ssub.s32 %s12107_s24, %s75_s8  ;;  %p12136_p8 = por %p144_p6, %p87_p3 }
  0x20   : > { %p77_p7 = scmp.eq.s32.totalorder %s76_s4, 0  ;;  %s264_s26 = smul.u32 %s16130_s20, %s16126_s19 }
  0x21   : > { %s270_s5 = sadd.s32 1, %s11946_s29  ;;  %p280_p9 = scmp.ne.s32.totalorder %s11946_s29, %s11942_s28 }
  0x22   : > { %s12144_s25 = scalar_select %p77_p7, %s11962_s11, %s79_s23  }
  0x23   : > { %s266_s12 = ssub.s32 %s263_s0, %s264_s26  ;;  %s16089_s18 = sadd.s32 4294967295, %s11982_s16  }
  0x24   : > { %p268_p10 = scmp.eq.s32.totalorder %s266_s12, 0  ;;  %p281_p11 = scmp.eq.s32.totalorder %s16089_s18, 3 }
  0x25   : > { %p286_p12 = scmp.ne.s32.totalorder %s11942_s28, %s11938_s27  ;;  %s16090_s22 = sadd.s32 4294967294, %s11982_s16  }
  0x26   : > { %p287_p13 = scmp.eq.s32.totalorder %s16090_s22, 3  ;;  %p12157_p0 = por %p281_p11, %p280_p9 }
  0x27   : > { %s12155_s8 = scalar_select %p268_p10, %s11946_s29, %s270_s5  }
  0x28   : > { %p12161_p1 = por %p287_p13, %p286_p12  ;;  %p11044_p2 = scmp.ge.s32.totalorder %s11982_s16, 4 }
  0x2a   : > { %316 = sbr.rel (%p11044_p2) target bundleno = 151 (0x97), region = 24 }
  0x31   : > { %319 = sbr.rel (!%p12119_p4) target bundleno = 91 (0x5b), region = 28  ;;  %s321_s0 = sand.u32 (%p12119_p4), 1, %s11962_s11  }
  0x32   : > { %s11249_s12 = sshll.u32 (%p12119_p4), %s12107_s24, 5  ;;  %s11045_s5 = sshll.u32 (%p12119_p4), %s321_s0, 9 }
  0x33   : > { %s16093_s1 = sld [smem:[#allocation17_spill]] (%p12119_p4)  ;;  %s12178_s22 = scalar_lea.vmem (%p12119_p4), [#allocation4], %s11045_s5 }
  0x39   : > { %s12173_s18 = scalar_lea.vmem %s16093_s1, %s11249_s12 }
  0x3a   : > { %v342_v0 = vld [vmem:[%s12173_s18] sm:$0xff]  ;;  %v344_v1 = vld [vmem:[%s12173_s18 + $0x8] sm:$0xff]  ;;  %v346_v2 = vld [vmem:[%s12173_s18 + $0x10] sm:$0xff] }
  0x3b   : > { %343 = vst [vmem:[%s12178_s22] sm:$0xff] %v342_v0  ;;  %345 = vst [vmem:[%s12178_s22 + $0x8] sm:$0xff] %v344_v1  ;;  %v348_v3 = vld [vmem:[%s12173_s18 + $0x18] sm:$0xff]  ;;  %v350_v4 = vld [vmem:[%s12173_s18 + $0x40] sm:$0xff] }
  0x3c   : > { %347 = vst [vmem:[%s12178_s22 + $0x10] sm:$0xff] %v346_v2  ;;  %v352_v5 = vld [vmem:[%s12173_s18 + $0x48] sm:$0xff]  ;;  %349 = vst [vmem:[%s12178_s22 + $0x18] sm:$0xff] %v348_v3  ;;  %v354_v6 = vld [vmem:[%s12173_s18 + $0x50] sm:$0xff] }
  0x3d   : > { %351 = vst [vmem:[%s12178_s22 + $0x20] sm:$0xff] %v350_v4  ;;  %353 = vst [vmem:[%s12178_s22 + $0x28] sm:$0xff] %v352_v5  ;;  %v356_v7 = vld [vmem:[%s12173_s18 + $0x58] sm:$0xff]  ;;  %v358_v8 = vld [vmem:[%s12173_s18 + $0x80] sm:$0xff] }
  0x3e   : > { %355 = vst [vmem:[%s12178_s22 + $0x30] sm:$0xff] %v354_v6  ;;  %357 = vst [vmem:[%s12178_s22 + $0x38] sm:$0xff] %v356_v7  ;;  %v360_v9 = vld [vmem:[%s12173_s18 + $0x88] sm:$0xff]  ;;  %v362_v10 = vld [vmem:[%s12173_s18 + $0x90] sm:$0xff] }
  0x3f   : > { %359 = vst [vmem:[%s12178_s22 + $0x40] sm:$0xff] %v358_v8  ;;  %v364_v11 = vld [vmem:[%s12173_s18 + $0x98] sm:$0xff]  ;;  %361 = vst [vmem:[%s12178_s22 + $0x48] sm:$0xff] %v360_v9  ;;  %v366_v12 = vld [vmem:[%s12173_s18 + $0xc0] sm:$0xff] }
  0x40   : > { %363 = vst [vmem:[%s12178_s22 + $0x50] sm:$0xff] %v362_v10  ;;  %365 = vst [vmem:[%s12178_s22 + $0x58] sm:$0xff] %v364_v11  ;;  %v368_v13 = vld [vmem:[%s12173_s18 + $0xc8] sm:$0xff]  ;;  %v370_v14 = vld [vmem:[%s12173_s18 + $0xd0] sm:$0xff] }
  0x41   : > { %367 = vst [vmem:[%s12178_s22 + $0x60] sm:$0xff] %v366_v12  ;;  %369 = vst [vmem:[%s12178_s22 + $0x68] sm:$0xff] %v368_v13  ;;  %v372_v15 = vld [vmem:[%s12173_s18 + $0xd8] sm:$0xff]  ;;  %v374_v16 = vld [vmem:[%s12173_s18 + $0x100] sm:$0xff] }
  0x42   : > { %371 = vst [vmem:[%s12178_s22 + $0x70] sm:$0xff] %v370_v14  ;;  %v376_v17 = vld [vmem:[%s12173_s18 + $0x108] sm:$0xff]  ;;  %373 = vst [vmem:[%s12178_s22 + $0x78] sm:$0xff] %v372_v15  ;;  %v378_v18 = vld [vmem:[%s12173_s18 + $0x110] sm:$0xff] }
  0x43   : > { %375 = vst [vmem:[%s12178_s22 + $0x80] sm:$0xff] %v374_v16  ;;  %377 = vst [vmem:[%s12178_s22 + $0x88] sm:$0xff] %v376_v17  ;;  %v380_v19 = vld [vmem:[%s12173_s18 + $0x118] sm:$0xff]  ;;  %v382_v20 = vld [vmem:[%s12173_s18 + $0x140] sm:$0xff] }
  0x44   : > { %379 = vst [vmem:[%s12178_s22 + $0x90] sm:$0xff] %v378_v18  ;;  %381 = vst [vmem:[%s12178_s22 + $0x98] sm:$0xff] %v380_v19  ;;  %v384_v21 = vld [vmem:[%s12173_s18 + $0x148] sm:$0xff]  ;;  %v386_v22 = vld [vmem:[%s12173_s18 + $0x150] sm:$0xff] }
  0x45   : > { %383 = vst [vmem:[%s12178_s22 + $0xa0] sm:$0xff] %v382_v20  ;;  %v388_v23 = vld [vmem:[%s12173_s18 + $0x158] sm:$0xff]  ;;  %385 = vst [vmem:[%s12178_s22 + $0xa8] sm:$0xff] %v384_v21  ;;  %v390_v24 = vld [vmem:[%s12173_s18 + $0x180] sm:$0xff] }
  0x46   : > { %387 = vst [vmem:[%s12178_s22 + $0xb0] sm:$0xff] %v386_v22  ;;  %389 = vst [vmem:[%s12178_s22 + $0xb8] sm:$0xff] %v388_v23  ;;  %v392_v25 = vld [vmem:[%s12173_s18 + $0x188] sm:$0xff]  ;;  %v394_v26 = vld [vmem:[%s12173_s18 + $0x190] sm:$0xff] }
  0x47   : > { %391 = vst [vmem:[%s12178_s22 + $0xc0] sm:$0xff] %v390_v24  ;;  %393 = vst [vmem:[%s12178_s22 + $0xc8] sm:$0xff] %v392_v25  ;;  %v396_v27 = vld [vmem:[%s12173_s18 + $0x198] sm:$0xff]  ;;  %v398_v28 = vld [vmem:[%s12173_s18 + $0x1c0] sm:$0xff] }
  0x48   : > { %395 = vst [vmem:[%s12178_s22 + $0xd0] sm:$0xff] %v394_v26  ;;  %v400_v29 = vld [vmem:[%s12173_s18 + $0x1c8] sm:$0xff]  ;;  %397 = vst [vmem:[%s12178_s22 + $0xd8] sm:$0xff] %v396_v27  ;;  %v402_v30 = vld [vmem:[%s12173_s18 + $0x1d0] sm:$0xff] }
  0x49   : > { %399 = vst [vmem:[%s12178_s22 + $0xe0] sm:$0xff] %v398_v28  ;;  %401 = vst [vmem:[%s12178_s22 + $0xe8] sm:$0xff] %v400_v29  ;;  %v404_v31 = vld [vmem:[%s12173_s18 + $0x1d8] sm:$0xff]  ;;  %v406_v32 = vld [vmem:[%s12173_s18 + $0x200] sm:$0xff] }
  0x4a   : > { %403 = vst [vmem:[%s12178_s22 + $0xf0] sm:$0xff] %v402_v30  ;;  %405 = vst [vmem:[%s12178_s22 + $0xf8] sm:$0xff] %v404_v31  ;;  %v408_v33 = vld [vmem:[%s12173_s18 + $0x208] sm:$0xff]  ;;  %v410_v34 = vld [vmem:[%s12173_s18 + $0x210] sm:$0xff] }
  0x4b   : > { %407 = vst [vmem:[%s12178_s22 + $0x100] sm:$0xff] %v406_v32  ;;  %v412_v35 = vld [vmem:[%s12173_s18 + $0x218] sm:$0xff]  ;;  %409 = vst [vmem:[%s12178_s22 + $0x108] sm:$0xff] %v408_v33  ;;  %v414_v36 = vld [vmem:[%s12173_s18 + $0x240] sm:$0xff] }
  0x4c   : > { %411 = vst [vmem:[%s12178_s22 + $0x110] sm:$0xff] %v410_v34  ;;  %413 = vst [vmem:[%s12178_s22 + $0x118] sm:$0xff] %v412_v35  ;;  %v416_v37 = vld [vmem:[%s12173_s18 + $0x248] sm:$0xff]  ;;  %v418_v38 = vld [vmem:[%s12173_s18 + $0x250] sm:$0xff] }
  0x4d   : > { %415 = vst [vmem:[%s12178_s22 + $0x120] sm:$0xff] %v414_v36  ;;  %417 = vst [vmem:[%s12178_s22 + $0x128] sm:$0xff] %v416_v37  ;;  %v420_v39 = vld [vmem:[%s12173_s18 + $0x258] sm:$0xff]  ;;  %v422_v40 = vld [vmem:[%s12173_s18 + $0x280] sm:$0xff] }
  0x4e   : > { %419 = vst [vmem:[%s12178_s22 + $0x130] sm:$0xff] %v418_v38  ;;  %v424_v41 = vld [vmem:[%s12173_s18 + $0x288] sm:$0xff]  ;;  %421 = vst [vmem:[%s12178_s22 + $0x138] sm:$0xff] %v420_v39  ;;  %v426_v42 = vld [vmem:[%s12173_s18 + $0x290] sm:$0xff] }
  0x4f   : > { %423 = vst [vmem:[%s12178_s22 + $0x140] sm:$0xff] %v422_v40  ;;  %425 = vst [vmem:[%s12178_s22 + $0x148] sm:$0xff] %v424_v41  ;;  %v428_v43 = vld [vmem:[%s12173_s18 + $0x298] sm:$0xff]  ;;  %v430_v44 = vld [vmem:[%s12173_s18 + $0x2c0] sm:$0xff] }
  0x50   : > { %427 = vst [vmem:[%s12178_s22 + $0x150] sm:$0xff] %v426_v42  ;;  %429 = vst [vmem:[%s12178_s22 + $0x158] sm:$0xff] %v428_v43  ;;  %v432_v45 = vld [vmem:[%s12173_s18 + $0x2c8] sm:$0xff]  ;;  %v434_v46 = vld [vmem:[%s12173_s18 + $0x2d0] sm:$0xff] }
  0x51   : > { %431 = vst [vmem:[%s12178_s22 + $0x160] sm:$0xff] %v430_v44  ;;  %v436_v47 = vld [vmem:[%s12173_s18 + $0x2d8] sm:$0xff]  ;;  %433 = vst [vmem:[%s12178_s22 + $0x168] sm:$0xff] %v432_v45  ;;  %v438_v48 = vld [vmem:[%s12173_s18 + $0x300] sm:$0xff] }
  0x52   : > { %435 = vst [vmem:[%s12178_s22 + $0x170] sm:$0xff] %v434_v46  ;;  %437 = vst [vmem:[%s12178_s22 + $0x178] sm:$0xff] %v436_v47  ;;  %v440_v49 = vld [vmem:[%s12173_s18 + $0x308] sm:$0xff]  ;;  %v442_v50 = vld [vmem:[%s12173_s18 + $0x310] sm:$0xff] }
  0x53   : > { %439 = vst [vmem:[%s12178_s22 + $0x180] sm:$0xff] %v438_v48  ;;  %441 = vst [vmem:[%s12178_s22 + $0x188] sm:$0xff] %v440_v49  ;;  %v444_v51 = vld [vmem:[%s12173_s18 + $0x318] sm:$0xff]  ;;  %v446_v52 = vld [vmem:[%s12173_s18 + $0x340] sm:$0xff] }
  0x54   : > { %443 = vst [vmem:[%s12178_s22 + $0x190] sm:$0xff] %v442_v50  ;;  %v448_v53 = vld [vmem:[%s12173_s18 + $0x348] sm:$0xff]  ;;  %445 = vst [vmem:[%s12178_s22 + $0x198] sm:$0xff] %v444_v51  ;;  %v450_v54 = vld [vmem:[%s12173_s18 + $0x350] sm:$0xff] }
  0x55   : > { %447 = vst [vmem:[%s12178_s22 + $0x1a0] sm:$0xff] %v446_v52  ;;  %449 = vst [vmem:[%s12178_s22 + $0x1a8] sm:$0xff] %v448_v53  ;;  %v452_v55 = vld [vmem:[%s12173_s18 + $0x358] sm:$0xff]  ;;  %v454_v56 = vld [vmem:[%s12173_s18 + $0x380] sm:$0xff] }
  0x56   : > { %451 = vst [vmem:[%s12178_s22 + $0x1b0] sm:$0xff] %v450_v54  ;;  %453 = vst [vmem:[%s12178_s22 + $0x1b8] sm:$0xff] %v452_v55  ;;  %v456_v57 = vld [vmem:[%s12173_s18 + $0x388] sm:$0xff]  ;;  %v458_v58 = vld [vmem:[%s12173_s18 + $0x390] sm:$0xff] }
  0x57   : > { %455 = vst [vmem:[%s12178_s22 + $0x1c0] sm:$0xff] %v454_v56  ;;  %v460_v59 = vld [vmem:[%s12173_s18 + $0x398] sm:$0xff]  ;;  %457 = vst [vmem:[%s12178_s22 + $0x1c8] sm:$0xff] %v456_v57  ;;  %v462_v60 = vld [vmem:[%s12173_s18 + $0x3c0] sm:$0xff] }
  0x58   : > { %459 = vst [vmem:[%s12178_s22 + $0x1d0] sm:$0xff] %v458_v58  ;;  %461 = vst [vmem:[%s12178_s22 + $0x1d8] sm:$0xff] %v460_v59  ;;  %v464_v61 = vld [vmem:[%s12173_s18 + $0x3c8] sm:$0xff]  ;;  %v466_v62 = vld [vmem:[%s12173_s18 + $0x3d0] sm:$0xff] }
  0x59   : > { %463 = vst [vmem:[%s12178_s22 + $0x1e0] sm:$0xff] %v462_v60  ;;  %465 = vst [vmem:[%s12178_s22 + $0x1e8] sm:$0xff] %v464_v61  ;;  %v468_v63 = vld [vmem:[%s12173_s18 + $0x3d8] sm:$0xff] }
  0x5a   : > { %467 = vst [vmem:[%s12178_s22 + $0x1f0] sm:$0xff] %v466_v62  ;;  %469 = vst [vmem:[%s12178_s22 + $0x1f8] sm:$0xff] %v468_v63 }
  0x5b PF: > { %475 = sbr.rel (!%p12119_p4) target bundleno = 105 (0x69), region = 51  ;;  %s477_s0 = sand.u32 (%p12119_p4), 1, %s11962_s11  }
  0x5c   : > { %s11250_s12 = sshll.u32 (%p12119_p4), %s12107_s24, 4  ;;  %s11048_s5 = sshll.u32 (%p12119_p4), %s477_s0, 6 }
  0x5d   : > { %s16094_s2 = sld [smem:[#allocation18_spill]] (%p12119_p4)  ;;  %s479_s20 = scalar_lea.vmem (%p12119_p4), [#allocation5], %s11048_s5 }
  0x63   : > { %s485_s1 = scalar_lea.vmem %s16094_s2, %s11250_s12 }
  0x64   : > { %v498_v0 = vld [vmem:[%s485_s1] sm:$0xff]  ;;  %v500_v1 = vld [vmem:[%s485_s1 + $0x8] sm:$0xff] }
  0x65   : > { %v502_v2 = vld [vmem:[%s485_s1 + $0x20] sm:$0xff]  ;;  %499 = vst [vmem:[%s479_s20] sm:$0xff] %v498_v0  ;;  %501 = vst [vmem:[%s479_s20 + $0x8] sm:$0xff] %v500_v1  ;;  %v504_v3 = vld [vmem:[%s485_s1 + $0x28] sm:$0xff] }
  0x66   : > { %503 = vst [vmem:[%s479_s20 + $0x10] sm:$0xff] %v502_v2  ;;  %v506_v4 = vld [vmem:[%s485_s1 + $0x40] sm:$0xff]  ;;  %v508_v5 = vld [vmem:[%s485_s1 + $0x48] sm:$0xff]  ;;  %505 = vst [vmem:[%s479_s20 + $0x18] sm:$0xff] %v504_v3 }
  0x67   : > { %507 = vst [vmem:[%s479_s20 + $0x20] sm:$0xff] %v506_v4  ;;  %509 = vst [vmem:[%s479_s20 + $0x28] sm:$0xff] %v508_v5  ;;  %v510_v6 = vld [vmem:[%s485_s1 + $0x60] sm:$0xff]  ;;  %v512_v7 = vld [vmem:[%s485_s1 + $0x68] sm:$0xff] }
  0x68   : > { %511 = vst [vmem:[%s479_s20 + $0x30] sm:$0xff] %v510_v6  ;;  %513 = vst [vmem:[%s479_s20 + $0x38] sm:$0xff] %v512_v7 }
  0x69 PF: > { %519 = sbr.rel (!%p12136_p8) target bundleno = 123 (0x7b), region = 74  ;;  %s521_s24 = sand.u32 (%p12136_p8), 1, %s11954_s9  }
  0x6a   : > { %s11251_s21 = sshll.u32 (%p12136_p8), %s11974_s14, 5  ;;  %s11051_s18 = sshll.u32 (%p12136_p8), %s521_s24, 7 }
  0x6b   : > { %s16095_s3 = sld [smem:[#allocation19_spill]] (%p12136_p8)  ;;  %s523_s1 = scalar_lea.vmem (%p12136_p8), [#allocation6], %s11051_s18 }
  0x71   : > { %s12319_s12 = scalar_lea.vmem %s16095_s3, %s11251_s21 }
  0x72   : > { %v539_v8 = vld [vmem:[%s12319_s12] sm:$0xff]  ;;  %v541_v9 = vld [vmem:[%s12319_s12 + $0x8] sm:$0xff]  ;;  %v543_v10 = vld [vmem:[%s12319_s12 + $0x10] sm:$0xff] }
  0x73   : > { %540 = vst [vmem:[%s523_s1] sm:$0xff] %v539_v8  ;;  %542 = vst [vmem:[%s523_s1 + $0x8] sm:$0xff] %v541_v9  ;;  %v545_v11 = vld [vmem:[%s12319_s12 + $0x18] sm:$0xff]  ;;  %v547_v12 = vld [vmem:[%s12319_s12 + $0x40] sm:$0xff] }
  0x74   : > { %544 = vst [vmem:[%s523_s1 + $0x10] sm:$0xff] %v543_v10  ;;  %v549_v13 = vld [vmem:[%s12319_s12 + $0x48] sm:$0xff]  ;;  %546 = vst [vmem:[%s523_s1 + $0x18] sm:$0xff] %v545_v11  ;;  %v551_v14 = vld [vmem:[%s12319_s12 + $0x50] sm:$0xff] }
  0x75   : > { %548 = vst [vmem:[%s523_s1 + $0x20] sm:$0xff] %v547_v12  ;;  %550 = vst [vmem:[%s523_s1 + $0x28] sm:$0xff] %v549_v13  ;;  %v553_v15 = vld [vmem:[%s12319_s12 + $0x58] sm:$0xff]  ;;  %v555_v16 = vld [vmem:[%s12319_s12 + $0x80] sm:$0xff] }
  0x76   : > { %552 = vst [vmem:[%s523_s1 + $0x30] sm:$0xff] %v551_v14  ;;  %554 = vst [vmem:[%s523_s1 + $0x38] sm:$0xff] %v553_v15  ;;  %v557_v17 = vld [vmem:[%s12319_s12 + $0x88] sm:$0xff]  ;;  %v559_v18 = vld [vmem:[%s12319_s12 + $0x90] sm:$0xff] }
  0x77   : > { %556 = vst [vmem:[%s523_s1 + $0x40] sm:$0xff] %v555_v16  ;;  %v561_v19 = vld [vmem:[%s12319_s12 + $0x98] sm:$0xff]  ;;  %558 = vst [vmem:[%s523_s1 + $0x48] sm:$0xff] %v557_v17  ;;  %v563_v20 = vld [vmem:[%s12319_s12 + $0xc0] sm:$0xff] }
  0x78   : > { %560 = vst [vmem:[%s523_s1 + $0x50] sm:$0xff] %v559_v18  ;;  %562 = vst [vmem:[%s523_s1 + $0x58] sm:$0xff] %v561_v19  ;;  %v565_v21 = vld [vmem:[%s12319_s12 + $0xc8] sm:$0xff]  ;;  %v567_v22 = vld [vmem:[%s12319_s12 + $0xd0] sm:$0xff] }
  0x79   : > { %564 = vst [vmem:[%s523_s1 + $0x60] sm:$0xff] %v563_v20  ;;  %566 = vst [vmem:[%s523_s1 + $0x68] sm:$0xff] %v565_v21  ;;  %v569_v23 = vld [vmem:[%s12319_s12 + $0xd8] sm:$0xff] }
  0x7a   : > { %568 = vst [vmem:[%s523_s1 + $0x70] sm:$0xff] %v567_v22  ;;  %570 = vst [vmem:[%s523_s1 + $0x78] sm:$0xff] %v569_v23 }
  0x7b PF: > { %584 = sbr.rel (!%p12136_p8) target bundleno = 137 (0x89), region = 101  ;;  %s586_s20 = sand.u32 (%p12136_p8), 1, %s11954_s9  }
  0x7c   : > { %s11252_s5 = sshll.u32 (%p12136_p8), %s11974_s14, 5  ;;  %s11054_s23 = sshll.u32 (%p12136_p8), %s586_s20, 6 }
  0x7d   : > { %s16096_s6 = sld [smem:[#allocation22_spill]] (%p12136_p8)  ;;  %s588_s18 = scalar_lea.vmem (%p12136_p8), [#allocation7], %s11054_s23 }
  0x83   : > { %s594_s21 = scalar_lea.vmem %s16096_s6, %s11252_s5 }
  0x84   : > { %v607_v24 = vld [vmem:[%s594_s21] sm:$0xff]  ;;  %v609_v25 = vld [vmem:[%s594_s21 + $0x8] sm:$0xff]  ;;  %v611_v26 = vld [vmem:[%s594_s21 + $0x10] sm:$0xff] }
  0x85   : > { %608 = vst [vmem:[%s588_s18] sm:$0xff] %v607_v24  ;;  %610 = vst [vmem:[%s588_s18 + $0x8] sm:$0xff] %v609_v25  ;;  %v613_v27 = vld [vmem:[%s594_s21 + $0x18] sm:$0xff]  ;;  %v615_v28 = vld [vmem:[%s594_s21 + $0x40] sm:$0xff] }
  0x86   : > { %612 = vst [vmem:[%s588_s18 + $0x10] sm:$0xff] %v611_v26  ;;  %v617_v29 = vld [vmem:[%s594_s21 + $0x48] sm:$0xff]  ;;  %614 = vst [vmem:[%s588_s18 + $0x18] sm:$0xff] %v613_v27  ;;  %v619_v30 = vld [vmem:[%s594_s21 + $0x50] sm:$0xff] }
  0x87   : > { %616 = vst [vmem:[%s588_s18 + $0x20] sm:$0xff] %v615_v28  ;;  %618 = vst [vmem:[%s588_s18 + $0x28] sm:$0xff] %v617_v29  ;;  %v621_v31 = vld [vmem:[%s594_s21 + $0x58] sm:$0xff] }
  0x88   : > { %620 = vst [vmem:[%s588_s18 + $0x30] sm:$0xff] %v619_v30  ;;  %622 = vst [vmem:[%s588_s18 + $0x38] sm:$0xff] %v621_v31 }
  0x89 PF: > { %628 = sbr.rel (!%p12136_p8) target bundleno = 151 (0x97), region = 124  ;;  %s630_s22 = sand.u32 (%p12136_p8), 1, %s11954_s9  }
  0x8a   : > { %s11253_s0 = sshll.u32 (%p12136_p8), %s11974_s14, 5  ;;  %s11057_s12 = sshll.u32 (%p12136_p8), %s630_s22, 6 }
  0x8b   : > { %s16097_s7 = sld [smem:[#allocation23_spill]] (%p12136_p8)  ;;  %s632_s23 = scalar_lea.vmem (%p12136_p8), [#allocation8], %s11057_s12 }
  0x91   : > { %s638_s5 = scalar_lea.vmem %s16097_s7, %s11253_s0 }
  0x92   : > { %v651_v32 = vld [vmem:[%s638_s5] sm:$0xff]  ;;  %v653_v33 = vld [vmem:[%s638_s5 + $0x8] sm:$0xff]  ;;  %v655_v34 = vld [vmem:[%s638_s5 + $0x10] sm:$0xff] }
  0x93   : > { %652 = vst [vmem:[%s632_s23] sm:$0xff] %v651_v32  ;;  %654 = vst [vmem:[%s632_s23 + $0x8] sm:$0xff] %v653_v33  ;;  %v657_v35 = vld [vmem:[%s638_s5 + $0x18] sm:$0xff]  ;;  %v659_v36 = vld [vmem:[%s638_s5 + $0x40] sm:$0xff] }
  0x94   : > { %656 = vst [vmem:[%s632_s23 + $0x10] sm:$0xff] %v655_v34  ;;  %v661_v37 = vld [vmem:[%s638_s5 + $0x48] sm:$0xff]  ;;  %658 = vst [vmem:[%s632_s23 + $0x18] sm:$0xff] %v657_v35  ;;  %v663_v38 = vld [vmem:[%s638_s5 + $0x50] sm:$0xff] }
  0x95   : > { %660 = vst [vmem:[%s632_s23 + $0x20] sm:$0xff] %v659_v36  ;;  %662 = vst [vmem:[%s632_s23 + $0x28] sm:$0xff] %v661_v37  ;;  %v665_v39 = vld [vmem:[%s638_s5 + $0x58] sm:$0xff] }
  0x96   : > { %664 = vst [vmem:[%s632_s23 + $0x30] sm:$0xff] %v663_v38  ;;  %666 = vst [vmem:[%s632_s23 + $0x38] sm:$0xff] %v665_v39 }
  0x97 PF: > { %p11060_p3 = scmp.ge.s32.totalorder %s11982_s16, 1  ;;  %p671_p4 = scmp.lt.s32.totalorder %s11982_s16, 5 }
  0x99   : > { %p672_p5 = pnand %p11060_p3, %p671_p4 }
  0x9a   : > { %s16098_s13 = sld [smem:[#allocation12_spill]] (!%p672_p5)  ;;  %s678_s26 = sand.u32 (!%p672_p5), 1, %s11958_s10  }
  0x9b   : > { %675 = sbr.rel (%p672_p5) target bundleno = 2369 (0x941), region = 147  ;;  %s692_s24 = sand.u32 (!%p672_p5), 1, %s11950_s30  }
  0x9c   : > { %s11061_s21 = sshll.u32 (!%p672_p5), %s678_s26, 9  ;;  %s11062_s18 = sshll.u32 (!%p672_p5), %s678_s26, 6 }
  0x9d   : > { %s11063_s22 = sshll.u32 (!%p672_p5), %s692_s24, 7  ;;  %s11064_s0 = sshll.u32 (!%p672_p5), %s692_s24, 6 }
  0x9e   : > { %s16073_s12 = sand.u32 (!%p672_p5), 1, %s11942_s28   ;;  %s16099_s2 = sld [smem:[#allocation21_spill]] (!%p672_p5) }
  0x9f   : > { %s11066_s1 = sshll.u32 (!%p672_p5), %s16073_s12, 6  ;;  %s12364_s6 = scalar_lea.vmem (!%p672_p5), [#allocation4], %s11061_s21 }
  0xa0   : > { %s11067_s20 = sshll.u32 (!%p672_p5), %s16098_s13, 2  ;;  %s12366_s7 = scalar_lea.vmem (!%p672_p5), [#allocation5], %s11062_s18 }
  0xa1   : > { %p782_p6 = scmp.lt.s32.totalorder (!%p672_p5), %s11067_s20, 7  ;;  %s12368_s30 = scalar_lea.vmem (!%p672_p5), [#allocation6], %s11063_s22 }
  0xa2   : > { %s12370_s10 = scalar_lea.vmem [#allocation7], %s11064_s0  ;;  %s12372_s26 = scalar_lea.vmem [#allocation8], %s11064_s0 }
  0xa3   : > { %s16132_s20 = smov (!%p782_p6, %s11067_s20), 7  ;;  %s12374_s24 = scalar_lea.vmem [#allocation9], %s11066_s1 }
  0xa4   : > { %s12362_s3 = scalar_lea.vmem %s16099_s2, %s16132_s20  ;;  %s16100_s13 = sld [smem:[#allocation13_spill]] }
  0xaa   : > { %p11068_p7 = scmp.ne.s32.totalorder %s16100_s13, 0 }
  0xab   : > { %v862_v40 = vlaneseq (!%p11068_p7)  ;;  %v11622_v41 = vld [vmem:[%s12364_s6] ss:$8 sps:$4 sm:$0xff] (!%p11068_p7)   ;;  %v11984_v42 = vmov (!%p11068_p7), 1966171168   ;;  %v11624_v45 = vld [vmem:[%s12364_s6 + $0x4] ss:$8 sps:$4 sm:$0xff] (!%p11068_p7)  }
  0xac   : > { %797 = sbr.rel (%p11068_p7) target bundleno = 1558 (0x616), region = 171  ;;  %v870_v43 = vunpack.c.l.s4 (!%p11068_p7), %v11984_v42  ;;  %v11625_v46 = vld [vmem:[%s12364_s6 + $0x10] ss:$8 sps:$4 sm:$0xff] (!%p11068_p7)   ;;  %v11069_v48 = vld.sshfl [vmem:[%s12366_s7] sm:$0xff pattern:$0x75316420] (!%p11068_p7) }
  0xad   : > { %v863_v44 = vshrl.u32 (!%p11068_p7), %v862_v40, 7  ;;  %v11070_v49 = vld.sshfl [vmem:[%s12366_s7 + $0x8] sm:$0xff pattern:$0x75316420] (!%p11068_p7)  ;;  %v11627_v50 = vld [vmem:[%s12364_s6 + $0x14] ss:$8 sps:$4 sm:$0xff] (!%p11068_p7)  }
  0xae   : > { %v871_v47 = vunpack.c.0.s8 (!%p11068_p7), %v870_v43  ;;  %v5823_v53 = vcombine.low (!%p11068_p7), %v11069_v48, %v11070_v49  ;;  %v5824_v54 = vcombine.high (!%p11068_p7), %v11069_v48, %v11070_v49  ;;  %v11628_v55 = vld [vmem:[%s12364_s6 + $0x20] ss:$8 sps:$4 sm:$0xff] (!%p11068_p7)   ;;  %v11630_v56 = vld [vmem:[%s12364_s6 + $0x30] ss:$8 sps:$4 sm:$0xff] (!%p11068_p7)   ;;  %s16101_s2 = sld [smem:[#allocation12_spill]] (!%p11068_p7)  ;;  %s16102_s1 = sld [smem:[#allocation16_spill]] (!%p11068_p7) }
  0xaf   : > { %v12383_v51 = vmul.u32 (!%p11068_p7), 4, %v863_v44  ;;  %v12389_v57 = vsub.s32 (!%p11068_p7), 0, %v863_v44  ;;  %v12391_v58 = vsub.s32 (!%p11068_p7), 1, %v863_v44  ;;  %v12393_v59 = vsub.s32 (!%p11068_p7), 2, %v863_v44  ;;  %s16103_s20 = sld [smem:[#allocation20_spill]] (!%p11068_p7) }
  0xb0   : > { %v12385_v52 = vsub.s32 (!%p11068_p7), %v871_v47, %v863_v44  ;;  %v12395_v60 = vsub.s32 (!%p11068_p7), 3, %v863_v44  ;;  %vm9008_vm0 = vcmask (!%p11068_p7), 261120  }
  0xb2   : > { %v875_v61 = vrot.slane (!%p11068_p7), %v11622_v41, %v12385_v52  ;;  %v889_v62 = vrot.slane (!%p11068_p7), %v11625_v46, %v12385_v52  ;;  %v12400_v63 = vrot.slane (!%p11068_p7), %v5823_v53, %v12385_v52  ;;  %v882_v0 = vrot.slane (!%p11068_p7), %v11624_v45, %v12385_v52 }
  0xb3   : > { %v896_v1 = vrot.slane %v11627_v50, %v12385_v52  ;;  %v12405_v2 = vrot.slane %v11628_v55, %v12385_v52  ;;  %v12408_v3 = vrot.slane %v11630_v56, %v12385_v52  ;;  %v12411_v4 = vrot.slane %v5824_v54, %v12385_v52 }
  0xb4   : > { %v897_v5 = vcombine.low %v875_v61, %v889_v62  ;;  %v898_v6 = vcombine.high %v875_v61, %v889_v62  ;;  %v11077_v7 = vpack.i.b16 %v12400_v63, %v12400_v63  ;;  %v5938_v8 = vunpack.i.h.s16 %v12400_v63  ;;  %s11254_s21 = sshll.u32 %s16101_s2, 11  ;;  %p11171_p8 = scmp.ne.s32.totalorder %s16101_s2, 0 }
  0xb5   : > { %v899_v9 = vcombine.low %v882_v0, %v896_v1  ;;  %v900_v10 = vcombine.high %v882_v0, %v896_v1  ;;  %v965_v11 = vcombine.low %v12405_v2, %v12408_v3  ;;  %v966_v12 = vcombine.high %v12405_v2, %v12408_v3  ;;  %s12466_s18 = scalar_lea.vmem [#allocation3], %s11254_s21 }
  0xb6   : > { %v907_v13 = vrot.slane %v897_v5, %v12385_v52  ;;  %v921_v14 = vrot.slane %v898_v6, %v12385_v52  ;;  %v6008_v15 = vrot.slane %v11077_v7, %v12391_v58  ;;  %v6016_v16 = vrot.slane %v11077_v7, %v12395_v60 }
  0xb7   : > { %v6004_v17 = vrot.slane %v11077_v7, %v12389_v57  ;;  %v6012_v18 = vrot.slane %v11077_v7, %v12393_v59  ;;  %v12427_v19 = vrot.slane %v899_v9, %v12385_v52  ;;  %v12430_v20 = vrot.slane %v900_v10, %v12385_v52 }
  0xb8   : > { %v1960_v21 = vrot.slane %v907_v13, %v12391_v58  ;;  %v1976_v22 = vrot.slane %v921_v14, %v12391_v58  ;;  %v6521_v23 = vpack.i.b16 %v6008_v15, %v6008_v15  ;;  %v1968_v24 = vrot.slane %v907_v13, %v12395_v60 }
  0xb9   : > { %v1984_v25 = vrot.slane %v921_v14, %v12395_v60  ;;  %v6535_v26 = vpack.i.b16 %v6016_v16, %v6016_v16  ;;  %v1956_v27 = vrot.slane %v907_v13, %v12389_v57  ;;  %v1972_v28 = vrot.slane %v921_v14, %v12389_v57 }
  0xba   : > { %v4002_v29 = vshra.s32 %v1960_v21, %v12383_v51  ;;  %v4006_v30 = vshra.s32 %v1976_v22, %v12383_v51  ;;  %v12441_v31 = vrot.slane %v6521_v23, %v12389_v57  ;;  %v4004_v32 = vshra.s32 %v1968_v24, %v12383_v51 }
  0xbb   : > { %v4008_v33 = vshra.s32 %v1984_v25, %v12383_v51  ;;  %v12446_v34 = vrot.slane %v6535_v26, %v12389_v57  ;;  %v4001_v35 = vshra.s32 %v1956_v27, %v12383_v51  ;;  %v4005_v36 = vshra.s32 %v1972_v28, %v12383_v51 }
  0xbc   : > { %v4514_v37 = vand.u32 15, %v4002_v29  ;;  %v4518_v38 = vand.u32 15, %v4006_v30  ;;  %v4516_v39 = vand.u32 15, %v4004_v32  ;;  %v6514_v40 = vpack.i.b16 %v6004_v17, %v6004_v17 }
  0xbd   : > { %v4520_v41 = vand.u32 15, %v4008_v33  ;;  %v4513_v42 = vand.u32 15, %v4001_v35  ;;  %v4517_v43 = vand.u32 15, %v4005_v36  ;;  %v1964_v44 = vrot.slane %v907_v13, %v12393_v59 }
  0xbe   : > { %v5026_v45 = vcvt.s32.f32 %v4514_v37  ;;  %v5030_v46 = vcvt.s32.f32 %v4518_v38  ;;  %v5028_v47 = vcvt.s32.f32 %v4516_v39  ;;  %v12453_v48 = vrot.slane %v6514_v40, %v12389_v57 }
  0xbf   : > { %v5032_v49 = vcvt.s32.f32 %v4520_v41  ;;  %v5025_v50 = vcvt.s32.f32 %v4513_v42  ;;  %v5029_v53 = vcvt.s32.f32 %v4517_v43  ;;  %v1980_v54 = vrot.slane %v921_v14, %v12393_v59 }
  0xc0   : > { %v5538_v55 = vpack.c.bf16 %v5030_v46, %v5026_v45  ;;  %v4003_v56 = vshra.s32 %v1964_v44, %v12383_v51  ;;  %v6528_v61 = vpack.i.b16 %v6012_v18, %v6012_v18  ;;  %v929_v62 = vcombine.high %v907_v13, %v907_v13 }
  0xc1   : > { %v5540_v0 = vpack.c.bf16 %v5032_v49, %v5028_v47  ;;  %v5537_v1 = vpack.c.bf16 %v5029_v53, %v5025_v50  ;;  %v4007_v5 = vshra.s32 %v1980_v54, %v12383_v51  ;;  %v931_v6 = vcombine.high %v921_v14, %v921_v14 }
  0xc2   : > { %v7410_v7 = vmul.bf16 %v12441_v31, %v5538_v55  ;;  %v4515_v9 = vand.u32 15, %v4003_v56  ;;  %v12460_v10 = vrot.slane %v6528_v61, %v12389_v57  ;;  %v1992_v15 = vrot.slane %v929_v62, %v12391_v58 }
  0xc3   : > { %v7412_v16 = vmul.bf16 %v12446_v34, %v5540_v0  ;;  %v7409_v17 = vmul.bf16 %v12453_v48, %v5537_v1  ;;  %v4519_v21 = vand.u32 15, %v4007_v5  ;;  %v2008_v13 = vrot.slane %v931_v6, %v12391_v58 }
  0xc4   : > { %7669 = vst [vmem:[%s12466_s18 + $0x8] sm:$0xff] %v7410_v7  ;;  %7972 = vmatprep.subr.bf16.mxu0 %v7410_v7  ;;  %v5027_v14 = vcvt.s32.f32 %v4515_v9  ;;  %v4010_v18 = vshra.s32 %v1992_v15, %v12383_v51  ;;  %v2000_v22 = vrot.slane %v929_v62, %v12395_v60  ;;  %v2016_v23 = vrot.slane %v931_v6, %v12395_v60 }
  0xc5   : > { %7671 = vst [vmem:[%s12466_s18 + $0x18] sm:$0xff] %v7412_v16  ;;  %8144 = vmatprep.subr.bf16.mxu1 %v7412_v16  ;;  %7668 = vst [vmem:[%s12466_s18] sm:$0xff] %v7409_v17  ;;  %7973 = vmatpush1.bf16.msra.mxu0 %v7409_v17  ;;  %v5031_v24 = vcvt.s32.f32 %v4519_v21  ;;  %v4014_v25 = vshra.s32 %v2008_v13, %v12383_v51  ;;  %v1988_v26 = vrot.slane %v929_v62, %v12389_v57 }
  0xc6   : > { %v2004_v27 = vrot.slane %v931_v6, %v12389_v57  ;;  %v4522_v28 = vand.u32 15, %v4010_v18  ;;  %v4012_v29 = vshra.s32 %v2000_v22, %v12383_v51  ;;  %v4016_v30 = vshra.s32 %v2016_v23, %v12383_v51 }
  0xc7   : > { %v1996_v32 = vrot.slane %v929_v62, %v12393_v59  ;;  %v5539_v33 = vpack.c.bf16 %v5031_v24, %v5027_v14  ;;  %v4526_v35 = vand.u32 15, %v4014_v25  ;;  %v4009_v36 = vshra.s32 %v1988_v26, %v12383_v51 }
  0xc8   : > { %v4013_v37 = vshra.s32 %v2004_v27, %v12383_v51  ;;  %v5034_v38 = vcvt.s32.f32 %v4522_v28  ;;  %v4524_v39 = vand.u32 15, %v4012_v29  ;;  %v4528_v40 = vand.u32 15, %v4016_v30 }
  0xc9   : > { %v2012_v41 = vrot.slane %v931_v6, %v12393_v59  ;;  %v7411_v42 = vmul.bf16 %v12460_v10, %v5539_v33  ;;  %v5038_v43 = vcvt.s32.f32 %v4526_v35  ;;  %v4521_v44 = vand.u32 15, %v4009_v36 }
  0xca   : > { %v4525_v45 = vand.u32 15, %v4013_v37  ;;  %v5036_v46 = vcvt.s32.f32 %v4524_v39  ;;  %v5040_v47 = vcvt.s32.f32 %v4528_v40  ;;  %v4011_v49 = vshra.s32 %v1996_v32, %v12383_v51 }
  0xcb   : > { %v4015_v50 = vshra.s32 %v2012_v41, %v12383_v51  ;;  %7670 = vst [vmem:[%s12466_s18 + $0x10] sm:$0xff] %v7411_v42  ;;  %8145 = vmatpush1.bf16.msra.mxu1 %v7411_v42  ;;  %v5542_v53 = vpack.c.bf16 %v5038_v43, %v5034_v38  ;;  %v5033_v54 = vcvt.s32.f32 %v4521_v44  ;;  %v2024_v56 = vrot.slane %v12427_v19, %v12391_v58 }
  0xcc   : > { %v5037_v55 = vcvt.s32.f32 %v4525_v45  ;;  %v5544_v61 = vpack.c.bf16 %v5040_v47, %v5036_v46  ;;  %v4523_v62 = vand.u32 15, %v4011_v49  ;;  %v2040_v1 = vrot.slane %v12430_v20, %v12391_v58 }
  0xcd   : > { %v4527_v0 = vand.u32 15, %v4015_v50  ;;  %v7414_v5 = vmul.bf16 %v12441_v31, %v5542_v53  ;;  %v4018_v7 = vshra.s32 %v2024_v56, %v12383_v51  ;;  %v5970_v9 = vpack.i.b16 %v5938_v8, %v5938_v8 }
  0xce   : > { %v5541_v6 = vpack.c.bf16 %v5037_v55, %v5033_v54  ;;  %v7416_v15 = vmul.bf16 %v12446_v34, %v5544_v61  ;;  %v5035_v16 = vcvt.s32.f32 %v4523_v62  ;;  %v4022_v21 = vshra.s32 %v2040_v1, %v12383_v51 }
  0xcf   : > { %v5039_v17 = vcvt.s32.f32 %v4527_v0  ;;  %7673 = vst [vmem:[%s12466_s18 + $0x28] sm:$0xff] %v7414_v5  ;;  %7974 = vmatprep.subr.bf16.mxu0 %v7414_v5  ;;  %v4530_v14 = vand.u32 15, %v4018_v7  ;;  %v6024_v31 = vrot.slane %v5970_v9, %v12391_v58  ;;  %v2032_v18 = vrot.slane %v12427_v19, %v12395_v60 }
  0xd0   : > { %v7413_v13 = vmul.bf16 %v12453_v48, %v5541_v6  ;;  %7675 = vst [vmem:[%s12466_s18 + $0x38] sm:$0xff] %v7416_v15  ;;  %8146 = vmatprep.subr.bf16.mxu1 %v7416_v15  ;;  %v4534_v22 = vand.u32 15, %v4022_v21  ;;  %v2048_v34 = vrot.slane %v12430_v20, %v12395_v60  ;;  %v6032_v23 = vrot.slane %v5970_v9, %v12395_v60 }
  0xd1   : > { %v5543_v8 = vpack.c.bf16 %v5039_v17, %v5035_v16  ;;  %v5042_v24 = vcvt.s32.f32 %v4530_v14  ;;  %v6549_v48 = vpack.i.b16 %v6024_v31, %v6024_v31  ;;  %v4020_v25 = vshra.s32 %v2032_v18, %v12383_v51 }
  0xd2   : > { %7672 = vst [vmem:[%s12466_s18 + $0x20] sm:$0xff] %v7413_v13  ;;  %7975 = vmatpush1.bf16.msra.mxu0 %v7413_v13  ;;  %v2020_v26 = vrot.slane %v12427_v19, %v12389_v57  ;;  %v5046_v28 = vcvt.s32.f32 %v4534_v22  ;;  %v4024_v29 = vshra.s32 %v2048_v34, %v12383_v51  ;;  %v6563_v30 = vpack.i.b16 %v6032_v23, %v6032_v23 }
  0xd3   : > { %v7415_v27 = vmul.bf16 %v12460_v10, %v5543_v8  ;;  %v12514_v32 = vrot.slane %v6549_v48, %v12389_v57  ;;  %v4532_v33 = vand.u32 15, %v4020_v25  ;;  %v2036_v35 = vrot.slane %v12430_v20, %v12389_v57 }
  0xd4   : > { %v4017_v36 = vshra.s32 %v2020_v26, %v12383_v51  ;;  %v5546_v37 = vpack.c.bf16 %v5046_v28, %v5042_v24  ;;  %v4536_v38 = vand.u32 15, %v4024_v29  ;;  %v12521_v10 = vrot.slane %v6563_v30, %v12389_v57 }
  0xd5   : > { %7674 = vst [vmem:[%s12466_s18 + $0x30] sm:$0xff] %v7415_v27  ;;  %8147 = vmatpush1.bf16.msra.mxu1 %v7415_v27  ;;  %v6020_v39 = vrot.slane %v5970_v9, %v12389_v57  ;;  %v5044_v40 = vcvt.s32.f32 %v4532_v33  ;;  %v4021_v41 = vshra.s32 %v2036_v35, %v12383_v51  ;;  %v2028_v43 = vrot.slane %v12427_v19, %v12393_v59 }
  0xd6   : > { %v4529_v42 = vand.u32 15, %v4017_v36  ;;  %v7418_v44 = vmul.bf16 %v12514_v32, %v5546_v37  ;;  %v5048_v45 = vcvt.s32.f32 %v4536_v38  ;;  %v2044_v47 = vrot.slane %v12430_v20, %v12393_v59 }
  0xd7   : > { %v6542_v46 = vpack.i.b16 %v6020_v39, %v6020_v39  ;;  %v4533_v49 = vand.u32 15, %v4021_v41  ;;  %v4019_v53 = vshra.s32 %v2028_v43, %v12383_v51  ;;  %v6028_v54 = vrot.slane %v5970_v9, %v12393_v59 }
  0xd8   : > { %v5041_v50 = vcvt.s32.f32 %v4529_v42  ;;  %7677 = vst [vmem:[%s12466_s18 + $0x48] sm:$0xff] %v7418_v44  ;;  %7976 = vmatprep.subr.bf16.mxu0 %v7418_v44  ;;  %v5548_v55 = vpack.c.bf16 %v5048_v45, %v5044_v40  ;;  %v4023_v61 = vshra.s32 %v2044_v47, %v12383_v51  ;;  %v930_v62 = vcombine.high %v12427_v19, %v12427_v19 }
  0xd9   : > { %v12534_v56 = vrot.slane %v6542_v46, %v12389_v57  ;;  %v5045_v0 = vcvt.s32.f32 %v4533_v49  ;;  %v4531_v1 = vand.u32 15, %v4019_v53  ;;  %v6556_v5 = vpack.i.b16 %v6028_v54, %v6028_v54 }
  0xda   : > { %v932_v6 = vcombine.high %v12430_v20, %v12430_v20  ;;  %v7420_v7 = vmul.bf16 %v12521_v10, %v5548_v55  ;;  %v4535_v9 = vand.u32 15, %v4023_v61  ;;  %v2056_v15 = vrot.slane %v930_v62, %v12391_v58 }
  0xdb   : > { %v2064_v16 = vrot.slane %v930_v62, %v12395_v60  ;;  %v5545_v17 = vpack.c.bf16 %v5045_v0, %v5041_v50  ;;  %v5043_v21 = vcvt.s32.f32 %v4531_v1  ;;  %v12545_v13 = vrot.slane %v6556_v5, %v12389_v57 }
  0xdc   : > { %v2072_v19 = vrot.slane %v932_v6, %v12391_v58  ;;  %7679 = vst [vmem:[%s12466_s18 + $0x58] sm:$0xff] %v7420_v7  ;;  %8148 = vmatprep.subr.bf16.mxu1 %v7420_v7  ;;  %v5047_v14 = vcvt.s32.f32 %v4535_v9  ;;  %v4026_v20 = vshra.s32 %v2056_v15, %v12383_v51  ;;  %v2080_v31 = vrot.slane %v932_v6, %v12395_v60 }
  0xdd   : > { %v4028_v18 = vshra.s32 %v2064_v16, %v12383_v51  ;;  %v7417_v8 = vmul.bf16 %v12534_v56, %v5545_v17  ;;  %v2052_v34 = vrot.slane %v930_v62, %v12389_v57  ;;  %v2068_v23 = vrot.slane %v932_v6, %v12389_v57 }
  0xde   : > { %v4030_v22 = vshra.s32 %v2072_v19, %v12383_v51  ;;  %v5547_v24 = vpack.c.bf16 %v5047_v14, %v5043_v21  ;;  %v4538_v48 = vand.u32 15, %v4026_v20  ;;  %v4032_v25 = vshra.s32 %v2080_v31, %v12383_v51 }
  0xdf   : > { %v4540_v26 = vand.u32 15, %v4028_v18  ;;  %7676 = vst [vmem:[%s12466_s18 + $0x40] sm:$0xff] %v7417_v8  ;;  %7977 = vmatpush1.bf16.msra.mxu0 %v7417_v8  ;;  %v4025_v28 = vshra.s32 %v2052_v34, %v12383_v51  ;;  %v4029_v29 = vshra.s32 %v2068_v23, %v12383_v51  ;;  %v2060_v30 = vrot.slane %v930_v62, %v12393_v59 }
  0xe0   : > { %v4542_v27 = vand.u32 15, %v4030_v22  ;;  %v7419_v33 = vmul.bf16 %v12545_v13, %v5547_v24  ;;  %v5050_v35 = vcvt.s32.f32 %v4538_v48  ;;  %v4544_v36 = vand.u32 15, %v4032_v25 }
  0xe1   : > { %v5052_v37 = vcvt.s32.f32 %v4540_v26  ;;  %v4537_v39 = vand.u32 15, %v4025_v28  ;;  %v4541_v40 = vand.u32 15, %v4029_v29  ;;  %v2076_v41 = vrot.slane %v932_v6, %v12393_v59 }
  0xe2   : > { %v5054_v38 = vcvt.s32.f32 %v4542_v27  ;;  %7678 = vst [vmem:[%s12466_s18 + $0x50] sm:$0xff] %v7419_v33  ;;  %8149 = vmatpush1.bf16.msra.mxu1 %v7419_v33  ;;  %v5056_v42 = vcvt.s32.f32 %v4544_v36  ;;  %v4027_v43 = vshra.s32 %v2060_v30, %v12383_v51  ;;  %v12569_v44 = vrot.slane %v965_v11, %v12385_v52 }
  0xe3   : > { %v12575_v45 = vrot.slane %v966_v12, %v12385_v52  ;;  %v5049_v47 = vcvt.s32.f32 %v4537_v39  ;;  %v5053_v49 = vcvt.s32.f32 %v4541_v40  ;;  %v4031_v50 = vshra.s32 %v2076_v41, %v12383_v51 }
  0xe4   : > { %v5550_v46 = vpack.c.bf16 %v5054_v38, %v5050_v35  ;;  %v5552_v53 = vpack.c.bf16 %v5056_v42, %v5052_v37  ;;  %v4539_v54 = vand.u32 15, %v4027_v43  ;;  %v2088_v55 = vrot.slane %v12569_v44, %v12391_v58 }
  0xe5   : > { %v2104_v11 = vrot.slane %v12575_v45, %v12391_v58  ;;  %v5549_v2 = vpack.c.bf16 %v5053_v49, %v5049_v47  ;;  %v4543_v3 = vand.u32 15, %v4031_v50  ;;  %v11078_v12 = vpack.i.b16 %v12411_v4, %v12411_v4 }
  0xe6   : > { %v7422_v61 = vmul.bf16 %v12514_v32, %v5550_v46  ;;  %v7424_v62 = vmul.bf16 %v12521_v10, %v5552_v53  ;;  %v5051_v0 = vcvt.s32.f32 %v4539_v54  ;;  %v4034_v1 = vshra.s32 %v2088_v55, %v12383_v51 }
  0xe7   : > { %v4038_v5 = vshra.s32 %v2104_v11, %v12383_v51  ;;  %v7421_v6 = vmul.bf16 %v12534_v56, %v5549_v2  ;;  %v5055_v7 = vcvt.s32.f32 %v4543_v3  ;;  %v6040_v32 = vrot.slane %v11078_v12, %v12391_v58 }
  0xe8   : > { %7681 = vst [vmem:[%s12466_s18 + $0x68] sm:$0xff] %v7422_v61  ;;  %7978 = vmatprep.subr.bf16.mxu0 %v7422_v61  ;;  %v2096_v9 = vrot.slane %v12569_v44, %v12395_v60  ;;  %7683 = vst [vmem:[%s12466_s18 + $0x78] sm:$0xff] %v7424_v62  ;;  %8150 = vmatprep.subr.bf16.mxu1 %v7424_v62  ;;  %v4546_v15 = vand.u32 15, %v4034_v1  ;;  %v2112_v16 = vrot.slane %v12575_v45, %v12395_v60 }
  0xe9   : > { %v4550_v10 = vand.u32 15, %v4038_v5  ;;  %v6048_v17 = vrot.slane %v11078_v12, %v12395_v60  ;;  %7680 = vst [vmem:[%s12466_s18 + $0x60] sm:$0xff] %v7421_v6  ;;  %7979 = vmatpush1.bf16.msra.mxu0 %v7421_v6  ;;  %v5551_v21 = vpack.c.bf16 %v5055_v7, %v5051_v0  ;;  %v6577_v56 = vpack.i.b16 %v6040_v32, %v6040_v32  ;;  %v11632_v6 = vld [vmem:[%s12364_s6 + $0x24] ss:$8 sps:$4 sm:$0xff]  }
  0xea   : > { %v4036_v19 = vshra.s32 %v2096_v9, %v12383_v51  ;;  %v2084_v14 = vrot.slane %v12569_v44, %v12389_v57  ;;  %v5058_v20 = vcvt.s32.f32 %v4546_v15  ;;  %v4040_v18 = vshra.s32 %v2112_v16, %v12383_v51 }
  0xeb   : > { %v5062_v31 = vcvt.s32.f32 %v4550_v10  ;;  %v6591_v8 = vpack.i.b16 %v6048_v17, %v6048_v17  ;;  %v7423_v22 = vmul.bf16 %v12545_v13, %v5551_v21  ;;  %v12604_v34 = vrot.slane %v6577_v56, %v12389_v57  ;;  %v11633_v10 = vld [vmem:[%s12364_s6 + $0x34] ss:$8 sps:$4 sm:$0xff]  }
  0xec   : > { %v4548_v23 = vand.u32 15, %v4036_v19  ;;  %v2100_v24 = vrot.slane %v12575_v45, %v12389_v57  ;;  %v4552_v25 = vand.u32 15, %v4040_v18  ;;  %v4033_v27 = vshra.s32 %v2084_v14, %v12383_v51 }
  0xed   : > { %v5554_v48 = vpack.c.bf16 %v5062_v31, %v5058_v20  ;;  %v12609_v26 = vrot.slane %v6591_v8, %v12389_v57  ;;  %7682 = vst [vmem:[%s12466_s18 + $0x70] sm:$0xff] %v7423_v22  ;;  %8151 = vmatpush1.bf16.msra.mxu1 %v7423_v22  ;;  %v6036_v29 = vrot.slane %v11078_v12, %v12389_v57 }
  0xee   : > { %v5060_v28 = vcvt.s32.f32 %v4548_v23  ;;  %v4037_v13 = vshra.s32 %v2100_v24, %v12383_v51  ;;  %v2092_v30 = vrot.slane %v12569_v44, %v12393_v59  ;;  %v5064_v35 = vcvt.s32.f32 %v4552_v25 }
  0xef   : > { %v7426_v33 = vmul.bf16 %v12604_v34, %v5554_v48  ;;  %v4545_v36 = vand.u32 15, %v4033_v27  ;;  %v2108_v37 = vrot.slane %v12575_v45, %v12393_v59  ;;  %v6570_v39 = vpack.i.b16 %v6036_v29, %v6036_v29 }
  0xf0   : > { %v4549_v38 = vand.u32 15, %v4037_v13  ;;  %v4035_v40 = vshra.s32 %v2092_v30, %v12383_v51  ;;  %v6044_v41 = vrot.slane %v11078_v12, %v12393_v59  ;;  %v5556_v42 = vpack.c.bf16 %v5064_v35, %v5060_v28 }
  0xf1   : > { %7685 = vst [vmem:[%s12466_s18 + $0x88] sm:$0xff] %v7426_v33  ;;  %7980 = vmatprep.subr.bf16.mxu0 %v7426_v33  ;;  %v5057_v43 = vcvt.s32.f32 %v4545_v36  ;;  %v4039_v46 = vshra.s32 %v2108_v37, %v12383_v51  ;;  %v997_v47 = vcombine.high %v12569_v44, %v12569_v44  ;;  %v12627_v50 = vrot.slane %v6570_v39, %v12389_v57 }
  0xf2   : > { %v5061_v49 = vcvt.s32.f32 %v4549_v38  ;;  %v4547_v53 = vand.u32 15, %v4035_v40  ;;  %v6584_v54 = vpack.i.b16 %v6044_v41, %v6044_v41  ;;  %v7428_v55 = vmul.bf16 %v12609_v26, %v5556_v42 }
  0xf3   : > { %v4551_v11 = vand.u32 15, %v4039_v46  ;;  %v999_v61 = vcombine.high %v12575_v45, %v12575_v45  ;;  %v2120_v2 = vrot.slane %v997_v47, %v12391_v58  ;;  %v2128_v62 = vrot.slane %v997_v47, %v12395_v60 }
  0xf4   : > { %v5553_v3 = vpack.c.bf16 %v5061_v49, %v5057_v43  ;;  %v5059_v12 = vcvt.s32.f32 %v4547_v53  ;;  %v12634_v44 = vrot.slane %v6584_v54, %v12389_v57  ;;  %7687 = vst [vmem:[%s12466_s18 + $0x98] sm:$0xff] %v7428_v55  ;;  %8152 = vmatprep.subr.bf16.mxu1 %v7428_v55  ;;  %v2116_v9 = vrot.slane %v997_v47, %v12389_v57 }
  0xf5   : > { %v5063_v0 = vcvt.s32.f32 %v4551_v11  ;;  %v2136_v1 = vrot.slane %v999_v61, %v12391_v58  ;;  %v4042_v5 = vshra.s32 %v2120_v2, %v12383_v51  ;;  %v2144_v45 = vrot.slane %v999_v61, %v12395_v60 }
  0xf6   : > { %v7425_v7 = vmul.bf16 %v12627_v50, %v5553_v3  ;;  %v4044_v32 = vshra.s32 %v2128_v62, %v12383_v51  ;;  %v2132_v15 = vrot.slane %v999_v61, %v12389_v57  ;;  %v4041_v14 = vshra.s32 %v2116_v9, %v12383_v51 }
  0xf7   : > { %v5555_v16 = vpack.c.bf16 %v5063_v0, %v5059_v12  ;;  %v4046_v17 = vshra.s32 %v2136_v1, %v12383_v51  ;;  %v4554_v21 = vand.u32 15, %v4042_v5  ;;  %v4048_v56 = vshra.s32 %v2144_v45, %v12383_v51 }
  0xf8   : > { %7684 = vst [vmem:[%s12466_s18 + $0x80] sm:$0xff] %v7425_v7  ;;  %7981 = vmatpush1.bf16.msra.mxu0 %v7425_v7  ;;  %v4556_v19 = vand.u32 15, %v4044_v32  ;;  %v4045_v20 = vshra.s32 %v2132_v15, %v12383_v51  ;;  %v2124_v31 = vrot.slane %v997_v47, %v12393_v59  ;;  %v4553_v48 = vand.u32 15, %v4041_v14 }
  0xf9   : > { %v7427_v18 = vmul.bf16 %v12634_v44, %v5555_v16  ;;  %v4558_v8 = vand.u32 15, %v4046_v17  ;;  %v5066_v22 = vcvt.s32.f32 %v4554_v21  ;;  %v4560_v23 = vand.u32 15, %v4048_v56 }
  0xfa   : > { %v5068_v24 = vcvt.s32.f32 %v4556_v19  ;;  %v4557_v25 = vand.u32 15, %v4045_v20  ;;  %v2140_v27 = vrot.slane %v999_v61, %v12393_v59  ;;  %v4043_v29 = vshra.s32 %v2124_v31, %v12383_v51 }
  0xfb   : > { %7686 = vst [vmem:[%s12466_s18 + $0x90] sm:$0xff] %v7427_v18  ;;  %8153 = vmatpush1.bf16.msra.mxu1 %v7427_v18  ;;  %v5070_v28 = vcvt.s32.f32 %v4558_v8  ;;  %v5072_v13 = vcvt.s32.f32 %v4560_v23  ;;  %v950_v30 = vrot.slane %v11632_v6, %v12385_v52  ;;  %v5065_v33 = vcvt.s32.f32 %v4553_v48 }
  0xfc   : > { %v5069_v35 = vcvt.s32.f32 %v4557_v25  ;;  %v4047_v36 = vshra.s32 %v2140_v27, %v12383_v51  ;;  %v964_v37 = vrot.slane %v11633_v10, %v12385_v52  ;;  %v4555_v40 = vand.u32 15, %v4043_v29 }
  0xfd   : > { %v5558_v38 = vpack.c.bf16 %v5070_v28, %v5066_v22  ;;  %v5560_v39 = vpack.c.bf16 %v5072_v13, %v5068_v24  ;;  %v5940_v41 = vunpack.i.h.s16 %v12411_v4 }
  0xfe   : > { %v5557_v42 = vpack.c.bf16 %v5069_v35, %v5065_v33  ;;  %v4559_v43 = vand.u32 15, %v4047_v36  ;;  %v967_v46 = vcombine.low %v950_v30, %v964_v37  ;;  %v968_v47 = vcombine.high %v950_v30, %v964_v37 }
  0xff   : > { %v7430_v49 = vmul.bf16 %v12604_v34, %v5558_v38  ;;  %v7432_v53 = vmul.bf16 %v12609_v26, %v5560_v39  ;;  %v5067_v54 = vcvt.s32.f32 %v4555_v40  ;;  %v5972_v55 = vpack.i.b16 %v5940_v41, %v5940_v41 }
 0x100   : > { %v7429_v11 = vmul.bf16 %v12627_v50, %v5557_v42  ;;  %v5071_v61 = vcvt.s32.f32 %v4559_v43  ;;  %v982_v2 = vrot.slane %v967_v46, %v12385_v52  ;;  %v996_v3 = vrot.slane %v968_v47, %v12385_v52 }
 0x101   : > { %7689 = vst [vmem:[%s12466_s18 + $0xa8] sm:$0xff] %v7430_v49  ;;  %7982 = vmatprep.subr.bf16.mxu0 %v7430_v49  ;;  %7691 = vst [vmem:[%s12466_s18 + $0xb8] sm:$0xff] %v7432_v53  ;;  %8154 = vmatprep.subr.bf16.mxu1 %v7432_v53  ;;  %v6056_v12 = vrot.slane %v5972_v55, %v12391_v58  ;;  %v6064_v62 = vrot.slane %v5972_v55, %v12395_v60 }
 0x102   : > { %v6052_v34 = vrot.slane %v5972_v55, %v12389_v57  ;;  %7688 = vst [vmem:[%s12466_s18 + $0xa0] sm:$0xff] %v7429_v11  ;;  %7983 = vmatpush1.bf16.msra.mxu0 %v7429_v11  ;;  %v5559_v26 = vpack.c.bf16 %v5071_v61, %v5067_v54  ;;  %v2152_v50 = vrot.slane %v982_v2, %v12391_v58 }
 0x103   : > { %v2168_v0 = vrot.slane %v996_v3, %v12391_v58  ;;  %v2160_v1 = vrot.slane %v982_v2, %v12395_v60  ;;  %v6605_v5 = vpack.i.b16 %v6056_v12, %v6056_v12  ;;  %v2176_v45 = vrot.slane %v996_v3, %v12395_v60 }
 0x104   : > { %v6619_v6 = vpack.i.b16 %v6064_v62, %v6064_v62  ;;  %v2148_v7 = vrot.slane %v982_v2, %v12389_v57  ;;  %v7431_v32 = vmul.bf16 %v12634_v44, %v5559_v26  ;;  %v4050_v9 = vshra.s32 %v2152_v50, %v12383_v51 }
 0x105   : > { %v4054_v15 = vshra.s32 %v2168_v0, %v12383_v51  ;;  %v4052_v10 = vshra.s32 %v2160_v1, %v12383_v51  ;;  %v12682_v16 = vrot.slane %v6605_v5, %v12389_v57  ;;  %v4056_v17 = vshra.s32 %v2176_v45, %v12383_v51 }
 0x106   : > { %v12686_v21 = vrot.slane %v6619_v6, %v12389_v57  ;;  %v2164_v56 = vrot.slane %v996_v3, %v12389_v57  ;;  %7690 = vst [vmem:[%s12466_s18 + $0xb0] sm:$0xff] %v7431_v32  ;;  %8155 = vmatpush1.bf16.msra.mxu1 %v7431_v32  ;;  %v4562_v19 = vand.u32 15, %v4050_v9  ;;  %v4049_v20 = vshra.s32 %v2148_v7, %v12383_v51  ;;  %v11634_v32 = vld [vmem:[%s12364_s6 + $0x40] ss:$8 sps:$4 sm:$0xff]  }
 0x107   : > { %v4566_v44 = vand.u32 15, %v4054_v15  ;;  %v4564_v14 = vand.u32 15, %v4052_v10  ;;  %v4568_v31 = vand.u32 15, %v4056_v17  ;;  %v6598_v8 = vpack.i.b16 %v6052_v34, %v6052_v34 }
 0x108   : > { %v4053_v18 = vshra.s32 %v2164_v56, %v12383_v51  ;;  %v2156_v22 = vrot.slane %v982_v2, %v12393_v59  ;;  %v5074_v23 = vcvt.s32.f32 %v4562_v19  ;;  %v4561_v25 = vand.u32 15, %v4049_v20  ;;  %v11636_v56 = vld [vmem:[%s12364_s6 + $0x50] ss:$8 sps:$4 sm:$0xff]  }
 0x109   : > { %v5078_v24 = vcvt.s32.f32 %v4566_v44  ;;  %v5076_v48 = vcvt.s32.f32 %v4564_v14  ;;  %v5080_v27 = vcvt.s32.f32 %v4568_v31  ;;  %v12694_v13 = vrot.slane %v6598_v8, %v12389_v57 }
 0x10a   : > { %v4565_v28 = vand.u32 15, %v4053_v18  ;;  %v2172_v29 = vrot.slane %v996_v3, %v12393_v59  ;;  %v5073_v33 = vcvt.s32.f32 %v4561_v25  ;;  %v4051_v35 = vshra.s32 %v2156_v22, %v12383_v51 }
 0x10b   : > { %v5562_v30 = vpack.c.bf16 %v5078_v24, %v5074_v23  ;;  %v6060_v36 = vrot.slane %v5972_v55, %v12393_v59  ;;  %v5564_v37 = vpack.c.bf16 %v5080_v27, %v5076_v48  ;;  %v998_v40 = vcombine.high %v982_v2, %v982_v2 }
 0x10c   : > { %v5077_v38 = vcvt.s32.f32 %v4565_v28  ;;  %v4055_v39 = vshra.s32 %v2172_v29, %v12383_v51  ;;  %v4563_v42 = vand.u32 15, %v4051_v35  ;;  %v1000_v46 = vcombine.high %v996_v3, %v996_v3 }
 0x10d   : > { %v7434_v41 = vmul.bf16 %v12682_v16, %v5562_v30  ;;  %v6612_v43 = vpack.i.b16 %v6060_v36, %v6060_v36  ;;  %v7436_v47 = vmul.bf16 %v12686_v21, %v5564_v37  ;;  %v2184_v54 = vrot.slane %v998_v40, %v12391_v58 }
 0x10e   : > { %v5561_v49 = vpack.c.bf16 %v5077_v38, %v5073_v33  ;;  %v4567_v53 = vand.u32 15, %v4055_v39  ;;  %v5075_v55 = vcvt.s32.f32 %v4563_v42  ;;  %v2200_v61 = vrot.slane %v1000_v46, %v12391_v58  ;;  %v11638_v33 = vld [vmem:[%s12364_s6 + $0x44] ss:$8 sps:$4 sm:$0xff]  }
 0x10f   : > { %7693 = vst [vmem:[%s12466_s18 + $0xc8] sm:$0xff] %v7434_v41  ;;  %7984 = vmatprep.subr.bf16.mxu0 %v7434_v41  ;;  %v12705_v11 = vrot.slane %v6612_v43, %v12389_v57  ;;  %v2192_v2 = vrot.slane %v998_v40, %v12395_v60  ;;  %7695 = vst [vmem:[%s12466_s18 + $0xd8] sm:$0xff] %v7436_v47  ;;  %8156 = vmatprep.subr.bf16.mxu1 %v7436_v47 }
 0x110   : > { %v7433_v3 = vmul.bf16 %v12694_v13, %v5561_v49  ;;  %v5079_v12 = vcvt.s32.f32 %v4567_v53  ;;  %v4058_v62 = vshra.s32 %v2184_v54, %v12383_v51  ;;  %v2208_v34 = vrot.slane %v1000_v46, %v12395_v60 }
 0x111   : > { %v4062_v26 = vshra.s32 %v2200_v61, %v12383_v51  ;;  %v4060_v50 = vshra.s32 %v2192_v2, %v12383_v51  ;;  %v2180_v0 = vrot.slane %v998_v40, %v12389_v57  ;;  %v2196_v1 = vrot.slane %v1000_v46, %v12389_v57 }
 0x112   : > { %7692 = vst [vmem:[%s12466_s18 + $0xc0] sm:$0xff] %v7433_v3  ;;  %7985 = vmatpush1.bf16.msra.mxu0 %v7433_v3  ;;  %v5563_v5 = vpack.c.bf16 %v5079_v12, %v5075_v55  ;;  %v4570_v45 = vand.u32 15, %v4058_v62  ;;  %v4064_v6 = vshra.s32 %v2208_v34, %v12383_v51  ;;  %v2188_v7 = vrot.slane %v998_v40, %v12393_v59 }
 0x113   : > { %v4574_v9 = vand.u32 15, %v4062_v26  ;;  %v4572_v15 = vand.u32 15, %v4060_v50  ;;  %v4057_v10 = vshra.s32 %v2180_v0, %v12383_v51  ;;  %v4061_v17 = vshra.s32 %v2196_v1, %v12383_v51 }
 0x114   : > { %v7435_v19 = vmul.bf16 %v12705_v11, %v5563_v5  ;;  %v5082_v44 = vcvt.s32.f32 %v4570_v45  ;;  %v4576_v14 = vand.u32 15, %v4064_v6  ;;  %v2204_v20 = vrot.slane %v1000_v46, %v12393_v59 }
 0x115   : > { %v5086_v31 = vcvt.s32.f32 %v4574_v9  ;;  %v5084_v18 = vcvt.s32.f32 %v4572_v15  ;;  %v4569_v8 = vand.u32 15, %v4057_v10  ;;  %v4573_v22 = vand.u32 15, %v4061_v17 }
 0x116   : > { %7694 = vst [vmem:[%s12466_s18 + $0xd0] sm:$0xff] %v7435_v19  ;;  %8157 = vmatpush1.bf16.msra.mxu1 %v7435_v19  ;;  %v5088_v23 = vcvt.s32.f32 %v4576_v14  ;;  %v4059_v24 = vshra.s32 %v2188_v7, %v12383_v51  ;;  %v4063_v48 = vshra.s32 %v2204_v20, %v12383_v51  ;;  %v1011_v25 = vrot.slane %v11634_v32, %v12385_v52 }
 0x117   : > { %v5566_v27 = vpack.c.bf16 %v5086_v31, %v5082_v44  ;;  %v5081_v28 = vcvt.s32.f32 %v4569_v8  ;;  %v5085_v29 = vcvt.s32.f32 %v4573_v22  ;;  %v1025_v30 = vrot.slane %v11636_v56, %v12385_v52 }
 0x118   : > { %v5568_v35 = vpack.c.bf16 %v5088_v23, %v5084_v18  ;;  %v4571_v36 = vand.u32 15, %v4059_v24  ;;  %v4575_v37 = vand.u32 15, %v4063_v48  ;;  %v12734_v38 = vcombine.high %v12400_v63, %v12400_v63 }
 0x119   : > { %v7438_v39 = vmul.bf16 %v12682_v16, %v5566_v27  ;;  %v5565_v40 = vpack.c.bf16 %v5085_v29, %v5081_v28  ;;  %v1033_v41 = vcombine.low %v1011_v25, %v1025_v30  ;;  %v1034_v42 = vcombine.high %v1011_v25, %v1025_v30 }
 0x11a   : > { %v7440_v43 = vmul.bf16 %v12686_v21, %v5568_v35  ;;  %v5083_v46 = vcvt.s32.f32 %v4571_v36  ;;  %v5087_v47 = vcvt.s32.f32 %v4575_v37  ;;  %v11079_v49 = vpack.i.b16 %v12734_v38, %v12734_v38 }
 0x11b   : > { %7697 = vst [vmem:[%s12466_s18 + $0xe8] sm:$0xff] %v7438_v39  ;;  %7986 = vmatprep.subr.bf16.mxu0 %v7438_v39  ;;  %v7437_v53 = vmul.bf16 %v12694_v13, %v5565_v40  ;;  %v1043_v63 = vrot.slane %v1033_v41, %v12385_v52  ;;  %v1057_v54 = vrot.slane %v1034_v42, %v12385_v52 }
 0x11c   : > { %v12745_v16 = vrot.slane %v11638_v33, %v12385_v52  ;;  %7699 = vst [vmem:[%s12466_s18 + $0xf8] sm:$0xff] %v7440_v43  ;;  %8158 = vmatprep.subr.bf16.mxu1 %v7440_v43  ;;  %v5567_v21 = vpack.c.bf16 %v5087_v47, %v5083_v46  ;;  %v6072_v55 = vrot.slane %v11079_v49, %v12391_v58 }
 0x11d   : > { %v6080_v61 = vrot.slane %v11079_v49, %v12395_v60  ;;  %v6068_v2 = vrot.slane %v11079_v49, %v12389_v57  ;;  %7696 = vst [vmem:[%s12466_s18 + $0xe0] sm:$0xff] %v7437_v53  ;;  %7987 = vmatpush1.bf16.msra.mxu0 %v7437_v53  ;;  %v2216_v13 = vrot.slane %v1043_v63, %v12391_v58 }
 0x11e   : > { %v2232_v3 = vrot.slane %v1057_v54, %v12391_v58  ;;  %v2224_v12 = vrot.slane %v1043_v63, %v12395_v60  ;;  %v2240_v62 = vrot.slane %v1057_v54, %v12395_v60  ;;  %v7439_v34 = vmul.bf16 %v12705_v11, %v5567_v21 }
 0x11f   : > { %v6633_v26 = vpack.i.b16 %v6072_v55, %v6072_v55  ;;  %v6647_v50 = vpack.i.b16 %v6080_v61, %v6080_v61  ;;  %v2212_v0 = vrot.slane %v1043_v63, %v12389_v57  ;;  %v4066_v1 = vshra.s32 %v2216_v13, %v12383_v51 }
 0x120   : > { %v4070_v5 = vshra.s32 %v2232_v3, %v12383_v51  ;;  %v4068_v45 = vshra.s32 %v2224_v12, %v12383_v51  ;;  %v4072_v6 = vshra.s32 %v2240_v62, %v12383_v51  ;;  %7698 = vst [vmem:[%s12466_s18 + $0xf0] sm:$0xff] %v7439_v34  ;;  %8159 = vmatpush1.bf16.msra.mxu1 %v7439_v34 }
 0x121   : > { %v12764_v7 = vrot.slane %v6633_v26, %v12389_v57  ;;  %v12767_v32 = vrot.slane %v6647_v50, %v12389_v57  ;;  %v2228_v11 = vrot.slane %v1057_v54, %v12389_v57  ;;  %v4065_v9 = vshra.s32 %v2212_v0, %v12383_v51 }
 0x122   : > { %v4578_v15 = vand.u32 15, %v4066_v1  ;;  %v4582_v10 = vand.u32 15, %v4070_v5  ;;  %v4580_v17 = vand.u32 15, %v4068_v45  ;;  %v4584_v56 = vand.u32 15, %v4072_v6  ;;  %v11639_v5 = vld [vmem:[%s12364_s6 + $0x54] ss:$8 sps:$4 sm:$0xff]  }
 0x123   : > { %v4069_v19 = vshra.s32 %v2228_v11, %v12383_v51  ;;  %v4577_v44 = vand.u32 15, %v4065_v9  ;;  %v6626_v14 = vpack.i.b16 %v6068_v2, %v6068_v2  ;;  %v2220_v20 = vrot.slane %v1043_v63, %v12393_v59 }
 0x124   : > { %v5090_v31 = vcvt.s32.f32 %v4578_v15  ;;  %v5094_v18 = vcvt.s32.f32 %v4582_v10  ;;  %v5092_v8 = vcvt.s32.f32 %v4580_v17  ;;  %v5096_v22 = vcvt.s32.f32 %v4584_v56 }
 0x125   : > { %v4581_v23 = vand.u32 15, %v4069_v19  ;;  %v5089_v24 = vcvt.s32.f32 %v4577_v44  ;;  %v12774_v48 = vrot.slane %v6626_v14, %v12389_v57  ;;  %v2236_v25 = vrot.slane %v1057_v54, %v12393_v59 }
 0x126   : > { %v5570_v27 = vpack.c.bf16 %v5094_v18, %v5090_v31  ;;  %v5572_v28 = vpack.c.bf16 %v5096_v22, %v5092_v8  ;;  %v4067_v29 = vshra.s32 %v2220_v20, %v12383_v51  ;;  %v6076_v30 = vrot.slane %v11079_v49, %v12393_v59 }
 0x127   : > { %v5093_v33 = vcvt.s32.f32 %v4581_v23  ;;  %v4071_v35 = vshra.s32 %v2236_v25, %v12383_v51  ;;  %v1065_v36 = vcombine.high %v1043_v63, %v1043_v63  ;;  %v1067_v37 = vcombine.high %v1057_v54, %v1057_v54  ;;  %v11640_v23 = vld [vmem:[%s12364_s6 + $0x60] ss:$8 sps:$4 sm:$0xff]  }
 0x128   : > { %v7442_v39 = vmul.bf16 %v12764_v7, %v5570_v27  ;;  %v7444_v40 = vmul.bf16 %v12767_v32, %v5572_v28  ;;  %v4579_v41 = vand.u32 15, %v4067_v29  ;;  %v6640_v42 = vpack.i.b16 %v6076_v30, %v6076_v30 }
 0x129   : > { %v5569_v43 = vpack.c.bf16 %v5093_v33, %v5089_v24  ;;  %v4583_v46 = vand.u32 15, %v4071_v35  ;;  %v2248_v47 = vrot.slane %v1065_v36, %v12391_v58  ;;  %v2264_v53 = vrot.slane %v1067_v37, %v12391_v58 }
 0x12a   : > { %7701 = vst [vmem:[%s12466_s18 + $0x108] sm:$0xff] %v7442_v39  ;;  %7988 = vmatprep.subr.bf16.mxu0 %v7442_v39  ;;  %7703 = vst [vmem:[%s12466_s18 + $0x118] sm:$0xff] %v7444_v40  ;;  %8160 = vmatprep.subr.bf16.mxu1 %v7444_v40  ;;  %v5091_v49 = vcvt.s32.f32 %v4579_v41  ;;  %v12787_v63 = vrot.slane %v6640_v42, %v12389_v57  ;;  %v2256_v54 = vrot.slane %v1065_v36, %v12395_v60 }
 0x12b   : > { %v2272_v21 = vrot.slane %v1067_v37, %v12395_v60  ;;  %v7441_v55 = vmul.bf16 %v12774_v48, %v5569_v43  ;;  %v5095_v61 = vcvt.s32.f32 %v4583_v46  ;;  %v4074_v2 = vshra.s32 %v2248_v47, %v12383_v51 }
 0x12c   : > { %v4078_v13 = vshra.s32 %v2264_v53, %v12383_v51  ;;  %v4076_v3 = vshra.s32 %v2256_v54, %v12383_v51  ;;  %v2244_v62 = vrot.slane %v1065_v36, %v12389_v57  ;;  %v2260_v34 = vrot.slane %v1067_v37, %v12389_v57 }
 0x12d   : > { %v4080_v12 = vshra.s32 %v2272_v21, %v12383_v51  ;;  %7700 = vst [vmem:[%s12466_s18 + $0x100] sm:$0xff] %v7441_v55  ;;  %7989 = vmatpush1.bf16.msra.mxu0 %v7441_v55  ;;  %v5571_v26 = vpack.c.bf16 %v5095_v61, %v5091_v49  ;;  %v4586_v50 = vand.u32 15, %v4074_v2  ;;  %v2252_v1 = vrot.slane %v1065_v36, %v12393_v59 }
 0x12e   : > { %v4590_v0 = vand.u32 15, %v4078_v13  ;;  %v4588_v45 = vand.u32 15, %v4076_v3  ;;  %v4073_v11 = vshra.s32 %v2244_v62, %v12383_v51  ;;  %v4077_v9 = vshra.s32 %v2260_v34, %v12383_v51 }
 0x12f   : > { %v4592_v6 = vand.u32 15, %v4080_v12  ;;  %v7443_v15 = vmul.bf16 %v12787_v63, %v5571_v26  ;;  %v5098_v10 = vcvt.s32.f32 %v4586_v50  ;;  %v2268_v56 = vrot.slane %v1067_v37, %v12393_v59 }
 0x130   : > { %v5102_v17 = vcvt.s32.f32 %v4590_v0  ;;  %v5100_v19 = vcvt.s32.f32 %v4588_v45  ;;  %v4585_v14 = vand.u32 15, %v4073_v11  ;;  %v4589_v20 = vand.u32 15, %v4077_v9 }
 0x131   : > { %v5104_v44 = vcvt.s32.f32 %v4592_v6  ;;  %7702 = vst [vmem:[%s12466_s18 + $0x110] sm:$0xff] %v7443_v15  ;;  %8161 = vmatpush1.bf16.msra.mxu1 %v7443_v15  ;;  %v4075_v18 = vshra.s32 %v2252_v1, %v12383_v51  ;;  %v4079_v8 = vshra.s32 %v2268_v56, %v12383_v51  ;;  %v1032_v22 = vrot.slane %v11639_v5, %v12385_v52 }
 0x132   : > { %v5574_v31 = vpack.c.bf16 %v5102_v17, %v5098_v10  ;;  %v5097_v25 = vcvt.s32.f32 %v4585_v14  ;;  %v5101_v27 = vcvt.s32.f32 %v4589_v20  ;;  %v5942_v28 = vunpack.i.h.s16 %v12734_v38 }
 0x133   : > { %v5576_v24 = vpack.c.bf16 %v5104_v44, %v5100_v19  ;;  %v4587_v30 = vand.u32 15, %v4075_v18  ;;  %v4591_v33 = vand.u32 15, %v4079_v8  ;;  %v1035_v35 = vcombine.low %v12745_v16, %v1032_v22 }
 0x134   : > { %v7446_v29 = vmul.bf16 %v12764_v7, %v5574_v31  ;;  %v5573_v37 = vpack.c.bf16 %v5101_v27, %v5097_v25  ;;  %v1036_v39 = vcombine.high %v12745_v16, %v1032_v22  ;;  %v5974_v40 = vpack.i.b16 %v5942_v28, %v5942_v28 }
 0x135   : > { %v7448_v36 = vmul.bf16 %v12767_v32, %v5576_v24  ;;  %v5099_v41 = vcvt.s32.f32 %v4587_v30  ;;  %v5103_v42 = vcvt.s32.f32 %v4591_v33  ;;  %v1050_v43 = vrot.slane %v1035_v35, %v12385_v52 }
 0x136   : > { %7705 = vst [vmem:[%s12466_s18 + $0x128] sm:$0xff] %v7446_v29  ;;  %7990 = vmatprep.subr.bf16.mxu0 %v7446_v29  ;;  %v12818_v38 = vrot.slane %v11640_v23, %v12385_v52  ;;  %v7445_v7 = vmul.bf16 %v12774_v48, %v5573_v37  ;;  %v1064_v32 = vrot.slane %v1036_v39, %v12385_v52 }
 0x137   : > { %7707 = vst [vmem:[%s12466_s18 + $0x138] sm:$0xff] %v7448_v36  ;;  %8162 = vmatprep.subr.bf16.mxu1 %v7448_v36  ;;  %v6088_v46 = vrot.slane %v5974_v40, %v12391_v58  ;;  %v6096_v16 = vrot.slane %v5974_v40, %v12395_v60  ;;  %v5575_v47 = vpack.c.bf16 %v5103_v42, %v5099_v41 }
 0x138   : > { %v2280_v53 = vrot.slane %v1050_v43, %v12391_v58  ;;  %v2288_v49 = vrot.slane %v1050_v43, %v12395_v60  ;;  %v2276_v54 = vrot.slane %v1050_v43, %v12389_v57  ;;  %7704 = vst [vmem:[%s12466_s18 + $0x120] sm:$0xff] %v7445_v7  ;;  %7991 = vmatpush1.bf16.msra.mxu0 %v7445_v7 }
 0x139   : > { %v2296_v21 = vrot.slane %v1064_v32, %v12391_v58  ;;  %v6661_v55 = vpack.i.b16 %v6088_v46, %v6088_v46  ;;  %v2304_v48 = vrot.slane %v1064_v32, %v12395_v60  ;;  %v6675_v61 = vpack.i.b16 %v6096_v16, %v6096_v16 }
 0x13a   : > { %v7447_v2 = vmul.bf16 %v12787_v63, %v5575_v47  ;;  %v4082_v13 = vshra.s32 %v2280_v53, %v12383_v51  ;;  %v4084_v3 = vshra.s32 %v2288_v49, %v12383_v51  ;;  %v2292_v12 = vrot.slane %v1064_v32, %v12389_v57 }
 0x13b   : > { %v4086_v62 = vshra.s32 %v2296_v21, %v12383_v51  ;;  %v12837_v34 = vrot.slane %v6661_v55, %v12389_v57  ;;  %v4088_v26 = vshra.s32 %v2304_v48, %v12383_v51  ;;  %v12841_v50 = vrot.slane %v6675_v61, %v12389_v57 }
 0x13c   : > { %7706 = vst [vmem:[%s12466_s18 + $0x130] sm:$0xff] %v7447_v2  ;;  %8163 = vmatpush1.bf16.msra.mxu1 %v7447_v2  ;;  %v4594_v0 = vand.u32 15, %v4082_v13  ;;  %v4596_v63 = vand.u32 15, %v4084_v3  ;;  %v4081_v1 = vshra.s32 %v2276_v54, %v12383_v51  ;;  %v4085_v5 = vshra.s32 %v2292_v12, %v12383_v51 }
 0x13d   : > { %v4598_v45 = vand.u32 15, %v4086_v62  ;;  %v4600_v6 = vand.u32 15, %v4088_v26  ;;  %v6084_v11 = vrot.slane %v5974_v40, %v12389_v57  ;;  %v2284_v9 = vrot.slane %v1050_v43, %v12393_v59  ;;  %v11642_v62 = vld [vmem:[%s12364_s6 + $0x70] ss:$8 sps:$4 sm:$0xff]  }
 0x13e   : > { %v5106_v15 = vcvt.s32.f32 %v4594_v0  ;;  %v5108_v10 = vcvt.s32.f32 %v4596_v63  ;;  %v4593_v17 = vand.u32 15, %v4081_v1  ;;  %v4597_v56 = vand.u32 15, %v4085_v5 }
 0x13f   : > { %v5110_v19 = vcvt.s32.f32 %v4598_v45  ;;  %v5112_v44 = vcvt.s32.f32 %v4600_v6  ;;  %v6654_v14 = vpack.i.b16 %v6084_v11, %v6084_v11  ;;  %v2300_v20 = vrot.slane %v1064_v32, %v12393_v59 }
 0x140   : > { %v5105_v31 = vcvt.s32.f32 %v4593_v17  ;;  %v5109_v18 = vcvt.s32.f32 %v4597_v56  ;;  %v4083_v8 = vshra.s32 %v2284_v9, %v12383_v51  ;;  %v6092_v22 = vrot.slane %v5974_v40, %v12393_v59 }
 0x141   : > { %v5578_v23 = vpack.c.bf16 %v5110_v19, %v5106_v15  ;;  %v5580_v24 = vpack.c.bf16 %v5112_v44, %v5108_v10  ;;  %v12852_v25 = vrot.slane %v6654_v14, %v12389_v57  ;;  %v4087_v27 = vshra.s32 %v2300_v20, %v12383_v51  ;;  %v11644_v20 = vld [vmem:[%s12364_s6 + $0x64] ss:$8 sps:$4 sm:$0xff]  }
 0x142   : > { %v5577_v28 = vpack.c.bf16 %v5109_v18, %v5105_v31  ;;  %v4595_v29 = vand.u32 15, %v4083_v8  ;;  %v6668_v30 = vpack.i.b16 %v6092_v22, %v6092_v22  ;;  %v1066_v33 = vcombine.high %v1050_v43, %v1050_v43 }
 0x143   : > { %v7450_v35 = vmul.bf16 %v12837_v34, %v5578_v23  ;;  %v7452_v36 = vmul.bf16 %v12841_v50, %v5580_v24  ;;  %v4599_v37 = vand.u32 15, %v4087_v27  ;;  %v1068_v39 = vcombine.high %v1064_v32, %v1064_v32 }
 0x144   : > { %v7449_v40 = vmul.bf16 %v12852_v25, %v5577_v28  ;;  %v5107_v41 = vcvt.s32.f32 %v4595_v29  ;;  %v12859_v42 = vrot.slane %v6668_v30, %v12389_v57  ;;  %v2312_v7 = vrot.slane %v1066_v33, %v12391_v58 }
 0x145   : > { %7709 = vst [vmem:[%s12466_s18 + $0x148] sm:$0xff] %v7450_v35  ;;  %7992 = vmatprep.subr.bf16.mxu0 %v7450_v35  ;;  %7711 = vst [vmem:[%s12466_s18 + $0x158] sm:$0xff] %v7452_v36  ;;  %8164 = vmatprep.subr.bf16.mxu1 %v7452_v36  ;;  %v5111_v43 = vcvt.s32.f32 %v4599_v37  ;;  %v2328_v46 = vrot.slane %v1068_v39, %v12391_v58  ;;  %v2320_v16 = vrot.slane %v1066_v33, %v12395_v60 }
 0x146   : > { %v2336_v32 = vrot.slane %v1068_v39, %v12395_v60  ;;  %7708 = vst [vmem:[%s12466_s18 + $0x140] sm:$0xff] %v7449_v40  ;;  %7993 = vmatpush1.bf16.msra.mxu0 %v7449_v40  ;;  %v4090_v47 = vshra.s32 %v2312_v7, %v12383_v51  ;;  %v2308_v53 = vrot.slane %v1066_v33, %v12389_v57 }
 0x147   : > { %v2324_v49 = vrot.slane %v1068_v39, %v12389_v57  ;;  %v2316_v54 = vrot.slane %v1066_v33, %v12393_v59  ;;  %v5579_v21 = vpack.c.bf16 %v5111_v43, %v5107_v41  ;;  %v4094_v55 = vshra.s32 %v2328_v46, %v12383_v51 }
 0x148   : > { %v4092_v48 = vshra.s32 %v2320_v16, %v12383_v51  ;;  %v4096_v61 = vshra.s32 %v2336_v32, %v12383_v51  ;;  %v4602_v2 = vand.u32 15, %v4090_v47  ;;  %v4089_v13 = vshra.s32 %v2308_v53, %v12383_v51 }
 0x149   : > { %v4093_v3 = vshra.s32 %v2324_v49, %v12383_v51  ;;  %v2332_v12 = vrot.slane %v1068_v39, %v12393_v59  ;;  %v7451_v26 = vmul.bf16 %v12859_v42, %v5579_v21  ;;  %v4606_v0 = vand.u32 15, %v4094_v55 }
 0x14a   : > { %v4604_v63 = vand.u32 15, %v4092_v48  ;;  %v4608_v1 = vand.u32 15, %v4096_v61  ;;  %v5114_v5 = vcvt.s32.f32 %v4602_v2  ;;  %v4601_v45 = vand.u32 15, %v4089_v13 }
 0x14b   : > { %v4605_v6 = vand.u32 15, %v4093_v3  ;;  %v4091_v11 = vshra.s32 %v2316_v54, %v12383_v51  ;;  %7710 = vst [vmem:[%s12466_s18 + $0x150] sm:$0xff] %v7451_v26  ;;  %8165 = vmatpush1.bf16.msra.mxu1 %v7451_v26  ;;  %v5118_v9 = vcvt.s32.f32 %v4606_v0  ;;  %v4095_v17 = vshra.s32 %v2332_v12, %v12383_v51 }
 0x14c   : > { %v5116_v15 = vcvt.s32.f32 %v4604_v63  ;;  %v5120_v10 = vcvt.s32.f32 %v4608_v1  ;;  %v5113_v56 = vcvt.s32.f32 %v4601_v45  ;;  %v1093_v14 = vrot.slane %v11642_v62, %v12385_v52 }
 0x14d   : > { %v5117_v19 = vcvt.s32.f32 %v4605_v6  ;;  %v4603_v44 = vand.u32 15, %v4091_v11  ;;  %v5582_v31 = vpack.c.bf16 %v5118_v9, %v5114_v5  ;;  %v4607_v8 = vand.u32 15, %v4095_v17 }
 0x14e   : > { %v5584_v18 = vpack.c.bf16 %v5120_v10, %v5116_v15  ;;  %v12887_v22 = vcombine.high %v12411_v4, %v12411_v4  ;;  %v1101_v27 = vcombine.low %v12818_v38, %v1093_v14  ;;  %v1102_v28 = vcombine.high %v12818_v38, %v1093_v14 }
 0x14f   : > { %v5581_v23 = vpack.c.bf16 %v5117_v19, %v5113_v56  ;;  %v5115_v24 = vcvt.s32.f32 %v4603_v44  ;;  %v7454_v29 = vmul.bf16 %v12837_v34, %v5582_v31  ;;  %v5119_v33 = vcvt.s32.f32 %v4607_v8 }
 0x150   : > { %v7456_v30 = vmul.bf16 %v12841_v50, %v5584_v18  ;;  %v11080_v35 = vpack.i.b16 %v12887_v22, %v12887_v22  ;;  %v1111_v4 = vrot.slane %v1101_v27, %v12385_v52  ;;  %v1125_v37 = vrot.slane %v1102_v28, %v12385_v52 }
 0x151   : > { %v7453_v36 = vmul.bf16 %v12852_v25, %v5581_v23  ;;  %v12899_v39 = vrot.slane %v11644_v20, %v12385_v52  ;;  %7713 = vst [vmem:[%s12466_s18 + $0x168] sm:$0xff] %v7454_v29  ;;  %7994 = vmatprep.subr.bf16.mxu0 %v7454_v29  ;;  %v5583_v38 = vpack.c.bf16 %v5119_v33, %v5115_v24  ;;  %v5944_v40 = vunpack.i.h.s16 %v12887_v22 }
 0x152   : > { %7715 = vst [vmem:[%s12466_s18 + $0x178] sm:$0xff] %v7456_v30  ;;  %8166 = vmatprep.subr.bf16.mxu1 %v7456_v30  ;;  %v6104_v34 = vrot.slane %v11080_v35, %v12391_v58  ;;  %v6112_v50 = vrot.slane %v11080_v35, %v12395_v60  ;;  %v2344_v25 = vrot.slane %v1111_v4, %v12391_v58 }
 0x153   : > { %7712 = vst [vmem:[%s12466_s18 + $0x160] sm:$0xff] %v7453_v36  ;;  %7995 = vmatpush1.bf16.msra.mxu0 %v7453_v36  ;;  %v2360_v41 = vrot.slane %v1125_v37, %v12391_v58  ;;  %v2352_v7 = vrot.slane %v1111_v4, %v12395_v60  ;;  %v2368_v43 = vrot.slane %v1125_v37, %v12395_v60 }
 0x154   : > { %v7455_v46 = vmul.bf16 %v12859_v42, %v5583_v38  ;;  %v6689_v16 = vpack.i.b16 %v6104_v34, %v6104_v34  ;;  %v6703_v32 = vpack.i.b16 %v6112_v50, %v6112_v50  ;;  %v2340_v47 = vrot.slane %v1111_v4, %v12389_v57 }
 0x155   : > { %v4098_v53 = vshra.s32 %v2344_v25, %v12383_v51  ;;  %v4102_v49 = vshra.s32 %v2360_v41, %v12383_v51  ;;  %v4100_v54 = vshra.s32 %v2352_v7, %v12383_v51  ;;  %v4104_v21 = vshra.s32 %v2368_v43, %v12383_v51 }
 0x156   : > { %7714 = vst [vmem:[%s12466_s18 + $0x170] sm:$0xff] %v7455_v46  ;;  %8167 = vmatpush1.bf16.msra.mxu1 %v7455_v46  ;;  %v12919_v55 = vrot.slane %v6689_v16, %v12389_v57  ;;  %v12922_v48 = vrot.slane %v6703_v32, %v12389_v57  ;;  %v2356_v42 = vrot.slane %v1125_v37, %v12389_v57 }
 0x157   : > { %v4097_v61 = vshra.s32 %v2340_v47, %v12383_v51  ;;  %v4610_v2 = vand.u32 15, %v4098_v53  ;;  %v4614_v13 = vand.u32 15, %v4102_v49  ;;  %v4612_v3 = vand.u32 15, %v4100_v54  ;;  %v11645_v49 = vld [vmem:[%s12364_s6 + $0x74] ss:$8 sps:$4 sm:$0xff]  }
 0x158   : > { %v4616_v12 = vand.u32 15, %v4104_v21  ;;  %v4101_v62 = vshra.s32 %v2356_v42, %v12383_v51  ;;  %v6100_v0 = vrot.slane %v11080_v35, %v12389_v57  ;;  %v2348_v63 = vrot.slane %v1111_v4, %v12393_v59 }
 0x159   : > { %v4609_v26 = vand.u32 15, %v4097_v61  ;;  %v5122_v1 = vcvt.s32.f32 %v4610_v2  ;;  %v5126_v5 = vcvt.s32.f32 %v4614_v13  ;;  %v5124_v45 = vcvt.s32.f32 %v4612_v3 }
 0x15a   : > { %v5128_v6 = vcvt.s32.f32 %v4616_v12  ;;  %v4613_v11 = vand.u32 15, %v4101_v62  ;;  %v6682_v15 = vpack.i.b16 %v6100_v0, %v6100_v0  ;;  %v2364_v10 = vrot.slane %v1125_v37, %v12393_v59  ;;  %v12964_v62 = vld [vmem:[%s16102_s1] sm:$0xff] }
 0x15b   : > { %v5121_v9 = vcvt.s32.f32 %v4609_v26  ;;  %v5586_v17 = vpack.c.bf16 %v5126_v5, %v5122_v1  ;;  %v4099_v19 = vshra.s32 %v2348_v63, %v12383_v51  ;;  %v6108_v44 = vrot.slane %v11080_v35, %v12393_v59  ;;  %v12969_v26 = vld [vmem:[%s16102_s1 + $0x20] sm:$0xff] }
 0x15c   : > { %v5588_v56 = vpack.c.bf16 %v5128_v6, %v5124_v45  ;;  %v5125_v14 = vcvt.s32.f32 %v4613_v11  ;;  %v12933_v20 = vrot.slane %v6682_v15, %v12389_v57  ;;  %v4103_v31 = vshra.s32 %v2364_v10, %v12383_v51 }
 0x15d   : > { %v1133_v18 = vcombine.high %v1111_v4, %v1111_v4  ;;  %v7458_v8 = vmul.bf16 %v12919_v55, %v5586_v17  ;;  %v4611_v24 = vand.u32 15, %v4099_v19  ;;  %v6696_v27 = vpack.i.b16 %v6108_v44, %v6108_v44 }
 0x15e   : > { %v7460_v23 = vmul.bf16 %v12922_v48, %v5588_v56  ;;  %v5585_v28 = vpack.c.bf16 %v5125_v14, %v5121_v9  ;;  %v4615_v29 = vand.u32 15, %v4103_v31  ;;  %v1135_v30 = vcombine.high %v1125_v37, %v1125_v37 }
 0x15f   : > { %v2376_v33 = vrot.slane %v1133_v18, %v12391_v58  ;;  %7717 = vst [vmem:[%s12466_s18 + $0x188] sm:$0xff] %v7458_v8  ;;  %7996 = vmatprep.subr.bf16.mxu0 %v7458_v8  ;;  %v5123_v35 = vcvt.s32.f32 %v4611_v24  ;;  %v12942_v36 = vrot.slane %v6696_v27, %v12389_v57  ;;  %v2384_v4 = vrot.slane %v1133_v18, %v12395_v60 }
 0x160   : > { %7719 = vst [vmem:[%s12466_s18 + $0x198] sm:$0xff] %v7460_v23  ;;  %8168 = vmatprep.subr.bf16.mxu1 %v7460_v23  ;;  %v2372_v38 = vrot.slane %v1133_v18, %v12389_v57  ;;  %v7457_v34 = vmul.bf16 %v12933_v20, %v5585_v28  ;;  %v5127_v50 = vcvt.s32.f32 %v4615_v29  ;;  %v2392_v37 = vrot.slane %v1135_v30, %v12391_v58 }
 0x161   : > { %v4106_v25 = vshra.s32 %v2376_v33, %v12383_v51  ;;  %v2400_v41 = vrot.slane %v1135_v30, %v12395_v60  ;;  %v4108_v7 = vshra.s32 %v2384_v4, %v12383_v51  ;;  %v2388_v43 = vrot.slane %v1135_v30, %v12389_v57 }
 0x162   : > { %v4105_v46 = vshra.s32 %v2372_v38, %v12383_v51  ;;  %7716 = vst [vmem:[%s12466_s18 + $0x180] sm:$0xff] %v7457_v34  ;;  %7997 = vmatpush1.bf16.msra.mxu0 %v7457_v34  ;;  %v5587_v16 = vpack.c.bf16 %v5127_v50, %v5123_v35  ;;  %v4110_v32 = vshra.s32 %v2392_v37, %v12383_v51 }
 0x163   : > { %v4618_v47 = vand.u32 15, %v4106_v25  ;;  %v2380_v53 = vrot.slane %v1133_v18, %v12393_v59  ;;  %v4112_v54 = vshra.s32 %v2400_v41, %v12383_v51  ;;  %v4620_v21 = vand.u32 15, %v4108_v7 }
 0x164   : > { %v4109_v42 = vshra.s32 %v2388_v43, %v12383_v51  ;;  %v4617_v61 = vand.u32 15, %v4105_v46  ;;  %v7459_v2 = vmul.bf16 %v12942_v36, %v5587_v16  ;;  %v4622_v13 = vand.u32 15, %v4110_v32 }
 0x165   : > { %v5130_v3 = vcvt.s32.f32 %v4618_v47  ;;  %v2396_v12 = vrot.slane %v1135_v30, %v12393_v59  ;;  %v4624_v0 = vand.u32 15, %v4112_v54  ;;  %v5132_v63 = vcvt.s32.f32 %v4620_v21 }
 0x166   : > { %v4621_v1 = vand.u32 15, %v4109_v42  ;;  %v5129_v5 = vcvt.s32.f32 %v4617_v61  ;;  %7718 = vst [vmem:[%s12466_s18 + $0x190] sm:$0xff] %v7459_v2  ;;  %8169 = vmatpush1.bf16.msra.mxu1 %v7459_v2  ;;  %v5134_v45 = vcvt.s32.f32 %v4622_v13  ;;  %v4107_v6 = vshra.s32 %v2380_v53, %v12383_v51 }
 0x167   : > { %v4111_v11 = vshra.s32 %v2396_v12, %v12383_v51  ;;  %v1100_v9 = vrot.slane %v11645_v49, %v12385_v52  ;;  %v5136_v15 = vcvt.s32.f32 %v4624_v0  ;;  %v5976_v17 = vpack.i.b16 %v5944_v40, %v5944_v40 }
 0x168   : > { %v5133_v10 = vcvt.s32.f32 %v4621_v1  ;;  %v12980_v56 = vcombine.high %v12964_v62, %v12969_v26  ;;  %v5590_v19 = vpack.c.bf16 %v5134_v45, %v5130_v3  ;;  %v4619_v44 = vand.u32 15, %v4107_v6 }
 0x169   : > { %v4623_v14 = vand.u32 15, %v4111_v11  ;;  %v1103_v31 = vcombine.low %v12899_v39, %v1100_v9  ;;  %v5592_v18 = vpack.c.bf16 %v5136_v15, %v5132_v63  ;;  %v1104_v23 = vcombine.high %v12899_v39, %v1100_v9 }
 0x16a   : > { %v5589_v8 = vpack.c.bf16 %v5133_v10, %v5129_v5  ;;  %v6120_v24 = vrot.slane %v5976_v17, %v12391_v58  ;;  %8004 = vmatprep.mubr.bf16.mxu0 %v12980_v56  ;;  %v7462_v22 = vmul.bf16 %v12919_v55, %v5590_v19  ;;  %v5131_v40 = vcvt.s32.f32 %v4619_v44  ;;  %8176 = vmatprep.mubr.bf16.mxu1 %v12980_v56 }
 0x16b   : > { %v5135_v27 = vcvt.s32.f32 %v4623_v14  ;;  %v1118_v28 = vrot.slane %v1103_v31, %v12385_v52  ;;  %v7464_v29 = vmul.bf16 %v12922_v48, %v5592_v18  ;;  %v1132_v39 = vrot.slane %v1104_v23, %v12385_v52 }
 0x16c   : > { %v7461_v30 = vmul.bf16 %v12933_v20, %v5589_v8  ;;  %v6717_v33 = vpack.i.b16 %v6120_v24, %v6120_v24  ;;  %7721 = vst [vmem:[%s12466_s18 + $0x1a8] sm:$0xff] %v7462_v22  ;;  %7998 = vmatprep.subr.bf16.mxu0 %v7462_v22  ;;  %v6128_v38 = vrot.slane %v5976_v17, %v12395_v60 }
 0x16d   : > { %v5591_v35 = vpack.c.bf16 %v5135_v27, %v5131_v40  ;;  %v2408_v4 = vrot.slane %v1118_v28, %v12391_v58  ;;  %v2416_v55 = vrot.slane %v1118_v28, %v12395_v60  ;;  %7723 = vst [vmem:[%s12466_s18 + $0x1b8] sm:$0xff] %v7464_v29  ;;  %8170 = vmatprep.subr.bf16.mxu1 %v7464_v29 }
 0x16e   : > { %7720 = vst [vmem:[%s12466_s18 + $0x1a0] sm:$0xff] %v7461_v30  ;;  %7999 = vmatpush1.bf16.msra.mxu0 %v7461_v30  ;;  %v2424_v48 = vrot.slane %v1132_v39, %v12391_v58  ;;  %v13000_v20 = vrot.slane %v6717_v33, %v12389_v57  ;;  %v2432_v34 = vrot.slane %v1132_v39, %v12395_v60 }
 0x16f   : > { %v7463_v50 = vmul.bf16 %v12942_v36, %v5591_v35  ;;  %v4114_v37 = vshra.s32 %v2408_v4, %v12383_v51  ;;  %v4116_v25 = vshra.s32 %v2416_v55, %v12383_v51  ;;  %v6731_v41 = vpack.i.b16 %v6128_v38, %v6128_v38 }
 0x170   : > { %v4118_v7 = vshra.s32 %v2424_v48, %v12383_v51  ;;  %v4120_v43 = vshra.s32 %v2432_v34, %v12383_v51  ;;  %v2404_v46 = vrot.slane %v1118_v28, %v12389_v57  ;;  %v2420_v16 = vrot.slane %v1132_v39, %v12389_v57 }
 0x171   : > { %7722 = vst [vmem:[%s12466_s18 + $0x1b0] sm:$0xff] %v7463_v50  ;;  %8171 = vmatpush1.bf16.msra.mxu1 %v7463_v50  ;;  %v4626_v32 = vand.u32 15, %v4114_v37  ;;  %v4628_v47 = vand.u32 15, %v4116_v25  ;;  %v13012_v53 = vrot.slane %v6731_v41, %v12389_v57  ;;  %v6116_v36 = vrot.slane %v5976_v17, %v12389_v57 }
 0x172   : > { %v4630_v49 = vand.u32 15, %v4118_v7  ;;  %v4632_v54 = vand.u32 15, %v4120_v43  ;;  %v4113_v21 = vshra.s32 %v2404_v46, %v12383_v51  ;;  %v4117_v42 = vshra.s32 %v2420_v16, %v12383_v51  ;;  %v11646_v43 = vld [vmem:[%s12364_s6 + $0x80] ss:$8 sps:$4 sm:$0xff]  }
 0x173   : > { %v5138_v61 = vcvt.s32.f32 %v4626_v32  ;;  %v5140_v2 = vcvt.s32.f32 %v4628_v47  ;;  %v6710_v13 = vpack.i.b16 %v6116_v36, %v6116_v36  ;;  %v2412_v3 = vrot.slane %v1118_v28, %v12393_v59  ;;  %v11648_v36 = vld [vmem:[%s12364_s6 + $0x90] ss:$8 sps:$4 sm:$0xff]  }
 0x174   : > { %v5142_v12 = vcvt.s32.f32 %v4630_v49  ;;  %v5144_v0 = vcvt.s32.f32 %v4632_v54  ;;  %v4625_v63 = vand.u32 15, %v4113_v21  ;;  %v4629_v1 = vand.u32 15, %v4117_v42 }
 0x175   : > { %v13019_v5 = vrot.slane %v6710_v13, %v12389_v57  ;;  %v2428_v45 = vrot.slane %v1132_v39, %v12393_v59  ;;  %v4115_v6 = vshra.s32 %v2412_v3, %v12383_v51  ;;  %v6124_v11 = vrot.slane %v5976_v17, %v12393_v59 }
 0x176   : > { %v5594_v9 = vpack.c.bf16 %v5142_v12, %v5138_v61  ;;  %v5596_v15 = vpack.c.bf16 %v5144_v0, %v5140_v2  ;;  %v5137_v10 = vcvt.s32.f32 %v4625_v63  ;;  %v5141_v19 = vcvt.s32.f32 %v4629_v1  ;;  %v13052_v61 = vld.sshfl [vmem:[%s12366_s7 + $0x10] sm:$0xff pattern:$0x75316420]  ;;  %v13056_v0 = vld.sshfl [vmem:[%s12366_s7 + $0x18] sm:$0xff pattern:$0x75316420] }
 0x177   : > { %v4119_v44 = vshra.s32 %v2428_v45, %v12383_v51  ;;  %v4627_v14 = vand.u32 15, %v4115_v6  ;;  %v6724_v31 = vpack.i.b16 %v6124_v11, %v6124_v11  ;;  %v1134_v18 = vcombine.high %v1118_v28, %v1118_v28 }
 0x178   : > { %v7466_v8 = vmul.bf16 %v13000_v20, %v5594_v9  ;;  %v7468_v23 = vmul.bf16 %v13012_v53, %v5596_v15  ;;  %v5593_v24 = vpack.c.bf16 %v5141_v19, %v5137_v10  ;;  %v1136_v22 = vcombine.high %v1132_v39, %v1132_v39  ;;  %v11650_v19 = vld [vmem:[%s12364_s6 + $0x84] ss:$8 sps:$4 sm:$0xff]  }
 0x179   : > { %v4631_v40 = vand.u32 15, %v4119_v44  ;;  %v5139_v17 = vcvt.s32.f32 %v4627_v14  ;;  %v13028_v27 = vrot.slane %v6724_v31, %v12389_v57  ;;  %v2440_v29 = vrot.slane %v1134_v18, %v12391_v58 }
 0x17a   : > { %7725 = vst [vmem:[%s12466_s18 + $0x1c8] sm:$0xff] %v7466_v8  ;;  %8000 = vmatprep.subr.bf16.mxu0 %v7466_v8  ;;  %7727 = vst [vmem:[%s12466_s18 + $0x1d8] sm:$0xff] %v7468_v23  ;;  %8172 = vmatprep.subr.bf16.mxu1 %v7468_v23  ;;  %v7465_v28 = vmul.bf16 %v13019_v5, %v5593_v24  ;;  %v2456_v30 = vrot.slane %v1136_v22, %v12391_v58 }
 0x17b   : > { %v2448_v33 = vrot.slane %v1134_v18, %v12395_v60  ;;  %v5143_v39 = vcvt.s32.f32 %v4631_v40  ;;  %v4122_v35 = vshra.s32 %v2440_v29, %v12383_v51  ;;  %v2464_v4 = vrot.slane %v1136_v22, %v12395_v60 }
 0x17c   : > { %v2436_v55 = vrot.slane %v1134_v18, %v12389_v57  ;;  %7724 = vst [vmem:[%s12466_s18 + $0x1c0] sm:$0xff] %v7465_v28  ;;  %8001 = vmatpush1.bf16.msra.mxu0 %v7465_v28  ;;  %v4126_v38 = vshra.s32 %v2456_v30, %v12383_v51  ;;  %v2452_v34 = vrot.slane %v1136_v22, %v12389_v57 }
 0x17d   : > { %v4124_v48 = vshra.s32 %v2448_v33, %v12383_v51  ;;  %v2444_v50 = vrot.slane %v1134_v18, %v12393_v59  ;;  %v5595_v37 = vpack.c.bf16 %v5143_v39, %v5139_v17  ;;  %v4634_v25 = vand.u32 15, %v4122_v35  ;;  %v11651_v18 = vld [vmem:[%s12364_s6 + $0x94] ss:$8 sps:$4 sm:$0xff]  }
 0x17e   : > { %v4128_v41 = vshra.s32 %v2464_v4, %v12383_v51  ;;  %v4121_v7 = vshra.s32 %v2436_v55, %v12383_v51  ;;  %v4638_v46 = vand.u32 15, %v4126_v38  ;;  %v4125_v32 = vshra.s32 %v2452_v34, %v12383_v51 }
 0x17f   : > { %v4636_v16 = vand.u32 15, %v4124_v48  ;;  %v2460_v47 = vrot.slane %v1136_v22, %v12393_v59  ;;  %v7467_v49 = vmul.bf16 %v13028_v27, %v5595_v37  ;;  %v5146_v54 = vcvt.s32.f32 %v4634_v25 }
 0x180   : > { %v4640_v21 = vand.u32 15, %v4128_v41  ;;  %v4633_v42 = vand.u32 15, %v4121_v7  ;;  %v5150_v2 = vcvt.s32.f32 %v4638_v46  ;;  %v4637_v3 = vand.u32 15, %v4125_v32 }
 0x181   : > { %v5148_v13 = vcvt.s32.f32 %v4636_v16  ;;  %v4123_v12 = vshra.s32 %v2444_v50, %v12383_v51  ;;  %7726 = vst [vmem:[%s12466_s18 + $0x1d0] sm:$0xff] %v7467_v49  ;;  %8173 = vmatpush1.bf16.msra.mxu1 %v7467_v49  ;;  %v4127_v45 = vshra.s32 %v2460_v47, %v12383_v51  ;;  %v1147_v6 = vrot.slane %v11646_v43, %v12385_v52 }
 0x182   : > { %v5152_v63 = vcvt.s32.f32 %v4640_v21  ;;  %v5145_v1 = vcvt.s32.f32 %v4633_v42  ;;  %v5598_v11 = vpack.c.bf16 %v5150_v2, %v5146_v54  ;;  %v5149_v9 = vcvt.s32.f32 %v4637_v3 }
 0x183   : > { %v4635_v15 = vand.u32 15, %v4123_v12  ;;  %v1161_v10 = vrot.slane %v11648_v36, %v12385_v52  ;;  %v4639_v14 = vand.u32 15, %v4127_v45  ;;  %v5855_v31 = vcombine.low %v13052_v61, %v13056_v0 }
 0x184   : > { %v5600_v44 = vpack.c.bf16 %v5152_v63, %v5148_v13  ;;  %v7470_v8 = vmul.bf16 %v13000_v20, %v5598_v11  ;;  %v5597_v23 = vpack.c.bf16 %v5149_v9, %v5145_v1  ;;  %v13076_v20 = vcombine.low %v12964_v62, %v12969_v26 }
 0x185   : > { %v5147_v24 = vcvt.s32.f32 %v4635_v15  ;;  %v1169_v22 = vcombine.low %v1147_v6, %v1161_v10  ;;  %v5151_v17 = vcvt.s32.f32 %v4639_v14  ;;  %v1170_v29 = vcombine.high %v1147_v6, %v1161_v10 }
 0x186   : > { %v7472_v40 = vmul.bf16 %v13012_v53, %v5600_v44  ;;  %v13069_v28 = vrot.slane %v5855_v31, %v12385_v52  ;;  %7729 = vst [vmem:[%s12466_s18 + $0x1e8] sm:$0xff] %v7470_v8  ;;  %8002 = vmatprep.subr.bf16.mxu0 %v7470_v8  ;;  %v7469_v30 = vmul.bf16 %v13019_v5, %v5597_v23 }
 0x187   : > { %v1179_v33 = vrot.slane %v1169_v22, %v12385_v52  ;;  %v13079_v39 = vrot.slane %v11650_v19, %v12385_v52  ;;  %v5599_v53 = vpack.c.bf16 %v5151_v17, %v5147_v24  ;;  %v1193_v35 = vrot.slane %v1170_v29, %v12385_v52 }
 0x188   : > { %7731 = vst [vmem:[%s12466_s18 + $0x1f8] sm:$0xff] %v7472_v40  ;;  %8174 = vmatprep.subr.bf16.mxu1 %v7472_v40  ;;  %v11081_v4 = vpack.i.b16 %v13069_v28, %v13069_v28  ;;  %v13086_v5 = vrot.slane %v11651_v18, %v12385_v52  ;;  %7728 = vst [vmem:[%s12466_s18 + $0x1e0] sm:$0xff] %v7469_v30  ;;  %8003 = vmatpush1.bf16.msra.mxu0 %v7469_v30 }
 0x189   : > { %v2472_v62 = vrot.slane %v1179_v33, %v12391_v58  ;;  %v2480_v26 = vrot.slane %v1179_v33, %v12395_v60  ;;  %v2468_v55 = vrot.slane %v1179_v33, %v12389_v57  ;;  %v2476_v38 = vrot.slane %v1179_v33, %v12393_v59 }
 0x18a   : > { %v7471_v48 = vmul.bf16 %v13028_v27, %v5599_v53  ;;  %v2488_v34 = vrot.slane %v1193_v35, %v12391_v58  ;;  %v6136_v50 = vrot.slane %v11081_v4, %v12391_v58  ;;  %v2496_v37 = vrot.slane %v1193_v35, %v12395_v60 }
 0x18b   : > { %v4130_v25 = vshra.s32 %v2472_v62, %v12383_v51  ;;  %v4132_v41 = vshra.s32 %v2480_v26, %v12383_v51  ;;  %v6144_v7 = vrot.slane %v11081_v4, %v12395_v60  ;;  %v2484_v43 = vrot.slane %v1193_v35, %v12389_v57  ;;  %8005 = vmatmul.mubr.bf16.vlgmr.msra.gmra.mrb[0].mxu0 %v13076_v20 }
 0x18c   : > { %7730 = vst [vmem:[%s12466_s18 + $0x1f0] sm:$0xff] %v7471_v48  ;;  %8175 = vmatpush1.bf16.msra.mxu1 %v7471_v48  ;;  %v4134_v46 = vshra.s32 %v2488_v34, %v12383_v51  ;;  %v6745_v16 = vpack.i.b16 %v6136_v50, %v6136_v50  ;;  %v4136_v27 = vshra.s32 %v2496_v37, %v12383_v51  ;;  %v5946_v48 = vunpack.i.h.s16 %v13069_v28 }
 0x18d   : > { %v4642_v32 = vand.u32 15, %v4130_v25  ;;  %v4644_v47 = vand.u32 15, %v4132_v41  ;;  %v6759_v36 = vpack.i.b16 %v6144_v7, %v6144_v7  ;;  %v4129_v49 = vshra.s32 %v2468_v55, %v12383_v51 }
 0x18e   : > { %v4646_v54 = vand.u32 15, %v4134_v46  ;;  %v13107_v21 = vrot.slane %v6745_v16, %v12389_v57  ;;  %v4648_v42 = vand.u32 15, %v4136_v27  ;;  %v4133_v2 = vshra.s32 %v2484_v43, %v12383_v51 }
 0x18f   : > { %v5154_v13 = vcvt.s32.f32 %v4642_v32  ;;  %v5156_v3 = vcvt.s32.f32 %v4644_v47  ;;  %v13111_v12 = vrot.slane %v6759_v36, %v12389_v57  ;;  %v4641_v63 = vand.u32 15, %v4129_v49  ;;  %8177 = vmatmul.mubr.bf16.vlgmr.msra.gmra.mrb[0].mxu1 %v13076_v20 }
 0x190   : > { %v5158_v1 = vcvt.s32.f32 %v4646_v54  ;;  %v5160_v45 = vcvt.s32.f32 %v4648_v42  ;;  %v4645_v6 = vand.u32 15, %v4133_v2  ;;  %v6132_v11 = vrot.slane %v11081_v4, %v12389_v57 }
 0x191   : > { %v5153_v9 = vcvt.s32.f32 %v4641_v63  ;;  %v2492_v15 = vrot.slane %v1193_v35, %v12393_v59  ;;  %v4131_v10 = vshra.s32 %v2476_v38, %v12383_v51  ;;  %v6140_v19 = vrot.slane %v11081_v4, %v12393_v59 }
 0x192   : > { %v5602_v44 = vpack.c.bf16 %v5158_v1, %v5154_v13  ;;  %v5604_v14 = vpack.c.bf16 %v5160_v45, %v5156_v3  ;;  %v5157_v31 = vcvt.s32.f32 %v4645_v6  ;;  %v6738_v18 = vpack.i.b16 %v6132_v11, %v6132_v11 }
 0x193   : > { %v4135_v8 = vshra.s32 %v2492_v15, %v12383_v51  ;;  %v4643_v23 = vand.u32 15, %v4131_v10  ;;  %v6752_v24 = vpack.i.b16 %v6140_v19, %v6140_v19  ;;  %v1201_v22 = vcombine.high %v1179_v33, %v1179_v33 }
 0x194   : > { %v7474_v40 = vmul.bf16 %v13107_v21, %v5602_v44  ;;  %v7476_v17 = vmul.bf16 %v13111_v12, %v5604_v14  ;;  %v5601_v29 = vpack.c.bf16 %v5157_v31, %v5153_v9  ;;  %v6743_v30 = vrot.slane %v6738_v18, %v12389_v57 }
 0x195   : > { %v4647_v53 = vand.u32 15, %v4135_v8  ;;  %v5155_v4 = vcvt.s32.f32 %v4643_v23  ;;  %v13123_v62 = vrot.slane %v6752_v24, %v12389_v57  ;;  %v1203_v26 = vcombine.high %v1193_v35, %v1193_v35 }
 0x196   : > { %7733 = vst [vmem:[%s12466_s18 + $0x208] sm:$0xff] %v7474_v40  ;;  %8015 = vmatprep.subr.bf16.mxu0 %v7474_v40  ;;  %7735 = vst [vmem:[%s12466_s18 + $0x218] sm:$0xff] %v7476_v17  ;;  %8187 = vmatprep.subr.bf16.mxu1 %v7476_v17  ;;  %v7473_v55 = vmul.bf16 %v6743_v30, %v5601_v29  ;;  %v2504_v33 = vrot.slane %v1201_v22, %v12391_v58 }
 0x197   : > { %v2512_v38 = vrot.slane %v1201_v22, %v12395_v60  ;;  %v5159_v34 = vcvt.s32.f32 %v4647_v53  ;;  %v2520_v50 = vrot.slane %v1203_v26, %v12391_v58  ;;  %v2528_v37 = vrot.slane %v1203_v26, %v12395_v60 }
 0x198   : > { %v2500_v25 = vrot.slane %v1201_v22, %v12389_v57  ;;  %7732 = vst [vmem:[%s12466_s18 + $0x200] sm:$0xff] %v7473_v55  ;;  %8016 = vmatpush1.bf16.msra.mxu0 %v7473_v55  ;;  %v4138_v35 = vshra.s32 %v2504_v33, %v12383_v51  ;;  %v2516_v7 = vrot.slane %v1203_v26, %v12389_v57 }
 0x199   : > { %v4140_v41 = vshra.s32 %v2512_v38, %v12383_v51  ;;  %v2508_v43 = vrot.slane %v1201_v22, %v12393_v59  ;;  %v5603_v46 = vpack.c.bf16 %v5159_v34, %v5155_v4  ;;  %v4142_v16 = vshra.s32 %v2520_v50, %v12383_v51 }
 0x19a   : > { %v4144_v27 = vshra.s32 %v2528_v37, %v12383_v51  ;;  %v4137_v32 = vshra.s32 %v2500_v25, %v12383_v51  ;;  %v4650_v47 = vand.u32 15, %v4138_v35  ;;  %v4141_v49 = vshra.s32 %v2516_v7, %v12383_v51 }
 0x19b   : > { %v4652_v36 = vand.u32 15, %v4140_v41  ;;  %v2524_v54 = vrot.slane %v1203_v26, %v12393_v59  ;;  %v7475_v42 = vmul.bf16 %v13123_v62, %v5603_v46  ;;  %v4654_v2 = vand.u32 15, %v4142_v16 }
 0x19c   : > { %v4656_v13 = vand.u32 15, %v4144_v27  ;;  %v4649_v3 = vand.u32 15, %v4137_v32  ;;  %v5162_v63 = vcvt.s32.f32 %v4650_v47  ;;  %v4653_v45 = vand.u32 15, %v4141_v49 }
 0x19d   : > { %v5164_v1 = vcvt.s32.f32 %v4652_v36  ;;  %v4139_v6 = vshra.s32 %v2508_v43, %v12383_v51  ;;  %7734 = vst [vmem:[%s12466_s18 + $0x210] sm:$0xff] %v7475_v42  ;;  %8188 = vmatpush1.bf16.msra.mxu1 %v7475_v42  ;;  %v5166_v11 = vcvt.s32.f32 %v4654_v2  ;;  %v4143_v10 = vshra.s32 %v2524_v54, %v12383_v51 }
 0x19e   : > { %v5168_v9 = vcvt.s32.f32 %v4656_v13  ;;  %v5161_v15 = vcvt.s32.f32 %v4649_v3  ;;  %v5165_v19 = vcvt.s32.f32 %v4653_v45  ;;  %v1171_v14 = vcombine.low %v13079_v39, %v13086_v5 }
 0x19f   : > { %v4651_v44 = vand.u32 15, %v4139_v6  ;;  %v1172_v31 = vcombine.high %v13079_v39, %v13086_v5  ;;  %v5606_v18 = vpack.c.bf16 %v5166_v11, %v5162_v63  ;;  %v4655_v23 = vand.u32 15, %v4143_v10 }
 0x1a0   : > { %v5608_v8 = vpack.c.bf16 %v5168_v9, %v5164_v1  ;;  %v5978_v24 = vpack.i.b16 %v5946_v48, %v5946_v48  ;;  %v5605_v22 = vpack.c.bf16 %v5165_v19, %v5161_v15  ;;  %v1186_v17 = vrot.slane %v1171_v14, %v12385_v52  ;;  %v11652_v15 = vld [vmem:[%s12364_s6 + $0xa0] ss:$8 sps:$4 sm:$0xff]  }
 0x1a1   : > { %v5163_v40 = vcvt.s32.f32 %v4651_v44  ;;  %v1200_v29 = vrot.slane %v1172_v31, %v12385_v52  ;;  %v7478_v53 = vmul.bf16 %v13107_v21, %v5606_v18  ;;  %v5167_v26 = vcvt.s32.f32 %v4655_v23 }
 0x1a2   : > { %v7480_v4 = vmul.bf16 %v13111_v12, %v5608_v8  ;;  %v6152_v39 = vrot.slane %v5978_v24, %v12391_v58  ;;  %v7477_v5 = vmul.bf16 %v6743_v30, %v5605_v22  ;;  %v2536_v55 = vrot.slane %v1186_v17, %v12391_v58 }
 0x1a3   : > { %v2552_v33 = vrot.slane %v1200_v29, %v12391_v58  ;;  %v2544_v38 = vrot.slane %v1186_v17, %v12395_v60  ;;  %7737 = vst [vmem:[%s12466_s18 + $0x228] sm:$0xff] %v7478_v53  ;;  %8017 = vmatprep.subr.bf16.mxu0 %v7478_v53  ;;  %v5607_v48 = vpack.c.bf16 %v5167_v26, %v5163_v40 }
 0x1a4   : > { %7739 = vst [vmem:[%s12466_s18 + $0x238] sm:$0xff] %v7480_v4  ;;  %8189 = vmatprep.subr.bf16.mxu1 %v7480_v4  ;;  %v6773_v34 = vpack.i.b16 %v6152_v39, %v6152_v39  ;;  %v2560_v21 = vrot.slane %v1200_v29, %v12395_v60  ;;  %7736 = vst [vmem:[%s12466_s18 + $0x220] sm:$0xff] %v7477_v5  ;;  %8018 = vmatpush1.bf16.msra.mxu0 %v7477_v5 }
 0x1a5   : > { %v4146_v12 = vshra.s32 %v2536_v55, %v12383_v51  ;;  %v4150_v30 = vshra.s32 %v2552_v33, %v12383_v51  ;;  %v4148_v50 = vshra.s32 %v2544_v38, %v12383_v51  ;;  %v6160_v37 = vrot.slane %v5978_v24, %v12395_v60 }
 0x1a6   : > { %v7479_v25 = vmul.bf16 %v13123_v62, %v5607_v48  ;;  %v13169_v35 = vrot.slane %v6773_v34, %v12389_v57  ;;  %v4152_v41 = vshra.s32 %v2560_v21, %v12383_v51  ;;  %v2532_v7 = vrot.slane %v1186_v17, %v12389_v57 }
 0x1a7   : > { %v4658_v43 = vand.u32 15, %v4146_v12  ;;  %v4662_v46 = vand.u32 15, %v4150_v30  ;;  %v4660_v16 = vand.u32 15, %v4148_v50  ;;  %v6787_v27 = vpack.i.b16 %v6160_v37, %v6160_v37 }
 0x1a8   : > { %7738 = vst [vmem:[%s12466_s18 + $0x230] sm:$0xff] %v7479_v25  ;;  %8190 = vmatpush1.bf16.msra.mxu1 %v7479_v25  ;;  %v4664_v32 = vand.u32 15, %v4152_v41  ;;  %v2548_v47 = vrot.slane %v1200_v29, %v12389_v57  ;;  %v4145_v36 = vshra.s32 %v2532_v7, %v12383_v51  ;;  %v6148_v62 = vrot.slane %v5978_v24, %v12389_v57 }
 0x1a9   : > { %v5170_v49 = vcvt.s32.f32 %v4658_v43  ;;  %v5174_v54 = vcvt.s32.f32 %v4662_v46  ;;  %v5172_v42 = vcvt.s32.f32 %v4660_v16  ;;  %v13178_v2 = vrot.slane %v6787_v27, %v12389_v57 }
 0x1aa   : > { %v5176_v13 = vcvt.s32.f32 %v4664_v32  ;;  %v4149_v3 = vshra.s32 %v2548_v47, %v12383_v51  ;;  %v4657_v63 = vand.u32 15, %v4145_v36  ;;  %v6766_v1 = vpack.i.b16 %v6148_v62, %v6148_v62  ;;  %v11654_v47 = vld [vmem:[%s12364_s6 + $0xb0] ss:$8 sps:$4 sm:$0xff]  }
 0x1ab   : > { %v5610_v45 = vpack.c.bf16 %v5174_v54, %v5170_v49  ;;  %v2540_v6 = vrot.slane %v1186_v17, %v12393_v59  ;;  %v2556_v11 = vrot.slane %v1200_v29, %v12393_v59  ;;  %v6156_v9 = vrot.slane %v5978_v24, %v12393_v59 }
 0x1ac   : > { %v5612_v10 = vpack.c.bf16 %v5176_v13, %v5172_v42  ;;  %v4661_v19 = vand.u32 15, %v4149_v3  ;;  %v5169_v44 = vcvt.s32.f32 %v4657_v63  ;;  %v13186_v14 = vrot.slane %v6766_v1, %v12389_v57  ;;  %v11656_v42 = vld [vmem:[%s12364_s6 + $0xa4] ss:$8 sps:$4 sm:$0xff]  }
 0x1ad   : > { %v7482_v31 = vmul.bf16 %v13169_v35, %v5610_v45  ;;  %v4147_v18 = vshra.s32 %v2540_v6, %v12383_v51  ;;  %v4151_v8 = vshra.s32 %v2556_v11, %v12383_v51  ;;  %v6780_v23 = vpack.i.b16 %v6156_v9, %v6156_v9 }
 0x1ae   : > { %v7484_v22 = vmul.bf16 %v13178_v2, %v5612_v10  ;;  %v5173_v40 = vcvt.s32.f32 %v4661_v19  ;;  %v1202_v53 = vcombine.high %v1186_v17, %v1186_v17  ;;  %v1204_v24 = vcombine.high %v1200_v29, %v1200_v29 }
 0x1af   : > { %7741 = vst [vmem:[%s12466_s18 + $0x248] sm:$0xff] %v7482_v31  ;;  %8019 = vmatprep.subr.bf16.mxu0 %v7482_v31  ;;  %v4659_v4 = vand.u32 15, %v4147_v18  ;;  %v4663_v26 = vand.u32 15, %v4151_v8  ;;  %v13194_v39 = vrot.slane %v6780_v23, %v12389_v57  ;;  %v13197_v5 = vrot.slane %v11652_v15, %v12385_v52  ;;  %v11657_v31 = vld [vmem:[%s12364_s6 + $0xb4] ss:$8 sps:$4 sm:$0xff]  }
 0x1b0   : > { %7743 = vst [vmem:[%s12466_s18 + $0x258] sm:$0xff] %v7484_v22  ;;  %8191 = vmatprep.subr.bf16.mxu1 %v7484_v22  ;;  %v5609_v55 = vpack.c.bf16 %v5173_v40, %v5169_v44  ;;  %v2568_v33 = vrot.slane %v1202_v53, %v12391_v58  ;;  %v2584_v38 = vrot.slane %v1204_v24, %v12391_v58  ;;  %v11658_v40 = vld [vmem:[%s12364_s6 + $0xc0] ss:$8 sps:$4 sm:$0xff]  }
 0x1b1   : > { %v2576_v17 = vrot.slane %v1202_v53, %v12395_v60  ;;  %v5171_v29 = vcvt.s32.f32 %v4659_v4  ;;  %v5175_v48 = vcvt.s32.f32 %v4663_v26  ;;  %v2592_v34 = vrot.slane %v1204_v24, %v12395_v60 }
 0x1b2   : > { %v2564_v21 = vrot.slane %v1202_v53, %v12389_v57  ;;  %v7481_v12 = vmul.bf16 %v13186_v14, %v5609_v55  ;;  %v4154_v30 = vshra.s32 %v2568_v33, %v12383_v51  ;;  %v4158_v50 = vshra.s32 %v2584_v38, %v12383_v51 }
 0x1b3   : > { %v4156_v37 = vshra.s32 %v2576_v17, %v12383_v51  ;;  %v5611_v25 = vpack.c.bf16 %v5175_v48, %v5171_v29  ;;  %v4160_v41 = vshra.s32 %v2592_v34, %v12383_v51  ;;  %v2580_v7 = vrot.slane %v1204_v24, %v12389_v57 }
 0x1b4   : > { %v4153_v43 = vshra.s32 %v2564_v21, %v12383_v51  ;;  %7740 = vst [vmem:[%s12466_s18 + $0x240] sm:$0xff] %v7481_v12  ;;  %8020 = vmatpush1.bf16.msra.mxu0 %v7481_v12  ;;  %v4666_v46 = vand.u32 15, %v4154_v30  ;;  %v4670_v16 = vand.u32 15, %v4158_v50  ;;  %v2572_v32 = vrot.slane %v1202_v53, %v12393_v59 }
 0x1b5   : > { %v4668_v27 = vand.u32 15, %v4156_v37  ;;  %v7483_v36 = vmul.bf16 %v13194_v39, %v5611_v25  ;;  %v4672_v62 = vand.u32 15, %v4160_v41  ;;  %v4157_v49 = vshra.s32 %v2580_v7, %v12383_v51 }
 0x1b6   : > { %v4665_v54 = vand.u32 15, %v4153_v43  ;;  %v5178_v13 = vcvt.s32.f32 %v4666_v46  ;;  %v5182_v3 = vcvt.s32.f32 %v4670_v16  ;;  %v2588_v1 = vrot.slane %v1204_v24, %v12393_v59 }
 0x1b7   : > { %v5180_v63 = vcvt.s32.f32 %v4668_v27  ;;  %7742 = vst [vmem:[%s12466_s18 + $0x250] sm:$0xff] %v7483_v36  ;;  %8192 = vmatpush1.bf16.msra.mxu1 %v7483_v36  ;;  %v5184_v45 = vcvt.s32.f32 %v4672_v62  ;;  %v4669_v6 = vand.u32 15, %v4157_v49  ;;  %v4155_v9 = vshra.s32 %v2572_v32, %v12383_v51 }
 0x1b8   : > { %v5177_v11 = vcvt.s32.f32 %v4665_v54  ;;  %v5614_v15 = vpack.c.bf16 %v5182_v3, %v5178_v13  ;;  %v4159_v10 = vshra.s32 %v2588_v1, %v12383_v51  ;;  %v1229_v19 = vrot.slane %v11654_v47, %v12385_v52 }
 0x1b9   : > { %v5856_v44 = vcombine.high %v13052_v61, %v13056_v0  ;;  %v5616_v18 = vpack.c.bf16 %v5184_v45, %v5180_v63  ;;  %v5181_v8 = vcvt.s32.f32 %v4669_v6  ;;  %v4667_v23 = vand.u32 15, %v4155_v9 }
 0x1ba   : > { %v13227_v22 = vrot.slane %v11656_v42, %v12385_v52  ;;  %v7486_v53 = vmul.bf16 %v13169_v35, %v5614_v15  ;;  %v4671_v24 = vand.u32 15, %v4159_v10  ;;  %v1237_v4 = vcombine.low %v13197_v5, %v1229_v19 }
 0x1bb   : > { %v1238_v26 = vcombine.high %v13197_v5, %v1229_v19  ;;  %v7488_v55 = vmul.bf16 %v13178_v2, %v5616_v18  ;;  %v5613_v33 = vpack.c.bf16 %v5181_v8, %v5177_v11  ;;  %v5179_v61 = vcvt.s32.f32 %v4667_v23 }
 0x1bc   : > { %v13235_v0 = vrot.slane %v5856_v44, %v12385_v52  ;;  %7745 = vst [vmem:[%s12466_s18 + $0x268] sm:$0xff] %v7486_v53  ;;  %8021 = vmatprep.subr.bf16.mxu0 %v7486_v53  ;;  %v5183_v38 = vcvt.s32.f32 %v4671_v24  ;;  %v1247_v17 = vrot.slane %v1237_v4, %v12385_v52  ;;  %v13243_v29 = vrot.slane %v11657_v31, %v12385_v52 }
 0x1bd   : > { %v13240_v35 = vrot.slane %v1238_v26, %v12385_v52  ;;  %7747 = vst [vmem:[%s12466_s18 + $0x278] sm:$0xff] %v7488_v55  ;;  %8193 = vmatprep.subr.bf16.mxu1 %v7488_v55  ;;  %v7485_v2 = vmul.bf16 %v13186_v14, %v5613_v33  ;;  %v13251_v34 = vrot.slane %v11658_v40, %v12385_v52 }
 0x1be   : > { %v11082_v5 = vpack.i.b16 %v13235_v0, %v13235_v0  ;;  %v5948_v48 = vunpack.i.h.s16 %v13235_v0  ;;  %v5615_v21 = vpack.c.bf16 %v5183_v38, %v5179_v61  ;;  %v2600_v12 = vrot.slane %v1247_v17, %v12391_v58 }
 0x1bf   : > { %v2616_v30 = vrot.slane %v13240_v35, %v12391_v58  ;;  %v2608_v50 = vrot.slane %v1247_v17, %v12395_v60  ;;  %7744 = vst [vmem:[%s12466_s18 + $0x260] sm:$0xff] %v7485_v2  ;;  %8022 = vmatpush1.bf16.msra.mxu0 %v7485_v2  ;;  %v2624_v37 = vrot.slane %v13240_v35, %v12395_v60 }
 0x1c0   : > { %v6168_v14 = vrot.slane %v11082_v5, %v12391_v58  ;;  %v6176_v25 = vrot.slane %v11082_v5, %v12395_v60  ;;  %v2596_v41 = vrot.slane %v1247_v17, %v12389_v57  ;;  %v7487_v7 = vmul.bf16 %v13194_v39, %v5615_v21 }
 0x1c1   : > { %v4162_v43 = vshra.s32 %v2600_v12, %v12383_v51  ;;  %v4166_v46 = vshra.s32 %v2616_v30, %v12383_v51  ;;  %v4164_v16 = vshra.s32 %v2608_v50, %v12383_v51  ;;  %v4168_v32 = vshra.s32 %v2624_v37, %v12383_v51 }
 0x1c2   : > { %v6801_v27 = vpack.i.b16 %v6168_v14, %v6168_v14  ;;  %v6815_v47 = vpack.i.b16 %v6176_v25, %v6176_v25  ;;  %v2612_v36 = vrot.slane %v13240_v35, %v12389_v57  ;;  %7746 = vst [vmem:[%s12466_s18 + $0x270] sm:$0xff] %v7487_v7  ;;  %8194 = vmatpush1.bf16.msra.mxu1 %v7487_v7 }
 0x1c3   : > { %v4674_v62 = vand.u32 15, %v4162_v43  ;;  %v4678_v49 = vand.u32 15, %v4166_v46  ;;  %v4676_v54 = vand.u32 15, %v4164_v16  ;;  %v4161_v39 = vshra.s32 %v2596_v41, %v12383_v51 }
 0x1c4   : > { %v13273_v42 = vrot.slane %v6801_v27, %v12389_v57  ;;  %v4680_v13 = vand.u32 15, %v4168_v32  ;;  %v13276_v3 = vrot.slane %v6815_v47, %v12389_v57  ;;  %v4165_v63 = vshra.s32 %v2612_v36, %v12383_v51 }
 0x1c5   : > { %v5186_v1 = vcvt.s32.f32 %v4674_v62  ;;  %v5190_v45 = vcvt.s32.f32 %v4678_v49  ;;  %v5188_v6 = vcvt.s32.f32 %v4676_v54  ;;  %v4673_v11 = vand.u32 15, %v4161_v39 }
 0x1c6   : > { %v5192_v9 = vcvt.s32.f32 %v4680_v13  ;;  %v4677_v15 = vand.u32 15, %v4165_v63  ;;  %v6164_v10 = vrot.slane %v11082_v5, %v12389_v57  ;;  %v2604_v19 = vrot.slane %v1247_v17, %v12393_v59 }
 0x1c7   : > { %v5618_v44 = vpack.c.bf16 %v5190_v45, %v5186_v1  ;;  %v5185_v31 = vcvt.s32.f32 %v4673_v11  ;;  %v2620_v18 = vrot.slane %v13240_v35, %v12393_v59  ;;  %v6172_v8 = vrot.slane %v11082_v5, %v12393_v59 }
 0x1c8   : > { %v5620_v23 = vpack.c.bf16 %v5192_v9, %v5188_v6  ;;  %v5189_v40 = vcvt.s32.f32 %v4677_v15  ;;  %v6794_v53 = vpack.i.b16 %v6164_v10, %v6164_v10  ;;  %v4163_v24 = vshra.s32 %v2604_v19, %v12383_v51 }
 0x1c9   : > { %v7490_v4 = vmul.bf16 %v13273_v42, %v5618_v44  ;;  %v4167_v26 = vshra.s32 %v2620_v18, %v12383_v51  ;;  %v6808_v55 = vpack.i.b16 %v6172_v8, %v6172_v8  ;;  %v1269_v33 = vcombine.high %v1247_v17, %v1247_v17 }
 0x1ca   : > { %v7492_v61 = vmul.bf16 %v13276_v3, %v5620_v23  ;;  %v5617_v38 = vpack.c.bf16 %v5189_v40, %v5185_v31  ;;  %v6799_v2 = vrot.slane %v6794_v53, %v12389_v57  ;;  %v4675_v21 = vand.u32 15, %v4163_v24 }
 0x1cb   : > { %7749 = vst [vmem:[%s12466_s18 + $0x288] sm:$0xff] %v7490_v4  ;;  %8023 = vmatprep.subr.bf16.mxu0 %v7490_v4  ;;  %v4679_v5 = vand.u32 15, %v4167_v26  ;;  %v13291_v12 = vrot.slane %v6808_v55, %v12389_v57  ;;  %v1271_v30 = vcombine.high %v13240_v35, %v13240_v35  ;;  %v2632_v50 = vrot.slane %v1269_v33, %v12391_v58 }
 0x1cc   : > { %7751 = vst [vmem:[%s12466_s18 + $0x298] sm:$0xff] %v7492_v61  ;;  %8195 = vmatprep.subr.bf16.mxu1 %v7492_v61  ;;  %v7489_v17 = vmul.bf16 %v6799_v2, %v5617_v38  ;;  %v5187_v14 = vcvt.s32.f32 %v4675_v21  ;;  %v2640_v37 = vrot.slane %v1269_v33, %v12395_v60  ;;  %v2628_v25 = vrot.slane %v1269_v33, %v12389_v57 }
 0x1cd   : > { %v5191_v41 = vcvt.s32.f32 %v4679_v5  ;;  %v2648_v7 = vrot.slane %v1271_v30, %v12391_v58  ;;  %v4170_v43 = vshra.s32 %v2632_v50, %v12383_v51  ;;  %v2656_v46 = vrot.slane %v1271_v30, %v12395_v60 }
 0x1ce   : > { %7748 = vst [vmem:[%s12466_s18 + $0x280] sm:$0xff] %v7489_v17  ;;  %8024 = vmatpush1.bf16.msra.mxu0 %v7489_v17  ;;  %v4172_v35 = vshra.s32 %v2640_v37, %v12383_v51  ;;  %v2644_v16 = vrot.slane %v1271_v30, %v12389_v57  ;;  %v4169_v27 = vshra.s32 %v2628_v25, %v12383_v51 }
 0x1cf   : > { %v2636_v32 = vrot.slane %v1269_v33, %v12393_v59  ;;  %v5619_v47 = vpack.c.bf16 %v5191_v41, %v5187_v14  ;;  %v4174_v36 = vshra.s32 %v2648_v7, %v12383_v51  ;;  %v4682_v62 = vand.u32 15, %v4170_v43 }
 0x1d0   : > { %v4176_v49 = vshra.s32 %v2656_v46, %v12383_v51  ;;  %v4684_v54 = vand.u32 15, %v4172_v35  ;;  %v4173_v39 = vshra.s32 %v2644_v16, %v12383_v51  ;;  %v4681_v13 = vand.u32 15, %v4169_v27 }
 0x1d1   : > { %v2652_v63 = vrot.slane %v1271_v30, %v12393_v59  ;;  %v7491_v1 = vmul.bf16 %v13291_v12, %v5619_v47  ;;  %v4686_v45 = vand.u32 15, %v4174_v36  ;;  %v5194_v6 = vcvt.s32.f32 %v4682_v62 }
 0x1d2   : > { %v4688_v11 = vand.u32 15, %v4176_v49  ;;  %v5196_v9 = vcvt.s32.f32 %v4684_v54  ;;  %v4685_v15 = vand.u32 15, %v4173_v39  ;;  %v5193_v10 = vcvt.s32.f32 %v4681_v13 }
 0x1d3   : > { %v4171_v19 = vshra.s32 %v2636_v32, %v12383_v51  ;;  %7750 = vst [vmem:[%s12466_s18 + $0x290] sm:$0xff] %v7491_v1  ;;  %8196 = vmatpush1.bf16.msra.mxu1 %v7491_v1  ;;  %v5198_v44 = vcvt.s32.f32 %v4686_v45  ;;  %v4175_v18 = vshra.s32 %v2652_v63, %v12383_v51  ;;  %v1239_v8 = vcombine.low %v13227_v22, %v13243_v29 }
 0x1d4   : > { %v5200_v31 = vcvt.s32.f32 %v4688_v11  ;;  %v5197_v23 = vcvt.s32.f32 %v4685_v15  ;;  %v1240_v53 = vcombine.high %v13227_v22, %v13243_v29  ;;  %v5980_v24 = vpack.i.b16 %v5948_v48, %v5948_v48 }
 0x1d5   : > { %v4683_v40 = vand.u32 15, %v4171_v19  ;;  %v5622_v4 = vpack.c.bf16 %v5198_v44, %v5194_v6  ;;  %v4687_v55 = vand.u32 15, %v4175_v18  ;;  %v1254_v33 = vrot.slane %v1239_v8, %v12385_v52  ;;  %v11660_v18 = vld [vmem:[%s12364_s6 + $0xd0] ss:$8 sps:$4 sm:$0xff]  }
 0x1d6   : > { %v5624_v26 = vpack.c.bf16 %v5200_v31, %v5196_v9  ;;  %v5621_v61 = vpack.c.bf16 %v5197_v23, %v5193_v10  ;;  %v1268_v21 = vrot.slane %v1240_v53, %v12385_v52  ;;  %v6184_v5 = vrot.slane %v5980_v24, %v12391_v58 }
 0x1d7   : > { %v5195_v38 = vcvt.s32.f32 %v4683_v40  ;;  %v7494_v22 = vmul.bf16 %v13273_v42, %v5622_v4  ;;  %v5199_v30 = vcvt.s32.f32 %v4687_v55  ;;  %v2664_v48 = vrot.slane %v1254_v33, %v12391_v58 }
 0x1d8   : > { %v7496_v29 = vmul.bf16 %v13276_v3, %v5624_v26  ;;  %v7493_v50 = vmul.bf16 %v6799_v2, %v5621_v61  ;;  %v2680_v17 = vrot.slane %v1268_v21, %v12391_v58  ;;  %v6829_v14 = vpack.i.b16 %v6184_v5, %v6184_v5 }
 0x1d9   : > { %v2672_v37 = vrot.slane %v1254_v33, %v12395_v60  ;;  %7753 = vst [vmem:[%s12466_s18 + $0x2a8] sm:$0xff] %v7494_v22  ;;  %8025 = vmatprep.subr.bf16.mxu0 %v7494_v22  ;;  %v5623_v25 = vpack.c.bf16 %v5199_v30, %v5195_v38  ;;  %v4178_v41 = vshra.s32 %v2664_v48, %v12383_v51 }
 0x1da   : > { %7755 = vst [vmem:[%s12466_s18 + $0x2b8] sm:$0xff] %v7496_v29  ;;  %8197 = vmatprep.subr.bf16.mxu1 %v7496_v29  ;;  %v2688_v42 = vrot.slane %v1268_v21, %v12395_v60  ;;  %7752 = vst [vmem:[%s12466_s18 + $0x2a0] sm:$0xff] %v7493_v50  ;;  %8026 = vmatpush1.bf16.msra.mxu0 %v7493_v50  ;;  %v4182_v3 = vshra.s32 %v2680_v17, %v12383_v51 }
 0x1db   : > { %v13337_v2 = vrot.slane %v6829_v14, %v12389_v57  ;;  %v4180_v7 = vshra.s32 %v2672_v37, %v12383_v51  ;;  %v6192_v43 = vrot.slane %v5980_v24, %v12395_v60  ;;  %v7495_v46 = vmul.bf16 %v13291_v12, %v5623_v25 }
 0x1dc   : > { %v4690_v35 = vand.u32 15, %v4178_v41  ;;  %v4184_v16 = vshra.s32 %v2688_v42, %v12383_v51  ;;  %v2660_v27 = vrot.slane %v1254_v33, %v12389_v57  ;;  %v4694_v32 = vand.u32 15, %v4182_v3 }
 0x1dd   : > { %v4692_v47 = vand.u32 15, %v4180_v7  ;;  %v6843_v36 = vpack.i.b16 %v6192_v43, %v6192_v43  ;;  %v2676_v62 = vrot.slane %v1268_v21, %v12389_v57  ;;  %7754 = vst [vmem:[%s12466_s18 + $0x2b0] sm:$0xff] %v7495_v46  ;;  %8198 = vmatpush1.bf16.msra.mxu1 %v7495_v46  ;;  %v6180_v13 = vrot.slane %v5980_v24, %v12389_v57 }
 0x1de   : > { %v5202_v49 = vcvt.s32.f32 %v4690_v35  ;;  %v4696_v54 = vand.u32 15, %v4184_v16  ;;  %v4177_v39 = vshra.s32 %v2660_v27, %v12383_v51  ;;  %v5206_v12 = vcvt.s32.f32 %v4694_v32 }
 0x1df   : > { %v5204_v63 = vcvt.s32.f32 %v4692_v47  ;;  %v13349_v1 = vrot.slane %v6843_v36, %v12389_v57  ;;  %v4181_v45 = vshra.s32 %v2676_v62, %v12383_v51  ;;  %v6822_v9 = vpack.i.b16 %v6180_v13, %v6180_v13 }
 0x1e0   : > { %v5208_v6 = vcvt.s32.f32 %v4696_v54  ;;  %v4689_v11 = vand.u32 15, %v4177_v39  ;;  %v2668_v15 = vrot.slane %v1254_v33, %v12393_v59  ;;  %v5626_v10 = vpack.c.bf16 %v5206_v12, %v5202_v49 }
 0x1e1   : > { %v4693_v19 = vand.u32 15, %v4181_v45  ;;  %v2684_v44 = vrot.slane %v1268_v21, %v12393_v59  ;;  %v6188_v31 = vrot.slane %v5980_v24, %v12393_v59  ;;  %v13357_v40 = vrot.slane %v6822_v9, %v12389_v57 }
 0x1e2   : > { %v5628_v8 = vpack.c.bf16 %v5208_v6, %v5204_v63  ;;  %v5201_v23 = vcvt.s32.f32 %v4689_v11  ;;  %v4179_v53 = vshra.s32 %v2668_v15, %v12383_v51  ;;  %v7498_v4 = vmul.bf16 %v13337_v2, %v5626_v10 }
 0x1e3   : > { %v5205_v26 = vcvt.s32.f32 %v4693_v19  ;;  %v4183_v55 = vshra.s32 %v2684_v44, %v12383_v51  ;;  %v6836_v61 = vpack.i.b16 %v6188_v31, %v6188_v31  ;;  %v1270_v22 = vcombine.high %v1254_v33, %v1254_v33 }
 0x1e4   : > { %v7500_v38 = vmul.bf16 %v13349_v1, %v5628_v8  ;;  %v4691_v5 = vand.u32 15, %v4179_v53  ;;  %v1272_v24 = vcombine.high %v1268_v21, %v1268_v21  ;;  %7757 = vst [vmem:[%s12466_s18 + $0x2c8] sm:$0xff] %v7498_v4  ;;  %8027 = vmatprep.subr.bf16.mxu0 %v7498_v4  ;;  %v1297_v50 = vrot.slane %v11660_v18, %v12385_v52 }
 0x1e5   : > { %v5625_v29 = vpack.c.bf16 %v5205_v26, %v5201_v23  ;;  %v4695_v30 = vand.u32 15, %v4183_v55  ;;  %v13365_v48 = vrot.slane %v6836_v61, %v12389_v57  ;;  %v2696_v14 = vrot.slane %v1270_v22, %v12391_v58 }
 0x1e6   : > { %7759 = vst [vmem:[%s12466_s18 + $0x2d8] sm:$0xff] %v7500_v38  ;;  %8199 = vmatprep.subr.bf16.mxu1 %v7500_v38  ;;  %v5203_v17 = vcvt.s32.f32 %v4691_v5  ;;  %v2712_v37 = vrot.slane %v1272_v24, %v12391_v58  ;;  %v2704_v33 = vrot.slane %v1270_v22, %v12395_v60  ;;  %v2720_v41 = vrot.slane %v1272_v24, %v12395_v60 }
 0x1e7   : > { %v7497_v21 = vmul.bf16 %v13357_v40, %v5625_v29  ;;  %v5207_v25 = vcvt.s32.f32 %v4695_v30  ;;  %v2692_v42 = vrot.slane %v1270_v22, %v12389_v57  ;;  %v4186_v3 = vshra.s32 %v2696_v14, %v12383_v51 }
 0x1e8   : > { %v4190_v7 = vshra.s32 %v2712_v37, %v12383_v51  ;;  %v4188_v43 = vshra.s32 %v2704_v33, %v12383_v51  ;;  %v2708_v46 = vrot.slane %v1272_v24, %v12389_v57  ;;  %v4192_v16 = vshra.s32 %v2720_v41, %v12383_v51 }
 0x1e9   : > { %7756 = vst [vmem:[%s12466_s18 + $0x2c0] sm:$0xff] %v7497_v21  ;;  %8028 = vmatpush1.bf16.msra.mxu0 %v7497_v21  ;;  %v5627_v35 = vpack.c.bf16 %v5207_v25, %v5203_v17  ;;  %v4185_v27 = vshra.s32 %v2692_v42, %v12383_v51  ;;  %v2700_v32 = vrot.slane %v1270_v22, %v12393_v59  ;;  %v4698_v47 = vand.u32 15, %v4186_v3 }
 0x1ea   : > { %v4702_v36 = vand.u32 15, %v4190_v7  ;;  %v4700_v62 = vand.u32 15, %v4188_v43  ;;  %v4189_v49 = vshra.s32 %v2708_v46, %v12383_v51  ;;  %v4704_v39 = vand.u32 15, %v4192_v16 }
 0x1eb   : > { %v7499_v54 = vmul.bf16 %v13365_v48, %v5627_v35  ;;  %v4697_v13 = vand.u32 15, %v4185_v27  ;;  %v2716_v12 = vrot.slane %v1272_v24, %v12393_v59  ;;  %v5210_v63 = vcvt.s32.f32 %v4698_v47 }
 0x1ec   : > { %v5214_v45 = vcvt.s32.f32 %v4702_v36  ;;  %v5212_v6 = vcvt.s32.f32 %v4700_v62  ;;  %v4701_v11 = vand.u32 15, %v4189_v49  ;;  %v5216_v9 = vcvt.s32.f32 %v4704_v39 }
 0x1ed   : > { %7758 = vst [vmem:[%s12466_s18 + $0x2d0] sm:$0xff] %v7499_v54  ;;  %8200 = vmatpush1.bf16.msra.mxu1 %v7499_v54  ;;  %v5209_v15 = vcvt.s32.f32 %v4697_v13  ;;  %v4187_v10 = vshra.s32 %v2700_v32, %v12383_v51  ;;  %v4191_v19 = vshra.s32 %v2716_v12, %v12383_v51  ;;  %v1305_v18 = vcombine.low %v13251_v34, %v1297_v50 }
 0x1ee   : > { %v5630_v44 = vpack.c.bf16 %v5214_v45, %v5210_v63  ;;  %v5213_v31 = vcvt.s32.f32 %v4701_v11  ;;  %v1306_v8 = vcombine.high %v13251_v34, %v1297_v50  ;;  %v5632_v23 = vpack.c.bf16 %v5216_v9, %v5212_v6 }
 0x1ef   : > { %v4699_v53 = vand.u32 15, %v4187_v10  ;;  %v4703_v4 = vand.u32 15, %v4191_v19  ;;  %v13393_v26 = vcombine.high %v13069_v28, %v13069_v28  ;;  %v1315_v38 = vrot.slane %v1305_v18, %v12385_v52 }
 0x1f0   : > { %v7502_v55 = vmul.bf16 %v13337_v2, %v5630_v44  ;;  %v5629_v61 = vpack.c.bf16 %v5213_v31, %v5209_v15  ;;  %v13398_v5 = vrot.slane %v1306_v8, %v12385_v52  ;;  %v7504_v22 = vmul.bf16 %v13349_v1, %v5632_v23 }
 0x1f1   : > { %v5211_v34 = vcvt.s32.f32 %v4699_v53  ;;  %v5215_v24 = vcvt.s32.f32 %v4703_v4  ;;  %v11083_v29 = vpack.i.b16 %v13393_v26, %v13393_v26  ;;  %v2728_v2 = vrot.slane %v1315_v38, %v12391_v58 }
 0x1f2   : > { %7761 = vst [vmem:[%s12466_s18 + $0x2e8] sm:$0xff] %v7502_v55  ;;  %8029 = vmatprep.subr.bf16.mxu0 %v7502_v55  ;;  %v7501_v28 = vmul.bf16 %v13357_v40, %v5629_v61  ;;  %v2744_v30 = vrot.slane %v13398_v5, %v12391_v58  ;;  %v2736_v50 = vrot.slane %v1315_v38, %v12395_v60  ;;  %7763 = vst [vmem:[%s12466_s18 + $0x2f8] sm:$0xff] %v7504_v22 }
 0x1f3   : > { %8201 = vmatprep.subr.bf16.mxu1 %v7504_v22  ;;  %v5631_v1 = vpack.c.bf16 %v5215_v24, %v5211_v34  ;;  %v6200_v17 = vrot.slane %v11083_v29, %v12391_v58  ;;  %v2752_v14 = vrot.slane %v13398_v5, %v12395_v60  ;;  %v6208_v37 = vrot.slane %v11083_v29, %v12395_v60 }
 0x1f4   : > { %7760 = vst [vmem:[%s12466_s18 + $0x2e0] sm:$0xff] %v7501_v28  ;;  %8030 = vmatpush1.bf16.msra.mxu0 %v7501_v28  ;;  %v4194_v40 = vshra.s32 %v2728_v2, %v12383_v51  ;;  %v4198_v33 = vshra.s32 %v2744_v30, %v12383_v51  ;;  %v4196_v21 = vshra.s32 %v2736_v50, %v12383_v51 }
 0x1f5   : > { %v2724_v25 = vrot.slane %v1315_v38, %v12389_v57  ;;  %v7503_v41 = vmul.bf16 %v13365_v48, %v5631_v1  ;;  %v6857_v42 = vpack.i.b16 %v6200_v17, %v6200_v17  ;;  %v4200_v3 = vshra.s32 %v2752_v14, %v12383_v51 }
 0x1f6   : > { %v6871_v7 = vpack.i.b16 %v6208_v37, %v6208_v37  ;;  %v4706_v43 = vand.u32 15, %v4194_v40  ;;  %v4710_v46 = vand.u32 15, %v4198_v33  ;;  %v4708_v35 = vand.u32 15, %v4196_v21 }
 0x1f7   : > { %v2740_v16 = vrot.slane %v13398_v5, %v12389_v57  ;;  %7762 = vst [vmem:[%s12466_s18 + $0x2f0] sm:$0xff] %v7503_v41  ;;  %8202 = vmatpush1.bf16.msra.mxu1 %v7503_v41  ;;  %v13425_v27 = vrot.slane %v6857_v42, %v12389_v57  ;;  %v4712_v32 = vand.u32 15, %v4200_v3  ;;  %v4193_v48 = vshra.s32 %v2724_v25, %v12383_v51  ;;  %v11662_v3 = vld [vmem:[%s12364_s6 + $0xc4] ss:$8 sps:$4 sm:$0xff]  }
 0x1f8   : > { %v13428_v47 = vrot.slane %v6871_v7, %v12389_v57  ;;  %v5218_v36 = vcvt.s32.f32 %v4706_v43  ;;  %v5222_v62 = vcvt.s32.f32 %v4710_v46  ;;  %v5220_v49 = vcvt.s32.f32 %v4708_v35 }
 0x1f9   : > { %v4197_v54 = vshra.s32 %v2740_v16, %v12383_v51  ;;  %v5224_v39 = vcvt.s32.f32 %v4712_v32  ;;  %v4705_v13 = vand.u32 15, %v4193_v48  ;;  %v6196_v12 = vrot.slane %v11083_v29, %v12389_v57  ;;  %v11663_v16 = vld [vmem:[%s12364_s6 + $0xd4] ss:$8 sps:$4 sm:$0xff]  }
 0x1fa   : > { %v2732_v63 = vrot.slane %v1315_v38, %v12393_v59  ;;  %v5634_v45 = vpack.c.bf16 %v5222_v62, %v5218_v36  ;;  %v2748_v11 = vrot.slane %v13398_v5, %v12393_v59  ;;  %v6204_v9 = vrot.slane %v11083_v29, %v12393_v59 }
 0x1fb   : > { %v4709_v6 = vand.u32 15, %v4197_v54  ;;  %v5636_v15 = vpack.c.bf16 %v5224_v39, %v5220_v49  ;;  %v5217_v10 = vcvt.s32.f32 %v4705_v13  ;;  %v6850_v19 = vpack.i.b16 %v6196_v12, %v6196_v12 }
 0x1fc   : > { %v4195_v44 = vshra.s32 %v2732_v63, %v12383_v51  ;;  %v7506_v31 = vmul.bf16 %v13425_v27, %v5634_v45  ;;  %v4199_v8 = vshra.s32 %v2748_v11, %v12383_v51  ;;  %v6864_v23 = vpack.i.b16 %v6204_v9, %v6204_v9 }
 0x1fd   : > { %v5221_v18 = vcvt.s32.f32 %v4709_v6  ;;  %v7508_v53 = vmul.bf16 %v13428_v47, %v5636_v15  ;;  %v13442_v4 = vrot.slane %v6850_v19, %v12389_v57  ;;  %v1337_v61 = vcombine.high %v1315_v38, %v1315_v38 }
 0x1fe   : > { %v4707_v55 = vand.u32 15, %v4195_v44  ;;  %7765 = vst [vmem:[%s12466_s18 + $0x308] sm:$0xff] %v7506_v31  ;;  %8031 = vmatprep.subr.bf16.mxu0 %v7506_v31  ;;  %v4711_v34 = vand.u32 15, %v4199_v8  ;;  %v13446_v24 = vrot.slane %v6864_v23, %v12389_v57  ;;  %v1339_v29 = vcombine.high %v13398_v5, %v13398_v5 }
 0x1ff   : > { %v5633_v22 = vpack.c.bf16 %v5221_v18, %v5217_v10  ;;  %7767 = vst [vmem:[%s12466_s18 + $0x318] sm:$0xff] %v7508_v53  ;;  %8203 = vmatprep.subr.bf16.mxu1 %v7508_v53  ;;  %v2760_v2 = vrot.slane %v1337_v61, %v12391_v58  ;;  %v2768_v30 = vrot.slane %v1337_v61, %v12395_v60  ;;  %v5950_v10 = vunpack.i.h.s16 %v13393_v26 }
 0x200   : > { %v5219_v28 = vcvt.s32.f32 %v4707_v55  ;;  %v2756_v38 = vrot.slane %v1337_v61, %v12389_v57  ;;  %v5223_v1 = vcvt.s32.f32 %v4711_v34  ;;  %v2776_v17 = vrot.slane %v1339_v29, %v12391_v58 }
 0x201   : > { %v7505_v50 = vmul.bf16 %v13442_v4, %v5633_v22  ;;  %v2784_v14 = vrot.slane %v1339_v29, %v12395_v60  ;;  %v4202_v5 = vshra.s32 %v2760_v2, %v12383_v51  ;;  %v4204_v37 = vshra.s32 %v2768_v30, %v12383_v51 }
 0x202   : > { %v2772_v40 = vrot.slane %v1339_v29, %v12389_v57  ;;  %v4201_v33 = vshra.s32 %v2756_v38, %v12383_v51  ;;  %v5635_v21 = vpack.c.bf16 %v5223_v1, %v5219_v28  ;;  %v4206_v25 = vshra.s32 %v2776_v17, %v12383_v51 }
 0x203   : > { %7764 = vst [vmem:[%s12466_s18 + $0x300] sm:$0xff] %v7505_v50  ;;  %8032 = vmatpush1.bf16.msra.mxu0 %v7505_v50  ;;  %v4208_v41 = vshra.s32 %v2784_v14, %v12383_v51  ;;  %v2764_v42 = vrot.slane %v1337_v61, %v12393_v59  ;;  %v4714_v7 = vand.u32 15, %v4202_v5  ;;  %v4716_v43 = vand.u32 15, %v4204_v37 }
 0x204   : > { %v4205_v46 = vshra.s32 %v2772_v40, %v12383_v51  ;;  %v4713_v35 = vand.u32 15, %v4201_v33  ;;  %v7507_v32 = vmul.bf16 %v13446_v24, %v5635_v21  ;;  %v4718_v48 = vand.u32 15, %v4206_v25 }
 0x205   : > { %v4720_v36 = vand.u32 15, %v4208_v41  ;;  %v2780_v62 = vrot.slane %v1339_v29, %v12393_v59  ;;  %v5226_v49 = vcvt.s32.f32 %v4714_v7  ;;  %v5228_v54 = vcvt.s32.f32 %v4716_v43 }
 0x206   : > { %v4717_v39 = vand.u32 15, %v4205_v46  ;;  %v5225_v13 = vcvt.s32.f32 %v4713_v35  ;;  %7766 = vst [vmem:[%s12466_s18 + $0x310] sm:$0xff] %v7507_v32  ;;  %8204 = vmatpush1.bf16.msra.mxu1 %v7507_v32  ;;  %v5230_v12 = vcvt.s32.f32 %v4718_v48  ;;  %v4203_v45 = vshra.s32 %v2764_v42, %v12383_v51 }
 0x207   : > { %v5232_v63 = vcvt.s32.f32 %v4720_v36  ;;  %v4207_v6 = vshra.s32 %v2780_v62, %v12383_v51  ;;  %v1290_v9 = vrot.slane %v11662_v3, %v12385_v52  ;;  %v1304_v15 = vrot.slane %v11663_v16, %v12385_v52 }
 0x208   : > { %v5229_v11 = vcvt.s32.f32 %v4717_v39  ;;  %v5638_v19 = vpack.c.bf16 %v5230_v12, %v5226_v49  ;;  %v4715_v31 = vand.u32 15, %v4203_v45  ;;  %v5982_v55 = vpack.i.b16 %v5950_v10, %v5950_v10 }
 0x209   : > { %v5640_v44 = vpack.c.bf16 %v5232_v63, %v5228_v54  ;;  %v4719_v18 = vand.u32 15, %v4207_v6  ;;  %v1307_v23 = vcombine.low %v1290_v9, %v1304_v15  ;;  %v1308_v53 = vcombine.high %v1290_v9, %v1304_v15 }
 0x20a   : > { %v5637_v8 = vpack.c.bf16 %v5229_v11, %v5225_v13  ;;  %v7510_v61 = vmul.bf16 %v13425_v27, %v5638_v19  ;;  %v5227_v34 = vcvt.s32.f32 %v4715_v31  ;;  %v6216_v30 = vrot.slane %v5982_v55, %v12391_v58 }
 0x20b   : > { %v7512_v22 = vmul.bf16 %v13428_v47, %v5640_v44  ;;  %v5231_v29 = vcvt.s32.f32 %v4719_v18  ;;  %v1322_v26 = vrot.slane %v1307_v23, %v12385_v52  ;;  %v1336_v2 = vrot.slane %v1308_v53, %v12385_v52 }
 0x20c   : > { %v7509_v28 = vmul.bf16 %v13442_v4, %v5637_v8  ;;  %7769 = vst [vmem:[%s12466_s18 + $0x328] sm:$0xff] %v7510_v61  ;;  %8033 = vmatprep.subr.bf16.mxu0 %v7510_v61  ;;  %v6224_v50 = vrot.slane %v5982_v55, %v12395_v60  ;;  %v6212_v27 = vrot.slane %v5982_v55, %v12389_v57 }
 0x20d   : > { %7771 = vst [vmem:[%s12466_s18 + $0x338] sm:$0xff] %v7512_v22  ;;  %8205 = vmatprep.subr.bf16.mxu1 %v7512_v22  ;;  %v5639_v38 = vpack.c.bf16 %v5231_v29, %v5227_v34  ;;  %v2792_v47 = vrot.slane %v1322_v26, %v12391_v58  ;;  %v2808_v4 = vrot.slane %v1336_v2, %v12391_v58 }
 0x20e   : > { %7768 = vst [vmem:[%s12466_s18 + $0x320] sm:$0xff] %v7509_v28  ;;  %8034 = vmatpush1.bf16.msra.mxu0 %v7509_v28  ;;  %v6885_v1 = vpack.i.b16 %v6216_v30, %v6216_v30  ;;  %v2800_v17 = vrot.slane %v1322_v26, %v12395_v60  ;;  %v2816_v5 = vrot.slane %v1336_v2, %v12395_v60 }
 0x20f   : > { %v7511_v14 = vmul.bf16 %v13446_v24, %v5639_v38  ;;  %v6899_v37 = vpack.i.b16 %v6224_v50, %v6224_v50  ;;  %v2788_v40 = vrot.slane %v1322_v26, %v12389_v57  ;;  %v4210_v33 = vshra.s32 %v2792_v47, %v12383_v51 }
 0x210   : > { %v4214_v21 = vshra.s32 %v2808_v4, %v12383_v51  ;;  %v13496_v25 = vrot.slane %v6885_v1, %v12389_v57  ;;  %v4212_v41 = vshra.s32 %v2800_v17, %v12383_v51  ;;  %v4216_v42 = vshra.s32 %v2816_v5, %v12383_v51 }
 0x211   : > { %7770 = vst [vmem:[%s12466_s18 + $0x330] sm:$0xff] %v7511_v14  ;;  %8206 = vmatpush1.bf16.msra.mxu1 %v7511_v14  ;;  %v13502_v24 = vrot.slane %v6899_v37, %v12389_v57  ;;  %v2804_v3 = vrot.slane %v1336_v2, %v12389_v57  ;;  %v4209_v7 = vshra.s32 %v2788_v40, %v12383_v51  ;;  %v4722_v43 = vand.u32 15, %v4210_v33 }
 0x212   : > { %v4726_v46 = vand.u32 15, %v4214_v21  ;;  %v4724_v35 = vand.u32 15, %v4212_v41  ;;  %v6878_v16 = vpack.i.b16 %v6212_v27, %v6212_v27  ;;  %v4728_v32 = vand.u32 15, %v4216_v42  ;;  %v11664_v21 = vld [vmem:[%s12364_s6 + $0xe0] ss:$8 sps:$4 sm:$0xff]  }
 0x213   : > { %v4213_v48 = vshra.s32 %v2804_v3, %v12383_v51  ;;  %v4721_v36 = vand.u32 15, %v4209_v7  ;;  %v2796_v62 = vrot.slane %v1322_v26, %v12393_v59  ;;  %v5234_v49 = vcvt.s32.f32 %v4722_v43  ;;  %v11666_v43 = vld [vmem:[%s12364_s6 + $0xf0] ss:$8 sps:$4 sm:$0xff]  }
 0x214   : > { %v5238_v54 = vcvt.s32.f32 %v4726_v46  ;;  %v5236_v39 = vcvt.s32.f32 %v4724_v35  ;;  %v13509_v13 = vrot.slane %v6878_v16, %v12389_v57  ;;  %v5240_v12 = vcvt.s32.f32 %v4728_v32 }
 0x215   : > { %v4725_v63 = vand.u32 15, %v4213_v48  ;;  %v5233_v45 = vcvt.s32.f32 %v4721_v36  ;;  %v2812_v6 = vrot.slane %v1336_v2, %v12393_v59  ;;  %v4211_v9 = vshra.s32 %v2796_v62, %v12383_v51 }
 0x216   : > { %v5642_v11 = vpack.c.bf16 %v5238_v54, %v5234_v49  ;;  %v6220_v15 = vrot.slane %v5982_v55, %v12393_v59  ;;  %v1338_v10 = vcombine.high %v1322_v26, %v1322_v26  ;;  %v5644_v19 = vpack.c.bf16 %v5240_v12, %v5236_v39 }
 0x217   : > { %v5237_v44 = vcvt.s32.f32 %v4725_v63  ;;  %v4215_v31 = vshra.s32 %v2812_v6, %v12383_v51  ;;  %v1340_v18 = vcombine.high %v1336_v2, %v1336_v2  ;;  %v4723_v23 = vand.u32 15, %v4211_v9 }
 0x218   : > { %v7514_v8 = vmul.bf16 %v13496_v25, %v5642_v11  ;;  %v6892_v53 = vpack.i.b16 %v6220_v15, %v6220_v15  ;;  %v2824_v61 = vrot.slane %v1338_v10, %v12391_v58  ;;  %v7516_v22 = vmul.bf16 %v13502_v24, %v5644_v19 }
 0x219   : > { %v5641_v34 = vpack.c.bf16 %v5237_v44, %v5233_v45  ;;  %v4727_v29 = vand.u32 15, %v4215_v31  ;;  %v2840_v28 = vrot.slane %v1340_v18, %v12391_v58  ;;  %v5235_v55 = vcvt.s32.f32 %v4723_v23  ;;  %v11668_v45 = vld [vmem:[%s12364_s6 + $0xe4] ss:$8 sps:$4 sm:$0xff]  }
 0x21a   : > { %7773 = vst [vmem:[%s12466_s18 + $0x348] sm:$0xff] %v7514_v8  ;;  %8035 = vmatprep.subr.bf16.mxu0 %v7514_v8  ;;  %v13521_v26 = vrot.slane %v6892_v53, %v12389_v57  ;;  %v4218_v2 = vshra.s32 %v2824_v61, %v12383_v51  ;;  %v2832_v30 = vrot.slane %v1338_v10, %v12395_v60  ;;  %7775 = vst [vmem:[%s12466_s18 + $0x358] sm:$0xff] %v7516_v22 }
 0x21b   : > { %8207 = vmatprep.subr.bf16.mxu1 %v7516_v22  ;;  %v7513_v38 = vmul.bf16 %v13509_v13, %v5641_v34  ;;  %v5239_v50 = vcvt.s32.f32 %v4727_v29  ;;  %v4222_v27 = vshra.s32 %v2840_v28, %v12383_v51  ;;  %v2848_v47 = vrot.slane %v1340_v18, %v12395_v60 }
 0x21c   : > { %v4730_v4 = vand.u32 15, %v4218_v2  ;;  %v4220_v1 = vshra.s32 %v2832_v30, %v12383_v51  ;;  %v2820_v17 = vrot.slane %v1338_v10, %v12389_v57  ;;  %v2836_v14 = vrot.slane %v1340_v18, %v12389_v57 }
 0x21d   : > { %7772 = vst [vmem:[%s12466_s18 + $0x340] sm:$0xff] %v7513_v38  ;;  %8036 = vmatpush1.bf16.msra.mxu0 %v7513_v38  ;;  %v5643_v5 = vpack.c.bf16 %v5239_v50, %v5235_v55  ;;  %v4734_v37 = vand.u32 15, %v4222_v27  ;;  %v4224_v40 = vshra.s32 %v2848_v47, %v12383_v51  ;;  %v2828_v33 = vrot.slane %v1338_v10, %v12393_v59  ;;  %v11669_v10 = vld [vmem:[%s12364_s6 + $0xf4] ss:$8 sps:$4 sm:$0xff]  }
 0x21e   : > { %v5242_v41 = vcvt.s32.f32 %v4730_v4  ;;  %v4732_v42 = vand.u32 15, %v4220_v1  ;;  %v4217_v3 = vshra.s32 %v2820_v17, %v12383_v51  ;;  %v4221_v7 = vshra.s32 %v2836_v14, %v12383_v51 }
 0x21f   : > { %v7515_v46 = vmul.bf16 %v13521_v26, %v5643_v5  ;;  %v5246_v35 = vcvt.s32.f32 %v4734_v37  ;;  %v4736_v16 = vand.u32 15, %v4224_v40  ;;  %v2844_v32 = vrot.slane %v1340_v18, %v12393_v59 }
 0x220   : > { %v5244_v48 = vcvt.s32.f32 %v4732_v42  ;;  %v4729_v36 = vand.u32 15, %v4217_v3  ;;  %v4733_v62 = vand.u32 15, %v4221_v7  ;;  %v4219_v49 = vshra.s32 %v2828_v33, %v12383_v51 }
 0x221   : > { %7774 = vst [vmem:[%s12466_s18 + $0x350] sm:$0xff] %v7515_v46  ;;  %8208 = vmatpush1.bf16.msra.mxu1 %v7515_v46  ;;  %v5646_v54 = vpack.c.bf16 %v5246_v35, %v5242_v41  ;;  %v5248_v39 = vcvt.s32.f32 %v4736_v16  ;;  %v4223_v12 = vshra.s32 %v2844_v32, %v12383_v51  ;;  %v1351_v63 = vrot.slane %v11664_v21, %v12385_v52 }
 0x222   : > { %v5241_v6 = vcvt.s32.f32 %v4729_v36  ;;  %v5245_v11 = vcvt.s32.f32 %v4733_v62  ;;  %v4731_v9 = vand.u32 15, %v4219_v49  ;;  %v1365_v15 = vrot.slane %v11666_v43, %v12385_v52 }
 0x223   : > { %v7518_v19 = vmul.bf16 %v13496_v25, %v5646_v54  ;;  %v5648_v44 = vpack.c.bf16 %v5248_v39, %v5244_v48  ;;  %v4735_v31 = vand.u32 15, %v4223_v12  ;;  %v13551_v18 = vcombine.high %v13235_v0, %v13235_v0 }
 0x224   : > { %v5645_v8 = vpack.c.bf16 %v5245_v11, %v5241_v6  ;;  %v5243_v23 = vcvt.s32.f32 %v4731_v9  ;;  %v1373_v53 = vcombine.low %v1351_v63, %v1365_v15  ;;  %v1374_v61 = vcombine.high %v1351_v63, %v1365_v15 }
 0x225   : > { %7777 = vst [vmem:[%s12466_s18 + $0x368] sm:$0xff] %v7518_v19  ;;  %8037 = vmatprep.subr.bf16.mxu0 %v7518_v19  ;;  %v7520_v22 = vmul.bf16 %v13502_v24, %v5648_v44  ;;  %v5247_v34 = vcvt.s32.f32 %v4735_v31  ;;  %v11084_v25 = vpack.i.b16 %v13551_v18, %v13551_v18  ;;  %v13558_v29 = vrot.slane %v11668_v45, %v12385_v52 }
 0x226   : > { %v7517_v28 = vmul.bf16 %v13509_v13, %v5645_v8  ;;  %v1383_v0 = vrot.slane %v1373_v53, %v12385_v52  ;;  %v1397_v55 = vrot.slane %v1374_v61, %v12385_v52  ;;  %v13564_v2 = vrot.slane %v11669_v10, %v12385_v52 }
 0x227   : > { %7779 = vst [vmem:[%s12466_s18 + $0x378] sm:$0xff] %v7520_v22  ;;  %8209 = vmatprep.subr.bf16.mxu1 %v7520_v22  ;;  %v5647_v30 = vpack.c.bf16 %v5247_v34, %v5243_v23  ;;  %v6232_v24 = vrot.slane %v11084_v25, %v12391_v58  ;;  %v6240_v38 = vrot.slane %v11084_v25, %v12395_v60 }
 0x228   : > { %v6228_v50 = vrot.slane %v11084_v25, %v12389_v57  ;;  %7776 = vst [vmem:[%s12466_s18 + $0x360] sm:$0xff] %v7517_v28  ;;  %8038 = vmatpush1.bf16.msra.mxu0 %v7517_v28  ;;  %v2856_v13 = vrot.slane %v1383_v0, %v12391_v58  ;;  %v2872_v27 = vrot.slane %v1397_v55, %v12391_v58 }
 0x229   : > { %v2864_v47 = vrot.slane %v1383_v0, %v12395_v60  ;;  %v2880_v4 = vrot.slane %v1397_v55, %v12395_v60  ;;  %v7519_v1 = vmul.bf16 %v13521_v26, %v5647_v30  ;;  %v6913_v17 = vpack.i.b16 %v6232_v24, %v6232_v24 }
 0x22a   : > { %v6927_v14 = vpack.i.b16 %v6240_v38, %v6240_v38  ;;  %v2852_v5 = vrot.slane %v1383_v0, %v12389_v57  ;;  %v4226_v37 = vshra.s32 %v2856_v13, %v12383_v51  ;;  %v4230_v40 = vshra.s32 %v2872_v27, %v12383_v51 }
 0x22b   : > { %v4228_v33 = vshra.s32 %v2864_v47, %v12383_v51  ;;  %v4232_v21 = vshra.s32 %v2880_v4, %v12383_v51  ;;  %7778 = vst [vmem:[%s12466_s18 + $0x370] sm:$0xff] %v7519_v1  ;;  %8210 = vmatpush1.bf16.msra.mxu1 %v7519_v1  ;;  %v13583_v41 = vrot.slane %v6913_v17, %v12389_v57 }
 0x22c   : > { %v13586_v42 = vrot.slane %v6927_v14, %v12389_v57  ;;  %v2868_v26 = vrot.slane %v1397_v55, %v12389_v57  ;;  %v4225_v3 = vshra.s32 %v2852_v5, %v12383_v51  ;;  %v4738_v7 = vand.u32 15, %v4226_v37 }
 0x22d   : > { %v4742_v43 = vand.u32 15, %v4230_v40  ;;  %v4740_v46 = vand.u32 15, %v4228_v33  ;;  %v4744_v35 = vand.u32 15, %v4232_v21  ;;  %v6906_v48 = vpack.i.b16 %v6228_v50, %v6228_v50 }
 0x22e   : > { %v4229_v16 = vshra.s32 %v2868_v26, %v12383_v51  ;;  %v4737_v32 = vand.u32 15, %v4225_v3  ;;  %v2860_v36 = vrot.slane %v1383_v0, %v12393_v59  ;;  %v5250_v62 = vcvt.s32.f32 %v4738_v7 }
 0x22f   : > { %v5254_v49 = vcvt.s32.f32 %v4742_v43  ;;  %v5252_v54 = vcvt.s32.f32 %v4740_v46  ;;  %v5256_v39 = vcvt.s32.f32 %v4744_v35  ;;  %v13593_v45 = vrot.slane %v6906_v48, %v12389_v57 }
 0x230   : > { %v4741_v12 = vand.u32 15, %v4229_v16  ;;  %v5249_v63 = vcvt.s32.f32 %v4737_v32  ;;  %v2876_v6 = vrot.slane %v1397_v55, %v12393_v59  ;;  %v4227_v15 = vshra.s32 %v2860_v36, %v12383_v51 }
 0x231   : > { %v5650_v11 = vpack.c.bf16 %v5254_v49, %v5250_v62  ;;  %v5652_v9 = vpack.c.bf16 %v5256_v39, %v5252_v54  ;;  %v6236_v10 = vrot.slane %v11084_v25, %v12393_v59  ;;  %v1405_v31 = vcombine.high %v1383_v0, %v1383_v0 }
 0x232   : > { %v5253_v19 = vcvt.s32.f32 %v4741_v12  ;;  %v4231_v44 = vshra.s32 %v2876_v6, %v12383_v51  ;;  %v1407_v8 = vcombine.high %v1397_v55, %v1397_v55  ;;  %v4739_v61 = vand.u32 15, %v4227_v15 }
 0x233   : > { %v7522_v23 = vmul.bf16 %v13583_v41, %v5650_v11  ;;  %v7524_v53 = vmul.bf16 %v13586_v42, %v5652_v9  ;;  %v6920_v22 = vpack.i.b16 %v6236_v10, %v6236_v10  ;;  %v2888_v30 = vrot.slane %v1405_v31, %v12391_v58 }
 0x234   : > { %v5649_v34 = vpack.c.bf16 %v5253_v19, %v5249_v63  ;;  %v4743_v28 = vand.u32 15, %v4231_v44  ;;  %v2904_v24 = vrot.slane %v1407_v8, %v12391_v58  ;;  %v5251_v25 = vcvt.s32.f32 %v4739_v61 }
 0x235   : > { %7781 = vst [vmem:[%s12466_s18 + $0x388] sm:$0xff] %v7522_v23  ;;  %8039 = vmatprep.subr.bf16.mxu0 %v7522_v23  ;;  %7783 = vst [vmem:[%s12466_s18 + $0x398] sm:$0xff] %v7524_v53  ;;  %8211 = vmatprep.subr.bf16.mxu1 %v7524_v53  ;;  %v13606_v0 = vrot.slane %v6920_v22, %v12389_v57  ;;  %v2896_v55 = vrot.slane %v1405_v31, %v12395_v60  ;;  %v5952_v53 = vunpack.i.h.s16 %v13551_v18 }
 0x236   : > { %v2912_v38 = vrot.slane %v1407_v8, %v12395_v60  ;;  %v7521_v50 = vmul.bf16 %v13593_v45, %v5649_v34  ;;  %v5255_v13 = vcvt.s32.f32 %v4743_v28  ;;  %v4234_v27 = vshra.s32 %v2888_v30, %v12383_v51 }
 0x237   : > { %v4238_v47 = vshra.s32 %v2904_v24, %v12383_v51  ;;  %v4236_v4 = vshra.s32 %v2896_v55, %v12383_v51  ;;  %v2884_v17 = vrot.slane %v1405_v31, %v12389_v57  ;;  %v2900_v14 = vrot.slane %v1407_v8, %v12389_v57 }
 0x238   : > { %v4240_v1 = vshra.s32 %v2912_v38, %v12383_v51  ;;  %7780 = vst [vmem:[%s12466_s18 + $0x380] sm:$0xff] %v7521_v50  ;;  %8040 = vmatpush1.bf16.msra.mxu0 %v7521_v50  ;;  %v5651_v5 = vpack.c.bf16 %v5255_v13, %v5251_v25  ;;  %v4746_v37 = vand.u32 15, %v4234_v27  ;;  %v2892_v33 = vrot.slane %v1405_v31, %v12393_v59 }
 0x239   : > { %v4750_v40 = vand.u32 15, %v4238_v47  ;;  %v4748_v21 = vand.u32 15, %v4236_v4  ;;  %v4233_v3 = vshra.s32 %v2884_v17, %v12383_v51  ;;  %v4237_v7 = vshra.s32 %v2900_v14, %v12383_v51 }
 0x23a   : > { %v4752_v26 = vand.u32 15, %v4240_v1  ;;  %v7523_v43 = vmul.bf16 %v13606_v0, %v5651_v5  ;;  %v5258_v46 = vcvt.s32.f32 %v4746_v37  ;;  %v2908_v16 = vrot.slane %v1407_v8, %v12393_v59 }
 0x23b   : > { %v5262_v35 = vcvt.s32.f32 %v4750_v40  ;;  %v5260_v32 = vcvt.s32.f32 %v4748_v21  ;;  %v4745_v36 = vand.u32 15, %v4233_v3  ;;  %v4749_v62 = vand.u32 15, %v4237_v7 }
 0x23c   : > { %v5264_v48 = vcvt.s32.f32 %v4752_v26  ;;  %7782 = vst [vmem:[%s12466_s18 + $0x390] sm:$0xff] %v7523_v43  ;;  %8212 = vmatpush1.bf16.msra.mxu1 %v7523_v43  ;;  %v4235_v54 = vshra.s32 %v2892_v33, %v12383_v51  ;;  %v4239_v39 = vshra.s32 %v2908_v16, %v12383_v51  ;;  %v1375_v12 = vcombine.low %v13558_v29, %v13564_v2 }
 0x23d   : > { %v5654_v49 = vpack.c.bf16 %v5262_v35, %v5258_v46  ;;  %v5257_v6 = vcvt.s32.f32 %v4745_v36  ;;  %v5261_v11 = vcvt.s32.f32 %v4749_v62  ;;  %v1376_v9 = vcombine.high %v13558_v29, %v13564_v2 }
 0x23e   : > { %v5656_v63 = vpack.c.bf16 %v5264_v48, %v5260_v32  ;;  %v4747_v10 = vand.u32 15, %v4235_v54  ;;  %v4751_v19 = vand.u32 15, %v4239_v39  ;;  %v13632_v44 = vrot.slane %v1375_v12, %v12385_v52 }
 0x23f   : > { %v7526_v15 = vmul.bf16 %v13583_v41, %v5654_v49  ;;  %v5653_v8 = vpack.c.bf16 %v5261_v11, %v5257_v6  ;;  %v13636_v23 = vrot.slane %v1376_v9, %v12385_v52  ;;  %v5984_v34 = vpack.i.b16 %v5952_v53, %v5952_v53  ;;  %v7929_v6 = vld [vmem:[%s16102_s1 + $0x28] sm:$0xff] }
 0x240   : > { %v7528_v31 = vmul.bf16 %v13586_v42, %v5656_v63  ;;  %v5259_v61 = vcvt.s32.f32 %v4747_v10  ;;  %v5263_v29 = vcvt.s32.f32 %v4751_v19  ;;  %v2920_v2 = vrot.slane %v13632_v44, %v12391_v58  ;;  %v7925_v63 = vld [vmem:[%s16102_s1 + $0x8] sm:$0xff] }
 0x241   : > { %7785 = vst [vmem:[%s12466_s18 + $0x3a8] sm:$0xff] %v7526_v15  ;;  %8041 = vmatprep.subr.bf16.mxu0 %v7526_v15  ;;  %v2928_v41 = vrot.slane %v13632_v44, %v12395_v60  ;;  %v7525_v42 = vmul.bf16 %v13593_v45, %v5653_v8  ;;  %v2936_v22 = vrot.slane %v13636_v23, %v12391_v58 }
 0x242   : > { %7787 = vst [vmem:[%s12466_s18 + $0x3b8] sm:$0xff] %v7528_v31  ;;  %8213 = vmatprep.subr.bf16.mxu1 %v7528_v31  ;;  %v2944_v18 = vrot.slane %v13636_v23, %v12395_v60  ;;  %v5655_v28 = vpack.c.bf16 %v5263_v29, %v5259_v61  ;;  %v4242_v30 = vshra.s32 %v2920_v2, %v12383_v51 }
 0x243   : > { %v4244_v24 = vshra.s32 %v2928_v41, %v12383_v51  ;;  %v2916_v25 = vrot.slane %v13632_v44, %v12389_v57  ;;  %7784 = vst [vmem:[%s12466_s18 + $0x3a0] sm:$0xff] %v7525_v42  ;;  %8042 = vmatpush1.bf16.msra.mxu0 %v7525_v42  ;;  %v4246_v45 = vshra.s32 %v2936_v22, %v12383_v51 }
 0x244   : > { %v6248_v55 = vrot.slane %v5984_v34, %v12391_v58  ;;  %v4248_v38 = vshra.s32 %v2944_v18, %v12383_v51  ;;  %v6256_v50 = vrot.slane %v5984_v34, %v12395_v60  ;;  %v7527_v13 = vmul.bf16 %v13606_v0, %v5655_v28 }
 0x245   : > { %v4754_v27 = vand.u32 15, %v4242_v30  ;;  %v4756_v47 = vand.u32 15, %v4244_v24  ;;  %v2932_v4 = vrot.slane %v13636_v23, %v12389_v57  ;;  %v4758_v1 = vand.u32 15, %v4246_v45 }
 0x246   : > { %v6941_v17 = vpack.i.b16 %v6248_v55, %v6248_v55  ;;  %v4760_v14 = vand.u32 15, %v4248_v38  ;;  %v6955_v5 = vpack.i.b16 %v6256_v50, %v6256_v50  ;;  %7786 = vst [vmem:[%s12466_s18 + $0x3b0] sm:$0xff] %v7527_v13  ;;  %8214 = vmatpush1.bf16.msra.mxu1 %v7527_v13  ;;  %v4241_v33 = vshra.s32 %v2916_v25, %v12383_v51 }
 0x247   : > { %v5266_v37 = vcvt.s32.f32 %v4754_v27  ;;  %v5268_v40 = vcvt.s32.f32 %v4756_v47  ;;  %v4245_v21 = vshra.s32 %v2932_v4, %v12383_v51  ;;  %v5270_v26 = vcvt.s32.f32 %v4758_v1 }
 0x248   : > { %v13666_v0 = vrot.slane %v6941_v17, %v12389_v57  ;;  %v5272_v3 = vcvt.s32.f32 %v4760_v14  ;;  %v13669_v7 = vrot.slane %v6955_v5, %v12389_v57  ;;  %v4753_v43 = vand.u32 15, %v4241_v33  ;;  %v11670_v14 = vld [vmem:[%s12364_s6 + $0x100] ss:$8 sps:$4 sm:$0xff]  }
 0x249   : > { %v4757_v46 = vand.u32 15, %v4245_v21  ;;  %v6244_v35 = vrot.slane %v5984_v34, %v12389_v57  ;;  %v2924_v16 = vrot.slane %v13632_v44, %v12393_v59  ;;  %v5658_v32 = vpack.c.bf16 %v5270_v26, %v5266_v37  ;;  %v11672_v21 = vld [vmem:[%s12364_s6 + $0x110] ss:$8 sps:$4 sm:$0xff]  }
 0x24a   : > { %v5660_v48 = vpack.c.bf16 %v5272_v3, %v5268_v40  ;;  %v2940_v36 = vrot.slane %v13636_v23, %v12393_v59  ;;  %v6252_v62 = vrot.slane %v5984_v34, %v12393_v59  ;;  %v5265_v49 = vcvt.s32.f32 %v4753_v43 }
 0x24b   : > { %v5269_v54 = vcvt.s32.f32 %v4757_v46  ;;  %v6934_v39 = vpack.i.b16 %v6244_v35, %v6244_v35  ;;  %v4243_v12 = vshra.s32 %v2924_v16, %v12383_v51  ;;  %v7530_v11 = vmul.bf16 %v13666_v0, %v5658_v32  ;;  %v11674_v35 = vld [vmem:[%s12364_s6 + $0x104] ss:$8 sps:$4 sm:$0xff]  }
 0x24c   : > { %v7532_v9 = vmul.bf16 %v13669_v7, %v5660_v48  ;;  %v4247_v15 = vshra.s32 %v2940_v36, %v12383_v51  ;;  %v6948_v10 = vpack.i.b16 %v6252_v62, %v6252_v62  ;;  %v1406_v53 = vcombine.high %v13632_v44, %v13632_v44  ;;  %v13725_v62 = vld.sshfl [vmem:[%s12366_s7 + $0x20] sm:$0xff pattern:$0x75316420] }
 0x24d   : > { %v5657_v19 = vpack.c.bf16 %v5269_v54, %v5265_v49  ;;  %v13688_v31 = vrot.slane %v6934_v39, %v12389_v57  ;;  %v4755_v8 = vand.u32 15, %v4243_v12  ;;  %7789 = vst [vmem:[%s12466_s18 + $0x3c8] sm:$0xff] %v7530_v11  ;;  %8043 = vmatprep.subr.bf16.mxu0 %v7530_v11  ;;  %v1408_v2 = vcombine.high %v13636_v23, %v13636_v23  ;;  %v13728_v49 = vld.sshfl [vmem:[%s12366_s7 + $0x28] sm:$0xff pattern:$0x75316420] }
 0x24e   : > { %7791 = vst [vmem:[%s12466_s18 + $0x3d8] sm:$0xff] %v7532_v9  ;;  %8215 = vmatprep.subr.bf16.mxu1 %v7532_v9  ;;  %v4759_v61 = vand.u32 15, %v4247_v15  ;;  %v13695_v29 = vrot.slane %v6948_v10, %v12389_v57  ;;  %v13699_v41 = vcombine.low %v7925_v63, %v7929_v6  ;;  %v2952_v34 = vrot.slane %v1406_v53, %v12391_v58  ;;  %v11675_v9 = vld [vmem:[%s12364_s6 + $0x114] ss:$8 sps:$4 sm:$0xff]  }
 0x24f   : > { %v7529_v42 = vmul.bf16 %v13688_v31, %v5657_v19  ;;  %v5267_v22 = vcvt.s32.f32 %v4755_v8  ;;  %v2960_v44 = vrot.slane %v1406_v53, %v12395_v60  ;;  %v2968_v28 = vrot.slane %v1408_v2, %v12391_v58 }
 0x250   : > { %v5271_v18 = vcvt.s32.f32 %v4759_v61  ;;  %v2976_v30 = vrot.slane %v1408_v2, %v12395_v60  ;;  %v2948_v24 = vrot.slane %v1406_v53, %v12389_v57  ;;  %v4250_v23 = vshra.s32 %v2952_v34, %v12383_v51 }
 0x251   : > { %7788 = vst [vmem:[%s12466_s18 + $0x3c0] sm:$0xff] %v7529_v42  ;;  %8044 = vmatpush1.bf16.msra.mxu0 %v7529_v42  ;;  %v4252_v25 = vshra.s32 %v2960_v44, %v12383_v51  ;;  %v2964_v45 = vrot.slane %v1408_v2, %v12389_v57  ;;  %v2956_v55 = vrot.slane %v1406_v53, %v12393_v59  ;;  %v11676_v53 = vld [vmem:[%s12364_s6 + $0x120] ss:$8 sps:$4 sm:$0xff]  }
 0x252   : > { %v5659_v38 = vpack.c.bf16 %v5271_v18, %v5267_v22  ;;  %v4254_v50 = vshra.s32 %v2968_v28, %v12383_v51  ;;  %v4256_v13 = vshra.s32 %v2976_v30, %v12383_v51  ;;  %v4249_v27 = vshra.s32 %v2948_v24, %v12383_v51 }
 0x253   : > { %v4762_v47 = vand.u32 15, %v4250_v23  ;;  %v4764_v4 = vand.u32 15, %v4252_v25  ;;  %v4253_v1 = vshra.s32 %v2964_v45, %v12383_v51  ;;  %v2972_v17 = vrot.slane %v1408_v2, %v12393_v59 }
 0x254   : > { %v7531_v5 = vmul.bf16 %v13695_v29, %v5659_v38  ;;  %v4766_v37 = vand.u32 15, %v4254_v50  ;;  %v4768_v40 = vand.u32 15, %v4256_v13  ;;  %v4761_v33 = vand.u32 15, %v4249_v27 }
 0x255   : > { %v5274_v26 = vcvt.s32.f32 %v4762_v47  ;;  %v5276_v3 = vcvt.s32.f32 %v4764_v4  ;;  %v4765_v43 = vand.u32 15, %v4253_v1  ;;  %v4251_v46 = vshra.s32 %v2956_v55, %v12383_v51 }
 0x256   : > { %7790 = vst [vmem:[%s12466_s18 + $0x3d0] sm:$0xff] %v7531_v5  ;;  %8216 = vmatpush1.bf16.msra.mxu1 %v7531_v5  ;;  %v5278_v16 = vcvt.s32.f32 %v4766_v37  ;;  %v5280_v32 = vcvt.s32.f32 %v4768_v40  ;;  %v5273_v48 = vcvt.s32.f32 %v4761_v33  ;;  %v4255_v36 = vshra.s32 %v2972_v17, %v12383_v51 }
 0x257   : > { %v5277_v54 = vcvt.s32.f32 %v4765_v43  ;;  %v4763_v39 = vand.u32 15, %v4251_v46  ;;  %v13730_v12 = vcombine.high %v7925_v63, %v7929_v6  ;;  %v1419_v11 = vrot.slane %v11670_v14, %v12385_v52 }
 0x258   : > { %v5662_v15 = vpack.c.bf16 %v5278_v16, %v5274_v26  ;;  %v5664_v10 = vpack.c.bf16 %v5280_v32, %v5276_v3  ;;  %v4767_v19 = vand.u32 15, %v4255_v36  ;;  %v1433_v8 = vrot.slane %v11672_v21, %v12385_v52 }
 0x259   : > { %v5661_v61 = vpack.c.bf16 %v5277_v54, %v5273_v48  ;;  %v5275_v2 = vcvt.s32.f32 %v4763_v39  ;;  %8047 = vmatprep.mubr.bf16.mxu0 %v13730_v12  ;;  %v5887_v42 = vcombine.low %v13725_v62, %v13728_v49  ;;  %8219 = vmatprep.mubr.bf16.mxu1 %v13730_v12  ;;  %v13741_v63 = vrot.slane %v11674_v35, %v12385_v52 }
 0x25a   : > { %v7534_v6 = vmul.bf16 %v13666_v0, %v5662_v15  ;;  %v7536_v22 = vmul.bf16 %v13669_v7, %v5664_v10  ;;  %v5279_v34 = vcvt.s32.f32 %v4767_v19  ;;  %v1441_v44 = vcombine.low %v1419_v11, %v1433_v8 }
 0x25b   : > { %v7533_v18 = vmul.bf16 %v13688_v31, %v5661_v61  ;;  %v1442_v28 = vcombine.high %v1419_v11, %v1433_v8  ;;  %v13747_v30 = vrot.slane %v5887_v42, %v12385_v52  ;;  %v13750_v24 = vrot.slane %v11675_v9, %v12385_v52 }
 0x25c   : > { %7793 = vst [vmem:[%s12466_s18 + $0x3e8] sm:$0xff] %v7534_v6  ;;  %8045 = vmatprep.subr.bf16.mxu0 %v7534_v6  ;;  %7795 = vst [vmem:[%s12466_s18 + $0x3f8] sm:$0xff] %v7536_v22  ;;  %8217 = vmatprep.subr.bf16.mxu1 %v7536_v22  ;;  %v5663_v23 = vpack.c.bf16 %v5279_v34, %v5275_v2  ;;  %v1451_v0 = vrot.slane %v1441_v44, %v12385_v52 }
 0x25d   : > { %v13756_v7 = vrot.slane %v11676_v53, %v12385_v52  ;;  %7792 = vst [vmem:[%s12466_s18 + $0x3e0] sm:$0xff] %v7533_v18  ;;  %8046 = vmatpush1.bf16.msra.mxu0 %v7533_v18  ;;  %v1465_v31 = vrot.slane %v1442_v28, %v12385_v52  ;;  %v11085_v25 = vpack.i.b16 %v13747_v30, %v13747_v30  ;;  %v5954_v37 = vunpack.i.h.s16 %v13747_v30 }
 0x25e   : > { %v1443_v45 = vcombine.low %v13741_v63, %v13750_v24  ;;  %v1444_v55 = vcombine.high %v13741_v63, %v13750_v24  ;;  %v7535_v38 = vmul.bf16 %v13695_v29, %v5663_v23  ;;  %v2984_v50 = vrot.slane %v1451_v0, %v12391_v58 }
 0x25f   : > { %v2992_v13 = vrot.slane %v1451_v0, %v12395_v60  ;;  %v2980_v27 = vrot.slane %v1451_v0, %v12389_v57  ;;  %v3000_v47 = vrot.slane %v1465_v31, %v12391_v58  ;;  %v6264_v4 = vrot.slane %v11085_v25, %v12391_v58 }
 0x260   : > { %v3008_v1 = vrot.slane %v1465_v31, %v12395_v60  ;;  %v6272_v17 = vrot.slane %v11085_v25, %v12395_v60  ;;  %7794 = vst [vmem:[%s12466_s18 + $0x3f0] sm:$0xff] %v7535_v38  ;;  %8218 = vmatpush1.bf16.msra.mxu1 %v7535_v38  ;;  %v4258_v14 = vshra.s32 %v2984_v50, %v12383_v51 }
 0x261   : > { %v4260_v29 = vshra.s32 %v2992_v13, %v12383_v51  ;;  %8048 = vmatmul.mubr.bf16.vlgmr.msra.gmra.mrb[0].mxu0 %v13699_v41  ;;  %v2996_v5 = vrot.slane %v1465_v31, %v12389_v57  ;;  %v4262_v40 = vshra.s32 %v3000_v47, %v12383_v51  ;;  %v6969_v33 = vpack.i.b16 %v6264_v4, %v6264_v4 }
 0x262   : > { %v4264_v21 = vshra.s32 %v3008_v1, %v12383_v51  ;;  %v6983_v26 = vpack.i.b16 %v6272_v17, %v6272_v17  ;;  %v4770_v3 = vand.u32 15, %v4258_v14  ;;  %v4257_v46 = vshra.s32 %v2980_v27, %v12383_v51 }
 0x263   : > { %v4772_v43 = vand.u32 15, %v4260_v29  ;;  %v4261_v35 = vshra.s32 %v2996_v5, %v12383_v51  ;;  %v4774_v16 = vand.u32 15, %v4262_v40  ;;  %v13785_v32 = vrot.slane %v6969_v33, %v12389_v57  ;;  %8220 = vmatmul.mubr.bf16.vlgmr.msra.gmra.mrb[0].mxu1 %v13699_v41 }
 0x264   : > { %v4776_v48 = vand.u32 15, %v4264_v21  ;;  %v13788_v36 = vrot.slane %v6983_v26, %v12389_v57  ;;  %v5282_v54 = vcvt.s32.f32 %v4770_v3  ;;  %v4769_v11 = vand.u32 15, %v4257_v46 }
 0x265   : > { %v5284_v39 = vcvt.s32.f32 %v4772_v43  ;;  %v4773_v9 = vand.u32 15, %v4261_v35  ;;  %v5286_v15 = vcvt.s32.f32 %v4774_v16  ;;  %v6260_v19 = vrot.slane %v11085_v25, %v12389_v57 }
 0x266   : > { %v5288_v10 = vcvt.s32.f32 %v4776_v48  ;;  %v2988_v8 = vrot.slane %v1451_v0, %v12393_v59  ;;  %v5281_v53 = vcvt.s32.f32 %v4769_v11  ;;  %v3004_v2 = vrot.slane %v1465_v31, %v12393_v59 }
 0x267   : > { %v5285_v61 = vcvt.s32.f32 %v4773_v9  ;;  %v6268_v42 = vrot.slane %v11085_v25, %v12393_v59  ;;  %v5666_v6 = vpack.c.bf16 %v5286_v15, %v5282_v54  ;;  %v6962_v34 = vpack.i.b16 %v6260_v19, %v6260_v19 }
 0x268   : > { %v5668_v22 = vpack.c.bf16 %v5288_v10, %v5284_v39  ;;  %v4259_v44 = vshra.s32 %v2988_v8, %v12383_v51  ;;  %v4263_v28 = vshra.s32 %v3004_v2, %v12383_v51  ;;  %v1473_v38 = vcombine.high %v1451_v0, %v1451_v0 }
 0x269   : > { %v5665_v18 = vpack.c.bf16 %v5285_v61, %v5281_v53  ;;  %v6976_v23 = vpack.i.b16 %v6268_v42, %v6268_v42  ;;  %v7538_v50 = vmul.bf16 %v13785_v32, %v5666_v6  ;;  %v6967_v27 = vrot.slane %v6962_v34, %v12389_v57 }
 0x26a   : > { %v7540_v13 = vmul.bf16 %v13788_v36, %v5668_v22  ;;  %v4771_v47 = vand.u32 15, %v4259_v44  ;;  %v4775_v25 = vand.u32 15, %v4263_v28  ;;  %v1475_v1 = vcombine.high %v1465_v31, %v1465_v31 }
 0x26b   : > { %v13801_v4 = vrot.slane %v6976_v23, %v12389_v57  ;;  %v3016_v17 = vrot.slane %v1473_v38, %v12391_v58  ;;  %7797 = vst [vmem:[%s12466_s18 + $0x408] sm:$0xff] %v7538_v50  ;;  %8058 = vmatprep.subr.bf16.mxu0 %v7538_v50  ;;  %v7537_v0 = vmul.bf16 %v6967_v27, %v5665_v18 }
 0x26c   : > { %7799 = vst [vmem:[%s12466_s18 + $0x418] sm:$0xff] %v7540_v13  ;;  %8230 = vmatprep.subr.bf16.mxu1 %v7540_v13  ;;  %v5283_v14 = vcvt.s32.f32 %v4771_v47  ;;  %v3024_v29 = vrot.slane %v1473_v38, %v12395_v60  ;;  %v3012_v5 = vrot.slane %v1473_v38, %v12389_v57  ;;  %v5287_v40 = vcvt.s32.f32 %v4775_v25 }
 0x26d   : > { %v3032_v33 = vrot.slane %v1475_v1, %v12391_v58  ;;  %v4266_v21 = vshra.s32 %v3016_v17, %v12383_v51  ;;  %v3040_v26 = vrot.slane %v1475_v1, %v12395_v60  ;;  %7796 = vst [vmem:[%s12466_s18 + $0x400] sm:$0xff] %v7537_v0  ;;  %8059 = vmatpush1.bf16.msra.mxu0 %v7537_v0 }
 0x26e   : > { %v4268_v31 = vshra.s32 %v3024_v29, %v12383_v51  ;;  %v3028_v3 = vrot.slane %v1475_v1, %v12389_v57  ;;  %v4265_v43 = vshra.s32 %v3012_v5, %v12383_v51  ;;  %v3020_v46 = vrot.slane %v1473_v38, %v12393_v59 }
 0x26f   : > { %v5667_v35 = vpack.c.bf16 %v5287_v40, %v5283_v14  ;;  %v4270_v16 = vshra.s32 %v3032_v33, %v12383_v51  ;;  %v4778_v48 = vand.u32 15, %v4266_v21  ;;  %v4272_v54 = vshra.s32 %v3040_v26, %v12383_v51 }
 0x270   : > { %v4780_v39 = vand.u32 15, %v4268_v31  ;;  %v4269_v11 = vshra.s32 %v3028_v3, %v12383_v51  ;;  %v4777_v9 = vand.u32 15, %v4265_v43  ;;  %v3036_v15 = vrot.slane %v1475_v1, %v12393_v59 }
 0x271   : > { %v7539_v10 = vmul.bf16 %v13801_v4, %v5667_v35  ;;  %v4782_v19 = vand.u32 15, %v4270_v16  ;;  %v5290_v8 = vcvt.s32.f32 %v4778_v48  ;;  %v4784_v53 = vand.u32 15, %v4272_v54 }
 0x272   : > { %v5292_v61 = vcvt.s32.f32 %v4780_v39  ;;  %v4781_v2 = vand.u32 15, %v4269_v11  ;;  %v5289_v42 = vcvt.s32.f32 %v4777_v9  ;;  %v4267_v6 = vshra.s32 %v3020_v46, %v12383_v51 }
 0x273   : > { %7798 = vst [vmem:[%s12466_s18 + $0x410] sm:$0xff] %v7539_v10  ;;  %8231 = vmatpush1.bf16.msra.mxu1 %v7539_v10  ;;  %v5294_v22 = vcvt.s32.f32 %v4782_v19  ;;  %v5296_v34 = vcvt.s32.f32 %v4784_v53  ;;  %v4271_v44 = vshra.s32 %v3036_v15, %v12383_v51  ;;  %v13828_v18 = vrot.slane %v1443_v45, %v12385_v52 }
 0x274   : > { %v5293_v28 = vcvt.s32.f32 %v4781_v2  ;;  %v4779_v23 = vand.u32 15, %v4267_v6  ;;  %v13834_v38 = vrot.slane %v1444_v55, %v12385_v52  ;;  %v5986_v50 = vpack.i.b16 %v5954_v37, %v5954_v37 }
 0x275   : > { %v5670_v13 = vpack.c.bf16 %v5294_v22, %v5290_v8  ;;  %v5672_v47 = vpack.c.bf16 %v5296_v34, %v5292_v61  ;;  %v4783_v25 = vand.u32 15, %v4271_v44  ;;  %v3048_v45 = vrot.slane %v13828_v18, %v12391_v58  ;;  %v11678_v44 = vld [vmem:[%s12364_s6 + $0x130] ss:$8 sps:$4 sm:$0xff]  }
 0x276   : > { %v5669_v1 = vpack.c.bf16 %v5293_v28, %v5289_v42  ;;  %v5291_v17 = vcvt.s32.f32 %v4779_v23  ;;  %v3064_v0 = vrot.slane %v13834_v38, %v12391_v58  ;;  %v6280_v63 = vrot.slane %v5986_v50, %v12391_v58 }
 0x277   : > { %v7542_v24 = vmul.bf16 %v13785_v32, %v5670_v13  ;;  %v7544_v55 = vmul.bf16 %v13788_v36, %v5672_v47  ;;  %v5295_v37 = vcvt.s32.f32 %v4783_v25  ;;  %v4274_v14 = vshra.s32 %v3048_v45, %v12383_v51 }
 0x278   : > { %v7541_v29 = vmul.bf16 %v6967_v27, %v5669_v1  ;;  %v4278_v5 = vshra.s32 %v3064_v0, %v12383_v51  ;;  %v6997_v40 = vpack.i.b16 %v6280_v63, %v6280_v63  ;;  %v3056_v33 = vrot.slane %v13828_v18, %v12395_v60 }
 0x279   : > { %7801 = vst [vmem:[%s12466_s18 + $0x428] sm:$0xff] %v7542_v24  ;;  %8060 = vmatprep.subr.bf16.mxu0 %v7542_v24  ;;  %7803 = vst [vmem:[%s12466_s18 + $0x438] sm:$0xff] %v7544_v55  ;;  %8232 = vmatprep.subr.bf16.mxu1 %v7544_v55  ;;  %v5671_v21 = vpack.c.bf16 %v5295_v37, %v5291_v17  ;;  %v4786_v26 = vand.u32 15, %v4274_v14  ;;  %v3072_v32 = vrot.slane %v13834_v38, %v12395_v60 }
 0x27a   : > { %v6288_v36 = vrot.slane %v5986_v50, %v12395_v60  ;;  %7800 = vst [vmem:[%s12466_s18 + $0x420] sm:$0xff] %v7541_v29  ;;  %8061 = vmatpush1.bf16.msra.mxu0 %v7541_v29  ;;  %v4790_v27 = vand.u32 15, %v4278_v5  ;;  %v13857_v31 = vrot.slane %v6997_v40, %v12389_v57  ;;  %v4276_v3 = vshra.s32 %v3056_v33, %v12383_v51 }
 0x27b   : > { %v3044_v43 = vrot.slane %v13828_v18, %v12389_v57  ;;  %v7543_v46 = vmul.bf16 %v13801_v4, %v5671_v21  ;;  %v5298_v35 = vcvt.s32.f32 %v4786_v26  ;;  %v4280_v16 = vshra.s32 %v3072_v32, %v12383_v51 }
 0x27c   : > { %v7011_v48 = vpack.i.b16 %v6288_v36, %v6288_v36  ;;  %v5302_v54 = vcvt.s32.f32 %v4790_v27  ;;  %v4788_v39 = vand.u32 15, %v4276_v3  ;;  %v3060_v11 = vrot.slane %v13834_v38, %v12389_v57 }
 0x27d   : > { %v4273_v9 = vshra.s32 %v3044_v43, %v12383_v51  ;;  %7802 = vst [vmem:[%s12466_s18 + $0x430] sm:$0xff] %v7543_v46  ;;  %8233 = vmatpush1.bf16.msra.mxu1 %v7543_v46  ;;  %v4792_v15 = vand.u32 15, %v4280_v16  ;;  %v6276_v4 = vrot.slane %v5986_v50, %v12389_v57  ;;  %v3052_v19 = vrot.slane %v13828_v18, %v12393_v59 }
 0x27e   : > { %v13869_v10 = vrot.slane %v7011_v48, %v12389_v57  ;;  %v5674_v8 = vpack.c.bf16 %v5302_v54, %v5298_v35  ;;  %v5300_v53 = vcvt.s32.f32 %v4788_v39  ;;  %v4277_v61 = vshra.s32 %v3060_v11, %v12383_v51 }
 0x27f   : > { %v4785_v2 = vand.u32 15, %v4273_v9  ;;  %v5304_v42 = vcvt.s32.f32 %v4792_v15  ;;  %v6990_v6 = vpack.i.b16 %v6276_v4, %v6276_v4  ;;  %v3068_v22 = vrot.slane %v13834_v38, %v12393_v59 }
 0x280   : > { %v4275_v34 = vshra.s32 %v3052_v19, %v12383_v51  ;;  %v7546_v28 = vmul.bf16 %v13857_v31, %v5674_v8  ;;  %v4789_v23 = vand.u32 15, %v4277_v61  ;;  %v6284_v47 = vrot.slane %v5986_v50, %v12393_v59 }
 0x281   : > { %v5297_v13 = vcvt.s32.f32 %v4785_v2  ;;  %v5676_v25 = vpack.c.bf16 %v5304_v42, %v5300_v53  ;;  %v13882_v45 = vrot.slane %v6990_v6, %v12389_v57  ;;  %v4279_v1 = vshra.s32 %v3068_v22, %v12383_v51 }
 0x282   : > { %v4787_v17 = vand.u32 15, %v4275_v34  ;;  %7805 = vst [vmem:[%s12466_s18 + $0x448] sm:$0xff] %v7546_v28  ;;  %8062 = vmatprep.subr.bf16.mxu0 %v7546_v28  ;;  %v5301_v0 = vcvt.s32.f32 %v4789_v23  ;;  %v7004_v63 = vpack.i.b16 %v6284_v47, %v6284_v47  ;;  %v1474_v24 = vcombine.high %v13828_v18, %v13828_v18 }
 0x283   : > { %v1476_v55 = vcombine.high %v13834_v38, %v13834_v38  ;;  %v7548_v50 = vmul.bf16 %v13869_v10, %v5676_v25  ;;  %v4791_v37 = vand.u32 15, %v4279_v1  ;;  %v1501_v29 = vrot.slane %v11678_v44, %v12385_v52 }
 0x284   : > { %v5299_v14 = vcvt.s32.f32 %v4787_v17  ;;  %v5673_v5 = vpack.c.bf16 %v5301_v0, %v5297_v13  ;;  %v13893_v40 = vrot.slane %v7004_v63, %v12389_v57  ;;  %v3080_v33 = vrot.slane %v1474_v24, %v12391_v58 }
 0x285   : > { %v3096_v21 = vrot.slane %v1476_v55, %v12391_v58  ;;  %7807 = vst [vmem:[%s12466_s18 + $0x458] sm:$0xff] %v7548_v50  ;;  %8234 = vmatprep.subr.bf16.mxu1 %v7548_v50  ;;  %v5303_v18 = vcvt.s32.f32 %v4791_v37  ;;  %v3088_v38 = vrot.slane %v1474_v24, %v12395_v60  ;;  %v3104_v26 = vrot.slane %v1476_v55, %v12395_v60 }
 0x286   : > { %v3076_v32 = vrot.slane %v1474_v24, %v12389_v57  ;;  %v7545_v36 = vmul.bf16 %v13882_v45, %v5673_v5  ;;  %v4282_v27 = vshra.s32 %v3080_v33, %v12383_v51  ;;  %v3092_v43 = vrot.slane %v1476_v55, %v12389_v57 }
 0x287   : > { %v4286_v3 = vshra.s32 %v3096_v21, %v12383_v51  ;;  %v5675_v46 = vpack.c.bf16 %v5303_v18, %v5299_v14  ;;  %v4284_v35 = vshra.s32 %v3088_v38, %v12383_v51  ;;  %v4288_v16 = vshra.s32 %v3104_v26, %v12383_v51 }
 0x288   : > { %v4281_v48 = vshra.s32 %v3076_v32, %v12383_v51  ;;  %7804 = vst [vmem:[%s12466_s18 + $0x440] sm:$0xff] %v7545_v36  ;;  %8063 = vmatpush1.bf16.msra.mxu0 %v7545_v36  ;;  %v4794_v54 = vand.u32 15, %v4282_v27  ;;  %v4285_v11 = vshra.s32 %v3092_v43, %v12383_v51  ;;  %v3084_v9 = vrot.slane %v1474_v24, %v12393_v59 }
 0x289   : > { %v4798_v39 = vand.u32 15, %v4286_v3  ;;  %v7547_v15 = vmul.bf16 %v13893_v40, %v5675_v46  ;;  %v4796_v4 = vand.u32 15, %v4284_v35  ;;  %v4800_v19 = vand.u32 15, %v4288_v16 }
 0x28a   : > { %v4793_v8 = vand.u32 15, %v4281_v48  ;;  %v5306_v53 = vcvt.s32.f32 %v4794_v54  ;;  %v4797_v2 = vand.u32 15, %v4285_v11  ;;  %v3100_v42 = vrot.slane %v1476_v55, %v12393_v59 }
 0x28b   : > { %v5310_v61 = vcvt.s32.f32 %v4798_v39  ;;  %7806 = vst [vmem:[%s12466_s18 + $0x450] sm:$0xff] %v7547_v15  ;;  %8235 = vmatpush1.bf16.msra.mxu1 %v7547_v15  ;;  %v5308_v6 = vcvt.s32.f32 %v4796_v4  ;;  %v5312_v22 = vcvt.s32.f32 %v4800_v19  ;;  %v4283_v44 = vshra.s32 %v3084_v9, %v12383_v51 }
 0x28c   : > { %v5305_v34 = vcvt.s32.f32 %v4793_v8  ;;  %v5309_v23 = vcvt.s32.f32 %v4797_v2  ;;  %v4287_v13 = vshra.s32 %v3100_v42, %v12383_v51  ;;  %v1509_v47 = vcombine.low %v13756_v7, %v1501_v29 }
 0x28d   : > { %v5678_v28 = vpack.c.bf16 %v5310_v61, %v5306_v53  ;;  %v5680_v25 = vpack.c.bf16 %v5312_v22, %v5308_v6  ;;  %v4795_v1 = vand.u32 15, %v4283_v44  ;;  %v1510_v17 = vcombine.high %v13756_v7, %v1501_v29 }
 0x28e   : > { %v5888_v0 = vcombine.high %v13725_v62, %v13728_v49  ;;  %v5677_v24 = vpack.c.bf16 %v5309_v23, %v5305_v34  ;;  %v4799_v55 = vand.u32 15, %v4287_v13  ;;  %v1519_v50 = vrot.slane %v1509_v47, %v12385_v52 }
 0x28f   : > { %v7550_v63 = vmul.bf16 %v13857_v31, %v5678_v28  ;;  %v7552_v37 = vmul.bf16 %v13869_v10, %v5680_v25  ;;  %v5307_v14 = vcvt.s32.f32 %v4795_v1  ;;  %v1533_v5 = vrot.slane %v1510_v17, %v12385_v52 }
 0x290   : > { %v13925_v33 = vrot.slane %v5888_v0, %v12385_v52  ;;  %v7549_v7 = vmul.bf16 %v13882_v45, %v5677_v24  ;;  %v5311_v62 = vcvt.s32.f32 %v4799_v55  ;;  %v3112_v49 = vrot.slane %v1519_v50, %v12391_v58 }
 0x291   : > { %7809 = vst [vmem:[%s12466_s18 + $0x468] sm:$0xff] %v7550_v63  ;;  %8064 = vmatprep.subr.bf16.mxu0 %v7550_v63  ;;  %v3120_v31 = vrot.slane %v1519_v50, %v12395_v60  ;;  %7811 = vst [vmem:[%s12466_s18 + $0x478] sm:$0xff] %v7552_v37  ;;  %8236 = vmatprep.subr.bf16.mxu1 %v7552_v37  ;;  %v3128_v10 = vrot.slane %v1533_v5, %v12391_v58 }
 0x292   : > { %v11086_v29 = vpack.i.b16 %v13925_v33, %v13925_v33  ;;  %v3136_v21 = vrot.slane %v1533_v5, %v12395_v60  ;;  %v3108_v18 = vrot.slane %v1519_v50, %v12389_v57  ;;  %7808 = vst [vmem:[%s12466_s18 + $0x460] sm:$0xff] %v7549_v7  ;;  %8065 = vmatpush1.bf16.msra.mxu0 %v7549_v7 }
 0x293   : > { %v5679_v38 = vpack.c.bf16 %v5311_v62, %v5307_v14  ;;  %v4290_v45 = vshra.s32 %v3112_v49, %v12383_v51  ;;  %v4292_v26 = vshra.s32 %v3120_v31, %v12383_v51  ;;  %v3124_v32 = vrot.slane %v1533_v5, %v12389_v57 }
 0x294   : > { %v4294_v36 = vshra.s32 %v3128_v10, %v12383_v51  ;;  %v6296_v27 = vrot.slane %v11086_v29, %v12391_v58  ;;  %v4296_v3 = vshra.s32 %v3136_v21, %v12383_v51  ;;  %v6304_v43 = vrot.slane %v11086_v29, %v12395_v60 }
 0x295   : > { %v7551_v46 = vmul.bf16 %v13893_v40, %v5679_v38  ;;  %v4802_v35 = vand.u32 15, %v4290_v45  ;;  %v4804_v16 = vand.u32 15, %v4292_v26  ;;  %v4289_v48 = vshra.s32 %v3108_v18, %v12383_v51 }
 0x296   : > { %v4806_v54 = vand.u32 15, %v4294_v36  ;;  %v7025_v39 = vpack.i.b16 %v6296_v27, %v6296_v27  ;;  %v4808_v11 = vand.u32 15, %v4296_v3  ;;  %v7039_v9 = vpack.i.b16 %v6304_v43, %v6304_v43 }
 0x297   : > { %7810 = vst [vmem:[%s12466_s18 + $0x470] sm:$0xff] %v7551_v46  ;;  %8237 = vmatpush1.bf16.msra.mxu1 %v7551_v46  ;;  %v5314_v15 = vcvt.s32.f32 %v4802_v35  ;;  %v5316_v4 = vcvt.s32.f32 %v4804_v16  ;;  %v4293_v19 = vshra.s32 %v3124_v32, %v12383_v51  ;;  %v4801_v8 = vand.u32 15, %v4289_v48 }
 0x298   : > { %v5318_v53 = vcvt.s32.f32 %v4806_v54  ;;  %v13950_v61 = vrot.slane %v7025_v39, %v12389_v57  ;;  %v5320_v40 = vcvt.s32.f32 %v4808_v11  ;;  %v13953_v2 = vrot.slane %v7039_v9, %v12389_v57  ;;  %v11680_v54 = vld [vmem:[%s12364_s6 + $0x124] ss:$8 sps:$4 sm:$0xff]   ;;  %v11681_v39 = vld [vmem:[%s12364_s6 + $0x134] ss:$8 sps:$4 sm:$0xff]  }
 0x299   : > { %v4805_v42 = vand.u32 15, %v4293_v19  ;;  %v5313_v6 = vcvt.s32.f32 %v4801_v8  ;;  %v6292_v22 = vrot.slane %v11086_v29, %v12389_v57  ;;  %v3116_v34 = vrot.slane %v1519_v50, %v12393_v59 }
 0x29a   : > { %v5682_v44 = vpack.c.bf16 %v5318_v53, %v5314_v15  ;;  %v5684_v28 = vpack.c.bf16 %v5320_v40, %v5316_v4  ;;  %v3132_v23 = vrot.slane %v1533_v5, %v12393_v59  ;;  %v6300_v13 = vrot.slane %v11086_v29, %v12393_v59 }
 0x29b   : > { %v5317_v47 = vcvt.s32.f32 %v4805_v42  ;;  %v7018_v25 = vpack.i.b16 %v6292_v22, %v6292_v22  ;;  %v4291_v1 = vshra.s32 %v3116_v34, %v12383_v51  ;;  %v1541_v17 = vcombine.high %v1519_v50, %v1519_v50 }
 0x29c   : > { %v7554_v0 = vmul.bf16 %v13950_v61, %v5682_v44  ;;  %v7556_v63 = vmul.bf16 %v13953_v2, %v5684_v28  ;;  %v4295_v24 = vshra.s32 %v3132_v23, %v12383_v51  ;;  %v7032_v55 = vpack.i.b16 %v6300_v13, %v6300_v13 }
 0x29d   : > { %v5681_v37 = vpack.c.bf16 %v5317_v47, %v5313_v6  ;;  %v13964_v14 = vrot.slane %v7018_v25, %v12389_v57  ;;  %v4803_v7 = vand.u32 15, %v4291_v1  ;;  %v1543_v62 = vcombine.high %v1533_v5, %v1533_v5 }
 0x29e   : > { %7813 = vst [vmem:[%s12466_s18 + $0x488] sm:$0xff] %v7554_v0  ;;  %8066 = vmatprep.subr.bf16.mxu0 %v7554_v0  ;;  %7815 = vst [vmem:[%s12466_s18 + $0x498] sm:$0xff] %v7556_v63  ;;  %8238 = vmatprep.subr.bf16.mxu1 %v7556_v63  ;;  %v4807_v49 = vand.u32 15, %v4295_v24  ;;  %v13969_v50 = vrot.slane %v7032_v55, %v12389_v57  ;;  %v3144_v31 = vrot.slane %v1541_v17, %v12391_v58  ;;  %v11682_v0 = vld [vmem:[%s12364_s6 + $0x140] ss:$8 sps:$4 sm:$0xff]  }
 0x29f   : > { %v3152_v10 = vrot.slane %v1541_v17, %v12395_v60  ;;  %v7553_v29 = vmul.bf16 %v13964_v14, %v5681_v37  ;;  %v5315_v21 = vcvt.s32.f32 %v4803_v7  ;;  %v3160_v18 = vrot.slane %v1543_v62, %v12391_v58  ;;  %v11684_v63 = vld [vmem:[%s12364_s6 + $0x150] ss:$8 sps:$4 sm:$0xff]  }
 0x2a0   : > { %v3168_v5 = vrot.slane %v1543_v62, %v12395_v60  ;;  %v5319_v38 = vcvt.s32.f32 %v4807_v49  ;;  %v4298_v45 = vshra.s32 %v3144_v31, %v12383_v51  ;;  %v3140_v32 = vrot.slane %v1541_v17, %v12389_v57 }
 0x2a1   : > { %v4300_v26 = vshra.s32 %v3152_v10, %v12383_v51  ;;  %7812 = vst [vmem:[%s12466_s18 + $0x480] sm:$0xff] %v7553_v29  ;;  %8067 = vmatpush1.bf16.msra.mxu0 %v7553_v29  ;;  %v4302_v36 = vshra.s32 %v3160_v18, %v12383_v51  ;;  %v3156_v3 = vrot.slane %v1543_v62, %v12389_v57  ;;  %v5956_v7 = vunpack.i.h.s16 %v13925_v33 }
 0x2a2   : > { %v4304_v27 = vshra.s32 %v3168_v5, %v12383_v51  ;;  %v3148_v43 = vrot.slane %v1541_v17, %v12393_v59  ;;  %v5683_v46 = vpack.c.bf16 %v5319_v38, %v5315_v21  ;;  %v4810_v35 = vand.u32 15, %v4298_v45 }
 0x2a3   : > { %v4812_v16 = vand.u32 15, %v4300_v26  ;;  %v4297_v48 = vshra.s32 %v3140_v32, %v12383_v51  ;;  %v4814_v11 = vand.u32 15, %v4302_v36  ;;  %v4301_v15 = vshra.s32 %v3156_v3, %v12383_v51 }
 0x2a4   : > { %v4816_v9 = vand.u32 15, %v4304_v27  ;;  %v3164_v4 = vrot.slane %v1543_v62, %v12393_v59  ;;  %v7555_v19 = vmul.bf16 %v13969_v50, %v5683_v46  ;;  %v5322_v8 = vcvt.s32.f32 %v4810_v35 }
 0x2a5   : > { %v5324_v53 = vcvt.s32.f32 %v4812_v16  ;;  %v4809_v40 = vand.u32 15, %v4297_v48  ;;  %v5326_v42 = vcvt.s32.f32 %v4814_v11  ;;  %v4813_v22 = vand.u32 15, %v4301_v15 }
 0x2a6   : > { %v5328_v6 = vcvt.s32.f32 %v4816_v9  ;;  %v4299_v34 = vshra.s32 %v3148_v43, %v12383_v51  ;;  %7814 = vst [vmem:[%s12466_s18 + $0x490] sm:$0xff] %v7555_v19  ;;  %8239 = vmatpush1.bf16.msra.mxu1 %v7555_v19  ;;  %v4303_v28 = vshra.s32 %v3164_v4, %v12383_v51  ;;  %v1494_v23 = vrot.slane %v11680_v54, %v12385_v52 }
 0x2a7   : > { %v5321_v44 = vcvt.s32.f32 %v4809_v40  ;;  %v1508_v13 = vrot.slane %v11681_v39, %v12385_v52  ;;  %v5686_v47 = vpack.c.bf16 %v5326_v42, %v5322_v8  ;;  %v5325_v1 = vcvt.s32.f32 %v4813_v22 }
 0x2a8   : > { %v5688_v25 = vpack.c.bf16 %v5328_v6, %v5324_v53  ;;  %v4811_v17 = vand.u32 15, %v4299_v34  ;;  %v4815_v24 = vand.u32 15, %v4303_v28  ;;  %v5988_v5 = vpack.i.b16 %v5956_v7, %v5956_v7 }
 0x2a9   : > { %v1511_v55 = vcombine.low %v1494_v23, %v1508_v13  ;;  %v1512_v37 = vcombine.high %v1494_v23, %v1508_v13  ;;  %v7558_v62 = vmul.bf16 %v13950_v61, %v5686_v47  ;;  %v5685_v31 = vpack.c.bf16 %v5325_v1, %v5321_v44 }
 0x2aa   : > { %v7560_v49 = vmul.bf16 %v13953_v2, %v5688_v25  ;;  %v5323_v10 = vcvt.s32.f32 %v4811_v17  ;;  %v5327_v29 = vcvt.s32.f32 %v4815_v24  ;;  %v14008_v61 = vrot.slane %v11682_v0, %v12385_v52 }
 0x2ab   : > { %v1526_v21 = vrot.slane %v1511_v55, %v12385_v52  ;;  %v14002_v18 = vrot.slane %v1512_v37, %v12385_v52  ;;  %7817 = vst [vmem:[%s12466_s18 + $0x4a8] sm:$0xff] %v7558_v62  ;;  %8068 = vmatprep.subr.bf16.mxu0 %v7558_v62  ;;  %v7557_v38 = vmul.bf16 %v13964_v14, %v5685_v31 }
 0x2ac   : > { %7819 = vst [vmem:[%s12466_s18 + $0x4b8] sm:$0xff] %v7560_v49  ;;  %8240 = vmatprep.subr.bf16.mxu1 %v7560_v49  ;;  %v14011_v2 = vrot.slane %v11684_v63, %v12385_v52  ;;  %v5687_v45 = vpack.c.bf16 %v5327_v29, %v5323_v10  ;;  %v6312_v36 = vrot.slane %v5988_v5, %v12391_v58 }
 0x2ad   : > { %v3176_v26 = vrot.slane %v1526_v21, %v12391_v58  ;;  %v3192_v32 = vrot.slane %v14002_v18, %v12391_v58  ;;  %7816 = vst [vmem:[%s12466_s18 + $0x4a0] sm:$0xff] %v7557_v38  ;;  %8069 = vmatpush1.bf16.msra.mxu0 %v7557_v38  ;;  %v3184_v27 = vrot.slane %v1526_v21, %v12395_v60 }
 0x2ae   : > { %v3200_v14 = vrot.slane %v14002_v18, %v12395_v60  ;;  %v6320_v3 = vrot.slane %v5988_v5, %v12395_v60  ;;  %v3172_v43 = vrot.slane %v1526_v21, %v12389_v57  ;;  %v7559_v46 = vmul.bf16 %v13969_v50, %v5687_v45 }
 0x2af   : > { %v4306_v35 = vshra.s32 %v3176_v26, %v12383_v51  ;;  %v4310_v16 = vshra.s32 %v3192_v32, %v12383_v51  ;;  %v7053_v48 = vpack.i.b16 %v6312_v36, %v6312_v36  ;;  %v4308_v54 = vshra.s32 %v3184_v27, %v12383_v51 }
 0x2b0   : > { %v4312_v39 = vshra.s32 %v3200_v14, %v12383_v51  ;;  %v7067_v11 = vpack.i.b16 %v6320_v3, %v6320_v3  ;;  %v3188_v9 = vrot.slane %v14002_v18, %v12389_v57  ;;  %7818 = vst [vmem:[%s12466_s18 + $0x4b0] sm:$0xff] %v7559_v46  ;;  %8241 = vmatpush1.bf16.msra.mxu1 %v7559_v46 }
 0x2b1   : > { %v4818_v15 = vand.u32 15, %v4306_v35  ;;  %v4822_v4 = vand.u32 15, %v4310_v16  ;;  %v14032_v19 = vrot.slane %v7053_v48, %v12389_v57  ;;  %v4305_v50 = vshra.s32 %v3172_v43, %v12383_v51 }
 0x2b2   : > { %v4820_v8 = vand.u32 15, %v4308_v54  ;;  %v4824_v53 = vand.u32 15, %v4312_v39  ;;  %v14036_v40 = vrot.slane %v7067_v11, %v12389_v57  ;;  %v4309_v42 = vshra.s32 %v3188_v9, %v12383_v51 }
 0x2b3   : > { %v5330_v6 = vcvt.s32.f32 %v4818_v15  ;;  %v5334_v22 = vcvt.s32.f32 %v4822_v4  ;;  %v4817_v34 = vand.u32 15, %v4305_v50  ;;  %v6308_v44 = vrot.slane %v5988_v5, %v12389_v57 }
 0x2b4   : > { %v5332_v28 = vcvt.s32.f32 %v4820_v8  ;;  %v5336_v23 = vcvt.s32.f32 %v4824_v53  ;;  %v4821_v13 = vand.u32 15, %v4309_v42  ;;  %v3180_v47 = vrot.slane %v1526_v21, %v12393_v59 }
 0x2b5   : > { %v5690_v25 = vpack.c.bf16 %v5334_v22, %v5330_v6  ;;  %v5329_v1 = vcvt.s32.f32 %v4817_v34  ;;  %v7046_v17 = vpack.i.b16 %v6308_v44, %v6308_v44  ;;  %v3196_v0 = vrot.slane %v14002_v18, %v12393_v59 }
 0x2b6   : > { %v5692_v63 = vpack.c.bf16 %v5336_v23, %v5332_v28  ;;  %v5333_v24 = vcvt.s32.f32 %v4821_v13  ;;  %v4307_v55 = vshra.s32 %v3180_v47, %v12383_v51  ;;  %v6316_v37 = vrot.slane %v5988_v5, %v12393_v59 }
 0x2b7   : > { %v7562_v7 = vmul.bf16 %v14032_v19, %v5690_v25  ;;  %v14047_v62 = vrot.slane %v7046_v17, %v12389_v57  ;;  %v4311_v49 = vshra.s32 %v3196_v0, %v12383_v51  ;;  %v1542_v31 = vcombine.high %v1526_v21, %v1526_v21 }
 0x2b8   : > { %v7564_v10 = vmul.bf16 %v14036_v40, %v5692_v63  ;;  %v5689_v29 = vpack.c.bf16 %v5333_v24, %v5329_v1  ;;  %v4819_v38 = vand.u32 15, %v4307_v55  ;;  %v7060_v45 = vpack.i.b16 %v6316_v37, %v6316_v37 }
 0x2b9   : > { %7821 = vst [vmem:[%s12466_s18 + $0x4c8] sm:$0xff] %v7562_v7  ;;  %8070 = vmatprep.subr.bf16.mxu0 %v7562_v7  ;;  %v4823_v26 = vand.u32 15, %v4311_v49  ;;  %v1544_v5 = vcombine.high %v14002_v18, %v14002_v18  ;;  %v3208_v32 = vrot.slane %v1542_v31, %v12391_v58  ;;  %v3216_v36 = vrot.slane %v1542_v31, %v12395_v60 }
 0x2ba   : > { %7823 = vst [vmem:[%s12466_s18 + $0x4d8] sm:$0xff] %v7564_v10  ;;  %8242 = vmatprep.subr.bf16.mxu1 %v7564_v10  ;;  %v7561_v21 = vmul.bf16 %v14047_v62, %v5689_v29  ;;  %v5331_v27 = vcvt.s32.f32 %v4819_v38  ;;  %v14059_v14 = vrot.slane %v7060_v45, %v12389_v57  ;;  %v3204_v3 = vrot.slane %v1542_v31, %v12389_v57 }
 0x2bb   : > { %v5335_v43 = vcvt.s32.f32 %v4823_v26  ;;  %v3224_v46 = vrot.slane %v1544_v5, %v12391_v58  ;;  %v4314_v35 = vshra.s32 %v3208_v32, %v12383_v51  ;;  %v3232_v18 = vrot.slane %v1544_v5, %v12395_v60 }
 0x2bc   : > { %7820 = vst [vmem:[%s12466_s18 + $0x4c0] sm:$0xff] %v7561_v21  ;;  %8071 = vmatpush1.bf16.msra.mxu0 %v7561_v21  ;;  %v4316_v16 = vshra.s32 %v3216_v36, %v12383_v51  ;;  %v3220_v48 = vrot.slane %v1544_v5, %v12389_v57  ;;  %v4313_v54 = vshra.s32 %v3204_v3, %v12383_v51 }
 0x2bd   : > { %v3212_v39 = vrot.slane %v1542_v31, %v12393_v59  ;;  %v5691_v11 = vpack.c.bf16 %v5335_v43, %v5331_v27  ;;  %v4318_v9 = vshra.s32 %v3224_v46, %v12383_v51  ;;  %v4826_v15 = vand.u32 15, %v4314_v35 }
 0x2be   : > { %v4320_v4 = vshra.s32 %v3232_v18, %v12383_v51  ;;  %v4828_v50 = vand.u32 15, %v4316_v16  ;;  %v4317_v8 = vshra.s32 %v3220_v48, %v12383_v51  ;;  %v4825_v53 = vand.u32 15, %v4313_v54 }
 0x2bf   : > { %v3228_v42 = vrot.slane %v1544_v5, %v12393_v59  ;;  %v7563_v6 = vmul.bf16 %v14059_v14, %v5691_v11  ;;  %v4830_v22 = vand.u32 15, %v4318_v9  ;;  %v5338_v34 = vcvt.s32.f32 %v4826_v15 }
 0x2c0   : > { %v4832_v44 = vand.u32 15, %v4320_v4  ;;  %v5340_v28 = vcvt.s32.f32 %v4828_v50  ;;  %v4829_v23 = vand.u32 15, %v4317_v8  ;;  %v5337_v13 = vcvt.s32.f32 %v4825_v53 }
 0x2c1   : > { %v4315_v47 = vshra.s32 %v3212_v39, %v12383_v51  ;;  %7822 = vst [vmem:[%s12466_s18 + $0x4d0] sm:$0xff] %v7563_v6  ;;  %8243 = vmatpush1.bf16.msra.mxu1 %v7563_v6  ;;  %v5342_v25 = vcvt.s32.f32 %v4830_v22  ;;  %v4319_v17 = vshra.s32 %v3228_v42, %v12383_v51  ;;  %v1577_v0 = vcombine.low %v14008_v61, %v14011_v2 }
 0x2c2   : > { %v5344_v1 = vcvt.s32.f32 %v4832_v44  ;;  %v5341_v63 = vcvt.s32.f32 %v4829_v23  ;;  %v1578_v55 = vcombine.high %v14008_v61, %v14011_v2  ;;  %v14084_v37 = vcombine.high %v13747_v30, %v13747_v30 }
 0x2c3   : > { %v4827_v24 = vand.u32 15, %v4315_v47  ;;  %v5694_v7 = vpack.c.bf16 %v5342_v25, %v5338_v34  ;;  %v4831_v31 = vand.u32 15, %v4319_v17  ;;  %v14087_v10 = vrot.slane %v1577_v0, %v12385_v52  ;;  %v11686_v0 = vld [vmem:[%s12364_s6 + $0x144] ss:$8 sps:$4 sm:$0xff]  }
 0x2c4   : > { %v5696_v49 = vpack.c.bf16 %v5344_v1, %v5340_v28  ;;  %v5693_v29 = vpack.c.bf16 %v5341_v63, %v5337_v13  ;;  %v14090_v45 = vrot.slane %v1578_v55, %v12385_v52  ;;  %v11087_v61 = vpack.i.b16 %v14084_v37, %v14084_v37 }
 0x2c5   : > { %v5339_v38 = vcvt.s32.f32 %v4827_v24  ;;  %v7566_v2 = vmul.bf16 %v14032_v19, %v5694_v7  ;;  %v5343_v26 = vcvt.s32.f32 %v4831_v31  ;;  %v3240_v5 = vrot.slane %v14087_v10, %v12391_v58 }
 0x2c6   : > { %v7568_v30 = vmul.bf16 %v14036_v40, %v5696_v49  ;;  %v7565_v32 = vmul.bf16 %v14047_v62, %v5693_v29  ;;  %v3256_v36 = vrot.slane %v14090_v45, %v12391_v58  ;;  %v6328_v21 = vrot.slane %v11087_v61, %v12391_v58 }
 0x2c7   : > { %v3248_v27 = vrot.slane %v14087_v10, %v12395_v60  ;;  %7825 = vst [vmem:[%s12466_s18 + $0x4e8] sm:$0xff] %v7566_v2  ;;  %8072 = vmatprep.subr.bf16.mxu0 %v7566_v2  ;;  %v5695_v19 = vpack.c.bf16 %v5343_v26, %v5339_v38  ;;  %v4322_v40 = vshra.s32 %v3240_v5, %v12383_v51  ;;  %v5958_v62 = vunpack.i.h.s16 %v14084_v37 }
 0x2c8   : > { %7827 = vst [vmem:[%s12466_s18 + $0x4f8] sm:$0xff] %v7568_v30  ;;  %8244 = vmatprep.subr.bf16.mxu1 %v7568_v30  ;;  %v3264_v3 = vrot.slane %v14090_v45, %v12395_v60  ;;  %7824 = vst [vmem:[%s12466_s18 + $0x4e0] sm:$0xff] %v7565_v32  ;;  %8073 = vmatpush1.bf16.msra.mxu0 %v7565_v32  ;;  %v4326_v43 = vshra.s32 %v3256_v36, %v12383_v51 }
 0x2c9   : > { %v7081_v46 = vpack.i.b16 %v6328_v21, %v6328_v21  ;;  %v4324_v35 = vshra.s32 %v3248_v27, %v12383_v51  ;;  %v6336_v18 = vrot.slane %v11087_v61, %v12395_v60  ;;  %v7567_v16 = vmul.bf16 %v14059_v14, %v5695_v19 }
 0x2ca   : > { %v4834_v48 = vand.u32 15, %v4322_v40  ;;  %v4328_v54 = vshra.s32 %v3264_v3, %v12383_v51  ;;  %v3236_v39 = vrot.slane %v14087_v10, %v12389_v57  ;;  %v4838_v11 = vand.u32 15, %v4326_v43 }
 0x2cb   : > { %v14119_v9 = vrot.slane %v7081_v46, %v12389_v57  ;;  %v4836_v15 = vand.u32 15, %v4324_v35  ;;  %v7095_v4 = vpack.i.b16 %v6336_v18, %v6336_v18  ;;  %7826 = vst [vmem:[%s12466_s18 + $0x4f0] sm:$0xff] %v7567_v16  ;;  %8245 = vmatpush1.bf16.msra.mxu1 %v7567_v16  ;;  %v3252_v14 = vrot.slane %v14090_v45, %v12389_v57 }
 0x2cc   : > { %v5346_v50 = vcvt.s32.f32 %v4834_v48  ;;  %v4840_v8 = vand.u32 15, %v4328_v54  ;;  %v4321_v53 = vshra.s32 %v3236_v39, %v12383_v51  ;;  %v5350_v42 = vcvt.s32.f32 %v4838_v11 }
 0x2cd   : > { %v5348_v6 = vcvt.s32.f32 %v4836_v15  ;;  %v14126_v22 = vrot.slane %v7095_v4, %v12389_v57  ;;  %v6324_v34 = vrot.slane %v11087_v61, %v12389_v57  ;;  %v4325_v28 = vshra.s32 %v3252_v14, %v12383_v51 }
 0x2ce   : > { %v5352_v44 = vcvt.s32.f32 %v4840_v8  ;;  %v4833_v23 = vand.u32 15, %v4321_v53  ;;  %v3244_v13 = vrot.slane %v14087_v10, %v12393_v59  ;;  %v5698_v47 = vpack.c.bf16 %v5350_v42, %v5346_v50  ;;  %v11687_v53 = vld [vmem:[%s12364_s6 + $0x154] ss:$8 sps:$4 sm:$0xff]  }
 0x2cf   : > { %v7074_v25 = vpack.i.b16 %v6324_v34, %v6324_v34  ;;  %v3260_v1 = vrot.slane %v14090_v45, %v12393_v59  ;;  %v6332_v17 = vrot.slane %v11087_v61, %v12393_v59  ;;  %v4837_v24 = vand.u32 15, %v4325_v28  ;;  %v11688_v28 = vld [vmem:[%s12364_s6 + $0x160] ss:$8 sps:$4 sm:$0xff]  }
 0x2d0   : > { %v5700_v63 = vpack.c.bf16 %v5352_v44, %v5348_v6  ;;  %v5345_v55 = vcvt.s32.f32 %v4833_v23  ;;  %v4323_v7 = vshra.s32 %v3244_v13, %v12383_v51  ;;  %v7570_v49 = vmul.bf16 %v14119_v9, %v5698_v47 }
 0x2d1   : > { %v14139_v31 = vrot.slane %v7074_v25, %v12389_v57  ;;  %v4327_v29 = vshra.s32 %v3260_v1, %v12383_v51  ;;  %v7088_v38 = vpack.i.b16 %v6332_v17, %v6332_v17  ;;  %v5349_v30 = vcvt.s32.f32 %v4837_v24 }
 0x2d2   : > { %v7572_v2 = vmul.bf16 %v14126_v22, %v5700_v63  ;;  %v4835_v26 = vand.u32 15, %v4323_v7  ;;  %v1609_v61 = vcombine.high %v14087_v10, %v14087_v10  ;;  %7829 = vst [vmem:[%s12466_s18 + $0x508] sm:$0xff] %v7570_v49  ;;  %8074 = vmatprep.subr.bf16.mxu0 %v7570_v49  ;;  %v1611_v36 = vcombine.high %v14090_v45, %v14090_v45 }
 0x2d3   : > { %v4839_v5 = vand.u32 15, %v4327_v29  ;;  %v14147_v32 = vrot.slane %v7088_v38, %v12389_v57  ;;  %v1562_v21 = vrot.slane %v11686_v0, %v12385_v52  ;;  %v5697_v27 = vpack.c.bf16 %v5349_v30, %v5345_v55 }
 0x2d4   : > { %7831 = vst [vmem:[%s12466_s18 + $0x518] sm:$0xff] %v7572_v2  ;;  %8246 = vmatprep.subr.bf16.mxu1 %v7572_v2  ;;  %v5347_v19 = vcvt.s32.f32 %v4835_v26  ;;  %v3272_v40 = vrot.slane %v1609_v61, %v12391_v58  ;;  %v3280_v10 = vrot.slane %v1609_v61, %v12395_v60  ;;  %v3288_v43 = vrot.slane %v1611_v36, %v12391_v58 }
 0x2d5   : > { %v5351_v3 = vcvt.s32.f32 %v4839_v5  ;;  %v3296_v46 = vrot.slane %v1611_v36, %v12395_v60  ;;  %v3268_v35 = vrot.slane %v1609_v61, %v12389_v57  ;;  %v7569_v45 = vmul.bf16 %v14139_v31, %v5697_v27 }
 0x2d6   : > { %v4330_v18 = vshra.s32 %v3272_v40, %v12383_v51  ;;  %v4332_v16 = vshra.s32 %v3280_v10, %v12383_v51  ;;  %v3284_v48 = vrot.slane %v1611_v36, %v12389_v57  ;;  %v4334_v39 = vshra.s32 %v3288_v43, %v12383_v51 }
 0x2d7   : > { %v5699_v54 = vpack.c.bf16 %v5351_v3, %v5347_v19  ;;  %v4336_v11 = vshra.s32 %v3296_v46, %v12383_v51  ;;  %v4329_v15 = vshra.s32 %v3268_v35, %v12383_v51  ;;  %7828 = vst [vmem:[%s12466_s18 + $0x500] sm:$0xff] %v7569_v45  ;;  %8075 = vmatpush1.bf16.msra.mxu0 %v7569_v45 }
 0x2d8   : > { %v4842_v4 = vand.u32 15, %v4330_v18  ;;  %v4844_v50 = vand.u32 15, %v4332_v16  ;;  %v4333_v8 = vshra.s32 %v3284_v48, %v12383_v51  ;;  %v3276_v14 = vrot.slane %v1609_v61, %v12393_v59 }
 0x2d9   : > { %v7571_v42 = vmul.bf16 %v14147_v32, %v5699_v54  ;;  %v4846_v6 = vand.u32 15, %v4334_v39  ;;  %v4848_v34 = vand.u32 15, %v4336_v11  ;;  %v4841_v44 = vand.u32 15, %v4329_v15 }
 0x2da   : > { %v5354_v23 = vcvt.s32.f32 %v4842_v4  ;;  %v5356_v13 = vcvt.s32.f32 %v4844_v50  ;;  %v4845_v47 = vand.u32 15, %v4333_v8  ;;  %v3292_v25 = vrot.slane %v1611_v36, %v12393_v59 }
 0x2db   : > { %7830 = vst [vmem:[%s12466_s18 + $0x510] sm:$0xff] %v7571_v42  ;;  %8247 = vmatpush1.bf16.msra.mxu1 %v7571_v42  ;;  %v5358_v1 = vcvt.s32.f32 %v4846_v6  ;;  %v5360_v17 = vcvt.s32.f32 %v4848_v34  ;;  %v5353_v0 = vcvt.s32.f32 %v4841_v44  ;;  %v4331_v63 = vshra.s32 %v3276_v14, %v12383_v51 }
 0x2dc   : > { %v5357_v24 = vcvt.s32.f32 %v4845_v47  ;;  %v4335_v55 = vshra.s32 %v3292_v25, %v12383_v51  ;;  %v1576_v7 = vrot.slane %v11687_v53, %v12385_v52  ;;  %v5990_v49 = vpack.i.b16 %v5958_v62, %v5958_v62 }
 0x2dd   : > { %v5702_v29 = vpack.c.bf16 %v5358_v1, %v5354_v23  ;;  %v5704_v38 = vpack.c.bf16 %v5360_v17, %v5356_v13  ;;  %v4843_v2 = vand.u32 15, %v4331_v63  ;;  %v14180_v30 = vrot.slane %v11688_v28, %v12385_v52 }
 0x2de   : > { %v5701_v26 = vpack.c.bf16 %v5357_v24, %v5353_v0  ;;  %v4847_v61 = vand.u32 15, %v4335_v55  ;;  %v1579_v5 = vcombine.low %v1562_v21, %v1576_v7  ;;  %v1580_v36 = vcombine.high %v1562_v21, %v1576_v7 }
 0x2df   : > { %v7574_v27 = vmul.bf16 %v14119_v9, %v5702_v29  ;;  %v7576_v19 = vmul.bf16 %v14126_v22, %v5704_v38  ;;  %v5355_v37 = vcvt.s32.f32 %v4843_v2  ;;  %v6344_v62 = vrot.slane %v5990_v49, %v12391_v58 }
 0x2e0   : > { %v7573_v40 = vmul.bf16 %v14139_v31, %v5701_v26  ;;  %v5359_v10 = vcvt.s32.f32 %v4847_v61  ;;  %v1594_v3 = vrot.slane %v1579_v5, %v12385_v52  ;;  %v1608_v43 = vrot.slane %v1580_v36, %v12385_v52 }
 0x2e1   : > { %7833 = vst [vmem:[%s12466_s18 + $0x528] sm:$0xff] %v7574_v27  ;;  %8076 = vmatprep.subr.bf16.mxu0 %v7574_v27  ;;  %7835 = vst [vmem:[%s12466_s18 + $0x538] sm:$0xff] %v7576_v19  ;;  %8248 = vmatprep.subr.bf16.mxu1 %v7576_v19  ;;  %v7109_v21 = vpack.i.b16 %v6344_v62, %v6344_v62  ;;  %v6352_v46 = vrot.slane %v5990_v49, %v12395_v60 }
 0x2e2   : > { %v6340_v9 = vrot.slane %v5990_v49, %v12389_v57  ;;  %7832 = vst [vmem:[%s12466_s18 + $0x520] sm:$0xff] %v7573_v40  ;;  %8077 = vmatpush1.bf16.msra.mxu0 %v7573_v40  ;;  %v5703_v22 = vpack.c.bf16 %v5359_v10, %v5355_v37  ;;  %v3304_v31 = vrot.slane %v1594_v3, %v12391_v58 }
 0x2e3   : > { %v3320_v35 = vrot.slane %v1608_v43, %v12391_v58  ;;  %v3312_v45 = vrot.slane %v1594_v3, %v12395_v60  ;;  %v14197_v18 = vrot.slane %v7109_v21, %v12389_v57  ;;  %v3328_v16 = vrot.slane %v1608_v43, %v12395_v60 }
 0x2e4   : > { %v7123_v48 = vpack.i.b16 %v6352_v46, %v6352_v46  ;;  %v3300_v54 = vrot.slane %v1594_v3, %v12389_v57  ;;  %v7575_v39 = vmul.bf16 %v14147_v32, %v5703_v22  ;;  %v4338_v11 = vshra.s32 %v3304_v31, %v12383_v51 }
 0x2e5   : > { %v4342_v15 = vshra.s32 %v3320_v35, %v12383_v51  ;;  %v4340_v4 = vshra.s32 %v3312_v45, %v12383_v51  ;;  %v4344_v50 = vshra.s32 %v3328_v16, %v12383_v51  ;;  %v3316_v14 = vrot.slane %v1608_v43, %v12389_v57 }
 0x2e6   : > { %v14207_v8 = vrot.slane %v7123_v48, %v12389_v57  ;;  %v4337_v53 = vshra.s32 %v3300_v54, %v12383_v51  ;;  %7834 = vst [vmem:[%s12466_s18 + $0x530] sm:$0xff] %v7575_v39  ;;  %8249 = vmatpush1.bf16.msra.mxu1 %v7575_v39  ;;  %v4850_v42 = vand.u32 15, %v4338_v11  ;;  %v7102_v34 = vpack.i.b16 %v6340_v9, %v6340_v9 }
 0x2e7   : > { %v4854_v6 = vand.u32 15, %v4342_v15  ;;  %v4852_v32 = vand.u32 15, %v4340_v4  ;;  %v4856_v44 = vand.u32 15, %v4344_v50  ;;  %v4341_v28 = vshra.s32 %v3316_v14, %v12383_v51  ;;  %v11690_v14 = vld [vmem:[%s12364_s6 + $0x170] ss:$8 sps:$4 sm:$0xff]  }
 0x2e8   : > { %v4849_v23 = vand.u32 15, %v4337_v53  ;;  %v3308_v13 = vrot.slane %v1594_v3, %v12393_v59  ;;  %v5362_v47 = vcvt.s32.f32 %v4850_v42  ;;  %v14215_v17 = vrot.slane %v7102_v34, %v12389_v57 }
 0x2e9   : > { %v5366_v25 = vcvt.s32.f32 %v4854_v6  ;;  %v5364_v1 = vcvt.s32.f32 %v4852_v32  ;;  %v5368_v0 = vcvt.s32.f32 %v4856_v44  ;;  %v4853_v63 = vand.u32 15, %v4341_v28 }
 0x2ea   : > { %v5361_v24 = vcvt.s32.f32 %v4849_v23  ;;  %v3324_v55 = vrot.slane %v1608_v43, %v12393_v59  ;;  %v4339_v29 = vshra.s32 %v3308_v13, %v12383_v51  ;;  %v6348_v38 = vrot.slane %v5990_v49, %v12393_v59 }
 0x2eb   : > { %v5706_v7 = vpack.c.bf16 %v5366_v25, %v5362_v47  ;;  %v1610_v2 = vcombine.high %v1594_v3, %v1594_v3  ;;  %v5708_v26 = vpack.c.bf16 %v5368_v0, %v5364_v1  ;;  %v5365_v61 = vcvt.s32.f32 %v4853_v63 }
 0x2ec   : > { %v4343_v5 = vshra.s32 %v3324_v55, %v12383_v51  ;;  %v1612_v36 = vcombine.high %v1608_v43, %v1608_v43  ;;  %v4851_v19 = vand.u32 15, %v4339_v29  ;;  %v7116_v37 = vpack.i.b16 %v6348_v38, %v6348_v38 }
 0x2ed   : > { %v7578_v27 = vmul.bf16 %v14197_v18, %v5706_v7  ;;  %v3336_v62 = vrot.slane %v1610_v2, %v12391_v58  ;;  %v7580_v40 = vmul.bf16 %v14207_v8, %v5708_v26  ;;  %v5705_v10 = vpack.c.bf16 %v5365_v61, %v5361_v24  ;;  %v11692_v7 = vld [vmem:[%s12364_s6 + $0x164] ss:$8 sps:$4 sm:$0xff]  }
 0x2ee   : > { %v4855_v21 = vand.u32 15, %v4343_v5  ;;  %v3352_v46 = vrot.slane %v1612_v36, %v12391_v58  ;;  %v5363_v49 = vcvt.s32.f32 %v4851_v19  ;;  %v14227_v3 = vrot.slane %v7116_v37, %v12389_v57 }
 0x2ef   : > { %7837 = vst [vmem:[%s12466_s18 + $0x548] sm:$0xff] %v7578_v27  ;;  %8078 = vmatprep.subr.bf16.mxu0 %v7578_v27  ;;  %v4346_v43 = vshra.s32 %v3336_v62, %v12383_v51  ;;  %v3344_v9 = vrot.slane %v1610_v2, %v12395_v60  ;;  %7839 = vst [vmem:[%s12466_s18 + $0x558] sm:$0xff] %v7580_v40  ;;  %8250 = vmatprep.subr.bf16.mxu1 %v7580_v40 }
 0x2f0   : > { %v7577_v22 = vmul.bf16 %v14215_v17, %v5705_v10  ;;  %v5367_v31 = vcvt.s32.f32 %v4855_v21  ;;  %v4350_v35 = vshra.s32 %v3352_v46, %v12383_v51  ;;  %v3360_v45 = vrot.slane %v1612_v36, %v12395_v60 }
 0x2f1   : > { %v4858_v16 = vand.u32 15, %v4346_v43  ;;  %v4348_v48 = vshra.s32 %v3344_v9, %v12383_v51  ;;  %v3332_v54 = vrot.slane %v1610_v2, %v12389_v57  ;;  %v3348_v39 = vrot.slane %v1612_v36, %v12389_v57 }
 0x2f2   : > { %7836 = vst [vmem:[%s12466_s18 + $0x540] sm:$0xff] %v7577_v22  ;;  %8079 = vmatpush1.bf16.msra.mxu0 %v7577_v22  ;;  %v5707_v11 = vpack.c.bf16 %v5367_v31, %v5363_v49  ;;  %v4862_v15 = vand.u32 15, %v4350_v35  ;;  %v4352_v4 = vshra.s32 %v3360_v45, %v12383_v51  ;;  %v3340_v50 = vrot.slane %v1610_v2, %v12393_v59 }
 0x2f3   : > { %v5370_v53 = vcvt.s32.f32 %v4858_v16  ;;  %v4860_v42 = vand.u32 15, %v4348_v48  ;;  %v4345_v6 = vshra.s32 %v3332_v54, %v12383_v51  ;;  %v4349_v32 = vshra.s32 %v3348_v39, %v12383_v51 }
 0x2f4   : > { %v7579_v34 = vmul.bf16 %v14227_v3, %v5707_v11  ;;  %v5374_v44 = vcvt.s32.f32 %v4862_v15  ;;  %v4864_v28 = vand.u32 15, %v4352_v4  ;;  %v3356_v23 = vrot.slane %v1612_v36, %v12393_v59 }
 0x2f5   : > { %v5372_v13 = vcvt.s32.f32 %v4860_v42  ;;  %v4857_v47 = vand.u32 15, %v4345_v6  ;;  %v4861_v25 = vand.u32 15, %v4349_v32  ;;  %v4347_v1 = vshra.s32 %v3340_v50, %v12383_v51 }
 0x2f6   : > { %7838 = vst [vmem:[%s12466_s18 + $0x550] sm:$0xff] %v7579_v34  ;;  %8251 = vmatpush1.bf16.msra.mxu1 %v7579_v34  ;;  %v5710_v0 = vpack.c.bf16 %v5374_v44, %v5370_v53  ;;  %v5376_v63 = vcvt.s32.f32 %v4864_v28  ;;  %v4351_v24 = vshra.s32 %v3356_v23, %v12383_v51  ;;  %v1637_v55 = vrot.slane %v11690_v14, %v12385_v52 }
 0x2f7   : > { %v5369_v29 = vcvt.s32.f32 %v4857_v47  ;;  %v5373_v38 = vcvt.s32.f32 %v4861_v25  ;;  %v4859_v2 = vand.u32 15, %v4347_v1  ;;  %v14253_v26 = vcombine.high %v13925_v33, %v13925_v33 }
 0x2f8   : > { %v7582_v61 = vmul.bf16 %v14197_v18, %v5710_v0  ;;  %v5712_v5 = vpack.c.bf16 %v5376_v63, %v5372_v13  ;;  %v4863_v36 = vand.u32 15, %v4351_v24  ;;  %v1645_v27 = vcombine.low %v14180_v30, %v1637_v55 }
 0x2f9   : > { %v5709_v19 = vpack.c.bf16 %v5373_v38, %v5369_v29  ;;  %v5371_v37 = vcvt.s32.f32 %v4859_v2  ;;  %v1646_v62 = vcombine.high %v14180_v30, %v1637_v55  ;;  %v11088_v40 = vpack.i.b16 %v14253_v26, %v14253_v26 }
 0x2fa   : > { %7841 = vst [vmem:[%s12466_s18 + $0x568] sm:$0xff] %v7582_v61  ;;  %8080 = vmatprep.subr.bf16.mxu0 %v7582_v61  ;;  %v7584_v33 = vmul.bf16 %v14207_v8, %v5712_v5  ;;  %v5375_v10 = vcvt.s32.f32 %v4863_v36  ;;  %v1655_v18 = vrot.slane %v1645_v27, %v12385_v52  ;;  %v14264_v21 = vrot.slane %v11692_v7, %v12385_v52 }
 0x2fb   : > { %v7581_v46 = vmul.bf16 %v14215_v17, %v5709_v19  ;;  %v1669_v49 = vrot.slane %v1646_v62, %v12385_v52  ;;  %v6360_v30 = vrot.slane %v11088_v40, %v12391_v58  ;;  %v6368_v43 = vrot.slane %v11088_v40, %v12395_v60 }
 0x2fc   : > { %7843 = vst [vmem:[%s12466_s18 + $0x578] sm:$0xff] %v7584_v33  ;;  %8252 = vmatprep.subr.bf16.mxu1 %v7584_v33  ;;  %v5711_v9 = vpack.c.bf16 %v5375_v10, %v5371_v37  ;;  %v3368_v22 = vrot.slane %v1655_v18, %v12391_v58  ;;  %v3376_v8 = vrot.slane %v1655_v18, %v12395_v60 }
 0x2fd   : > { %v3364_v31 = vrot.slane %v1655_v18, %v12389_v57  ;;  %7840 = vst [vmem:[%s12466_s18 + $0x560] sm:$0xff] %v7581_v46  ;;  %8081 = vmatpush1.bf16.msra.mxu0 %v7581_v46  ;;  %v3384_v17 = vrot.slane %v1669_v49, %v12391_v58  ;;  %v7137_v35 = vpack.i.b16 %v6360_v30, %v6360_v30 }
 0x2fe   : > { %v3392_v45 = vrot.slane %v1669_v49, %v12395_v60  ;;  %v7151_v16 = vpack.i.b16 %v6368_v43, %v6368_v43  ;;  %v7583_v48 = vmul.bf16 %v14227_v3, %v5711_v9  ;;  %v4354_v54 = vshra.s32 %v3368_v22, %v12383_v51 }
 0x2ff   : > { %v4356_v39 = vshra.s32 %v3376_v8, %v12383_v51  ;;  %v3380_v11 = vrot.slane %v1669_v49, %v12389_v57  ;;  %v4358_v15 = vshra.s32 %v3384_v17, %v12383_v51  ;;  %v14283_v4 = vrot.slane %v7137_v35, %v12389_v57 }
 0x300   : > { %v4360_v50 = vshra.s32 %v3392_v45, %v12383_v51  ;;  %v14287_v14 = vrot.slane %v7151_v16, %v12389_v57  ;;  %7842 = vst [vmem:[%s12466_s18 + $0x570] sm:$0xff] %v7583_v48  ;;  %8253 = vmatpush1.bf16.msra.mxu1 %v7583_v48  ;;  %v4866_v53 = vand.u32 15, %v4354_v54  ;;  %v4353_v42 = vshra.s32 %v3364_v31, %v12383_v51 }
 0x301   : > { %v4868_v3 = vand.u32 15, %v4356_v39  ;;  %v4357_v6 = vshra.s32 %v3380_v11, %v12383_v51  ;;  %v4870_v32 = vand.u32 15, %v4358_v15  ;;  %v6356_v44 = vrot.slane %v11088_v40, %v12389_v57 }
 0x302   : > { %v4872_v34 = vand.u32 15, %v4360_v50  ;;  %v3372_v28 = vrot.slane %v1655_v18, %v12393_v59  ;;  %v5378_v23 = vcvt.s32.f32 %v4866_v53  ;;  %v4865_v47 = vand.u32 15, %v4353_v42  ;;  %v11693_v42 = vld [vmem:[%s12364_s6 + $0x174] ss:$8 sps:$4 sm:$0xff]  }
 0x303   : > { %v5380_v13 = vcvt.s32.f32 %v4868_v3  ;;  %v4869_v25 = vand.u32 15, %v4357_v6  ;;  %v5382_v1 = vcvt.s32.f32 %v4870_v32  ;;  %v7130_v63 = vpack.i.b16 %v6356_v44, %v6356_v44 }
 0x304   : > { %v5384_v0 = vcvt.s32.f32 %v4872_v34  ;;  %v3388_v24 = vrot.slane %v1669_v49, %v12393_v59  ;;  %v5377_v55 = vcvt.s32.f32 %v4865_v47  ;;  %v4355_v29 = vshra.s32 %v3372_v28, %v12383_v51 }
 0x305   : > { %v5381_v7 = vcvt.s32.f32 %v4869_v25  ;;  %v6364_v38 = vrot.slane %v11088_v40, %v12393_v59  ;;  %v5714_v2 = vpack.c.bf16 %v5382_v1, %v5378_v23  ;;  %v14298_v5 = vrot.slane %v7130_v63, %v12389_v57 }
 0x306   : > { %v5716_v61 = vpack.c.bf16 %v5384_v0, %v5380_v13  ;;  %v4359_v36 = vshra.s32 %v3388_v24, %v12383_v51  ;;  %v4867_v19 = vand.u32 15, %v4355_v29  ;;  %v1677_v62 = vcombine.high %v1655_v18, %v1655_v18 }
 0x307   : > { %v5713_v27 = vpack.c.bf16 %v5381_v7, %v5377_v55  ;;  %v7144_v37 = vpack.i.b16 %v6364_v38, %v6364_v38  ;;  %v7586_v33 = vmul.bf16 %v14283_v4, %v5714_v2  ;;  %v1679_v40 = vcombine.high %v1669_v49, %v1669_v49 }
 0x308   : > { %v7588_v10 = vmul.bf16 %v14287_v14, %v5716_v61  ;;  %v4871_v46 = vand.u32 15, %v4359_v36  ;;  %v5379_v43 = vcvt.s32.f32 %v4867_v19  ;;  %v3400_v22 = vrot.slane %v1677_v62, %v12391_v58  ;;  %v14339_v19 = vld [vmem:[%s16102_s1 + $0x30] sm:$0xff] }
 0x309   : > { %v7585_v30 = vmul.bf16 %v14298_v5, %v5713_v27  ;;  %v14305_v9 = vrot.slane %v7144_v37, %v12389_v57  ;;  %7845 = vst [vmem:[%s12466_s18 + $0x588] sm:$0xff] %v7586_v33  ;;  %8082 = vmatprep.subr.bf16.mxu0 %v7586_v33  ;;  %v3416_v8 = vrot.slane %v1679_v40, %v12391_v58  ;;  %v5960_v36 = vunpack.i.h.s16 %v14253_v26  ;;  %v14334_v27 = vld [vmem:[%s16102_s1 + $0x10] sm:$0xff] }
 0x30a   : > { %7847 = vst [vmem:[%s12466_s18 + $0x598] sm:$0xff] %v7588_v10  ;;  %8254 = vmatprep.subr.bf16.mxu1 %v7588_v10  ;;  %v5383_v18 = vcvt.s32.f32 %v4871_v46  ;;  %v3408_v31 = vrot.slane %v1677_v62, %v12395_v60  ;;  %v3424_v49 = vrot.slane %v1679_v40, %v12395_v60  ;;  %v4362_v17 = vshra.s32 %v3400_v22, %v12383_v51 }
 0x30b   : > { %7844 = vst [vmem:[%s12466_s18 + $0x580] sm:$0xff] %v7585_v30  ;;  %8083 = vmatpush1.bf16.msra.mxu0 %v7585_v30  ;;  %v3396_v35 = vrot.slane %v1677_v62, %v12389_v57  ;;  %v3412_v45 = vrot.slane %v1679_v40, %v12389_v57  ;;  %v3404_v16 = vrot.slane %v1677_v62, %v12393_v59 }
 0x30c   : > { %v5715_v48 = vpack.c.bf16 %v5383_v18, %v5379_v43  ;;  %v4366_v54 = vshra.s32 %v3416_v8, %v12383_v51  ;;  %v4364_v39 = vshra.s32 %v3408_v31, %v12383_v51  ;;  %v4368_v11 = vshra.s32 %v3424_v49, %v12383_v51 }
 0x30d   : > { %v4874_v15 = vand.u32 15, %v4362_v17  ;;  %v4361_v50 = vshra.s32 %v3396_v35, %v12383_v51  ;;  %v4365_v53 = vshra.s32 %v3412_v45, %v12383_v51  ;;  %v3420_v3 = vrot.slane %v1679_v40, %v12393_v59 }
 0x30e   : > { %v7587_v6 = vmul.bf16 %v14305_v9, %v5715_v48  ;;  %v4878_v32 = vand.u32 15, %v4366_v54  ;;  %v4876_v34 = vand.u32 15, %v4364_v39  ;;  %v4880_v44 = vand.u32 15, %v4368_v11 }
 0x30f   : > { %v5386_v28 = vcvt.s32.f32 %v4874_v15  ;;  %v4873_v23 = vand.u32 15, %v4361_v50  ;;  %v4877_v13 = vand.u32 15, %v4365_v53  ;;  %v4363_v47 = vshra.s32 %v3404_v16, %v12383_v51 }
 0x310   : > { %7846 = vst [vmem:[%s12466_s18 + $0x590] sm:$0xff] %v7587_v6  ;;  %8255 = vmatpush1.bf16.msra.mxu1 %v7587_v6  ;;  %v5390_v25 = vcvt.s32.f32 %v4878_v32  ;;  %v5388_v1 = vcvt.s32.f32 %v4876_v34  ;;  %v5392_v0 = vcvt.s32.f32 %v4880_v44  ;;  %v4367_v63 = vshra.s32 %v3420_v3, %v12383_v51 }
 0x311   : > { %v5385_v24 = vcvt.s32.f32 %v4873_v23  ;;  %v5389_v55 = vcvt.s32.f32 %v4877_v13  ;;  %v4875_v7 = vand.u32 15, %v4363_v47  ;;  %v1644_v29 = vrot.slane %v11693_v42, %v12385_v52 }
 0x312   : > { %v5718_v38 = vpack.c.bf16 %v5390_v25, %v5386_v28  ;;  %v5720_v2 = vpack.c.bf16 %v5392_v0, %v5388_v1  ;;  %v4879_v61 = vand.u32 15, %v4367_v63  ;;  %v5992_v30 = vpack.i.b16 %v5960_v36, %v5960_v36 }
 0x313   : > { %v5717_v37 = vpack.c.bf16 %v5389_v55, %v5385_v24  ;;  %v5387_v62 = vcvt.s32.f32 %v4875_v7  ;;  %v1647_v33 = vcombine.low %v14264_v21, %v1644_v29  ;;  %v1648_v10 = vcombine.high %v14264_v21, %v1644_v29 }
 0x314   : > { %v7590_v26 = vmul.bf16 %v14283_v4, %v5718_v38  ;;  %v7592_v46 = vmul.bf16 %v14287_v14, %v5720_v2  ;;  %v5391_v40 = vcvt.s32.f32 %v4879_v61  ;;  %v14350_v8 = vcombine.low %v14334_v27, %v14339_v19 }
 0x315   : > { %v7589_v43 = vmul.bf16 %v14298_v5, %v5717_v37  ;;  %v1662_v22 = vrot.slane %v1647_v33, %v12385_v52  ;;  %v1676_v18 = vrot.slane %v1648_v10, %v12385_v52  ;;  %v6376_v4 = vrot.slane %v5992_v30, %v12391_v58 }
 0x316   : > { %7849 = vst [vmem:[%s12466_s18 + $0x5a8] sm:$0xff] %v7590_v26  ;;  %8084 = vmatprep.subr.bf16.mxu0 %v7590_v26  ;;  %7851 = vst [vmem:[%s12466_s18 + $0x5b8] sm:$0xff] %v7592_v46  ;;  %8256 = vmatprep.subr.bf16.mxu1 %v7592_v46  ;;  %v5719_v21 = vpack.c.bf16 %v5391_v40, %v5387_v62  ;;  %v6384_v14 = vrot.slane %v5992_v30, %v12395_v60 }
 0x317   : > { %7848 = vst [vmem:[%s12466_s18 + $0x5a0] sm:$0xff] %v7589_v43  ;;  %8085 = vmatpush1.bf16.msra.mxu0 %v7589_v43  ;;  %v3432_v5 = vrot.slane %v1662_v22, %v12391_v58  ;;  %v3448_v31 = vrot.slane %v1676_v18, %v12391_v58  ;;  %v3440_v49 = vrot.slane %v1662_v22, %v12395_v60 }
 0x318   : > { %v3456_v17 = vrot.slane %v1676_v18, %v12395_v60  ;;  %v7591_v35 = vmul.bf16 %v14305_v9, %v5719_v21  ;;  %v7165_v45 = vpack.i.b16 %v6376_v4, %v6376_v4  ;;  %v7179_v16 = vpack.i.b16 %v6384_v14, %v6384_v14 }
 0x319   : > { %v3428_v48 = vrot.slane %v1662_v22, %v12389_v57  ;;  %v4370_v54 = vshra.s32 %v3432_v5, %v12383_v51  ;;  %v4374_v39 = vshra.s32 %v3448_v31, %v12383_v51  ;;  %v4372_v11 = vshra.s32 %v3440_v49, %v12383_v51 }
 0x31a   : > { %v4376_v15 = vshra.s32 %v3456_v17, %v12383_v51  ;;  %7850 = vst [vmem:[%s12466_s18 + $0x5b0] sm:$0xff] %v7591_v35  ;;  %8257 = vmatpush1.bf16.msra.mxu1 %v7591_v35  ;;  %v14369_v50 = vrot.slane %v7165_v45, %v12389_v57  ;;  %v14372_v53 = vrot.slane %v7179_v16, %v12389_v57 }
 0x31b   : > { %v3444_v9 = vrot.slane %v1676_v18, %v12389_v57  ;;  %v4369_v3 = vshra.s32 %v3428_v48, %v12383_v51  ;;  %v4882_v42 = vand.u32 15, %v4370_v54  ;;  %v4886_v6 = vand.u32 15, %v4374_v39 }
 0x31c   : > { %v4884_v32 = vand.u32 15, %v4372_v11  ;;  %v4888_v34 = vand.u32 15, %v4376_v15  ;;  %v6372_v23 = vrot.slane %v5992_v30, %v12389_v57  ;;  %v3436_v13 = vrot.slane %v1662_v22, %v12393_v59 }
 0x31d   : > { %v4373_v44 = vshra.s32 %v3444_v9, %v12383_v51  ;;  %v4881_v28 = vand.u32 15, %v4369_v3  ;;  %v5394_v47 = vcvt.s32.f32 %v4882_v42  ;;  %v5398_v25 = vcvt.s32.f32 %v4886_v6 }
 0x31e   : > { %v5396_v1 = vcvt.s32.f32 %v4884_v32  ;;  %v5400_v0 = vcvt.s32.f32 %v4888_v34  ;;  %v7158_v55 = vpack.i.b16 %v6372_v23, %v6372_v23  ;;  %v3452_v7 = vrot.slane %v1676_v18, %v12393_v59  ;;  %v11694_v34 = vld [vmem:[%s12364_s6 + $0x180] ss:$8 sps:$4 sm:$0xff]  }
 0x31f   : > { %v4885_v63 = vand.u32 15, %v4373_v44  ;;  %v5393_v24 = vcvt.s32.f32 %v4881_v28  ;;  %v5722_v29 = vpack.c.bf16 %v5398_v25, %v5394_v47  ;;  %v4371_v2 = vshra.s32 %v3436_v13, %v12383_v51  ;;  %v11696_v44 = vld [vmem:[%s12364_s6 + $0x190] ss:$8 sps:$4 sm:$0xff]  }
 0x320   : > { %v5724_v38 = vpack.c.bf16 %v5400_v0, %v5396_v1  ;;  %v6380_v61 = vrot.slane %v5992_v30, %v12393_v59  ;;  %v14383_v37 = vrot.slane %v7158_v55, %v12389_v57  ;;  %v4375_v62 = vshra.s32 %v3452_v7, %v12383_v51  ;;  %v14413_v25 = vld.sshfl [vmem:[%s12366_s7 + $0x30] sm:$0xff pattern:$0x75316420]  ;;  %v14416_v55 = vld.sshfl [vmem:[%s12366_s7 + $0x38] sm:$0xff pattern:$0x75316420] }
 0x321   : > { %v5397_v36 = vcvt.s32.f32 %v4885_v63  ;;  %v1678_v33 = vcombine.high %v1662_v22, %v1662_v22  ;;  %v7594_v10 = vmul.bf16 %v14369_v50, %v5722_v29  ;;  %v4883_v46 = vand.u32 15, %v4371_v2 }
 0x322   : > { %v7596_v26 = vmul.bf16 %v14372_v53, %v5724_v38  ;;  %v7172_v40 = vpack.i.b16 %v6380_v61, %v6380_v61  ;;  %v4887_v21 = vand.u32 15, %v4375_v62  ;;  %v1680_v4 = vcombine.high %v1676_v18, %v1676_v18 }
 0x323   : > { %v5721_v43 = vpack.c.bf16 %v5397_v36, %v5393_v24  ;;  %v3464_v14 = vrot.slane %v1678_v33, %v12391_v58  ;;  %7853 = vst [vmem:[%s12466_s18 + $0x5c8] sm:$0xff] %v7594_v10  ;;  %8086 = vmatprep.subr.bf16.mxu0 %v7594_v10  ;;  %v5395_v30 = vcvt.s32.f32 %v4883_v46  ;;  %v3472_v22 = vrot.slane %v1678_v33, %v12395_v60 }
 0x324   : > { %7855 = vst [vmem:[%s12466_s18 + $0x5d8] sm:$0xff] %v7596_v26  ;;  %8258 = vmatprep.subr.bf16.mxu1 %v7596_v26  ;;  %v14392_v5 = vrot.slane %v7172_v40, %v12389_v57  ;;  %v3460_v31 = vrot.slane %v1678_v33, %v12389_v57  ;;  %v5399_v17 = vcvt.s32.f32 %v4887_v21  ;;  %v3480_v18 = vrot.slane %v1680_v4, %v12391_v58 }
 0x325   : > { %v7593_v49 = vmul.bf16 %v14383_v37, %v5721_v43  ;;  %v4378_v35 = vshra.s32 %v3464_v14, %v12383_v51  ;;  %v3488_v45 = vrot.slane %v1680_v4, %v12395_v60  ;;  %v4380_v16 = vshra.s32 %v3472_v22, %v12383_v51  ;;  %v11698_v43 = vld [vmem:[%s12364_s6 + $0x184] ss:$8 sps:$4 sm:$0xff]  }
 0x326   : > { %v3476_v48 = vrot.slane %v1680_v4, %v12389_v57  ;;  %v4377_v54 = vshra.s32 %v3460_v31, %v12383_v51  ;;  %v5723_v39 = vpack.c.bf16 %v5399_v17, %v5395_v30  ;;  %v4382_v11 = vshra.s32 %v3480_v18, %v12383_v51 }
 0x327   : > { %7852 = vst [vmem:[%s12466_s18 + $0x5c0] sm:$0xff] %v7593_v49  ;;  %8087 = vmatpush1.bf16.msra.mxu0 %v7593_v49  ;;  %v4890_v15 = vand.u32 15, %v4378_v35  ;;  %v3468_v9 = vrot.slane %v1678_v33, %v12393_v59  ;;  %v4384_v3 = vshra.s32 %v3488_v45, %v12383_v51  ;;  %v4892_v42 = vand.u32 15, %v4380_v16 }
 0x328   : > { %v4381_v6 = vshra.s32 %v3476_v48, %v12383_v51  ;;  %v4889_v32 = vand.u32 15, %v4377_v54  ;;  %v7595_v28 = vmul.bf16 %v14392_v5, %v5723_v39  ;;  %v4894_v23 = vand.u32 15, %v4382_v11 }
 0x329   : > { %v5402_v13 = vcvt.s32.f32 %v4890_v15  ;;  %v3484_v47 = vrot.slane %v1680_v4, %v12393_v59  ;;  %v4896_v1 = vand.u32 15, %v4384_v3  ;;  %v5404_v0 = vcvt.s32.f32 %v4892_v42 }
 0x32a   : > { %v4893_v63 = vand.u32 15, %v4381_v6  ;;  %v5401_v24 = vcvt.s32.f32 %v4889_v32  ;;  %7854 = vst [vmem:[%s12466_s18 + $0x5d0] sm:$0xff] %v7595_v28  ;;  %8259 = vmatpush1.bf16.msra.mxu1 %v7595_v28  ;;  %v5406_v7 = vcvt.s32.f32 %v4894_v23  ;;  %v4379_v29 = vshra.s32 %v3468_v9, %v12383_v51 }
 0x32b   : > { %v4383_v38 = vshra.s32 %v3484_v47, %v12383_v51  ;;  %v14423_v2 = vcombine.high %v14334_v27, %v14339_v19  ;;  %v5408_v61 = vcvt.s32.f32 %v4896_v1  ;;  %v1691_v62 = vrot.slane %v11694_v34, %v12385_v52  ;;  %v11699_v27 = vld [vmem:[%s12364_s6 + $0x194] ss:$8 sps:$4 sm:$0xff]  }
 0x32c   : > { %v5405_v36 = vcvt.s32.f32 %v4893_v63  ;;  %v1705_v33 = vrot.slane %v11696_v44, %v12385_v52  ;;  %v5726_v10 = vpack.c.bf16 %v5406_v7, %v5402_v13  ;;  %v4891_v26 = vand.u32 15, %v4379_v29 }
 0x32d   : > { %v4895_v46 = vand.u32 15, %v4383_v38  ;;  %8090 = vmatprep.mubr.bf16.mxu0 %v14423_v2  ;;  %v5919_v40 = vcombine.low %v14413_v25, %v14416_v55  ;;  %8262 = vmatprep.mubr.bf16.mxu1 %v14423_v2  ;;  %v5728_v19 = vpack.c.bf16 %v5408_v61, %v5404_v0  ;;  %v14447_v48 = vrot.slane %v11698_v43, %v12385_v52 }
 0x32e   : > { %v5725_v21 = vpack.c.bf16 %v5405_v36, %v5401_v24  ;;  %v1713_v4 = vcombine.low %v1691_v62, %v1705_v33  ;;  %v1714_v14 = vcombine.high %v1691_v62, %v1705_v33  ;;  %v7598_v30 = vmul.bf16 %v14369_v50, %v5726_v10 }
 0x32f   : > { %v5403_v22 = vcvt.s32.f32 %v4891_v26  ;;  %v5407_v31 = vcvt.s32.f32 %v4895_v46  ;;  %v14435_v49 = vrot.slane %v5919_v40, %v12385_v52  ;;  %v7600_v17 = vmul.bf16 %v14372_v53, %v5728_v19 }
 0x330   : > { %v7597_v18 = vmul.bf16 %v14383_v37, %v5725_v21  ;;  %v1723_v35 = vrot.slane %v1713_v4, %v12385_v52  ;;  %v14441_v45 = vrot.slane %v1714_v14, %v12385_v52  ;;  %7857 = vst [vmem:[%s12466_s18 + $0x5e8] sm:$0xff] %v7598_v30  ;;  %8088 = vmatprep.subr.bf16.mxu0 %v7598_v30 }
 0x331   : > { %v5727_v16 = vpack.c.bf16 %v5407_v31, %v5403_v22  ;;  %v11089_v50 = vpack.i.b16 %v14435_v49, %v14435_v49  ;;  %v14450_v54 = vrot.slane %v11699_v27, %v12385_v52  ;;  %7859 = vst [vmem:[%s12466_s18 + $0x5f8] sm:$0xff] %v7600_v17  ;;  %8260 = vmatprep.subr.bf16.mxu1 %v7600_v17  ;;  %v5962_v23 = vunpack.i.h.s16 %v14435_v49 }
 0x332   : > { %7856 = vst [vmem:[%s12466_s18 + $0x5e0] sm:$0xff] %v7597_v18  ;;  %8089 = vmatpush1.bf16.msra.mxu0 %v7597_v18  ;;  %v3496_v53 = vrot.slane %v1723_v35, %v12391_v58  ;;  %v3512_v37 = vrot.slane %v14441_v45, %v12391_v58  ;;  %v3504_v39 = vrot.slane %v1723_v35, %v12395_v60 }
 0x333   : > { %v7599_v11 = vmul.bf16 %v14392_v5, %v5727_v16  ;;  %v6392_v15 = vrot.slane %v11089_v50, %v12391_v58  ;;  %v3520_v9 = vrot.slane %v14441_v45, %v12395_v60  ;;  %v6400_v3 = vrot.slane %v11089_v50, %v12395_v60 }
 0x334   : > { %v4386_v42 = vshra.s32 %v3496_v53, %v12383_v51  ;;  %v4390_v6 = vshra.s32 %v3512_v37, %v12383_v51  ;;  %v4388_v32 = vshra.s32 %v3504_v39, %v12383_v51  ;;  %v3492_v34 = vrot.slane %v1723_v35, %v12389_v57 }
 0x335   : > { %7858 = vst [vmem:[%s12466_s18 + $0x5f0] sm:$0xff] %v7599_v11  ;;  %8261 = vmatpush1.bf16.msra.mxu1 %v7599_v11  ;;  %v7193_v44 = vpack.i.b16 %v6392_v15, %v6392_v15  ;;  %v4392_v5 = vshra.s32 %v3520_v9, %v12383_v51  ;;  %v7207_v28 = vpack.i.b16 %v6400_v3, %v6400_v3 }
 0x336   : > { %8091 = vmatmul.mubr.bf16.vlgmr.msra.gmra.mrb[0].mxu0 %v14350_v8  ;;  %v4898_v13 = vand.u32 15, %v4386_v42  ;;  %v4902_v47 = vand.u32 15, %v4390_v6  ;;  %v4900_v1 = vand.u32 15, %v4388_v32  ;;  %v3508_v0 = vrot.slane %v14441_v45, %v12389_v57 }
 0x337   : > { %v14474_v63 = vrot.slane %v7193_v44, %v12389_v57  ;;  %v4904_v24 = vand.u32 15, %v4392_v5  ;;  %v14477_v7 = vrot.slane %v7207_v28, %v12389_v57  ;;  %v4385_v29 = vshra.s32 %v3492_v34, %v12383_v51 }
 0x338   : > { %v5410_v38 = vcvt.s32.f32 %v4898_v13  ;;  %v5414_v61 = vcvt.s32.f32 %v4902_v47  ;;  %v5412_v36 = vcvt.s32.f32 %v4900_v1  ;;  %v4389_v62 = vshra.s32 %v3508_v0, %v12383_v51  ;;  %8263 = vmatmul.mubr.bf16.vlgmr.msra.gmra.mrb[0].mxu1 %v14350_v8 }
 0x339   : > { %v5416_v33 = vcvt.s32.f32 %v4904_v24  ;;  %v4897_v10 = vand.u32 15, %v4385_v29  ;;  %v6388_v26 = vrot.slane %v11089_v50, %v12389_v57  ;;  %v3500_v46 = vrot.slane %v1723_v35, %v12393_v59 }
 0x33a   : > { %v5730_v40 = vpack.c.bf16 %v5414_v61, %v5410_v38  ;;  %v4901_v43 = vand.u32 15, %v4389_v62  ;;  %v3516_v27 = vrot.slane %v14441_v45, %v12393_v59  ;;  %v6396_v19 = vrot.slane %v11089_v50, %v12393_v59 }
 0x33b   : > { %v5732_v21 = vpack.c.bf16 %v5416_v33, %v5412_v36  ;;  %v5409_v4 = vcvt.s32.f32 %v4897_v10  ;;  %v7186_v14 = vpack.i.b16 %v6388_v26, %v6388_v26  ;;  %v4387_v30 = vshra.s32 %v3500_v46, %v12383_v51 }
 0x33c   : > { %v7602_v22 = vmul.bf16 %v14474_v63, %v5730_v40  ;;  %v5413_v31 = vcvt.s32.f32 %v4901_v43  ;;  %v4391_v17 = vshra.s32 %v3516_v27, %v12383_v51  ;;  %v7200_v18 = vpack.i.b16 %v6396_v19, %v6396_v19 }
 0x33d   : > { %v7604_v16 = vmul.bf16 %v14477_v7, %v5732_v21  ;;  %v14492_v53 = vrot.slane %v7186_v14, %v12389_v57  ;;  %v4899_v37 = vand.u32 15, %v4387_v30  ;;  %v1745_v39 = vcombine.high %v1723_v35, %v1723_v35 }
 0x33e   : > { %7861 = vst [vmem:[%s12466_s18 + $0x608] sm:$0xff] %v7602_v22  ;;  %8101 = vmatprep.subr.bf16.mxu0 %v7602_v22  ;;  %v5729_v50 = vpack.c.bf16 %v5413_v31, %v5409_v4  ;;  %v4903_v11 = vand.u32 15, %v4391_v17  ;;  %v14496_v15 = vrot.slane %v7200_v18, %v12389_v57  ;;  %v1747_v9 = vcombine.high %v14441_v45, %v14441_v45 }
 0x33f   : > { %7863 = vst [vmem:[%s12466_s18 + $0x618] sm:$0xff] %v7604_v16  ;;  %8273 = vmatprep.subr.bf16.mxu1 %v7604_v16  ;;  %v5411_v3 = vcvt.s32.f32 %v4899_v37  ;;  %v3528_v42 = vrot.slane %v1745_v39, %v12391_v58  ;;  %v3536_v6 = vrot.slane %v1745_v39, %v12395_v60  ;;  %v3524_v35 = vrot.slane %v1745_v39, %v12389_v57 }
 0x340   : > { %v7601_v32 = vmul.bf16 %v14492_v53, %v5729_v50  ;;  %v5415_v34 = vcvt.s32.f32 %v4903_v11  ;;  %v3544_v44 = vrot.slane %v1747_v9, %v12391_v58  ;;  %v3552_v5 = vrot.slane %v1747_v9, %v12395_v60 }
 0x341   : > { %v4394_v28 = vshra.s32 %v3528_v42, %v12383_v51  ;;  %v4396_v45 = vshra.s32 %v3536_v6, %v12383_v51  ;;  %v3540_v13 = vrot.slane %v1747_v9, %v12389_v57  ;;  %v4393_v47 = vshra.s32 %v3524_v35, %v12383_v51 }
 0x342   : > { %7860 = vst [vmem:[%s12466_s18 + $0x600] sm:$0xff] %v7601_v32  ;;  %8102 = vmatpush1.bf16.msra.mxu0 %v7601_v32  ;;  %v5731_v1 = vpack.c.bf16 %v5415_v34, %v5411_v3  ;;  %v4398_v0 = vshra.s32 %v3544_v44, %v12383_v51  ;;  %v4400_v24 = vshra.s32 %v3552_v5, %v12383_v51 }
 0x343   : > { %v3532_v29 = vrot.slane %v1745_v39, %v12393_v59  ;;  %v4906_v38 = vand.u32 15, %v4394_v28  ;;  %v4908_v61 = vand.u32 15, %v4396_v45  ;;  %v4397_v36 = vshra.s32 %v3540_v13, %v12383_v51 }
 0x344   : > { %v4905_v62 = vand.u32 15, %v4393_v47  ;;  %v7603_v33 = vmul.bf16 %v14496_v15, %v5731_v1  ;;  %v4910_v10 = vand.u32 15, %v4398_v0  ;;  %v4912_v26 = vand.u32 15, %v4400_v24 }
 0x345   : > { %v3548_v46 = vrot.slane %v1747_v9, %v12393_v59  ;;  %v5418_v40 = vcvt.s32.f32 %v4906_v38  ;;  %v5420_v43 = vcvt.s32.f32 %v4908_v61  ;;  %v4909_v27 = vand.u32 15, %v4397_v36 }
 0x346   : > { %v5417_v19 = vcvt.s32.f32 %v4905_v62  ;;  %7862 = vst [vmem:[%s12466_s18 + $0x610] sm:$0xff] %v7603_v33  ;;  %8274 = vmatpush1.bf16.msra.mxu1 %v7603_v33  ;;  %v5422_v21 = vcvt.s32.f32 %v4910_v10  ;;  %v5424_v4 = vcvt.s32.f32 %v4912_v26  ;;  %v4395_v14 = vshra.s32 %v3532_v29, %v12383_v51 }
 0x347   : > { %v4399_v30 = vshra.s32 %v3548_v46, %v12383_v51  ;;  %v5421_v22 = vcvt.s32.f32 %v4909_v27  ;;  %v1715_v31 = vcombine.low %v14447_v48, %v14450_v54  ;;  %v1716_v17 = vcombine.high %v14447_v48, %v14450_v54 }
 0x348   : > { %v5994_v18 = vpack.i.b16 %v5962_v23, %v5962_v23  ;;  %v5734_v16 = vpack.c.bf16 %v5422_v21, %v5418_v40  ;;  %v5736_v37 = vpack.c.bf16 %v5424_v4, %v5420_v43  ;;  %v4907_v39 = vand.u32 15, %v4395_v14 }
 0x349   : > { %v4911_v50 = vand.u32 15, %v4399_v30  ;;  %v5733_v11 = vpack.c.bf16 %v5421_v22, %v5417_v19  ;;  %v1730_v9 = vrot.slane %v1715_v31, %v12385_v52  ;;  %v1744_v3 = vrot.slane %v1716_v17, %v12385_v52  ;;  %v11700_v17 = vld [vmem:[%s12364_s6 + $0x1a0] ss:$8 sps:$4 sm:$0xff]  }
 0x34a   : > { %v6408_v42 = vrot.slane %v5994_v18, %v12391_v58  ;;  %v7606_v48 = vmul.bf16 %v14474_v63, %v5734_v16  ;;  %v7608_v54 = vmul.bf16 %v14477_v7, %v5736_v37  ;;  %v5419_v6 = vcvt.s32.f32 %v4907_v39 }
 0x34b   : > { %v5423_v23 = vcvt.s32.f32 %v4911_v50  ;;  %v7605_v35 = vmul.bf16 %v14492_v53, %v5733_v11  ;;  %v3560_v32 = vrot.slane %v1730_v9, %v12391_v58  ;;  %v3576_v34 = vrot.slane %v1744_v3, %v12391_v58 }
 0x34c   : > { %v7221_v44 = vpack.i.b16 %v6408_v42, %v6408_v42  ;;  %7865 = vst [vmem:[%s12466_s18 + $0x628] sm:$0xff] %v7606_v48  ;;  %8103 = vmatprep.subr.bf16.mxu0 %v7606_v48  ;;  %7867 = vst [vmem:[%s12466_s18 + $0x638] sm:$0xff] %v7608_v54  ;;  %8275 = vmatprep.subr.bf16.mxu1 %v7608_v54  ;;  %v3568_v28 = vrot.slane %v1730_v9, %v12395_v60 }
 0x34d   : > { %v5735_v5 = vpack.c.bf16 %v5423_v23, %v5419_v6  ;;  %v3584_v63 = vrot.slane %v1744_v3, %v12395_v60  ;;  %7864 = vst [vmem:[%s12466_s18 + $0x620] sm:$0xff] %v7605_v35  ;;  %8104 = vmatpush1.bf16.msra.mxu0 %v7605_v35  ;;  %v4402_v7 = vshra.s32 %v3560_v32, %v12383_v51 }
 0x34e   : > { %v4406_v53 = vshra.s32 %v3576_v34, %v12383_v51  ;;  %v14544_v45 = vrot.slane %v7221_v44, %v12389_v57  ;;  %v6416_v13 = vrot.slane %v5994_v18, %v12395_v60  ;;  %v4404_v1 = vshra.s32 %v3568_v28, %v12383_v51 }
 0x34f   : > { %v7607_v47 = vmul.bf16 %v14496_v15, %v5735_v5  ;;  %v4408_v0 = vshra.s32 %v3584_v63, %v12383_v51  ;;  %v3556_v24 = vrot.slane %v1730_v9, %v12389_v57  ;;  %v4914_v29 = vand.u32 15, %v4402_v7 }
 0x350   : > { %v4918_v38 = vand.u32 15, %v4406_v53  ;;  %v7235_v61 = vpack.i.b16 %v6416_v13, %v6416_v13  ;;  %v3572_v36 = vrot.slane %v1744_v3, %v12389_v57  ;;  %v4916_v62 = vand.u32 15, %v4404_v1 }
 0x351   : > { %7866 = vst [vmem:[%s12466_s18 + $0x630] sm:$0xff] %v7607_v47  ;;  %8276 = vmatpush1.bf16.msra.mxu1 %v7607_v47  ;;  %v4920_v33 = vand.u32 15, %v4408_v0  ;;  %v4401_v10 = vshra.s32 %v3556_v24, %v12383_v51  ;;  %v6404_v15 = vrot.slane %v5994_v18, %v12389_v57  ;;  %v5426_v26 = vcvt.s32.f32 %v4914_v29 }
 0x352   : > { %v5430_v46 = vcvt.s32.f32 %v4918_v38  ;;  %v14556_v40 = vrot.slane %v7235_v61, %v12389_v57  ;;  %v4405_v43 = vshra.s32 %v3572_v36, %v12383_v51  ;;  %v5428_v27 = vcvt.s32.f32 %v4916_v62 }
 0x353   : > { %v5432_v19 = vcvt.s32.f32 %v4920_v33  ;;  %v4913_v21 = vand.u32 15, %v4401_v10  ;;  %v7214_v4 = vpack.i.b16 %v6404_v15, %v6404_v15  ;;  %v3564_v22 = vrot.slane %v1730_v9, %v12393_v59 }
 0x354   : > { %v5738_v14 = vpack.c.bf16 %v5430_v46, %v5426_v26  ;;  %v4917_v30 = vand.u32 15, %v4405_v43  ;;  %v3580_v31 = vrot.slane %v1744_v3, %v12393_v59  ;;  %v6412_v50 = vrot.slane %v5994_v18, %v12393_v59  ;;  %v11702_v46 = vld [vmem:[%s12364_s6 + $0x1b0] ss:$8 sps:$4 sm:$0xff]  }
 0x355   : > { %v5740_v16 = vpack.c.bf16 %v5432_v19, %v5428_v27  ;;  %v5425_v37 = vcvt.s32.f32 %v4913_v21  ;;  %v14563_v39 = vrot.slane %v7214_v4, %v12389_v57  ;;  %v4403_v48 = vshra.s32 %v3564_v22, %v12383_v51 }
 0x356   : > { %v7610_v11 = vmul.bf16 %v14544_v45, %v5738_v14  ;;  %v5429_v42 = vcvt.s32.f32 %v4917_v30  ;;  %v4407_v54 = vshra.s32 %v3580_v31, %v12383_v51  ;;  %v7228_v23 = vpack.i.b16 %v6412_v50, %v6412_v50 }
 0x357   : > { %v7612_v6 = vmul.bf16 %v14556_v40, %v5740_v16  ;;  %v1746_v35 = vcombine.high %v1730_v9, %v1730_v9  ;;  %v1748_v32 = vcombine.high %v1744_v3, %v1744_v3  ;;  %v4915_v44 = vand.u32 15, %v4403_v48 }
 0x358   : > { %7869 = vst [vmem:[%s12466_s18 + $0x648] sm:$0xff] %v7610_v11  ;;  %8105 = vmatprep.subr.bf16.mxu0 %v7610_v11  ;;  %v5737_v34 = vpack.c.bf16 %v5429_v42, %v5425_v37  ;;  %v4919_v5 = vand.u32 15, %v4407_v54  ;;  %v1759_v18 = vrot.slane %v11700_v17, %v12385_v52  ;;  %v14574_v28 = vrot.slane %v7228_v23, %v12389_v57  ;;  %v11704_v54 = vld [vmem:[%s12364_s6 + $0x1a4] ss:$8 sps:$4 sm:$0xff]  }
 0x359   : > { %7871 = vst [vmem:[%s12466_s18 + $0x658] sm:$0xff] %v7612_v6  ;;  %8277 = vmatprep.subr.bf16.mxu1 %v7612_v6  ;;  %v3592_v63 = vrot.slane %v1746_v35, %v12391_v58  ;;  %v3608_v7 = vrot.slane %v1748_v32, %v12391_v58  ;;  %v3600_v9 = vrot.slane %v1746_v35, %v12395_v60  ;;  %v5427_v53 = vcvt.s32.f32 %v4915_v44 }
 0x35a   : > { %v7609_v3 = vmul.bf16 %v14563_v39, %v5737_v34  ;;  %v5431_v13 = vcvt.s32.f32 %v4919_v5  ;;  %v3616_v47 = vrot.slane %v1748_v32, %v12395_v60  ;;  %v3588_v29 = vrot.slane %v1746_v35, %v12389_v57  ;;  %v11705_v34 = vld [vmem:[%s12364_s6 + $0x1b4] ss:$8 sps:$4 sm:$0xff]  }
 0x35b   : > { %v4410_v1 = vshra.s32 %v3592_v63, %v12383_v51  ;;  %v4414_v0 = vshra.s32 %v3608_v7, %v12383_v51  ;;  %v4412_v24 = vshra.s32 %v3600_v9, %v12383_v51  ;;  %v3604_v36 = vrot.slane %v1748_v32, %v12389_v57 }
 0x35c   : > { %7868 = vst [vmem:[%s12466_s18 + $0x640] sm:$0xff] %v7609_v3  ;;  %8106 = vmatpush1.bf16.msra.mxu0 %v7609_v3  ;;  %v5739_v38 = vpack.c.bf16 %v5431_v13, %v5427_v53  ;;  %v4416_v61 = vshra.s32 %v3616_v47, %v12383_v51  ;;  %v3596_v62 = vrot.slane %v1746_v35, %v12393_v59 }
 0x35d   : > { %v4922_v33 = vand.u32 15, %v4410_v1  ;;  %v4926_v10 = vand.u32 15, %v4414_v0  ;;  %v4924_v15 = vand.u32 15, %v4412_v24  ;;  %v4409_v26 = vshra.s32 %v3588_v29, %v12383_v51 }
 0x35e   : > { %v7611_v43 = vmul.bf16 %v14574_v28, %v5739_v38  ;;  %v4928_v27 = vand.u32 15, %v4416_v61  ;;  %v4413_v19 = vshra.s32 %v3604_v36, %v12383_v51  ;;  %v3612_v21 = vrot.slane %v1748_v32, %v12393_v59 }
 0x35f   : > { %v5434_v4 = vcvt.s32.f32 %v4922_v33  ;;  %v5438_v14 = vcvt.s32.f32 %v4926_v10  ;;  %v5436_v30 = vcvt.s32.f32 %v4924_v15  ;;  %v4921_v22 = vand.u32 15, %v4409_v26 }
 0x360   : > { %7870 = vst [vmem:[%s12466_s18 + $0x650] sm:$0xff] %v7611_v43  ;;  %8278 = vmatpush1.bf16.msra.mxu1 %v7611_v43  ;;  %v5440_v31 = vcvt.s32.f32 %v4928_v27  ;;  %v4925_v17 = vand.u32 15, %v4413_v19  ;;  %v4411_v16 = vshra.s32 %v3596_v62, %v12383_v51  ;;  %v4415_v37 = vshra.s32 %v3612_v21, %v12383_v51 }
 0x361   : > { %v5742_v50 = vpack.c.bf16 %v5438_v14, %v5434_v4  ;;  %v5433_v11 = vcvt.s32.f32 %v4921_v22  ;;  %v1773_v42 = vrot.slane %v11702_v46, %v12385_v52  ;;  %v5920_v48 = vcombine.high %v14413_v25, %v14416_v55 }
 0x362   : > { %v5744_v6 = vpack.c.bf16 %v5440_v31, %v5436_v30  ;;  %v5437_v23 = vcvt.s32.f32 %v4925_v17  ;;  %v4923_v35 = vand.u32 15, %v4411_v16  ;;  %v4927_v32 = vand.u32 15, %v4415_v37 }
 0x363   : > { %v7614_v44 = vmul.bf16 %v14544_v45, %v5742_v50  ;;  %v1781_v5 = vcombine.low %v1759_v18, %v1773_v42  ;;  %v1782_v63 = vcombine.high %v1759_v18, %v1773_v42  ;;  %v14604_v7 = vrot.slane %v5920_v48, %v12385_v52 }
 0x364   : > { %v7616_v9 = vmul.bf16 %v14556_v40, %v5744_v6  ;;  %v5741_v3 = vpack.c.bf16 %v5437_v23, %v5433_v11  ;;  %v5435_v53 = vcvt.s32.f32 %v4923_v35  ;;  %v5439_v13 = vcvt.s32.f32 %v4927_v32 }
 0x365   : > { %7873 = vst [vmem:[%s12466_s18 + $0x668] sm:$0xff] %v7614_v44  ;;  %8107 = vmatprep.subr.bf16.mxu0 %v7614_v44  ;;  %v1791_v25 = vrot.slane %v1781_v5, %v12385_v52  ;;  %v1805_v55 = vrot.slane %v1782_v63, %v12385_v52  ;;  %v11090_v45 = vpack.i.b16 %v14604_v7, %v14604_v7  ;;  %v5964_v0 = vunpack.i.h.s16 %v14604_v7 }
 0x366   : > { %v14613_v18 = vrot.slane %v11704_v54, %v12385_v52  ;;  %7875 = vst [vmem:[%s12466_s18 + $0x678] sm:$0xff] %v7616_v9  ;;  %8279 = vmatprep.subr.bf16.mxu1 %v7616_v9  ;;  %v7613_v40 = vmul.bf16 %v14563_v39, %v5741_v3  ;;  %v5743_v47 = vpack.c.bf16 %v5439_v13, %v5435_v53 }
 0x367   : > { %v14618_v1 = vrot.slane %v11705_v34, %v12385_v52  ;;  %v3624_v24 = vrot.slane %v1791_v25, %v12391_v58  ;;  %v3640_v29 = vrot.slane %v1805_v55, %v12391_v58  ;;  %v6424_v38 = vrot.slane %v11090_v45, %v12391_v58 }
 0x368   : > { %v3632_v61 = vrot.slane %v1791_v25, %v12395_v60  ;;  %7872 = vst [vmem:[%s12466_s18 + $0x660] sm:$0xff] %v7613_v40  ;;  %8108 = vmatpush1.bf16.msra.mxu0 %v7613_v40  ;;  %v7615_v36 = vmul.bf16 %v14574_v28, %v5743_v47  ;;  %v3648_v39 = vrot.slane %v1805_v55, %v12395_v60 }
 0x369   : > { %v6432_v62 = vrot.slane %v11090_v45, %v12395_v60  ;;  %v3620_v33 = vrot.slane %v1791_v25, %v12389_v57  ;;  %v4418_v10 = vshra.s32 %v3624_v24, %v12383_v51  ;;  %v4422_v15 = vshra.s32 %v3640_v29, %v12383_v51 }
 0x36a   : > { %v7249_v26 = vpack.i.b16 %v6424_v38, %v6424_v38  ;;  %v4420_v46 = vshra.s32 %v3632_v61, %v12383_v51  ;;  %7874 = vst [vmem:[%s12466_s18 + $0x670] sm:$0xff] %v7615_v36  ;;  %8280 = vmatpush1.bf16.msra.mxu1 %v7615_v36  ;;  %v4424_v43 = vshra.s32 %v3648_v39, %v12383_v51 }
 0x36b   : > { %v7263_v27 = vpack.i.b16 %v6432_v62, %v6432_v62  ;;  %v3636_v28 = vrot.slane %v1805_v55, %v12389_v57  ;;  %v4417_v19 = vshra.s32 %v3620_v33, %v12383_v51  ;;  %v4930_v21 = vand.u32 15, %v4418_v10 }
 0x36c   : > { %v4934_v4 = vand.u32 15, %v4422_v15  ;;  %v14638_v14 = vrot.slane %v7249_v26, %v12389_v57  ;;  %v4932_v30 = vand.u32 15, %v4420_v46  ;;  %v4936_v22 = vand.u32 15, %v4424_v43 }
 0x36d   : > { %v14641_v31 = vrot.slane %v7263_v27, %v12389_v57  ;;  %v4421_v17 = vshra.s32 %v3636_v28, %v12383_v51  ;;  %v4929_v16 = vand.u32 15, %v4417_v19  ;;  %v5442_v37 = vcvt.s32.f32 %v4930_v21 }
 0x36e   : > { %v5446_v50 = vcvt.s32.f32 %v4934_v4  ;;  %v5444_v11 = vcvt.s32.f32 %v4932_v30  ;;  %v6420_v42 = vrot.slane %v11090_v45, %v12389_v57  ;;  %v5448_v48 = vcvt.s32.f32 %v4936_v22 }
 0x36f   : > { %v4933_v54 = vand.u32 15, %v4421_v17  ;;  %v5441_v6 = vcvt.s32.f32 %v4929_v16  ;;  %v3628_v23 = vrot.slane %v1791_v25, %v12393_v59  ;;  %v3644_v34 = vrot.slane %v1805_v55, %v12393_v59 }
 0x370   : > { %v5746_v35 = vpack.c.bf16 %v5446_v50, %v5442_v37  ;;  %v7242_v32 = vpack.i.b16 %v6420_v42, %v6420_v42  ;;  %v6428_v44 = vrot.slane %v11090_v45, %v12393_v59  ;;  %v5748_v5 = vpack.c.bf16 %v5448_v48, %v5444_v11 }
 0x371   : > { %v5445_v63 = vcvt.s32.f32 %v4933_v54  ;;  %v4419_v9 = vshra.s32 %v3628_v23, %v12383_v51  ;;  %v1813_v3 = vcombine.high %v1791_v25, %v1791_v25  ;;  %v4423_v40 = vshra.s32 %v3644_v34, %v12383_v51 }
 0x372   : > { %v7618_v53 = vmul.bf16 %v14638_v14, %v5746_v35  ;;  %v14651_v13 = vrot.slane %v7242_v32, %v12389_v57  ;;  %v7256_v47 = vpack.i.b16 %v6428_v44, %v6428_v44  ;;  %v7620_v24 = vmul.bf16 %v14641_v31, %v5748_v5 }
 0x373   : > { %v5745_v29 = vpack.c.bf16 %v5445_v63, %v5441_v6  ;;  %v4931_v38 = vand.u32 15, %v4419_v9  ;;  %v1815_v61 = vcombine.high %v1805_v55, %v1805_v55  ;;  %v4935_v45 = vand.u32 15, %v4423_v40 }
 0x374   : > { %7877 = vst [vmem:[%s12466_s18 + $0x688] sm:$0xff] %v7618_v53  ;;  %8109 = vmatprep.subr.bf16.mxu0 %v7618_v53  ;;  %v14657_v36 = vrot.slane %v7256_v47, %v12389_v57  ;;  %v3656_v25 = vrot.slane %v1813_v3, %v12391_v58  ;;  %v3664_v39 = vrot.slane %v1813_v3, %v12395_v60  ;;  %7879 = vst [vmem:[%s12466_s18 + $0x698] sm:$0xff] %v7620_v24 }
 0x375   : > { %8281 = vmatprep.subr.bf16.mxu1 %v7620_v24  ;;  %v7617_v62 = vmul.bf16 %v14651_v13, %v5745_v29  ;;  %v5443_v33 = vcvt.s32.f32 %v4931_v38  ;;  %v3672_v10 = vrot.slane %v1815_v61, %v12391_v58  ;;  %v3680_v55 = vrot.slane %v1815_v61, %v12395_v60 }
 0x376   : > { %v5447_v15 = vcvt.s32.f32 %v4935_v45  ;;  %v4426_v26 = vshra.s32 %v3656_v25, %v12383_v51  ;;  %v4428_v46 = vshra.s32 %v3664_v39, %v12383_v51  ;;  %v3652_v43 = vrot.slane %v1813_v3, %v12389_v57 }
 0x377   : > { %7876 = vst [vmem:[%s12466_s18 + $0x680] sm:$0xff] %v7617_v62  ;;  %8110 = vmatpush1.bf16.msra.mxu0 %v7617_v62  ;;  %v4430_v27 = vshra.s32 %v3672_v10, %v12383_v51  ;;  %v4432_v28 = vshra.s32 %v3680_v55, %v12383_v51  ;;  %v3668_v19 = vrot.slane %v1815_v61, %v12389_v57 }
 0x378   : > { %v3660_v21 = vrot.slane %v1813_v3, %v12393_v59  ;;  %v5747_v4 = vpack.c.bf16 %v5447_v15, %v5443_v33  ;;  %v4938_v30 = vand.u32 15, %v4426_v26  ;;  %v4940_v22 = vand.u32 15, %v4428_v46 }
 0x379   : > { %v4425_v17 = vshra.s32 %v3652_v43, %v12383_v51  ;;  %v4942_v16 = vand.u32 15, %v4430_v27  ;;  %v4944_v37 = vand.u32 15, %v4432_v28  ;;  %v4429_v50 = vshra.s32 %v3668_v19, %v12383_v51 }
 0x37a   : > { %v3676_v11 = vrot.slane %v1815_v61, %v12393_v59  ;;  %v7619_v42 = vmul.bf16 %v14657_v36, %v5747_v4  ;;  %v5450_v48 = vcvt.s32.f32 %v4938_v30  ;;  %v5452_v54 = vcvt.s32.f32 %v4940_v22 }
 0x37b   : > { %v4937_v6 = vand.u32 15, %v4425_v17  ;;  %v5454_v23 = vcvt.s32.f32 %v4942_v16  ;;  %v5456_v35 = vcvt.s32.f32 %v4944_v37  ;;  %v4941_v32 = vand.u32 15, %v4429_v50 }
 0x37c   : > { %v4427_v34 = vshra.s32 %v3660_v21, %v12383_v51  ;;  %7878 = vst [vmem:[%s12466_s18 + $0x690] sm:$0xff] %v7619_v42  ;;  %8282 = vmatpush1.bf16.msra.mxu1 %v7619_v42  ;;  %v4431_v5 = vshra.s32 %v3676_v11, %v12383_v51  ;;  %v1783_v63 = vcombine.low %v14613_v18, %v14618_v1 }
 0x37d   : > { %v5449_v44 = vcvt.s32.f32 %v4937_v6  ;;  %v1784_v9 = vcombine.high %v14613_v18, %v14618_v1  ;;  %v5750_v3 = vpack.c.bf16 %v5454_v23, %v5450_v48  ;;  %v5752_v53 = vpack.c.bf16 %v5456_v35, %v5452_v54 }
 0x37e   : > { %v5453_v40 = vcvt.s32.f32 %v4941_v32  ;;  %v4939_v47 = vand.u32 15, %v4427_v34  ;;  %v4943_v24 = vand.u32 15, %v4431_v5  ;;  %v14685_v29 = vrot.slane %v1783_v63, %v12385_v52  ;;  %v11706_v5 = vld [vmem:[%s12364_s6 + $0x1c0] ss:$8 sps:$4 sm:$0xff]  }
 0x37f   : > { %v14688_v38 = vrot.slane %v1784_v9, %v12385_v52  ;;  %v5996_v61 = vpack.i.b16 %v5964_v0, %v5964_v0  ;;  %v7622_v45 = vmul.bf16 %v14638_v14, %v5750_v3  ;;  %v7624_v18 = vmul.bf16 %v14641_v31, %v5752_v53 }
 0x380   : > { %v5749_v1 = vpack.c.bf16 %v5453_v40, %v5449_v44  ;;  %v5451_v25 = vcvt.s32.f32 %v4939_v47  ;;  %v5455_v39 = vcvt.s32.f32 %v4943_v24  ;;  %v3688_v62 = vrot.slane %v14685_v29, %v12391_v58  ;;  %v11708_v40 = vld [vmem:[%s12364_s6 + $0x1d0] ss:$8 sps:$4 sm:$0xff]  }
 0x381   : > { %v3704_v33 = vrot.slane %v14688_v38, %v12391_v58  ;;  %v6440_v10 = vrot.slane %v5996_v61, %v12391_v58  ;;  %7881 = vst [vmem:[%s12466_s18 + $0x6a8] sm:$0xff] %v7622_v45  ;;  %8111 = vmatprep.subr.bf16.mxu0 %v7622_v45  ;;  %7883 = vst [vmem:[%s12466_s18 + $0x6b8] sm:$0xff] %v7624_v18  ;;  %8283 = vmatprep.subr.bf16.mxu1 %v7624_v18 }
 0x382   : > { %v7621_v0 = vmul.bf16 %v14651_v13, %v5749_v1  ;;  %v3696_v14 = vrot.slane %v14685_v29, %v12395_v60  ;;  %v3712_v31 = vrot.slane %v14688_v38, %v12395_v60  ;;  %v5751_v55 = vpack.c.bf16 %v5455_v39, %v5451_v25 }
 0x383   : > { %v4434_v15 = vshra.s32 %v3688_v62, %v12383_v51  ;;  %v4438_v26 = vshra.s32 %v3704_v33, %v12383_v51  ;;  %v7277_v46 = vpack.i.b16 %v6440_v10, %v6440_v10  ;;  %v6448_v13 = vrot.slane %v5996_v61, %v12395_v60 }
 0x384   : > { %7880 = vst [vmem:[%s12466_s18 + $0x6a0] sm:$0xff] %v7621_v0  ;;  %8112 = vmatpush1.bf16.msra.mxu0 %v7621_v0  ;;  %v4436_v43 = vshra.s32 %v3696_v14, %v12383_v51  ;;  %v4440_v27 = vshra.s32 %v3712_v31, %v12383_v51  ;;  %v3684_v28 = vrot.slane %v14685_v29, %v12389_v57 }
 0x385   : > { %v7623_v19 = vmul.bf16 %v14657_v36, %v5751_v55  ;;  %v4946_v21 = vand.u32 15, %v4434_v15  ;;  %v4950_v4 = vand.u32 15, %v4438_v26  ;;  %v14717_v30 = vrot.slane %v7277_v46, %v12389_v57 }
 0x386   : > { %v4948_v22 = vand.u32 15, %v4436_v43  ;;  %v4952_v17 = vand.u32 15, %v4440_v27  ;;  %v7291_v16 = vpack.i.b16 %v6448_v13, %v6448_v13  ;;  %v3700_v37 = vrot.slane %v14688_v38, %v12389_v57 }
 0x387   : > { %7882 = vst [vmem:[%s12466_s18 + $0x6b0] sm:$0xff] %v7623_v19  ;;  %8284 = vmatpush1.bf16.msra.mxu1 %v7623_v19  ;;  %v5458_v50 = vcvt.s32.f32 %v4946_v21  ;;  %v5462_v11 = vcvt.s32.f32 %v4950_v4  ;;  %v4433_v42 = vshra.s32 %v3684_v28, %v12383_v51  ;;  %v6436_v36 = vrot.slane %v5996_v61, %v12389_v57 }
 0x388   : > { %v5460_v48 = vcvt.s32.f32 %v4948_v22  ;;  %v5464_v54 = vcvt.s32.f32 %v4952_v17  ;;  %v14725_v6 = vrot.slane %v7291_v16, %v12389_v57  ;;  %v4437_v23 = vshra.s32 %v3700_v37, %v12383_v51 }
 0x389   : > { %v5754_v35 = vpack.c.bf16 %v5462_v11, %v5458_v50  ;;  %v4945_v32 = vand.u32 15, %v4433_v42  ;;  %v7270_v34 = vpack.i.b16 %v6436_v36, %v6436_v36  ;;  %v3692_v44 = vrot.slane %v14685_v29, %v12393_v59 }
 0x38a   : > { %v5756_v63 = vpack.c.bf16 %v5464_v54, %v5460_v48  ;;  %v4949_v9 = vand.u32 15, %v4437_v23  ;;  %v3708_v3 = vrot.slane %v14688_v38, %v12393_v59  ;;  %v6444_v53 = vrot.slane %v5996_v61, %v12393_v59 }
 0x38b   : > { %v7626_v47 = vmul.bf16 %v14717_v30, %v5754_v35  ;;  %v5457_v24 = vcvt.s32.f32 %v4945_v32  ;;  %v14737_v45 = vrot.slane %v7270_v34, %v12389_v57  ;;  %v4435_v18 = vshra.s32 %v3692_v44, %v12383_v51 }
 0x38c   : > { %v7628_v1 = vmul.bf16 %v14725_v6, %v5756_v63  ;;  %v5461_v25 = vcvt.s32.f32 %v4949_v9  ;;  %v4439_v39 = vshra.s32 %v3708_v3, %v12383_v51  ;;  %v7284_v62 = vpack.i.b16 %v6444_v53, %v6444_v53 }
 0x38d   : > { %7885 = vst [vmem:[%s12466_s18 + $0x6c8] sm:$0xff] %v7626_v47  ;;  %8113 = vmatprep.subr.bf16.mxu0 %v7626_v47  ;;  %v4947_v33 = vand.u32 15, %v4435_v18  ;;  %v1814_v61 = vcombine.high %v14685_v29, %v14685_v29  ;;  %v1816_v10 = vcombine.high %v14688_v38, %v14688_v38  ;;  %v1827_v0 = vrot.slane %v11706_v5, %v12385_v52 }
 0x38e   : > { %7887 = vst [vmem:[%s12466_s18 + $0x6d8] sm:$0xff] %v7628_v1  ;;  %8285 = vmatprep.subr.bf16.mxu1 %v7628_v1  ;;  %v5753_v14 = vpack.c.bf16 %v5461_v25, %v5457_v24  ;;  %v4951_v31 = vand.u32 15, %v4439_v39  ;;  %v14750_v55 = vrot.slane %v7284_v62, %v12389_v57  ;;  %v1841_v15 = vrot.slane %v11708_v40, %v12385_v52 }
 0x38f   : > { %v5459_v26 = vcvt.s32.f32 %v4947_v33  ;;  %v3720_v46 = vrot.slane %v1814_v61, %v12391_v58  ;;  %v3736_v29 = vrot.slane %v1816_v10, %v12391_v58  ;;  %v3728_v43 = vrot.slane %v1814_v61, %v12395_v60 }
 0x390   : > { %v7625_v38 = vmul.bf16 %v14737_v45, %v5753_v14  ;;  %v5463_v27 = vcvt.s32.f32 %v4951_v31  ;;  %v3744_v13 = vrot.slane %v1816_v10, %v12395_v60  ;;  %v3716_v28 = vrot.slane %v1814_v61, %v12389_v57 }
 0x391   : > { %v4442_v19 = vshra.s32 %v3720_v46, %v12383_v51  ;;  %v4446_v21 = vshra.s32 %v3736_v29, %v12383_v51  ;;  %v4444_v4 = vshra.s32 %v3728_v43, %v12383_v51  ;;  %v3732_v22 = vrot.slane %v1816_v10, %v12389_v57 }
 0x392   : > { %7884 = vst [vmem:[%s12466_s18 + $0x6c0] sm:$0xff] %v7625_v38  ;;  %8114 = vmatpush1.bf16.msra.mxu0 %v7625_v38  ;;  %v5755_v17 = vpack.c.bf16 %v5463_v27, %v5459_v26  ;;  %v4448_v16 = vshra.s32 %v3744_v13, %v12383_v51  ;;  %v4441_v37 = vshra.s32 %v3716_v28, %v12383_v51 }
 0x393   : > { %v3724_v50 = vrot.slane %v1814_v61, %v12393_v59  ;;  %v4954_v11 = vand.u32 15, %v4442_v19  ;;  %v4958_v42 = vand.u32 15, %v4446_v21  ;;  %v4956_v36 = vand.u32 15, %v4444_v4 }
 0x394   : > { %v4445_v48 = vshra.s32 %v3732_v22, %v12383_v51  ;;  %v7627_v54 = vmul.bf16 %v14750_v55, %v5755_v17  ;;  %v4960_v23 = vand.u32 15, %v4448_v16  ;;  %v4953_v35 = vand.u32 15, %v4441_v37 }
 0x395   : > { %v3740_v32 = vrot.slane %v1816_v10, %v12393_v59  ;;  %v5466_v34 = vcvt.s32.f32 %v4954_v11  ;;  %v5470_v44 = vcvt.s32.f32 %v4958_v42  ;;  %v5468_v5 = vcvt.s32.f32 %v4956_v36 }
 0x396   : > { %v4957_v63 = vand.u32 15, %v4445_v48  ;;  %7886 = vst [vmem:[%s12466_s18 + $0x6d0] sm:$0xff] %v7627_v54  ;;  %8286 = vmatpush1.bf16.msra.mxu1 %v7627_v54  ;;  %v5472_v9 = vcvt.s32.f32 %v4960_v23  ;;  %v5465_v3 = vcvt.s32.f32 %v4953_v35  ;;  %v4443_v53 = vshra.s32 %v3724_v50, %v12383_v51 }
 0x397   : > { %v4447_v40 = vshra.s32 %v3740_v32, %v12383_v51  ;;  %v5758_v47 = vpack.c.bf16 %v5470_v44, %v5466_v34  ;;  %v1849_v18 = vcombine.low %v1827_v0, %v1841_v15  ;;  %v1850_v1 = vcombine.high %v1827_v0, %v1841_v15 }
 0x398   : > { %v5469_v24 = vcvt.s32.f32 %v4957_v63  ;;  %v5760_v25 = vpack.c.bf16 %v5472_v9, %v5468_v5  ;;  %v4955_v39 = vand.u32 15, %v4443_v53  ;;  %v14775_v33 = vcombine.high %v14435_v49, %v14435_v49 }
 0x399   : > { %v4959_v62 = vand.u32 15, %v4447_v40  ;;  %v7630_v61 = vmul.bf16 %v14717_v30, %v5758_v47  ;;  %v1859_v14 = vrot.slane %v1849_v18, %v12385_v52  ;;  %v14780_v31 = vrot.slane %v1850_v1, %v12385_v52 }
 0x39a   : > { %v5757_v10 = vpack.c.bf16 %v5469_v24, %v5465_v3  ;;  %v7632_v26 = vmul.bf16 %v14725_v6, %v5760_v25  ;;  %v5467_v0 = vcvt.s32.f32 %v4955_v39  ;;  %v11091_v46 = vpack.i.b16 %v14775_v33, %v14775_v33 }
 0x39b   : > { %v5471_v15 = vcvt.s32.f32 %v4959_v62  ;;  %7889 = vst [vmem:[%s12466_s18 + $0x6e8] sm:$0xff] %v7630_v61  ;;  %8115 = vmatprep.subr.bf16.mxu0 %v7630_v61  ;;  %v3752_v30 = vrot.slane %v1859_v14, %v12391_v58  ;;  %v3768_v29 = vrot.slane %v14780_v31, %v12391_v58  ;;  %v3760_v43 = vrot.slane %v1859_v14, %v12395_v60 }
 0x39c   : > { %v7629_v49 = vmul.bf16 %v14737_v45, %v5757_v10  ;;  %7891 = vst [vmem:[%s12466_s18 + $0x6f8] sm:$0xff] %v7632_v26  ;;  %8287 = vmatprep.subr.bf16.mxu1 %v7632_v26  ;;  %v6456_v38 = vrot.slane %v11091_v46, %v12391_v58  ;;  %v3776_v27 = vrot.slane %v14780_v31, %v12395_v60 }
 0x39d   : > { %v5759_v6 = vpack.c.bf16 %v5471_v15, %v5467_v0  ;;  %v6464_v13 = vrot.slane %v11091_v46, %v12395_v60  ;;  %v4450_v45 = vshra.s32 %v3752_v30, %v12383_v51  ;;  %v4454_v28 = vshra.s32 %v3768_v29, %v12383_v51 }
 0x39e   : > { %7888 = vst [vmem:[%s12466_s18 + $0x6e0] sm:$0xff] %v7629_v49  ;;  %8116 = vmatpush1.bf16.msra.mxu0 %v7629_v49  ;;  %v4452_v19 = vshra.s32 %v3760_v43, %v12383_v51  ;;  %v3748_v21 = vrot.slane %v1859_v14, %v12389_v57  ;;  %v7305_v22 = vpack.i.b16 %v6456_v38, %v6456_v38 }
 0x39f   : > { %v7631_v4 = vmul.bf16 %v14750_v55, %v5759_v6  ;;  %v4456_v17 = vshra.s32 %v3776_v27, %v12383_v51  ;;  %v7319_v16 = vpack.i.b16 %v6464_v13, %v6464_v13  ;;  %v4962_v37 = vand.u32 15, %v4450_v45 }
 0x3a0   : > { %v4966_v50 = vand.u32 15, %v4454_v28  ;;  %v4964_v11 = vand.u32 15, %v4452_v19  ;;  %v3764_v42 = vrot.slane %v14780_v31, %v12389_v57  ;;  %v14807_v36 = vrot.slane %v7305_v22, %v12389_v57 }
 0x3a1   : > { %7890 = vst [vmem:[%s12466_s18 + $0x6f0] sm:$0xff] %v7631_v4  ;;  %8288 = vmatpush1.bf16.msra.mxu1 %v7631_v4  ;;  %v4968_v48 = vand.u32 15, %v4456_v17  ;;  %v14810_v54 = vrot.slane %v7319_v16, %v12389_v57  ;;  %v4449_v55 = vshra.s32 %v3748_v21, %v12383_v51  ;;  %v5474_v23 = vcvt.s32.f32 %v4962_v37 }
 0x3a2   : > { %v5478_v35 = vcvt.s32.f32 %v4966_v50  ;;  %v5476_v32 = vcvt.s32.f32 %v4964_v11  ;;  %v4453_v34 = vshra.s32 %v3764_v42, %v12383_v51  ;;  %v6452_v63 = vrot.slane %v11091_v46, %v12389_v57  ;;  %v11710_v11 = vld [vmem:[%s12364_s6 + $0x1c4] ss:$8 sps:$4 sm:$0xff]  }
 0x3a3   : > { %v5480_v44 = vcvt.s32.f32 %v4968_v48  ;;  %v4961_v5 = vand.u32 15, %v4449_v55  ;;  %v3756_v9 = vrot.slane %v1859_v14, %v12393_v59  ;;  %v3772_v40 = vrot.slane %v14780_v31, %v12393_v59 }
 0x3a4   : > { %v5762_v3 = vpack.c.bf16 %v5478_v35, %v5474_v23  ;;  %v4965_v53 = vand.u32 15, %v4453_v34  ;;  %v6460_v47 = vrot.slane %v11091_v46, %v12393_v59  ;;  %v7298_v1 = vpack.i.b16 %v6452_v63, %v6452_v63  ;;  %v11711_v35 = vld [vmem:[%s12364_s6 + $0x1d4] ss:$8 sps:$4 sm:$0xff]  }
 0x3a5   : > { %v5764_v24 = vpack.c.bf16 %v5480_v44, %v5476_v32  ;;  %v5473_v18 = vcvt.s32.f32 %v4961_v5  ;;  %v4451_v25 = vshra.s32 %v3756_v9, %v12383_v51  ;;  %v4455_v61 = vshra.s32 %v3772_v40, %v12383_v51 }
 0x3a6   : > { %v7634_v39 = vmul.bf16 %v14807_v36, %v5762_v3  ;;  %v5477_v62 = vcvt.s32.f32 %v4965_v53  ;;  %v7312_v10 = vpack.i.b16 %v6460_v47, %v6460_v47  ;;  %v14824_v0 = vrot.slane %v7298_v1, %v12389_v57 }
 0x3a7   : > { %v7636_v26 = vmul.bf16 %v14810_v54, %v5764_v24  ;;  %v4963_v15 = vand.u32 15, %v4451_v25  ;;  %v1881_v49 = vcombine.high %v1859_v14, %v1859_v14  ;;  %v4967_v30 = vand.u32 15, %v4455_v61 }
 0x3a8   : > { %7893 = vst [vmem:[%s12466_s18 + $0x708] sm:$0xff] %v7634_v39  ;;  %8117 = vmatprep.subr.bf16.mxu0 %v7634_v39  ;;  %v5761_v46 = vpack.c.bf16 %v5477_v62, %v5473_v18  ;;  %v14828_v29 = vrot.slane %v7312_v10, %v12389_v57  ;;  %v1883_v43 = vcombine.high %v14780_v31, %v14780_v31  ;;  %v5966_v62 = vunpack.i.h.s16 %v14775_v33 }
 0x3a9   : > { %7895 = vst [vmem:[%s12466_s18 + $0x718] sm:$0xff] %v7636_v26  ;;  %8289 = vmatprep.subr.bf16.mxu1 %v7636_v26  ;;  %v5475_v6 = vcvt.s32.f32 %v4963_v15  ;;  %v3784_v38 = vrot.slane %v1881_v49, %v12391_v58  ;;  %v3792_v27 = vrot.slane %v1881_v49, %v12395_v60  ;;  %v3780_v14 = vrot.slane %v1881_v49, %v12389_v57 }
 0x3aa   : > { %v7633_v13 = vmul.bf16 %v14824_v0, %v5761_v46  ;;  %v5479_v45 = vcvt.s32.f32 %v4967_v30  ;;  %v3800_v28 = vrot.slane %v1883_v43, %v12391_v58  ;;  %v3808_v19 = vrot.slane %v1883_v43, %v12395_v60 }
 0x3ab   : > { %v4458_v31 = vshra.s32 %v3784_v38, %v12383_v51  ;;  %v4460_v21 = vshra.s32 %v3792_v27, %v12383_v51  ;;  %v3796_v4 = vrot.slane %v1883_v43, %v12389_v57  ;;  %v4457_v22 = vshra.s32 %v3780_v14, %v12383_v51 }
 0x3ac   : > { %7892 = vst [vmem:[%s12466_s18 + $0x700] sm:$0xff] %v7633_v13  ;;  %8118 = vmatpush1.bf16.msra.mxu0 %v7633_v13  ;;  %v5763_v17 = vpack.c.bf16 %v5479_v45, %v5475_v6  ;;  %v4462_v16 = vshra.s32 %v3800_v28, %v12383_v51  ;;  %v4464_v37 = vshra.s32 %v3808_v19, %v12383_v51 }
 0x3ad   : > { %v3788_v50 = vrot.slane %v1881_v49, %v12393_v59  ;;  %v4970_v42 = vand.u32 15, %v4458_v31  ;;  %v4972_v48 = vand.u32 15, %v4460_v21  ;;  %v4461_v55 = vshra.s32 %v3796_v4, %v12383_v51 }
 0x3ae   : > { %v4969_v23 = vand.u32 15, %v4457_v22  ;;  %v7635_v32 = vmul.bf16 %v14828_v29, %v5763_v17  ;;  %v4974_v34 = vand.u32 15, %v4462_v16  ;;  %v4976_v44 = vand.u32 15, %v4464_v37 }
 0x3af   : > { %v3804_v5 = vrot.slane %v1883_v43, %v12393_v59  ;;  %v5482_v63 = vcvt.s32.f32 %v4970_v42  ;;  %v5484_v9 = vcvt.s32.f32 %v4972_v48  ;;  %v4973_v3 = vand.u32 15, %v4461_v55 }
 0x3b0   : > { %v5481_v53 = vcvt.s32.f32 %v4969_v23  ;;  %7894 = vst [vmem:[%s12466_s18 + $0x710] sm:$0xff] %v7635_v32  ;;  %8290 = vmatpush1.bf16.msra.mxu1 %v7635_v32  ;;  %v5486_v40 = vcvt.s32.f32 %v4974_v34  ;;  %v5488_v47 = vcvt.s32.f32 %v4976_v44  ;;  %v4459_v24 = vshra.s32 %v3788_v50, %v12383_v51 }
 0x3b1   : > { %v4463_v18 = vshra.s32 %v3804_v5, %v12383_v51  ;;  %v5485_v1 = vcvt.s32.f32 %v4973_v3  ;;  %v1834_v25 = vrot.slane %v11710_v11, %v12385_v52  ;;  %v1848_v39 = vrot.slane %v11711_v35, %v12385_v52 }
 0x3b2   : > { %v5766_v61 = vpack.c.bf16 %v5486_v40, %v5482_v63  ;;  %v5768_v10 = vpack.c.bf16 %v5488_v47, %v5484_v9  ;;  %v4971_v26 = vand.u32 15, %v4459_v24  ;;  %v5998_v43 = vpack.i.b16 %v5966_v62, %v5966_v62 }
 0x3b3   : > { %v4975_v15 = vand.u32 15, %v4463_v18  ;;  %v5765_v49 = vpack.c.bf16 %v5485_v1, %v5481_v53  ;;  %v1851_v46 = vcombine.low %v1834_v25, %v1848_v39  ;;  %v1852_v30 = vcombine.high %v1834_v25, %v1848_v39 }
 0x3b4   : > { %v7638_v6 = vmul.bf16 %v14807_v36, %v5766_v61  ;;  %v7640_v38 = vmul.bf16 %v14810_v54, %v5768_v10  ;;  %v5483_v27 = vcvt.s32.f32 %v4971_v26  ;;  %v6472_v28 = vrot.slane %v5998_v43, %v12391_v58 }
 0x3b5   : > { %v5487_v14 = vcvt.s32.f32 %v4975_v15  ;;  %v7637_v13 = vmul.bf16 %v14824_v0, %v5765_v49  ;;  %v1866_v33 = vrot.slane %v1851_v46, %v12385_v52  ;;  %v1880_v45 = vrot.slane %v1852_v30, %v12385_v52 }
 0x3b6   : > { %7897 = vst [vmem:[%s12466_s18 + $0x728] sm:$0xff] %v7638_v6  ;;  %8119 = vmatprep.subr.bf16.mxu0 %v7638_v6  ;;  %7899 = vst [vmem:[%s12466_s18 + $0x738] sm:$0xff] %v7640_v38  ;;  %8291 = vmatprep.subr.bf16.mxu1 %v7640_v38  ;;  %v6480_v31 = vrot.slane %v5998_v43, %v12395_v60  ;;  %v6468_v36 = vrot.slane %v5998_v43, %v12389_v57 }
 0x3b7   : > { %v5767_v19 = vpack.c.bf16 %v5487_v14, %v5483_v27  ;;  %7896 = vst [vmem:[%s12466_s18 + $0x720] sm:$0xff] %v7637_v13  ;;  %8120 = vmatpush1.bf16.msra.mxu0 %v7637_v13  ;;  %v3816_v54 = vrot.slane %v1866_v33, %v12391_v58  ;;  %v3832_v0 = vrot.slane %v1880_v45, %v12391_v58 }
 0x3b8   : > { %v7333_v21 = vpack.i.b16 %v6472_v28, %v6472_v28  ;;  %v3824_v4 = vrot.slane %v1866_v33, %v12395_v60  ;;  %v3840_v17 = vrot.slane %v1880_v45, %v12395_v60  ;;  %v7347_v16 = vpack.i.b16 %v6480_v31, %v6480_v31 }
 0x3b9   : > { %v7639_v22 = vmul.bf16 %v14828_v29, %v5767_v19  ;;  %v3812_v37 = vrot.slane %v1866_v33, %v12389_v57  ;;  %v4466_v50 = vshra.s32 %v3816_v54, %v12383_v51  ;;  %v4470_v11 = vshra.s32 %v3832_v0, %v12383_v51 }
 0x3ba   : > { %v14878_v42 = vrot.slane %v7333_v21, %v12389_v57  ;;  %v4468_v48 = vshra.s32 %v3824_v4, %v12383_v51  ;;  %v4472_v55 = vshra.s32 %v3840_v17, %v12383_v51  ;;  %v14884_v29 = vrot.slane %v7347_v16, %v12389_v57 }
 0x3bb   : > { %7898 = vst [vmem:[%s12466_s18 + $0x730] sm:$0xff] %v7639_v22  ;;  %8292 = vmatpush1.bf16.msra.mxu1 %v7639_v22  ;;  %v3828_v23 = vrot.slane %v1880_v45, %v12389_v57  ;;  %v4465_v35 = vshra.s32 %v3812_v37, %v12383_v51  ;;  %v4978_v32 = vand.u32 15, %v4466_v50  ;;  %v4982_v34 = vand.u32 15, %v4470_v11 }
 0x3bc   : > { %v4980_v44 = vand.u32 15, %v4468_v48  ;;  %v7326_v5 = vpack.i.b16 %v6468_v36, %v6468_v36  ;;  %v4984_v63 = vand.u32 15, %v4472_v55  ;;  %v3820_v53 = vrot.slane %v1866_v33, %v12393_v59 }
 0x3bd   : > { %v4469_v9 = vshra.s32 %v3828_v23, %v12383_v51  ;;  %v4977_v3 = vand.u32 15, %v4465_v35  ;;  %v5490_v40 = vcvt.s32.f32 %v4978_v32  ;;  %v5494_v47 = vcvt.s32.f32 %v4982_v34  ;;  %v11712_v35 = vld [vmem:[%s12364_s6 + $0x1e0] ss:$8 sps:$4 sm:$0xff]  }
 0x3be   : > { %v5492_v24 = vcvt.s32.f32 %v4980_v44  ;;  %v14891_v18 = vrot.slane %v7326_v5, %v12389_v57  ;;  %v5496_v1 = vcvt.s32.f32 %v4984_v63  ;;  %v3836_v62 = vrot.slane %v1880_v45, %v12393_v59  ;;  %v11714_v63 = vld [vmem:[%s12364_s6 + $0x1f0] ss:$8 sps:$4 sm:$0xff]  }
 0x3bf   : > { %v4981_v25 = vand.u32 15, %v4469_v9  ;;  %v5489_v39 = vcvt.s32.f32 %v4977_v3  ;;  %v5770_v61 = vpack.c.bf16 %v5494_v47, %v5490_v40  ;;  %v4467_v10 = vshra.s32 %v3820_v53, %v12383_v51 }
 0x3c0   : > { %v6476_v26 = vrot.slane %v5998_v43, %v12393_v59  ;;  %v1882_v15 = vcombine.high %v1866_v33, %v1866_v33  ;;  %v5772_v49 = vpack.c.bf16 %v5496_v1, %v5492_v24  ;;  %v4471_v30 = vshra.s32 %v3836_v62, %v12383_v51 }
 0x3c1   : > { %v5493_v46 = vcvt.s32.f32 %v4981_v25  ;;  %v1884_v6 = vcombine.high %v1880_v45, %v1880_v45  ;;  %v7642_v38 = vmul.bf16 %v14878_v42, %v5770_v61  ;;  %v4979_v27 = vand.u32 15, %v4467_v10 }
 0x3c2   : > { %v7340_v14 = vpack.i.b16 %v6476_v26, %v6476_v26  ;;  %v3848_v13 = vrot.slane %v1882_v15, %v12391_v58  ;;  %v7644_v28 = vmul.bf16 %v14884_v29, %v5772_v49  ;;  %v4983_v31 = vand.u32 15, %v4471_v30  ;;  %v11716_v26 = vld [vmem:[%s12364_s6 + $0x1e4] ss:$8 sps:$4 sm:$0xff]  }
 0x3c3   : > { %v5769_v19 = vpack.c.bf16 %v5493_v46, %v5489_v39  ;;  %v3864_v36 = vrot.slane %v1884_v6, %v12391_v58  ;;  %7901 = vst [vmem:[%s12466_s18 + $0x748] sm:$0xff] %v7642_v38  ;;  %8121 = vmatprep.subr.bf16.mxu0 %v7642_v38  ;;  %v5491_v43 = vcvt.s32.f32 %v4979_v27  ;;  %v3856_v54 = vrot.slane %v1882_v15, %v12395_v60 }
 0x3c4   : > { %v14903_v33 = vrot.slane %v7340_v14, %v12389_v57  ;;  %v4474_v45 = vshra.s32 %v3848_v13, %v12383_v51  ;;  %7903 = vst [vmem:[%s12466_s18 + $0x758] sm:$0xff] %v7644_v28  ;;  %8293 = vmatprep.subr.bf16.mxu1 %v7644_v28  ;;  %v5495_v21 = vcvt.s32.f32 %v4983_v31  ;;  %v3872_v22 = vrot.slane %v1884_v6, %v12395_v60 }
 0x3c5   : > { %v7641_v0 = vmul.bf16 %v14891_v18, %v5769_v19  ;;  %v4478_v4 = vshra.s32 %v3864_v36, %v12383_v51  ;;  %v4476_v16 = vshra.s32 %v3856_v54, %v12383_v51  ;;  %v3844_v37 = vrot.slane %v1882_v15, %v12389_v57 }
 0x3c6   : > { %v4986_v17 = vand.u32 15, %v4474_v45  ;;  %v3860_v50 = vrot.slane %v1884_v6, %v12389_v57  ;;  %v5771_v11 = vpack.c.bf16 %v5495_v21, %v5491_v43  ;;  %v4480_v55 = vshra.s32 %v3872_v22, %v12383_v51 }
 0x3c7   : > { %7900 = vst [vmem:[%s12466_s18 + $0x740] sm:$0xff] %v7641_v0  ;;  %8122 = vmatpush1.bf16.msra.mxu0 %v7641_v0  ;;  %v4990_v48 = vand.u32 15, %v4478_v4  ;;  %v3852_v23 = vrot.slane %v1882_v15, %v12393_v59  ;;  %v4988_v34 = vand.u32 15, %v4476_v16  ;;  %v4473_v44 = vshra.s32 %v3844_v37, %v12383_v51 }
 0x3c8   : > { %v5498_v32 = vcvt.s32.f32 %v4986_v17  ;;  %v4477_v5 = vshra.s32 %v3860_v50, %v12383_v51  ;;  %v7643_v9 = vmul.bf16 %v14903_v33, %v5771_v11  ;;  %v4992_v53 = vand.u32 15, %v4480_v55 }
 0x3c9   : > { %v5502_v3 = vcvt.s32.f32 %v4990_v48  ;;  %v3868_v40 = vrot.slane %v1884_v6, %v12393_v59  ;;  %v5500_v47 = vcvt.s32.f32 %v4988_v34  ;;  %v4985_v24 = vand.u32 15, %v4473_v44  ;;  %v11717_v6 = vld [vmem:[%s12364_s6 + $0x1f4] ss:$8 sps:$4 sm:$0xff]  }
 0x3ca   : > { %v4989_v1 = vand.u32 15, %v4477_v5  ;;  %v4475_v25 = vshra.s32 %v3852_v23, %v12383_v51  ;;  %7902 = vst [vmem:[%s12466_s18 + $0x750] sm:$0xff] %v7643_v9  ;;  %8294 = vmatpush1.bf16.msra.mxu1 %v7643_v9  ;;  %v5504_v62 = vcvt.s32.f32 %v4992_v53  ;;  %v1895_v10 = vrot.slane %v11712_v35, %v12385_v52 }
 0x3cb   : > { %v5774_v39 = vpack.c.bf16 %v5502_v3, %v5498_v32  ;;  %v4479_v61 = vshra.s32 %v3868_v40, %v12383_v51  ;;  %v5497_v15 = vcvt.s32.f32 %v4985_v24  ;;  %v1909_v30 = vrot.slane %v11714_v63, %v12385_v52 }
 0x3cc   : > { %v5501_v49 = vcvt.s32.f32 %v4989_v1  ;;  %v4987_v46 = vand.u32 15, %v4475_v25  ;;  %v5776_v27 = vpack.c.bf16 %v5504_v62, %v5500_v47  ;;  %v14933_v13 = vcombine.high %v14604_v7, %v14604_v7 }
 0x3cd   : > { %v7646_v38 = vmul.bf16 %v14878_v42, %v5774_v39  ;;  %v4991_v14 = vand.u32 15, %v4479_v61  ;;  %v1917_v31 = vcombine.low %v1895_v10, %v1909_v30  ;;  %v1918_v36 = vcombine.high %v1895_v10, %v1909_v30 }
 0x3ce   : > { %v5773_v28 = vpack.c.bf16 %v5501_v49, %v5497_v15  ;;  %v5499_v19 = vcvt.s32.f32 %v4987_v46  ;;  %v7648_v43 = vmul.bf16 %v14884_v29, %v5776_v27  ;;  %v11092_v42 = vpack.i.b16 %v14933_v13, %v14933_v13 }
 0x3cf   : > { %7905 = vst [vmem:[%s12466_s18 + $0x768] sm:$0xff] %v7646_v38  ;;  %8123 = vmatprep.subr.bf16.mxu0 %v7646_v38  ;;  %v5503_v45 = vcvt.s32.f32 %v4991_v14  ;;  %v14940_v54 = vrot.slane %v11716_v26, %v12385_v52  ;;  %v1927_v7 = vrot.slane %v1917_v31, %v12385_v52  ;;  %v1941_v21 = vrot.slane %v1918_v36, %v12385_v52 }
 0x3d0   : > { %v7645_v0 = vmul.bf16 %v14891_v18, %v5773_v28  ;;  %v14946_v4 = vrot.slane %v11717_v6, %v12385_v52  ;;  %7907 = vst [vmem:[%s12466_s18 + $0x778] sm:$0xff] %v7648_v43  ;;  %8295 = vmatprep.subr.bf16.mxu1 %v7648_v43  ;;  %v6488_v29 = vrot.slane %v11092_v42, %v12391_v58 }
 0x3d1   : > { %v5775_v22 = vpack.c.bf16 %v5503_v45, %v5499_v19  ;;  %v6496_v17 = vrot.slane %v11092_v42, %v12395_v60  ;;  %v6484_v16 = vrot.slane %v11092_v42, %v12389_v57  ;;  %v3880_v18 = vrot.slane %v1927_v7, %v12391_v58 }
 0x3d2   : > { %7904 = vst [vmem:[%s12466_s18 + $0x760] sm:$0xff] %v7645_v0  ;;  %8124 = vmatpush1.bf16.msra.mxu0 %v7645_v0  ;;  %v3896_v37 = vrot.slane %v1941_v21, %v12391_v58  ;;  %v3888_v50 = vrot.slane %v1927_v7, %v12395_v60  ;;  %v3904_v11 = vrot.slane %v1941_v21, %v12395_v60 }
 0x3d3   : > { %v7647_v48 = vmul.bf16 %v14903_v33, %v5775_v22  ;;  %v7361_v55 = vpack.i.b16 %v6488_v29, %v6488_v29  ;;  %v7375_v23 = vpack.i.b16 %v6496_v17, %v6496_v17  ;;  %v3876_v35 = vrot.slane %v1927_v7, %v12389_v57 }
 0x3d4   : > { %v4482_v32 = vshra.s32 %v3880_v18, %v12383_v51  ;;  %v4486_v34 = vshra.s32 %v3896_v37, %v12383_v51  ;;  %v4484_v44 = vshra.s32 %v3888_v50, %v12383_v51  ;;  %v4488_v5 = vshra.s32 %v3904_v11, %v12383_v51 }
 0x3d5   : > { %7906 = vst [vmem:[%s12466_s18 + $0x770] sm:$0xff] %v7647_v48  ;;  %8296 = vmatpush1.bf16.msra.mxu1 %v7647_v48  ;;  %v14965_v63 = vrot.slane %v7361_v55, %v12389_v57  ;;  %v14968_v9 = vrot.slane %v7375_v23, %v12389_v57  ;;  %v3892_v33 = vrot.slane %v1941_v21, %v12389_v57 }
 0x3d6   : > { %v4481_v3 = vshra.s32 %v3876_v35, %v12383_v51  ;;  %v4994_v53 = vand.u32 15, %v4482_v32  ;;  %v4998_v40 = vand.u32 15, %v4486_v34  ;;  %v4996_v47 = vand.u32 15, %v4484_v44 }
 0x3d7   : > { %v5000_v24 = vand.u32 15, %v4488_v5  ;;  %v4485_v1 = vshra.s32 %v3892_v33, %v12383_v51  ;;  %v7354_v39 = vpack.i.b16 %v6484_v16, %v6484_v16  ;;  %v3884_v62 = vrot.slane %v1927_v7, %v12393_v59 }
 0x3d8   : > { %v4993_v25 = vand.u32 15, %v4481_v3  ;;  %v5506_v61 = vcvt.s32.f32 %v4994_v53  ;;  %v5510_v10 = vcvt.s32.f32 %v4998_v40  ;;  %v5508_v26 = vcvt.s32.f32 %v4996_v47 }
 0x3d9   : > { %v5512_v15 = vcvt.s32.f32 %v5000_v24  ;;  %v4997_v49 = vand.u32 15, %v4485_v1  ;;  %v14975_v30 = vrot.slane %v7354_v39, %v12389_v57  ;;  %v3900_v6 = vrot.slane %v1941_v21, %v12393_v59 }
 0x3da   : > { %v5505_v46 = vcvt.s32.f32 %v4993_v25  ;;  %v5778_v38 = vpack.c.bf16 %v5510_v10, %v5506_v61  ;;  %v4483_v14 = vshra.s32 %v3884_v62, %v12383_v51  ;;  %v6492_v28 = vrot.slane %v11092_v42, %v12393_v59 }
 0x3db   : > { %v5780_v27 = vpack.c.bf16 %v5512_v15, %v5508_v26  ;;  %v5509_v19 = vcvt.s32.f32 %v4997_v49  ;;  %v4487_v31 = vshra.s32 %v3900_v6, %v12383_v51  ;;  %v1949_v36 = vcombine.high %v1927_v7, %v1927_v7 }
 0x3dc   : > { %v1951_v43 = vcombine.high %v1941_v21, %v1941_v21  ;;  %v7650_v45 = vmul.bf16 %v14965_v63, %v5778_v38  ;;  %v4995_v22 = vand.u32 15, %v4483_v14  ;;  %v7368_v29 = vpack.i.b16 %v6492_v28, %v6492_v28 }
 0x3dd   : > { %v7652_v0 = vmul.bf16 %v14968_v9, %v5780_v27  ;;  %v5777_v17 = vpack.c.bf16 %v5509_v19, %v5505_v46  ;;  %v4999_v16 = vand.u32 15, %v4487_v31  ;;  %v3912_v18 = vrot.slane %v1949_v36, %v12391_v58 }
 0x3de   : > { %v3928_v37 = vrot.slane %v1951_v43, %v12391_v58  ;;  %7909 = vst [vmem:[%s12466_s18 + $0x788] sm:$0xff] %v7650_v45  ;;  %8125 = vmatprep.subr.bf16.mxu0 %v7650_v45  ;;  %v5507_v42 = vcvt.s32.f32 %v4995_v22  ;;  %v14988_v7 = vrot.slane %v7368_v29, %v12389_v57  ;;  %v3920_v21 = vrot.slane %v1949_v36, %v12395_v60 }
 0x3df   : > { %7911 = vst [vmem:[%s12466_s18 + $0x798] sm:$0xff] %v7652_v0  ;;  %8297 = vmatprep.subr.bf16.mxu1 %v7652_v0  ;;  %v3936_v50 = vrot.slane %v1951_v43, %v12395_v60  ;;  %v7649_v11 = vmul.bf16 %v14975_v30, %v5777_v17  ;;  %v5511_v48 = vcvt.s32.f32 %v4999_v16  ;;  %v4490_v55 = vshra.s32 %v3912_v18, %v12383_v51 }
 0x3e0   : > { %v4494_v23 = vshra.s32 %v3928_v37, %v12383_v51  ;;  %v4492_v35 = vshra.s32 %v3920_v21, %v12383_v51  ;;  %v3908_v34 = vrot.slane %v1949_v36, %v12389_v57  ;;  %v3924_v44 = vrot.slane %v1951_v43, %v12389_v57 }
 0x3e1   : > { %v4496_v32 = vshra.s32 %v3936_v50, %v12383_v51  ;;  %7908 = vst [vmem:[%s12466_s18 + $0x780] sm:$0xff] %v7649_v11  ;;  %8126 = vmatpush1.bf16.msra.mxu0 %v7649_v11  ;;  %v5779_v5 = vpack.c.bf16 %v5511_v48, %v5507_v42  ;;  %v5002_v33 = vand.u32 15, %v4490_v55  ;;  %v3916_v53 = vrot.slane %v1949_v36, %v12393_v59 }
 0x3e2   : > { %v5006_v3 = vand.u32 15, %v4494_v23  ;;  %v5004_v40 = vand.u32 15, %v4492_v35  ;;  %v4489_v24 = vshra.s32 %v3908_v34, %v12383_v51  ;;  %v4493_v1 = vshra.s32 %v3924_v44, %v12383_v51 }
 0x3e3   : > { %v5008_v47 = vand.u32 15, %v4496_v32  ;;  %v7651_v25 = vmul.bf16 %v14988_v7, %v5779_v5  ;;  %v5514_v39 = vcvt.s32.f32 %v5002_v33  ;;  %v3932_v61 = vrot.slane %v1951_v43, %v12393_v59 }
 0x3e4   : > { %v5518_v62 = vcvt.s32.f32 %v5006_v3  ;;  %v5516_v10 = vcvt.s32.f32 %v5004_v40  ;;  %v5001_v15 = vand.u32 15, %v4489_v24  ;;  %v5005_v49 = vand.u32 15, %v4493_v1 }
 0x3e5   : > { %v5520_v26 = vcvt.s32.f32 %v5008_v47  ;;  %7910 = vst [vmem:[%s12466_s18 + $0x790] sm:$0xff] %v7651_v25  ;;  %8298 = vmatpush1.bf16.msra.mxu1 %v7651_v25  ;;  %v4491_v6 = vshra.s32 %v3916_v53, %v12383_v51  ;;  %v4495_v38 = vshra.s32 %v3932_v61, %v12383_v51  ;;  %v1919_v27 = vcombine.low %v14940_v54, %v14946_v4 }
 0x3e6   : > { %v5782_v46 = vpack.c.bf16 %v5518_v62, %v5514_v39  ;;  %v5513_v28 = vcvt.s32.f32 %v5001_v15  ;;  %v5517_v19 = vcvt.s32.f32 %v5005_v49  ;;  %v1920_v31 = vcombine.high %v14940_v54, %v14946_v4 }
 0x3e7   : > { %v5784_v14 = vpack.c.bf16 %v5520_v26, %v5516_v10  ;;  %v5003_v43 = vand.u32 15, %v4491_v6  ;;  %v5007_v45 = vand.u32 15, %v4495_v38  ;;  %v15014_v0 = vrot.slane %v1919_v27, %v12385_v52 }
 0x3e8   : > { %v7654_v36 = vmul.bf16 %v14965_v63, %v5782_v46  ;;  %v5781_v29 = vpack.c.bf16 %v5517_v19, %v5513_v28  ;;  %v15018_v17 = vrot.slane %v1920_v31, %v12385_v52  ;;  %v5968_v16 = vunpack.i.h.s16 %v14933_v13 }
 0x3e9   : > { %v7656_v22 = vmul.bf16 %v14968_v9, %v5784_v14  ;;  %v5515_v18 = vcvt.s32.f32 %v5003_v43  ;;  %v5519_v54 = vcvt.s32.f32 %v5007_v45  ;;  %v3944_v4 = vrot.slane %v15014_v0, %v12391_v58 }
 0x3ea   : > { %7913 = vst [vmem:[%s12466_s18 + $0x7a8] sm:$0xff] %v7654_v36  ;;  %8127 = vmatprep.subr.bf16.mxu0 %v7654_v36  ;;  %v3952_v63 = vrot.slane %v15014_v0, %v12395_v60  ;;  %v7653_v9 = vmul.bf16 %v14975_v30, %v5781_v29  ;;  %v3960_v52 = vrot.slane %v15018_v17, %v12391_v58 }
 0x3eb   : > { %7915 = vst [vmem:[%s12466_s18 + $0x7b8] sm:$0xff] %v7656_v22  ;;  %8299 = vmatprep.subr.bf16.mxu1 %v7656_v22  ;;  %v6000_v37 = vpack.i.b16 %v5968_v16, %v5968_v16  ;;  %v3968_v13 = vrot.slane %v15018_v17, %v12395_v60  ;;  %v5783_v42 = vpack.c.bf16 %v5519_v54, %v5515_v18 }
 0x3ec   : > { %v4498_v21 = vshra.s32 %v3944_v4, %v12383_v51  ;;  %v4500_v50 = vshra.s32 %v3952_v63, %v12383_v51  ;;  %v3940_v11 = vrot.slane %v15014_v0, %v12389_v57  ;;  %7912 = vst [vmem:[%s12466_s18 + $0x7a0] sm:$0xff] %v7653_v9  ;;  %8128 = vmatpush1.bf16.msra.mxu0 %v7653_v9 }
 0x3ed   : > { %v4502_v30 = vshra.s32 %v3960_v52, %v12383_v51  ;;  %v6504_v48 = vrot.slane %v6000_v37, %v12391_v58  ;;  %v4504_v55 = vshra.s32 %v3968_v13, %v12383_v51  ;;  %v6512_v23 = vrot.slane %v6000_v37, %v12395_v60 }
 0x3ee   : > { %v7655_v35 = vmul.bf16 %v14988_v7, %v5783_v42  ;;  %v5010_v32 = vand.u32 15, %v4498_v21  ;;  %v5012_v34 = vand.u32 15, %v4500_v50  ;;  %v3956_v44 = vrot.slane %v15018_v17, %v12389_v57 }
 0x3ef   : > { %v5014_v5 = vand.u32 15, %v4502_v30  ;;  %v7389_v33 = vpack.i.b16 %v6504_v48, %v6504_v48  ;;  %v5016_v3 = vand.u32 15, %v4504_v55  ;;  %v7403_v53 = vpack.i.b16 %v6512_v23, %v6512_v23 }
 0x3f0   : > { %7914 = vst [vmem:[%s12466_s18 + $0x7b0] sm:$0xff] %v7655_v35  ;;  %8300 = vmatpush1.bf16.msra.mxu1 %v7655_v35  ;;  %v5522_v40 = vcvt.s32.f32 %v5010_v32  ;;  %v5524_v47 = vcvt.s32.f32 %v5012_v34  ;;  %v4497_v24 = vshra.s32 %v3940_v11, %v12383_v51  ;;  %v4501_v1 = vshra.s32 %v3956_v44, %v12383_v51 }
 0x3f1   : > { %v5526_v25 = vcvt.s32.f32 %v5014_v5  ;;  %v15048_v7 = vrot.slane %v7389_v33, %v12389_v57  ;;  %v5528_v39 = vcvt.s32.f32 %v5016_v3  ;;  %v15051_v62 = vrot.slane %v7403_v53, %v12389_v57 }
 0x3f2   : > { %v5009_v61 = vand.u32 15, %v4497_v24  ;;  %v5013_v10 = vand.u32 15, %v4501_v1  ;;  %v6500_v26 = vrot.slane %v6000_v37, %v12389_v57  ;;  %v3948_v15 = vrot.slane %v15014_v0, %v12393_v59  ;;  %v7927_v24 = vld [vmem:[%s16102_s1 + $0x18] sm:$0xff] }
 0x3f3   : > { %v5786_v49 = vpack.c.bf16 %v5526_v25, %v5522_v40  ;;  %v5788_v46 = vpack.c.bf16 %v5528_v39, %v5524_v47  ;;  %v3964_v6 = vrot.slane %v15018_v17, %v12393_v59  ;;  %v6508_v38 = vrot.slane %v6000_v37, %v12393_v59  ;;  %v7931_v1 = vld [vmem:[%s16102_s1 + $0x38] sm:$0xff] }
 0x3f4   : > { %v5521_v27 = vcvt.s32.f32 %v5009_v61  ;;  %v5525_v14 = vcvt.s32.f32 %v5013_v10  ;;  %v7382_v28 = vpack.i.b16 %v6500_v26, %v6500_v26  ;;  %v4499_v19 = vshra.s32 %v3948_v15, %v12383_v51 }
 0x3f5   : > { %v7658_v31 = vmul.bf16 %v15048_v7, %v5786_v49  ;;  %v7660_v36 = vmul.bf16 %v15051_v62, %v5788_v46  ;;  %v4503_v43 = vshra.s32 %v3964_v6, %v12383_v51  ;;  %v7396_v45 = vpack.i.b16 %v6508_v38, %v6508_v38 }
 0x3f6   : > { %v5785_v22 = vpack.c.bf16 %v5525_v14, %v5521_v27  ;;  %v7387_v29 = vrot.slane %v7382_v28, %v12389_v57  ;;  %v5011_v16 = vand.u32 15, %v4499_v19  ;;  %v1950_v18 = vcombine.high %v15014_v0, %v15014_v0 }
 0x3f7   : > { %7917 = vst [vmem:[%s12466_s18 + $0x7c8] sm:$0xff] %v7658_v31  ;;  %8129 = vmatprep.subr.bf16.mxu0 %v7658_v31  ;;  %7919 = vst [vmem:[%s12466_s18 + $0x7d8] sm:$0xff] %v7660_v36  ;;  %8301 = vmatprep.subr.bf16.mxu1 %v7660_v36  ;;  %v5015_v54 = vand.u32 15, %v4503_v43  ;;  %v15069_v4 = vrot.slane %v7396_v45, %v12389_v57  ;;  %v1952_v63 = vcombine.high %v15018_v17, %v15018_v17 }
 0x3f8   : > { %v7657_v9 = vmul.bf16 %v7387_v29, %v5785_v22  ;;  %v5523_v52 = vcvt.s32.f32 %v5011_v16  ;;  %v3976_v37 = vrot.slane %v1950_v18, %v12391_v58  ;;  %v3984_v13 = vrot.slane %v1950_v18, %v12395_v60  ;;  %v11718_v22 = vld [vmem:[%s16103_s20 + $0x40] sm:$0xff]  }
 0x3f9   : > { %v5527_v42 = vcvt.s32.f32 %v5015_v54  ;;  %v3992_v0 = vrot.slane %v1952_v63, %v12391_v58  ;;  %v4000_v21 = vrot.slane %v1952_v63, %v12395_v60  ;;  %v3972_v50 = vrot.slane %v1950_v18, %v12389_v57 }
 0x3fa   : > { %7916 = vst [vmem:[%s12466_s18 + $0x7c0] sm:$0xff] %v7657_v9  ;;  %8130 = vmatpush1.bf16.msra.mxu0 %v7657_v9  ;;  %v4506_v11 = vshra.s32 %v3976_v37, %v12383_v51  ;;  %v4508_v30 = vshra.s32 %v3984_v13, %v12383_v51  ;;  %v3988_v17 = vrot.slane %v1952_v63, %v12389_v57  ;;  %v11721_v9 = vld [vmem:[%s16103_s20 + $0x80] sm:$0xff]   ;;  %v11726_v37 = vld [vmem:[%s16103_s20 + $0x50] sm:$0xff]   ;;  %v11725_v13 = vld [vmem:[%s16103_s20 + $0x88] sm:$0xff]  }
 0x3fb   : > { %v3980_v48 = vrot.slane %v1950_v18, %v12393_v59  ;;  %v5787_v55 = vpack.c.bf16 %v5527_v42, %v5523_v52  ;;  %v4510_v23 = vshra.s32 %v3992_v0, %v12383_v51  ;;  %v4512_v35 = vshra.s32 %v4000_v21, %v12383_v51  ;;  %v11723_v52 = vld [vmem:[%s16103_s20 + $0xc8] sm:$0xff]   ;;  %v11727_v42 = vld [vmem:[%s16103_s20 + $0xd0] sm:$0xff]   ;;  %v11731_v21 = vld [vmem:[%s16103_s20 + $0xd8] sm:$0xff]  }
 0x3fc   : > { %v4505_v32 = vshra.s32 %v3972_v50, %v12383_v51  ;;  %v5018_v34 = vand.u32 15, %v4506_v11  ;;  %v5020_v44 = vand.u32 15, %v4508_v30  ;;  %v4509_v5 = vshra.s32 %v3988_v17, %v12383_v51  ;;  %v11728_v0 = vld [vmem:[%s16103_s20 + $0x10] sm:$0xff]   ;;  %v11732_v50 = vld [vmem:[%s16103_s20 + $0x18] sm:$0xff]   ;;  %v11734_v11 = vld [vmem:[%s16103_s20 + $0x60] sm:$0xff]  }
 0x3fd   : > { %v3996_v33 = vrot.slane %v1952_v63, %v12393_v59  ;;  %v7659_v3 = vmul.bf16 %v15069_v4, %v5787_v55  ;;  %v5022_v53 = vand.u32 15, %v4510_v23  ;;  %v5024_v40 = vand.u32 15, %v4512_v35  ;;  %v11733_v30 = vld [vmem:[%s16103_s20 + $0x98] sm:$0xff]   ;;  %v11735_v17 = vld [vmem:[%s16103_s20 + $0xe0] sm:$0xff]   ;;  %v11738_v55 = vld [vmem:[%s16103_s20 + $0x68] sm:$0xff]  }
 0x3fe   : > { %v5017_v47 = vand.u32 15, %v4505_v32  ;;  %v5530_v25 = vcvt.s32.f32 %v5018_v34  ;;  %v5532_v39 = vcvt.s32.f32 %v5020_v44  ;;  %v5021_v61 = vand.u32 15, %v4509_v5  ;;  %v11737_v23 = vld [vmem:[%s16103_s20 + $0xa0] sm:$0xff]   ;;  %v11739_v35 = vld [vmem:[%s16103_s20 + $0xe8] sm:$0xff]   ;;  %v11742_v34 = vld [vmem:[%s16103_s20 + $0x70] sm:$0xff]  }
 0x3ff   : > { %v4507_v10 = vshra.s32 %v3980_v48, %v12383_v51  ;;  %7918 = vst [vmem:[%s12466_s18 + $0x7d0] sm:$0xff] %v7659_v3  ;;  %8302 = vmatpush1.bf16.msra.mxu1 %v7659_v3  ;;  %v5534_v26 = vcvt.s32.f32 %v5022_v53  ;;  %v5536_v15 = vcvt.s32.f32 %v5024_v40  ;;  %v4511_v46 = vshra.s32 %v3996_v33, %v12383_v51  ;;  %v11736_v48 = vld [vmem:[%s16103_s20 + $0x20] sm:$0xff]   ;;  %v11740_v32 = vld [vmem:[%s16103_s20 + $0x28] sm:$0xff]   ;;  %v11743_v5 = vld [vmem:[%s16103_s20 + $0xf0] sm:$0xff]  }
 0x400   : > { %v5529_v49 = vcvt.s32.f32 %v5017_v47  ;;  %v5533_v6 = vcvt.s32.f32 %v5021_v61  ;;  %v15098_v27 = vcombine.high %v7927_v24, %v7931_v1  ;;  %v15109_v54 = vcombine.low %v7927_v24, %v7931_v1  ;;  %v11741_v44 = vld [vmem:[%s16103_s20 + $0xa8] sm:$0xff]   ;;  %v11744_v33 = vld [vmem:[%s16103_s20 + $0x30] sm:$0xff]   ;;  %v11746_v3 = vld [vmem:[%s16103_s20 + $0x78] sm:$0xff]  }
 0x401   : > { %v5019_v38 = vand.u32 15, %v4507_v10  ;;  %v5790_v14 = vpack.c.bf16 %v5534_v26, %v5530_v25  ;;  %v5792_v28 = vpack.c.bf16 %v5536_v15, %v5532_v39  ;;  %v5023_v19 = vand.u32 15, %v4511_v46  ;;  %v11745_v53 = vld [vmem:[%s16103_s20 + $0xb0] sm:$0xff]   ;;  %v11747_v40 = vld [vmem:[%s16103_s20 + $0xf8] sm:$0xff]   ;;  %v11750_v24 = vld [vmem:[%s16103_s20 + $0x140] sm:$0xff]  }
 0x402   : > { %v5789_v31 = vpack.c.bf16 %v5533_v6, %v5529_v49  ;;  %8133 = vmatprep.mubr.bf16.mxu0 %v15098_v27  ;;  %8305 = vmatprep.mubr.bf16.mxu1 %v15098_v27  ;;  %v11748_v47 = vld [vmem:[%s16103_s20 + $0x38] sm:$0xff]   ;;  %v11751_v25 = vld [vmem:[%s16103_s20 + $0x1c0] sm:$0xff]   ;;  %v11754_v61 = vld [vmem:[%s16103_s20 + $0x148] sm:$0xff]  }
 0x403   : > { %v5531_v36 = vcvt.s32.f32 %v5019_v38  ;;  %v7662_v43 = vmul.bf16 %v15048_v7, %v5790_v14  ;;  %v7664_v51 = vmul.bf16 %v15051_v62, %v5792_v28  ;;  %v5535_v45 = vcvt.s32.f32 %v5023_v19  ;;  %v11719_v7 = vld [vmem:[%s16103_s20 + $0xc0] sm:$0xff]   ;;  %v11749_v1 = vld [vmem:[%s16103_s20 + $0xb8] sm:$0xff]   ;;  %v11755_v26 = vld [vmem:[%s16103_s20 + $0x1c8] sm:$0xff]  }
 0x404   : > { %v7661_v16 = vmul.bf16 %v7387_v29, %v5789_v31  ;;  %v11720_v62 = vld [vmem:[%s16103_s20] sm:$0xff]   ;;  %v11722_v29 = vld [vmem:[%s16103_s20 + $0x48] sm:$0xff]   ;;  %v11758_v49 = vld [vmem:[%s16103_s20 + $0x150] sm:$0xff]  }
 0x405   : > { %7921 = vst [vmem:[%s12466_s18 + $0x7e8] sm:$0xff] %v7662_v43  ;;  %8131 = vmatprep.subr.bf16.mxu0 %v7662_v43  ;;  %7923 = vst [vmem:[%s12466_s18 + $0x7f8] sm:$0xff] %v7664_v51  ;;  %8303 = vmatprep.subr.bf16.mxu1 %v7664_v51  ;;  %v5791_v18 = vpack.c.bf16 %v5535_v45, %v5531_v36  ;;  %v11752_v39 = vld [vmem:[%s16103_s20 + $0x100] sm:$0xff]   ;;  %v11756_v15 = vld [vmem:[%s16103_s20 + $0x108] sm:$0xff]  }
 0x406   : > { %7920 = vst [vmem:[%s12466_s18 + $0x7e0] sm:$0xff] %v7661_v16  ;;  %8132 = vmatpush1.bf16.msra.mxu0 %v7661_v16  ;;  %v11753_v10 = vld [vmem:[%s16103_s20 + $0x180] sm:$0xff]   ;;  %v11759_v46 = vld [vmem:[%s16103_s20 + $0x1d0] sm:$0xff]   ;;  %v11763_v38 = vld [vmem:[%s16103_s20 + $0x1d8] sm:$0xff]  }
 0x407   : > { %v7663_v63 = vmul.bf16 %v15069_v4, %v5791_v18  ;;  %11257 = vmatprep.subr.bf16.mxu0 %v11718_v22  ;;  %v11724_v4 = vld [vmem:[%s16103_s20 + $0x8] sm:$0xff]   ;;  %v11760_v6 = vld [vmem:[%s16103_s20 + $0x110] sm:$0xff]   ;;  %v11766_v14 = vld [vmem:[%s16103_s20 + $0x160] sm:$0xff]  }
 0x408   : > { %v11765_v28 = vld [vmem:[%s16103_s20 + $0x198] sm:$0xff]   ;;  %v11767_v19 = vld [vmem:[%s16103_s20 + $0x1e0] sm:$0xff]   ;;  %v11770_v36 = vld [vmem:[%s16103_s20 + $0x168] sm:$0xff]  }
 0x409   : > { %7922 = vst [vmem:[%s12466_s18 + $0x7f0] sm:$0xff] %v7663_v63  ;;  %8304 = vmatpush1.bf16.msra.mxu1 %v7663_v63  ;;  %8134 = vmatmul.mubr.bf16.vlgmr.msra.gmra.mrb[0].mxu0 %v15109_v54  ;;  %v11768_v31 = vld [vmem:[%s16103_s20 + $0x120] sm:$0xff]   ;;  %v11771_v51 = vld [vmem:[%s16103_s20 + $0x1e8] sm:$0xff]   ;;  %v11774_v22 = vld [vmem:[%s16103_s20 + $0x170] sm:$0xff]  }
 0x40a   : > { %11279 = vmatprep.subr.bf16.mxu1 %v11719_v7  ;;  %11258 = vmatpush3.bf16.msra.mxu0 %v11720_v62  ;;  %v11769_v43 = vld [vmem:[%s16103_s20 + $0x1a0] sm:$0xff]   ;;  %v11772_v45 = vld [vmem:[%s16103_s20 + $0x128] sm:$0xff]   ;;  %v11775_v18 = vld [vmem:[%s16103_s20 + $0x1f0] sm:$0xff]  }
 0x40b   : > { %11259 = vmatprep.subr.bf16.mxu0 %v11722_v29  ;;  %8860 = vmatprep.mubr.bf16.mxu0 %v12980_v56  ;;  %v11730_v56 = vld [vmem:[%s16103_s20 + $0x58] sm:$0xff]   ;;  %v11773_v16 = vld [vmem:[%s16103_s20 + $0x1a8] sm:$0xff]   ;;  %v11776_v7 = vld [vmem:[%s16103_s20 + $0x130] sm:$0xff]  }
 0x40c   : > { %8306 = vmatmul.mubr.bf16.vlgmr.msra.gmra.mrb[0].mxu1 %v15109_v54  ;;  %v11778_v62 = vld [vmem:[%s16103_s20 + $0x178] sm:$0xff]   ;;  %v11777_v63 = vld [vmem:[%s16103_s20 + $0x1b0] sm:$0xff]  }
 0x40d   : > { %11280 = vmatpush3.bf16.msra.mxu1 %v11721_v9  ;;  %8901 = vmatprep.mubr.bf16.mxu1 %v13730_v12  ;;  %v11729_v12 = vld [vmem:[%s16103_s20 + $0x90] sm:$0xff]   ;;  %v11779_v29 = vld [vmem:[%s16103_s20 + $0x1f8] sm:$0xff]  }
 0x40e   : > { %11281 = vmatprep.subr.bf16.mxu1 %v11723_v52  ;;  %11260 = vmatpush3.bf16.msra.mxu0 %v11724_v4  ;;  %v11780_v9 = vld [vmem:[%s16103_s20 + $0x138] sm:$0xff]   ;;  %v8993_v4 = vld [vmem:[%s12368_s30 + $0x8] sm:$0xff] }
 0x40f   : > { %11261 = vmatprep.subr.bf16.mxu0 %v11726_v37  ;;  %v11781_v52 = vld [vmem:[%s16103_s20 + $0x1b8] sm:$0xff]   ;;  %v8997_v37 = vld [vmem:[%s12368_s30 + $0x28] sm:$0xff] }
 0x411   : > { %11282 = vmatpush3.bf16.msra.mxu1 %v11725_v13  ;;  %v8995_v13 = vld [vmem:[%s12368_s30 + $0x18] sm:$0xff] }
 0x412   : > { %11283 = vmatprep.subr.bf16.mxu1 %v11727_v42  ;;  %11262 = vmatpush3.bf16.msra.mxu0 %v11728_v0  ;;  %v11433_v42 = vpack.c.bf16 %v8997_v37, %v8993_v4  ;;  %v8999_v0 = vld [vmem:[%s12368_s30 + $0x38] sm:$0xff] }
 0x413   : > { %11263 = vmatprep.subr.bf16.mxu0 %v11730_v56  ;;  %v11441_v56 = vpack.c.bf16 %v8999_v0, %v8995_v13 }
 0x415   : > { %11284 = vmatpush3.bf16.msra.mxu1 %v11729_v12  ;;  %v8992_v12 = vld [vmem:[%s12368_s30] sm:$0xff] }
 0x416   : > { %11285 = vmatprep.subr.bf16.mxu1 %v11731_v21  ;;  %11264 = vmatpush3.bf16.msra.mxu0 %v11732_v50  ;;  %v8996_v21 = vld [vmem:[%s12368_s30 + $0x20] sm:$0xff]  ;;  %v8998_v50 = vld [vmem:[%s12368_s30 + $0x30] sm:$0xff] }
 0x417   : > { %11265 = vmatprep.subr.bf16.mxu0 %v11734_v11 }
 0x419   : > { %11286 = vmatpush3.bf16.msra.mxu1 %v11733_v30  ;;  %v9001_v30 = vld [vmem:[%s12368_s30 + $0x48] sm:$0xff] }
 0x41a   : > { %11287 = vmatprep.subr.bf16.mxu1 %v11735_v17  ;;  %11266 = vmatpush3.bf16.msra.mxu0 %v11736_v48  ;;  %v9005_v17 = vld [vmem:[%s12368_s30 + $0x68] sm:$0xff]  ;;  %v9003_v48 = vld [vmem:[%s12368_s30 + $0x58] sm:$0xff] }
 0x41b   : > { %11267 = vmatprep.subr.bf16.mxu0 %v11738_v55  ;;  %v11437_v55 = vpack.c.bf16 %v9005_v17, %v9001_v30 }
 0x41d   : > { %11288 = vmatpush3.bf16.msra.mxu1 %v11737_v23  ;;  %v9007_v23 = vld [vmem:[%s12368_s30 + $0x78] sm:$0xff] }
 0x41e   : > { %11289 = vmatprep.subr.bf16.mxu1 %v11739_v35  ;;  %11268 = vmatpush3.bf16.msra.mxu0 %v11740_v32  ;;  %v9000_v35 = vld [vmem:[%s12368_s30 + $0x40] sm:$0xff] }
 0x41f   : > { %11269 = vmatprep.subr.bf16.mxu0 %v11742_v34  ;;  %v9004_v32 = vld [vmem:[%s12368_s30 + $0x60] sm:$0xff]  ;;  %v11445_v34 = vpack.c.bf16 %v9007_v23, %v9003_v48 }
 0x420   : > { %v9207_v48 = vld [vmem:[%s12370_s10] sm:$0xff] }
 0x421   : > { %11290 = vmatpush3.bf16.msra.mxu1 %v11741_v44  ;;  %v11439_v44 = vpack.c.bf16 %v9004_v32, %v9000_v35  ;;  %v9208_v32 = vld [vmem:[%s12370_s10 + $0x8] sm:$0xff] }
 0x422   : > { %11291 = vmatprep.subr.bf16.mxu1 %v11743_v5  ;;  %11270 = vmatpush3.bf16.msra.mxu0 %v11744_v33  ;;  %v9002_v5 = vld [vmem:[%s12368_s30 + $0x50] sm:$0xff] }
 0x423   : > { %11271 = vmatprep.subr.bf16.mxu0 %v11746_v3  ;;  %v9006_v33 = vld [vmem:[%s12368_s30 + $0x70] sm:$0xff] }
 0x424   : > { %v11447_v3 = vpack.c.bf16 %v9006_v33, %v9002_v5 }
 0x425   : > { %11292 = vmatpush3.bf16.msra.mxu1 %v11745_v53  ;;  %v11985_v53 = vmov 0.0  }
 0x426   : > { %11293 = vmatprep.subr.bf16.mxu1 %v11747_v40  ;;  %11272 = vmatpush3.bf16.msra.mxu0 %v11748_v47 }
 0x427   : > { %11301 = vmatprep.subr.bf16.mxu0 %v11750_v24 }
 0x429   : > { %11294 = vmatpush3.bf16.msra.mxu1 %v11749_v1  ;;  %8861 = vmatmul.mubr.bf16.vlgmr.msra.gmra.mrb[4].mxu0 %v13076_v20  ;;  %v11757_v20 = vld [vmem:[%s16103_s20 + $0x188] sm:$0xff]  }
 0x42a   : > { %11323 = vmatprep.subr.bf16.mxu1 %v11751_v25  ;;  %11302 = vmatpush3.bf16.msra.mxu0 %v11752_v39 }
 0x42b   : > { %11303 = vmatprep.subr.bf16.mxu0 %v11754_v61  ;;  %8942 = vmatprep.mubr.bf16.mxu0 %v14423_v2  ;;  %v11761_v2 = vld [vmem:[%s16103_s20 + $0x190] sm:$0xff]  }
 0x42c   : > { %8902 = vmatmul.mubr.bf16.vlgmr.msra.gmra.mrb[4].mxu1 %v13699_v41  ;;  %v11762_v41 = vld [vmem:[%s16103_s20 + $0x158] sm:$0xff]  }
 0x42d   : > { %11324 = vmatpush3.bf16.msra.mxu1 %v11753_v10  ;;  %8983 = vmatprep.mubr.bf16.mxu1 %v15098_v27  ;;  %v11764_v27 = vld [vmem:[%s16103_s20 + $0x118] sm:$0xff]  }
 0x42e   : > { %11325 = vmatprep.subr.bf16.mxu1 %v11755_v26  ;;  %11304 = vmatpush3.bf16.msra.mxu0 %v11756_v15 }
 0x42f   : > { %11305 = vmatprep.subr.bf16.mxu0 %v11758_v49 }
 0x431   : > { %11326 = vmatpush3.bf16.msra.mxu1 %v11757_v20 }
 0x432   : > { %11327 = vmatprep.subr.bf16.mxu1 %v11759_v46  ;;  %11306 = vmatpush3.bf16.msra.mxu0 %v11760_v6 }
 0x433   : > { %11307 = vmatprep.subr.bf16.mxu0 %v11762_v41 }
 0x435   : > { %11328 = vmatpush3.bf16.msra.mxu1 %v11761_v2 }
 0x436   : > { %11329 = vmatprep.subr.bf16.mxu1 %v11763_v38  ;;  %11308 = vmatpush3.bf16.msra.mxu0 %v11764_v27 }
 0x437   : > { %11309 = vmatprep.subr.bf16.mxu0 %v11766_v14 }
 0x439   : > { %11330 = vmatpush3.bf16.msra.mxu1 %v11765_v28 }
 0x43a   : > { %11331 = vmatprep.subr.bf16.mxu1 %v11767_v19  ;;  %11310 = vmatpush3.bf16.msra.mxu0 %v11768_v31 }
 0x43b   : > { %11311 = vmatprep.subr.bf16.mxu0 %v11770_v36 }
 0x43d   : > { %11332 = vmatpush3.bf16.msra.mxu1 %v11769_v43 }
 0x43e   : > { %11333 = vmatprep.subr.bf16.mxu1 %v11771_v51  ;;  %11312 = vmatpush3.bf16.msra.mxu0 %v11772_v45 }
 0x43f   : > { %11313 = vmatprep.subr.bf16.mxu0 %v11774_v22 }
 0x441   : > { %11334 = vmatpush3.bf16.msra.mxu1 %v11773_v16 }
 0x442   : > { %11335 = vmatprep.subr.bf16.mxu1 %v11775_v18  ;;  %11314 = vmatpush3.bf16.msra.mxu0 %v11776_v7 }
 0x443   : > { %11315 = vmatprep.subr.bf16.mxu0 %v11778_v62 }
 0x445   : > { %11336 = vmatpush3.bf16.msra.mxu1 %v11777_v63 }
 0x446   : > { %11337 = vmatprep.subr.bf16.mxu1 %v11779_v29  ;;  %11316 = vmatpush3.bf16.msra.mxu0 %v11780_v9 }
 0x447   : > { %11434 = vmatprep.subr.bf16.mxu0 %v11433_v42  ;;  %v9177_v42 = vld [vmem:[%s12362_s3] sm:$0xf] }
 0x448   : > { %v9182_v0 = vrot.slane %v9177_v42, %v12389_v57 }
 0x449   : > { %11338 = vmatpush3.bf16.msra.mxu1 %v11781_v52  ;;  %8943 = vmatmul.mubr.bf16.vlgmr.msra.gmra.mrb[8].mxu0 %v14350_v8  ;;  %v8994_v8 = vld [vmem:[%s12368_s30 + $0x10] sm:$0xff] }
 0x44a   : > { %11442 = vmatprep.subr.bf16.mxu1 %v11441_v56  ;;  %v11443_v11 = vpack.c.bf16 %v8998_v50, %v8994_v8  ;;  %9079 = vmatprep.mubr.f32.mxu0 %v11985_v53  ;;  %v9190_v56 = vrot.slane %v9177_v42, %v12393_v59  ;;  %v9186_v8 = vrot.slane %v9177_v42, %v12391_v58  ;;  %v9225_v58 = vld [vmem:[%s12372_s26 + $0x10] sm:$0xff] }
 0x44c   : > { %8984 = vmatmul.mubr.bf16.vlgmr.msra.gmra.mrb[8].mxu1 %v15109_v54  ;;  %v11435_v54 = vpack.c.bf16 %v8996_v21, %v8992_v12 }
 0x44d   : > { %11444 = vmatpush1.bf16.msra.mxu1 %v11443_v11  ;;  %9156 = vmatprep.mubr.f32.mxu1 %v11985_v53 }
 0x44e   : > { %11436 = vmatpush1.bf16.msra.mxu0 %v11435_v54  ;;  %11446 = vmatprep.subr.bf16.mxu1 %v11445_v34  ;;  %v9194_v54 = vrot.slane %v9177_v42, %v12395_v60  ;;  %v9210_v34 = vld [vmem:[%s12370_s10 + $0x18] sm:$0xff] }
 0x44f   : > { %11438 = vmatprep.subr.bf16.mxu0 %v11437_v55  ;;  %v9209_v55 = vld [vmem:[%s12370_s10 + $0x10] sm:$0xff] }
 0x451   : > { %11448 = vmatpush1.bf16.msra.mxu1 %v11447_v3 }
 0x452   : > { %11440 = vmatpush1.bf16.msra.mxu0 %v11439_v44  ;;  %v9223_v44 = vld [vmem:[%s12372_s26] sm:$0xff] }
 0x4dc   : > { %v8135_v40 = vpop.f32.mrb[0].mxu0 }
 0x4dd   : > { %v15329_v47 = vpop.f32.mrb[1].mxu0 }
 0x4de   : > { %v15331_v24 = vpop.f32.mrb[2].mxu0 }
 0x4df   : > { %v8307_v1 = vpop.f32.mrb[0].mxu1  ;;  %v15333_v25 = vpop.f32.mrb[3].mxu0 }
 0x4e0   : > { %v15335_v39 = vpop.f32.mrb[1].mxu1 }
 0x4e1   : > { %v15337_v61 = vpop.f32.mrb[2].mxu1 }
 0x4e2   : > { %v15339_v10 = vpop.f32.mrb[3].mxu1 }
 0x4fc   : > { %v11273_v26 = vpop.f32.mrb[4].mxu0 }
 0x4fd   : > { %v11274_v15 = vpop.f32.mrb[5].mxu0 }
 0x4fe   : > { %v11275_v49 = vadd.f32 %v11274_v15, %v11273_v26  ;;  %v11276_v20 = vpop.f32.mrb[6].mxu0  ;;  %v9226_v26 = vld [vmem:[%s12372_s26 + $0x18] sm:$0xff] }
 0x4ff   : > { %v11295_v46 = vpop.f32.mrb[4].mxu1  ;;  %v11277_v6 = vpop.f32.mrb[7].mxu0 }
 0x500   : > { %v11296_v41 = vpop.f32.mrb[5].mxu1  ;;  %v11278_v2 = vadd.f32 %v11277_v6, %v11276_v20  ;;  %v9211_v6 = vld [vmem:[%s12370_s10 + $0x20] sm:$0xff] }
 0x501   : > { %v11297_v38 = vadd.f32 %v11296_v41, %v11295_v46  ;;  %v11298_v27 = vpop.f32.mrb[6].mxu1  ;;  %v9213_v41 = vld [vmem:[%s12370_s10 + $0x30] sm:$0xff] }
 0x502   : > { %v11299_v14 = vpop.f32.mrb[7].mxu1 }
 0x503   : > { %v8904_v28 = vadd.f32 %v11297_v38, %v11275_v49  ;;  %v11300_v19 = vadd.f32 %v11299_v14, %v11298_v27 }
 0x505   : > { %v8907_v31 = vadd.f32 %v11300_v19, %v11278_v2  ;;  %v9212_v19 = vld [vmem:[%s12370_s10 + $0x28] sm:$0xff] }
 0x51c   : > { %v11317_v36 = vpop.f32.mrb[8].mxu0 }
 0x51d   : > { %v11318_v43 = vpop.f32.mrb[9].mxu0 }
 0x51e   : > { %v11319_v51 = vadd.f32 %v11318_v43, %v11317_v36  ;;  %v11320_v45 = vpop.f32.mrb[10].mxu0  ;;  %v9227_v43 = vld [vmem:[%s12372_s26 + $0x20] sm:$0xff] }
 0x51f   : > { %v11339_v22 = vpop.f32.mrb[8].mxu1  ;;  %v11321_v16 = vpop.f32.mrb[11].mxu0 }
 0x520   : > { %v8945_v18 = vadd.f32 %v11319_v51, %v8904_v28  ;;  %v11340_v7 = vpop.f32.mrb[9].mxu1  ;;  %v11322_v62 = vadd.f32 %v11321_v16, %v11320_v45  ;;  %v9229_v51 = vld [vmem:[%s12372_s26 + $0x30] sm:$0xff] }
 0x521   : > { %v11341_v63 = vadd.f32 %v11340_v7, %v11339_v22  ;;  %v11342_v29 = vpop.f32.mrb[10].mxu1  ;;  %v9228_v7 = vld [vmem:[%s12372_s26 + $0x28] sm:$0xff] }
 0x522   : > { %v8948_v9 = vadd.f32 %v11322_v62, %v8907_v31  ;;  %v11343_v52 = vpop.f32.mrb[11].mxu1 }
 0x523   : > { %v8986_v4 = vadd.f32 %v11341_v63, %v8945_v18  ;;  %v11344_v37 = vadd.f32 %v11343_v52, %v11342_v29 }
 0x525   : > { %v8989_v13 = vadd.f32 %v11344_v37, %v8948_v9  ;;  %11167 = vmatmul.mubr.msk.f32.vlgmr.msra.gmra.mrb[12].mxu0 %vm9008_vm0, %v8986_v4  ;;  %11169 = vmatmul.mubr.msk.f32.vlgmr.msra.gmra.mrb[12].mxu1 %vm9008_vm0, %v8986_v4 }
 0x526   : > { %9085 = vmatprep.mubr.f32.mxu0 %v11985_v53  ;;  %9162 = vmatprep.mubr.f32.mxu1 %v11985_v53 }
 0x529   : > { %11168 = vmatmul.mubr.msk.f32.gmra.mrb[14].mxu0 %vm9008_vm0, %v8989_v13  ;;  %11170 = vmatmul.mubr.msk.f32.gmra.mrb[14].mxu1 %vm9008_vm0, %v8989_v13 }
 0x5f8   : > { %v9081_v12 = vpop.f32.mrb[12].mxu0  ;;  %v9158_v21 = vpop.f32.mrb[12].mxu1 }
 0x5f9   : > { %v9169_v50 = vsub.f32 %v8135_v40, %v9081_v12  ;;  %v9171_v11 = vsub.f32 %v8307_v1, %v9158_v21  ;;  %v9083_v30 = vpop.f32.mrb[13].mxu0  ;;  %v9160_v17 = vpop.f32.mrb[13].mxu1  ;;  %v9224_v1 = vld [vmem:[%s12372_s26 + $0x8] sm:$0xff] }
 0x5fa   : > { %v9170_v57 = vsub.f32 %v15329_v47, %v9083_v30  ;;  %v9172_v59 = vsub.f32 %v15335_v39, %v9160_v17 }
 0x5fb   : > { %v9199_v23 = vadd.f32 %v9182_v0, %v9169_v50  ;;  %v9201_v35 = vadd.f32 %v9190_v56, %v9171_v11 }
 0x5fc   : > { %v9200_v60 = vadd.f32 %v9186_v8, %v9170_v57  ;;  %v9202_v5 = vadd.f32 %v9194_v54, %v9172_v59  ;;  %v9087_v33 = vpop.f32.mrb[14].mxu0  ;;  %v9164_v3 = vpop.f32.mrb[14].mxu1 }
 0x5fd   : > { %v9215_v53 = vadd.f32 %v9207_v48, %v9199_v23  ;;  %v9217_v40 = vadd.f32 %v9209_v55, %v9201_v35  ;;  %v9173_v47 = vsub.f32 %v15331_v24, %v9087_v33  ;;  %v9175_v39 = vsub.f32 %v15337_v61, %v9164_v3  ;;  %v9089_v15 = vpop.f32.mrb[15].mxu0  ;;  %v9166_v49 = vpop.f32.mrb[15].mxu1  ;;  %v9214_v61 = vld [vmem:[%s12370_s10 + $0x38] sm:$0xff] }
 0x5fe   : > { %v9216_v20 = vadd.f32 %v9208_v32, %v9200_v60  ;;  %v9218_v46 = vadd.f32 %v9210_v34, %v9202_v5  ;;  %v9174_v2 = vsub.f32 %v15333_v25, %v9089_v15  ;;  %v9176_v38 = vsub.f32 %v15339_v10, %v9166_v49  ;;  %v9230_v25 = vld [vmem:[%s12372_s26 + $0x38] sm:$0xff]  ;;  %9242 = sbr.rel (%p11171_p8) target bundleno = 1543 (0x607), region = 175 }
 0x5ff   : > { %v9231_v27 = vadd.f32 %v9223_v44, %v9215_v53  ;;  %v9233_v14 = vadd.f32 %v9225_v58, %v9217_v40  ;;  %v9203_v28 = vadd.f32 %v9182_v0, %v9173_v47  ;;  %v9205_v24 = vadd.f32 %v9190_v56, %v9175_v39 }
 0x600   : > { %v9232_v31 = vadd.f32 %v9224_v1, %v9216_v20  ;;  %v9234_v36 = vadd.f32 %v9226_v26, %v9218_v46  ;;  %v9204_v45 = vadd.f32 %v9186_v8, %v9174_v2  ;;  %v9206_v22 = vadd.f32 %v9194_v54, %v9176_v38 }
 0x601   : > { %v9219_v16 = vadd.f32 %v9211_v6, %v9203_v28  ;;  %v9221_v18 = vadd.f32 %v9213_v41, %v9205_v24  ;;  %9243 = vst [vmem:[#allocation2] sm:$0xff] (!%p11171_p8), %v9231_v27  ;;  %9245 = vst [vmem:[#allocation2 + $0x10] sm:$0xff] (!%p11171_p8), %v9233_v14 }
 0x602   : > { %v9220_v62 = vadd.f32 %v9212_v19, %v9204_v45  ;;  %v9222_v63 = vadd.f32 %v9214_v61, %v9206_v22  ;;  %9244 = vst [vmem:[#allocation2 + $0x8] sm:$0xff] (!%p11171_p8), %v9232_v31  ;;  %9246 = vst [vmem:[#allocation2 + $0x18] sm:$0xff] (!%p11171_p8), %v9234_v36 }
 0x603   : > { %v9235_v10 = vadd.f32 %v9227_v43, %v9219_v16  ;;  %v9237_v29 = vadd.f32 %v9229_v51, %v9221_v18 }
 0x604   : > { %v9236_v9 = vadd.f32 %v9228_v7, %v9220_v62  ;;  %v9238_v52 = vadd.f32 %v9230_v25, %v9222_v63 }
 0x605   : > { %9247 = vst [vmem:[#allocation2 + $0x40] sm:$0xff] %v9235_v10  ;;  %9249 = vst [vmem:[#allocation2 + $0x50] sm:$0xff] %v9237_v29 }
 0x606   : > { %9248 = vst [vmem:[#allocation2 + $0x48] sm:$0xff] %v9236_v9  ;;  %9250 = vst [vmem:[#allocation2 + $0x58] sm:$0xff] %v9238_v52 }
 0x607 PF: > { %s16104_s20 = sld [smem:[#allocation12_spill]] }
 0x60d   : > { %p11172_p9 = scmp.ne.s32.totalorder %s16104_s20, 1 }
 0x60e   : > { %9255 = vst [vmem:[#allocation2 + $0x20] sm:$0xff] (!%p11172_p9), %v9231_v27  ;;  %9256 = vst [vmem:[#allocation2 + $0x28] sm:$0xff] (!%p11172_p9), %v9232_v31 }
 0x60f   : > { %9254 = sbr.rel (%p11172_p9) target bundleno = 1558 (0x616), region = 179  ;;  %9257 = vst [vmem:[#allocation2 + $0x30] sm:$0xff] (!%p11172_p9), %v9233_v14  ;;  %9258 = vst [vmem:[#allocation2 + $0x38] sm:$0xff] (!%p11172_p9), %v9234_v36 }
 0x610   : > { %9259 = vst [vmem:[#allocation2 + $0x60] sm:$0xff] (!%p11172_p9), %v9235_v10  ;;  %9260 = vst [vmem:[#allocation2 + $0x68] sm:$0xff] (!%p11172_p9), %v9236_v9 }
 0x611   : > { %9261 = vst [vmem:[#allocation2 + $0x70] sm:$0xff] (!%p11172_p9), %v9237_v29  ;;  %9262 = vst [vmem:[#allocation2 + $0x78] sm:$0xff] (!%p11172_p9), %v9238_v52 }
 0x616 PF: > { %s16105_s26 = sld [smem:[#allocation13_spill]] }
 0x61c   : > { %p11173_p10 = scmp.ne.s32.totalorder %s16105_s26, 1 }
 0x61d   : > { %s16106_s2 = sld [smem:[#allocation12_spill]] (!%p11173_p10)  ;;  %v9268_v4 = vld [vmem:[#allocation2 + $0x8] sm:$0xff] (!%p11173_p10)  ;;  %v15383_v54 = vld [vmem:[#allocation2] sm:$0xff] (!%p11173_p10)  ;;  %s16109_s13 = sld [smem:[#allocation20_spill]] (!%p11173_p10)  ;;  %vm10586_vm2 = vcmask (!%p11173_p10), 261120  }
 0x61e   : > { %9266 = sbr.rel (%p11173_p10) target bundleno = 2340 (0x924), region = 183  ;;  %v9276_v37 = vld [vmem:[#allocation2 + $0x48] sm:$0xff] (!%p11173_p10)  ;;  %v15385_v50 = vld [vmem:[#allocation2 + $0x20] sm:$0xff] (!%p11173_p10) }
 0x61f   : > { %v15378_v56 = vpack.c.bf16 (!%p11173_p10), %v9276_v37, %v9268_v4  ;;  %v15387_v11 = vld [vmem:[#allocation2 + $0x40] sm:$0xff] (!%p11173_p10) }
 0x620   : > { %v15391_v55 = vld [vmem:[#allocation2 + $0x60] sm:$0xff] (!%p11173_p10) }
 0x621   : > { %9582 = vmatprep.mubr.bf16.mxu0 (!%p11173_p10), %v15378_v56  ;;  %9754 = vmatprep.mubr.bf16.mxu1 (!%p11173_p10), %v15378_v56 }
 0x623   : > { %s11255_s0 = sshll.u32 (!%p11173_p10), %s16106_s2, 11  ;;  %p10801_p11 = scmp.eq.s32.totalorder (!%p11173_p10), %s16106_s2, 1 }
 0x624   : > { %s15373_s5 = scalar_lea.vmem (!%p11173_p10), [#allocation3], %s11255_s0 }
 0x625   : > { %v9287_v13 = vld [vmem:[%s15373_s5 + $0x8] sm:$0xff]  ;;  %v9289_v42 = vld [vmem:[%s15373_s5 + $0x18] sm:$0xff]  ;;  %v9286_v0 = vld [vmem:[%s15373_s5] sm:$0xff]  ;;  %s10802_s23 = scalar_select %p10801_p11, 1, 0 }
 0x626   : > { %9550 = vmatprep.subr.bf16.mxu0 %v9287_v13  ;;  %9722 = vmatprep.subr.bf16.mxu1 %v9289_v42  ;;  %v9288_v12 = vld [vmem:[%s15373_s5 + $0x10] sm:$0xff]  ;;  %v9291_v21 = vld [vmem:[%s15373_s5 + $0x28] sm:$0xff]  ;;  %v9293_v8 = vld [vmem:[%s15373_s5 + $0x38] sm:$0xff] }
 0x627   : > { %9551 = vmatpush1.bf16.msra.mxu0 %v9286_v0  ;;  %9723 = vmatpush1.bf16.msra.mxu1 %v9288_v12  ;;  %v10803_v30 = vstv %s10802_s23  ;;  %v9290_v17 = vld [vmem:[%s15373_s5 + $0x20] sm:$0xff]  ;;  %v9292_v48 = vld [vmem:[%s15373_s5 + $0x30] sm:$0xff]  ;;  %v9295_v59 = vld [vmem:[%s15373_s5 + $0x48] sm:$0xff] }
 0x628   : > { %9552 = vmatprep.subr.bf16.mxu0 %v9291_v21  ;;  %9724 = vmatprep.subr.bf16.mxu1 %v9293_v8  ;;  %vm15393_vm1 = vcmp.eq.s32.totalorder %v10803_v30, 1  ;;  %v9297_v23 = vld [vmem:[%s15373_s5 + $0x58] sm:$0xff]  ;;  %v9294_v34 = vld [vmem:[%s15373_s5 + $0x40] sm:$0xff]  ;;  %v9296_v44 = vld [vmem:[%s15373_s5 + $0x50] sm:$0xff] }
 0x629   : > { %v10805_v35 = vsel %vm15393_vm1, %v15385_v50, %v15383_v54  ;;  %v10809_v32 = vsel %vm15393_vm1, %v15391_v55, %v15387_v11  ;;  %v9299_v58 = vld [vmem:[%s15373_s5 + $0x68] sm:$0xff]  ;;  %v9301_v60 = vld [vmem:[%s15373_s5 + $0x78] sm:$0xff]  ;;  %v9298_v5 = vld [vmem:[%s15373_s5 + $0x60] sm:$0xff] }
 0x62a   : > { %v9300_v33 = vld [vmem:[%s15373_s5 + $0x70] sm:$0xff]  ;;  %v9303_v3 = vld [vmem:[%s15373_s5 + $0x88] sm:$0xff]  ;;  %v9305_v53 = vld [vmem:[%s15373_s5 + $0x98] sm:$0xff] }
 0x62b   : > { %9553 = vmatpush1.bf16.msra.mxu0 %v9290_v17  ;;  %9725 = vmatpush1.bf16.msra.mxu1 %v9292_v48  ;;  %v9302_v40 = vld [vmem:[%s15373_s5 + $0x80] sm:$0xff]  ;;  %v9304_v1 = vld [vmem:[%s15373_s5 + $0x90] sm:$0xff]  ;;  %v9307_v26 = vld [vmem:[%s15373_s5 + $0xa8] sm:$0xff] }
 0x62c   : > { %9554 = vmatprep.subr.bf16.mxu0 %v9295_v59  ;;  %9726 = vmatprep.subr.bf16.mxu1 %v9297_v23  ;;  %v9309_v47 = vld [vmem:[%s15373_s5 + $0xb8] sm:$0xff]  ;;  %v9306_v39 = vld [vmem:[%s15373_s5 + $0xa0] sm:$0xff]  ;;  %v9308_v15 = vld [vmem:[%s15373_s5 + $0xb0] sm:$0xff] }
 0x62d   : > { %v9311_v49 = vld [vmem:[%s15373_s5 + $0xc8] sm:$0xff]  ;;  %v9313_v20 = vld [vmem:[%s15373_s5 + $0xd8] sm:$0xff]  ;;  %v9310_v46 = vld [vmem:[%s15373_s5 + $0xc0] sm:$0xff] }
 0x62e   : > { %v9312_v6 = vld [vmem:[%s15373_s5 + $0xd0] sm:$0xff]  ;;  %v9315_v41 = vld [vmem:[%s15373_s5 + $0xe8] sm:$0xff]  ;;  %v9317_v2 = vld [vmem:[%s15373_s5 + $0xf8] sm:$0xff] }
 0x62f   : > { %9555 = vmatpush1.bf16.msra.mxu0 %v9294_v34  ;;  %9727 = vmatpush1.bf16.msra.mxu1 %v9296_v44  ;;  %v9314_v38 = vld [vmem:[%s15373_s5 + $0xe0] sm:$0xff]  ;;  %v9316_v27 = vld [vmem:[%s15373_s5 + $0xf0] sm:$0xff]  ;;  %v9319_v14 = vld [vmem:[%s15373_s5 + $0x108] sm:$0xff]  ;;  %v15467_v34 = vpack.c.bf16 %v15387_v11, %v15383_v54 }
 0x630   : > { %9556 = vmatprep.subr.bf16.mxu0 %v9299_v58  ;;  %9728 = vmatprep.subr.bf16.mxu1 %v9301_v60  ;;  %v9321_v28 = vld [vmem:[%s15373_s5 + $0x118] sm:$0xff]  ;;  %v9318_v24 = vld [vmem:[%s15373_s5 + $0x100] sm:$0xff]  ;;  %v9320_v19 = vld [vmem:[%s15373_s5 + $0x110] sm:$0xff] }
 0x631   : > { %v9323_v61 = vld [vmem:[%s15373_s5 + $0x128] sm:$0xff]  ;;  %v9325_v31 = vld [vmem:[%s15373_s5 + $0x138] sm:$0xff]  ;;  %v9322_v36 = vld [vmem:[%s15373_s5 + $0x120] sm:$0xff] }
 0x632   : > { %v9324_v43 = vld [vmem:[%s15373_s5 + $0x130] sm:$0xff]  ;;  %v9327_v51 = vld [vmem:[%s15373_s5 + $0x148] sm:$0xff]  ;;  %v9329_v45 = vld [vmem:[%s15373_s5 + $0x158] sm:$0xff] }
 0x633   : > { %9557 = vmatpush1.bf16.msra.mxu0 %v9298_v5  ;;  %9729 = vmatpush1.bf16.msra.mxu1 %v9300_v33  ;;  %v9326_v22 = vld [vmem:[%s15373_s5 + $0x140] sm:$0xff]  ;;  %v9328_v16 = vld [vmem:[%s15373_s5 + $0x150] sm:$0xff]  ;;  %v9331_v18 = vld [vmem:[%s15373_s5 + $0x168] sm:$0xff] }
 0x634   : > { %9558 = vmatprep.subr.bf16.mxu0 %v9303_v3  ;;  %9730 = vmatprep.subr.bf16.mxu1 %v9305_v53  ;;  %v9333_v7 = vld [vmem:[%s15373_s5 + $0x178] sm:$0xff]  ;;  %v9330_v25 = vld [vmem:[%s15373_s5 + $0x160] sm:$0xff]  ;;  %v9332_v62 = vld [vmem:[%s15373_s5 + $0x170] sm:$0xff] }
 0x635   : > { %v9335_v63 = vld [vmem:[%s15373_s5 + $0x188] sm:$0xff]  ;;  %v9337_v10 = vld [vmem:[%s15373_s5 + $0x198] sm:$0xff]  ;;  %v9334_v29 = vld [vmem:[%s15373_s5 + $0x180] sm:$0xff] }
 0x636   : > { %v9336_v9 = vld [vmem:[%s15373_s5 + $0x190] sm:$0xff]  ;;  %v9339_v52 = vld [vmem:[%s15373_s5 + $0x1a8] sm:$0xff]  ;;  %v9341_v4 = vld [vmem:[%s15373_s5 + $0x1b8] sm:$0xff] }
 0x637   : > { %9559 = vmatpush1.bf16.msra.mxu0 %v9302_v40  ;;  %9731 = vmatpush1.bf16.msra.mxu1 %v9304_v1  ;;  %v9338_v37 = vld [vmem:[%s15373_s5 + $0x1a0] sm:$0xff]  ;;  %v9340_v13 = vld [vmem:[%s15373_s5 + $0x1b0] sm:$0xff]  ;;  %v9343_v42 = vld [vmem:[%s15373_s5 + $0x1c8] sm:$0xff] }
 0x638   : > { %9560 = vmatprep.subr.bf16.mxu0 %v9307_v26  ;;  %9732 = vmatprep.subr.bf16.mxu1 %v9309_v47  ;;  %v9345_v0 = vld [vmem:[%s15373_s5 + $0x1d8] sm:$0xff]  ;;  %v9342_v12 = vld [vmem:[%s15373_s5 + $0x1c0] sm:$0xff]  ;;  %v9344_v21 = vld [vmem:[%s15373_s5 + $0x1d0] sm:$0xff] }
 0x639   : > { %v9347_v8 = vld [vmem:[%s15373_s5 + $0x1e8] sm:$0xff]  ;;  %v9349_v30 = vld [vmem:[%s15373_s5 + $0x1f8] sm:$0xff]  ;;  %v9346_v17 = vld [vmem:[%s15373_s5 + $0x1e0] sm:$0xff] }
 0x63a   : > { %v9348_v48 = vld [vmem:[%s15373_s5 + $0x1f0] sm:$0xff]  ;;  %v9351_v59 = vld [vmem:[%s15373_s5 + $0x208] sm:$0xff]  ;;  %v9353_v23 = vld [vmem:[%s15373_s5 + $0x218] sm:$0xff] }
 0x63b   : > { %9561 = vmatpush1.bf16.msra.mxu0 %v9306_v39  ;;  %9733 = vmatpush1.bf16.msra.mxu1 %v9308_v15  ;;  %v9270_v44 = vld [vmem:[#allocation2 + $0x18] sm:$0xff]  ;;  %v9350_v60 = vld [vmem:[%s15373_s5 + $0x200] sm:$0xff]  ;;  %v9352_v5 = vld [vmem:[%s15373_s5 + $0x210] sm:$0xff] }
 0x63c   : > { %9562 = vmatprep.subr.bf16.mxu0 %v9311_v49  ;;  %9734 = vmatprep.subr.bf16.mxu1 %v9313_v20  ;;  %v9278_v58 = vld [vmem:[#allocation2 + $0x58] sm:$0xff]  ;;  %v9355_v33 = vld [vmem:[%s15373_s5 + $0x228] sm:$0xff]  ;;  %v9354_v40 = vld [vmem:[%s15373_s5 + $0x220] sm:$0xff] }
 0x63d   : > { %v9357_v3 = vld [vmem:[%s15373_s5 + $0x238] sm:$0xff]  ;;  %v15473_v53 = vpack.c.bf16 %v9278_v58, %v9270_v44  ;;  %v9356_v1 = vld [vmem:[%s15373_s5 + $0x230] sm:$0xff]  ;;  %v9359_v26 = vld [vmem:[%s15373_s5 + $0x248] sm:$0xff] }
 0x63e   : > { %v9361_v47 = vld [vmem:[%s15373_s5 + $0x258] sm:$0xff]  ;;  %v9358_v39 = vld [vmem:[%s15373_s5 + $0x240] sm:$0xff]  ;;  %v9360_v15 = vld [vmem:[%s15373_s5 + $0x250] sm:$0xff] }
 0x63f   : > { %9563 = vmatpush1.bf16.msra.mxu0 %v9310_v46  ;;  %9735 = vmatpush1.bf16.msra.mxu1 %v9312_v6  ;;  %v9363_v49 = vld [vmem:[%s15373_s5 + $0x268] sm:$0xff]  ;;  %v9365_v20 = vld [vmem:[%s15373_s5 + $0x278] sm:$0xff]  ;;  %v9362_v46 = vld [vmem:[%s15373_s5 + $0x260] sm:$0xff] }
 0x640   : > { %9564 = vmatprep.subr.bf16.mxu0 %v9315_v41  ;;  %9736 = vmatprep.subr.bf16.mxu1 %v9317_v2  ;;  %v9364_v6 = vld [vmem:[%s15373_s5 + $0x270] sm:$0xff]  ;;  %v9367_v41 = vld [vmem:[%s15373_s5 + $0x288] sm:$0xff]  ;;  %v9369_v2 = vld [vmem:[%s15373_s5 + $0x298] sm:$0xff] }
 0x641   : > { %v9402_v44 = vld [vmem:[%s15373_s5 + $0x3a0] sm:$0xff]  ;;  %v9404_v58 = vld [vmem:[%s15373_s5 + $0x3b0] sm:$0xff]  ;;  %v11855_v50 = vld [vmem:[#allocation2 + $0x58] sm:$0xff] }
 0x643   : > { %9565 = vmatpush1.bf16.msra.mxu0 %v9314_v38  ;;  %9737 = vmatpush1.bf16.msra.mxu1 %v9316_v27  ;;  %v9366_v38 = vld [vmem:[%s15373_s5 + $0x280] sm:$0xff]  ;;  %v9368_v27 = vld [vmem:[%s15373_s5 + $0x290] sm:$0xff] }
 0x644   : > { %9566 = vmatprep.subr.bf16.mxu0 %v9319_v14  ;;  %9738 = vmatprep.subr.bf16.mxu1 %v9321_v28  ;;  %v9371_v14 = vld [vmem:[%s15373_s5 + $0x2a8] sm:$0xff]  ;;  %v9373_v28 = vld [vmem:[%s15373_s5 + $0x2b8] sm:$0xff] }
 0x647   : > { %9567 = vmatpush1.bf16.msra.mxu0 %v9318_v24  ;;  %9739 = vmatpush1.bf16.msra.mxu1 %v9320_v19  ;;  %v9370_v24 = vld [vmem:[%s15373_s5 + $0x2a0] sm:$0xff]  ;;  %v9372_v19 = vld [vmem:[%s15373_s5 + $0x2b0] sm:$0xff] }
 0x648   : > { %9568 = vmatprep.subr.bf16.mxu0 %v9323_v61  ;;  %9740 = vmatprep.subr.bf16.mxu1 %v9325_v31  ;;  %v9375_v61 = vld [vmem:[%s15373_s5 + $0x2c8] sm:$0xff]  ;;  %v9377_v31 = vld [vmem:[%s15373_s5 + $0x2d8] sm:$0xff] }
 0x64b   : > { %9569 = vmatpush1.bf16.msra.mxu0 %v9322_v36  ;;  %9741 = vmatpush1.bf16.msra.mxu1 %v9324_v43  ;;  %v9374_v36 = vld [vmem:[%s15373_s5 + $0x2c0] sm:$0xff]  ;;  %v9376_v43 = vld [vmem:[%s15373_s5 + $0x2d0] sm:$0xff] }
 0x64c   : > { %9570 = vmatprep.subr.bf16.mxu0 %v9327_v51  ;;  %9742 = vmatprep.subr.bf16.mxu1 %v9329_v45  ;;  %v9379_v51 = vld [vmem:[%s15373_s5 + $0x2e8] sm:$0xff]  ;;  %v9381_v45 = vld [vmem:[%s15373_s5 + $0x2f8] sm:$0xff] }
 0x64f   : > { %9571 = vmatpush1.bf16.msra.mxu0 %v9326_v22  ;;  %9743 = vmatpush1.bf16.msra.mxu1 %v9328_v16  ;;  %v9378_v22 = vld [vmem:[%s15373_s5 + $0x2e0] sm:$0xff]  ;;  %v9380_v16 = vld [vmem:[%s15373_s5 + $0x2f0] sm:$0xff] }
 0x650   : > { %9572 = vmatprep.subr.bf16.mxu0 %v9331_v18  ;;  %9744 = vmatprep.subr.bf16.mxu1 %v9333_v7  ;;  %v9383_v18 = vld [vmem:[%s15373_s5 + $0x308] sm:$0xff]  ;;  %v9385_v7 = vld [vmem:[%s15373_s5 + $0x318] sm:$0xff] }
 0x653   : > { %9573 = vmatpush1.bf16.msra.mxu0 %v9330_v25  ;;  %9745 = vmatpush1.bf16.msra.mxu1 %v9332_v62  ;;  %v9382_v25 = vld [vmem:[%s15373_s5 + $0x300] sm:$0xff]  ;;  %v9384_v62 = vld [vmem:[%s15373_s5 + $0x310] sm:$0xff] }
 0x654   : > { %9574 = vmatprep.subr.bf16.mxu0 %v9335_v63  ;;  %9746 = vmatprep.subr.bf16.mxu1 %v9337_v10  ;;  %v9387_v63 = vld [vmem:[%s15373_s5 + $0x328] sm:$0xff]  ;;  %v9389_v10 = vld [vmem:[%s15373_s5 + $0x338] sm:$0xff] }
 0x657   : > { %9575 = vmatpush1.bf16.msra.mxu0 %v9334_v29  ;;  %9747 = vmatpush1.bf16.msra.mxu1 %v9336_v9  ;;  %v9386_v29 = vld [vmem:[%s15373_s5 + $0x320] sm:$0xff]  ;;  %v9388_v9 = vld [vmem:[%s15373_s5 + $0x330] sm:$0xff] }
 0x658   : > { %9576 = vmatprep.subr.bf16.mxu0 %v9339_v52  ;;  %9748 = vmatprep.subr.bf16.mxu1 %v9341_v4  ;;  %v9391_v52 = vld [vmem:[%s15373_s5 + $0x348] sm:$0xff]  ;;  %v9393_v4 = vld [vmem:[%s15373_s5 + $0x358] sm:$0xff] }
 0x65b   : > { %9577 = vmatpush1.bf16.msra.mxu0 %v9338_v37  ;;  %9749 = vmatpush1.bf16.msra.mxu1 %v9340_v13  ;;  %v9390_v37 = vld [vmem:[%s15373_s5 + $0x340] sm:$0xff]  ;;  %v9392_v13 = vld [vmem:[%s15373_s5 + $0x350] sm:$0xff] }
 0x65c   : > { %9578 = vmatprep.subr.bf16.mxu0 %v9343_v42  ;;  %9750 = vmatprep.subr.bf16.mxu1 %v9345_v0  ;;  %v9395_v42 = vld [vmem:[%s15373_s5 + $0x368] sm:$0xff]  ;;  %v9397_v0 = vld [vmem:[%s15373_s5 + $0x378] sm:$0xff] }
 0x65f   : > { %9579 = vmatpush1.bf16.msra.mxu0 %v9342_v12  ;;  %9751 = vmatpush1.bf16.msra.mxu1 %v9344_v21  ;;  %v9394_v12 = vld [vmem:[%s15373_s5 + $0x360] sm:$0xff]  ;;  %v9396_v21 = vld [vmem:[%s15373_s5 + $0x370] sm:$0xff] }
 0x660   : > { %9580 = vmatprep.subr.bf16.mxu0 %v9347_v8  ;;  %9752 = vmatprep.subr.bf16.mxu1 %v9349_v30  ;;  %v9399_v8 = vld [vmem:[%s15373_s5 + $0x388] sm:$0xff]  ;;  %v9401_v30 = vld [vmem:[%s15373_s5 + $0x398] sm:$0xff] }
 0x663   : > { %9581 = vmatpush1.bf16.msra.mxu0 %v9346_v17  ;;  %9753 = vmatpush1.bf16.msra.mxu1 %v9348_v48  ;;  %v9398_v17 = vld [vmem:[%s15373_s5 + $0x380] sm:$0xff]  ;;  %v9400_v48 = vld [vmem:[%s15373_s5 + $0x390] sm:$0xff] }
 0x664   : > { %9593 = vmatprep.subr.bf16.mxu0 %v9351_v59  ;;  %9765 = vmatprep.subr.bf16.mxu1 %v9353_v23  ;;  %v9403_v59 = vld [vmem:[%s15373_s5 + $0x3a8] sm:$0xff]  ;;  %v9405_v23 = vld [vmem:[%s15373_s5 + $0x3b8] sm:$0xff] }
 0x666   : > { %9583 = vmatmul.mubr.bf16.vlgmr.msra.gmra.mrb[0].mxu0 %v15467_v34  ;;  %9755 = vmatmul.mubr.bf16.vlgmr.msra.gmra.mrb[0].mxu1 %v15467_v34 }
 0x667   : > { %9594 = vmatpush1.bf16.msra.mxu0 %v9350_v60  ;;  %9766 = vmatpush1.bf16.msra.mxu1 %v9352_v5  ;;  %v9407_v60 = vld [vmem:[%s15373_s5 + $0x3c8] sm:$0xff]  ;;  %v9409_v5 = vld [vmem:[%s15373_s5 + $0x3d8] sm:$0xff] }
 0x668   : > { %9595 = vmatprep.subr.bf16.mxu0 %v9355_v33  ;;  %9767 = vmatprep.subr.bf16.mxu1 %v9357_v3  ;;  %v9406_v33 = vld [vmem:[%s15373_s5 + $0x3c0] sm:$0xff]  ;;  %v9408_v3 = vld [vmem:[%s15373_s5 + $0x3d0] sm:$0xff] }
 0x669   : > { %9625 = vmatprep.mubr.bf16.mxu0 %v15473_v53  ;;  %9797 = vmatprep.mubr.bf16.mxu1 %v15473_v53 }
 0x66b   : > { %9596 = vmatpush1.bf16.msra.mxu0 %v9354_v40  ;;  %9768 = vmatpush1.bf16.msra.mxu1 %v9356_v1  ;;  %v9411_v40 = vld [vmem:[%s15373_s5 + $0x3e8] sm:$0xff]  ;;  %v9413_v1 = vld [vmem:[%s15373_s5 + $0x3f8] sm:$0xff] }
 0x66c   : > { %9597 = vmatprep.subr.bf16.mxu0 %v9359_v26  ;;  %9769 = vmatprep.subr.bf16.mxu1 %v9361_v47  ;;  %v9410_v26 = vld [vmem:[%s15373_s5 + $0x3e0] sm:$0xff]  ;;  %v9412_v47 = vld [vmem:[%s15373_s5 + $0x3f0] sm:$0xff] }
 0x66f   : > { %9598 = vmatpush1.bf16.msra.mxu0 %v9358_v39  ;;  %9770 = vmatpush1.bf16.msra.mxu1 %v9360_v15  ;;  %v9269_v39 = vld [vmem:[#allocation2 + $0x10] sm:$0xff] }
 0x670   : > { %9599 = vmatprep.subr.bf16.mxu0 %v9363_v49  ;;  %9771 = vmatprep.subr.bf16.mxu1 %v9365_v20  ;;  %v9277_v15 = vld [vmem:[#allocation2 + $0x50] sm:$0xff]  ;;  %v9415_v49 = vld [vmem:[%s15373_s5 + $0x408] sm:$0xff]  ;;  %v9417_v20 = vld [vmem:[%s15373_s5 + $0x418] sm:$0xff] }
 0x673   : > { %9600 = vmatpush1.bf16.msra.mxu0 %v9362_v46  ;;  %9772 = vmatpush1.bf16.msra.mxu1 %v9364_v6  ;;  %v15539_v46 = vpack.c.bf16 %v9277_v15, %v9269_v39  ;;  %v9272_v6 = vld [vmem:[#allocation2 + $0x28] sm:$0xff]  ;;  %v9465_v15 = vld [vmem:[%s15373_s5 + $0x598] sm:$0xff] }
 0x674   : > { %9601 = vmatprep.subr.bf16.mxu0 %v9367_v41  ;;  %9773 = vmatprep.subr.bf16.mxu1 %v9369_v2  ;;  %v9280_v41 = vld [vmem:[#allocation2 + $0x68] sm:$0xff]  ;;  %v9414_v2 = vld [vmem:[%s15373_s5 + $0x400] sm:$0xff] }
 0x675   : > { %v9463_v39 = vld [vmem:[%s15373_s5 + $0x588] sm:$0xff] }
 0x677   : > { %9602 = vmatpush1.bf16.msra.mxu0 %v9366_v38  ;;  %9774 = vmatpush1.bf16.msra.mxu1 %v9368_v27  ;;  %v9416_v38 = vld [vmem:[%s15373_s5 + $0x410] sm:$0xff]  ;;  %v9419_v27 = vld [vmem:[%s15373_s5 + $0x428] sm:$0xff] }
 0x678   : > { %9603 = vmatprep.subr.bf16.mxu0 %v9371_v14  ;;  %9775 = vmatprep.subr.bf16.mxu1 %v9373_v28  ;;  %v9421_v14 = vld [vmem:[%s15373_s5 + $0x438] sm:$0xff]  ;;  %v15545_v28 = vpack.c.bf16 %v9280_v41, %v9272_v6  ;;  %v9467_v6 = vld [vmem:[%s15373_s5 + $0x5a8] sm:$0xff] }
 0x679   : > { %v9469_v41 = vld [vmem:[%s15373_s5 + $0x5b8] sm:$0xff] }
 0x67b   : > { %9604 = vmatpush1.bf16.msra.mxu0 %v9370_v24  ;;  %9776 = vmatpush1.bf16.msra.mxu1 %v9372_v19  ;;  %v9418_v24 = vld [vmem:[%s15373_s5 + $0x420] sm:$0xff]  ;;  %v9420_v19 = vld [vmem:[%s15373_s5 + $0x430] sm:$0xff] }
 0x67c   : > { %9605 = vmatprep.subr.bf16.mxu0 %v9375_v61  ;;  %9777 = vmatprep.subr.bf16.mxu1 %v9377_v31  ;;  %v9423_v61 = vld [vmem:[%s15373_s5 + $0x448] sm:$0xff]  ;;  %v9425_v31 = vld [vmem:[%s15373_s5 + $0x458] sm:$0xff] }
 0x67f   : > { %9606 = vmatpush1.bf16.msra.mxu0 %v9374_v36  ;;  %9778 = vmatpush1.bf16.msra.mxu1 %v9376_v43  ;;  %v9422_v36 = vld [vmem:[%s15373_s5 + $0x440] sm:$0xff]  ;;  %v9424_v43 = vld [vmem:[%s15373_s5 + $0x450] sm:$0xff] }
 0x680   : > { %9607 = vmatprep.subr.bf16.mxu0 %v9379_v51  ;;  %9779 = vmatprep.subr.bf16.mxu1 %v9381_v45  ;;  %v9427_v51 = vld [vmem:[%s15373_s5 + $0x468] sm:$0xff]  ;;  %v9429_v45 = vld [vmem:[%s15373_s5 + $0x478] sm:$0xff] }
 0x683   : > { %9608 = vmatpush1.bf16.msra.mxu0 %v9378_v22  ;;  %9780 = vmatpush1.bf16.msra.mxu1 %v9380_v16  ;;  %v9426_v22 = vld [vmem:[%s15373_s5 + $0x460] sm:$0xff]  ;;  %v9428_v16 = vld [vmem:[%s15373_s5 + $0x470] sm:$0xff] }
 0x684   : > { %9609 = vmatprep.subr.bf16.mxu0 %v9383_v18  ;;  %9781 = vmatprep.subr.bf16.mxu1 %v9385_v7  ;;  %v9431_v18 = vld [vmem:[%s15373_s5 + $0x488] sm:$0xff]  ;;  %v9433_v7 = vld [vmem:[%s15373_s5 + $0x498] sm:$0xff] }
 0x687   : > { %9610 = vmatpush1.bf16.msra.mxu0 %v9382_v25  ;;  %9782 = vmatpush1.bf16.msra.mxu1 %v9384_v62  ;;  %v9430_v25 = vld [vmem:[%s15373_s5 + $0x480] sm:$0xff]  ;;  %v9432_v62 = vld [vmem:[%s15373_s5 + $0x490] sm:$0xff] }
 0x688   : > { %9611 = vmatprep.subr.bf16.mxu0 %v9387_v63  ;;  %9783 = vmatprep.subr.bf16.mxu1 %v9389_v10  ;;  %v9435_v63 = vld [vmem:[%s15373_s5 + $0x4a8] sm:$0xff]  ;;  %v9437_v10 = vld [vmem:[%s15373_s5 + $0x4b8] sm:$0xff] }
 0x68b   : > { %9612 = vmatpush1.bf16.msra.mxu0 %v9386_v29  ;;  %9784 = vmatpush1.bf16.msra.mxu1 %v9388_v9  ;;  %v9434_v29 = vld [vmem:[%s15373_s5 + $0x4a0] sm:$0xff]  ;;  %v9436_v9 = vld [vmem:[%s15373_s5 + $0x4b0] sm:$0xff] }
 0x68c   : > { %9613 = vmatprep.subr.bf16.mxu0 %v9391_v52  ;;  %9785 = vmatprep.subr.bf16.mxu1 %v9393_v4  ;;  %v9439_v52 = vld [vmem:[%s15373_s5 + $0x4c8] sm:$0xff]  ;;  %v9441_v4 = vld [vmem:[%s15373_s5 + $0x4d8] sm:$0xff] }
 0x68f   : > { %9614 = vmatpush1.bf16.msra.mxu0 %v9390_v37  ;;  %9786 = vmatpush1.bf16.msra.mxu1 %v9392_v13  ;;  %v9438_v37 = vld [vmem:[%s15373_s5 + $0x4c0] sm:$0xff]  ;;  %v9440_v13 = vld [vmem:[%s15373_s5 + $0x4d0] sm:$0xff] }
 0x690   : > { %9615 = vmatprep.subr.bf16.mxu0 %v9395_v42  ;;  %9787 = vmatprep.subr.bf16.mxu1 %v9397_v0  ;;  %v9443_v42 = vld [vmem:[%s15373_s5 + $0x4e8] sm:$0xff]  ;;  %v9445_v0 = vld [vmem:[%s15373_s5 + $0x4f8] sm:$0xff] }
 0x693   : > { %9616 = vmatpush1.bf16.msra.mxu0 %v9394_v12  ;;  %9788 = vmatpush1.bf16.msra.mxu1 %v9396_v21  ;;  %v9442_v12 = vld [vmem:[%s15373_s5 + $0x4e0] sm:$0xff]  ;;  %v9444_v21 = vld [vmem:[%s15373_s5 + $0x4f0] sm:$0xff] }
 0x694   : > { %9617 = vmatprep.subr.bf16.mxu0 %v9399_v8  ;;  %9789 = vmatprep.subr.bf16.mxu1 %v9401_v30  ;;  %v9447_v8 = vld [vmem:[%s15373_s5 + $0x508] sm:$0xff]  ;;  %v9449_v30 = vld [vmem:[%s15373_s5 + $0x518] sm:$0xff] }
 0x697   : > { %9618 = vmatpush1.bf16.msra.mxu0 %v9398_v17  ;;  %9790 = vmatpush1.bf16.msra.mxu1 %v9400_v48  ;;  %v9446_v17 = vld [vmem:[%s15373_s5 + $0x500] sm:$0xff]  ;;  %v9448_v48 = vld [vmem:[%s15373_s5 + $0x510] sm:$0xff] }
 0x698   : > { %9619 = vmatprep.subr.bf16.mxu0 %v9403_v59  ;;  %9791 = vmatprep.subr.bf16.mxu1 %v9405_v23  ;;  %v9451_v59 = vld [vmem:[%s15373_s5 + $0x528] sm:$0xff]  ;;  %v9453_v23 = vld [vmem:[%s15373_s5 + $0x538] sm:$0xff] }
 0x69b   : > { %9620 = vmatpush1.bf16.msra.mxu0 %v9402_v44  ;;  %9792 = vmatpush1.bf16.msra.mxu1 %v9404_v58  ;;  %v9450_v44 = vld [vmem:[%s15373_s5 + $0x520] sm:$0xff]  ;;  %v9452_v58 = vld [vmem:[%s15373_s5 + $0x530] sm:$0xff] }
 0x69c   : > { %9621 = vmatprep.subr.bf16.mxu0 %v9407_v60  ;;  %9793 = vmatprep.subr.bf16.mxu1 %v9409_v5  ;;  %v9455_v60 = vld [vmem:[%s15373_s5 + $0x548] sm:$0xff]  ;;  %v9457_v5 = vld [vmem:[%s15373_s5 + $0x558] sm:$0xff] }
 0x69f   : > { %9622 = vmatpush1.bf16.msra.mxu0 %v9406_v33  ;;  %9794 = vmatpush1.bf16.msra.mxu1 %v9408_v3  ;;  %v9454_v33 = vld [vmem:[%s15373_s5 + $0x540] sm:$0xff]  ;;  %v9456_v3 = vld [vmem:[%s15373_s5 + $0x550] sm:$0xff] }
 0x6a0   : > { %9623 = vmatprep.subr.bf16.mxu0 %v9411_v40  ;;  %9795 = vmatprep.subr.bf16.mxu1 %v9413_v1  ;;  %v9459_v40 = vld [vmem:[%s15373_s5 + $0x568] sm:$0xff]  ;;  %v9461_v1 = vld [vmem:[%s15373_s5 + $0x578] sm:$0xff] }
 0x6a3   : > { %9624 = vmatpush1.bf16.msra.mxu0 %v9410_v26  ;;  %9796 = vmatpush1.bf16.msra.mxu1 %v9412_v47  ;;  %v9458_v26 = vld [vmem:[%s15373_s5 + $0x560] sm:$0xff]  ;;  %v9460_v47 = vld [vmem:[%s15373_s5 + $0x570] sm:$0xff] }
 0x6a4   : > { %9636 = vmatprep.subr.bf16.mxu0 %v9415_v49  ;;  %9808 = vmatprep.subr.bf16.mxu1 %v9417_v20  ;;  %v9462_v49 = vld [vmem:[%s15373_s5 + $0x580] sm:$0xff]  ;;  %v9464_v20 = vld [vmem:[%s15373_s5 + $0x590] sm:$0xff] }
 0x6a6   : > { %9626 = vmatmul.mubr.bf16.vlgmr.msra.gmra.mrb[0].mxu0 %v15539_v46  ;;  %9798 = vmatmul.mubr.bf16.vlgmr.msra.gmra.mrb[0].mxu1 %v15539_v46 }
 0x6a7   : > { %9637 = vmatpush1.bf16.msra.mxu0 %v9414_v2  ;;  %9809 = vmatpush1.bf16.msra.mxu1 %v9416_v38  ;;  %v9466_v2 = vld [vmem:[%s15373_s5 + $0x5a0] sm:$0xff]  ;;  %v9468_v38 = vld [vmem:[%s15373_s5 + $0x5b0] sm:$0xff] }
 0x6a8   : > { %9638 = vmatprep.subr.bf16.mxu0 %v9419_v27  ;;  %9810 = vmatprep.subr.bf16.mxu1 %v9421_v14  ;;  %v9471_v27 = vld [vmem:[%s15373_s5 + $0x5c8] sm:$0xff]  ;;  %v9473_v14 = vld [vmem:[%s15373_s5 + $0x5d8] sm:$0xff] }
 0x6a9   : > { %9668 = vmatprep.mubr.bf16.mxu0 %v15545_v28  ;;  %9840 = vmatprep.mubr.bf16.mxu1 %v15545_v28 }
 0x6ab   : > { %9639 = vmatpush1.bf16.msra.mxu0 %v9418_v24  ;;  %9811 = vmatpush1.bf16.msra.mxu1 %v9420_v19  ;;  %v9470_v24 = vld [vmem:[%s15373_s5 + $0x5c0] sm:$0xff]  ;;  %v9472_v19 = vld [vmem:[%s15373_s5 + $0x5d0] sm:$0xff] }
 0x6ac   : > { %9640 = vmatprep.subr.bf16.mxu0 %v9423_v61  ;;  %9812 = vmatprep.subr.bf16.mxu1 %v9425_v31  ;;  %v9475_v61 = vld [vmem:[%s15373_s5 + $0x5e8] sm:$0xff]  ;;  %v9477_v31 = vld [vmem:[%s15373_s5 + $0x5f8] sm:$0xff] }
 0x6af   : > { %9641 = vmatpush1.bf16.msra.mxu0 %v9422_v36  ;;  %9813 = vmatpush1.bf16.msra.mxu1 %v9424_v43  ;;  %v9474_v36 = vld [vmem:[%s15373_s5 + $0x5e0] sm:$0xff]  ;;  %v9476_v43 = vld [vmem:[%s15373_s5 + $0x5f0] sm:$0xff] }
 0x6b0   : > { %9642 = vmatprep.subr.bf16.mxu0 %v9427_v51  ;;  %9814 = vmatprep.subr.bf16.mxu1 %v9429_v45  ;;  %v9479_v51 = vld [vmem:[%s15373_s5 + $0x608] sm:$0xff]  ;;  %v9481_v45 = vld [vmem:[%s15373_s5 + $0x618] sm:$0xff] }
 0x6b3   : > { %9643 = vmatpush1.bf16.msra.mxu0 %v9426_v22  ;;  %9815 = vmatpush1.bf16.msra.mxu1 %v9428_v16  ;;  %v11846_v22 = vld [vmem:[#allocation2 + $0x20] sm:$0xff] }
 0x6b4   : > { %9644 = vmatprep.subr.bf16.mxu0 %v9431_v18  ;;  %9816 = vmatprep.subr.bf16.mxu1 %v9433_v7  ;;  %v11847_v16 = vld [vmem:[#allocation2 + $0x60] sm:$0xff]  ;;  %v15613_v7 = vld [vmem:[#allocation2 + $0x38] sm:$0xff] }
 0x6b5   : > { %v15611_v18 = vpack.c.bf16 %v11847_v16, %v11846_v22  ;;  %v9527_v22 = vld [vmem:[%s15373_s5 + $0x788] sm:$0xff]  ;;  %v9529_v16 = vld [vmem:[%s15373_s5 + $0x798] sm:$0xff] }
 0x6b7   : > { %9645 = vmatpush1.bf16.msra.mxu0 %v9430_v25  ;;  %9817 = vmatpush1.bf16.msra.mxu1 %v9432_v62  ;;  %v15615_v25 = vld [vmem:[#allocation2 + $0x78] sm:$0xff]  ;;  %v9478_v62 = vld [vmem:[%s15373_s5 + $0x600] sm:$0xff] }
 0x6b8   : > { %9646 = vmatprep.subr.bf16.mxu0 %v9435_v63  ;;  %9818 = vmatprep.subr.bf16.mxu1 %v9437_v10  ;;  %v9480_v63 = vld [vmem:[%s15373_s5 + $0x610] sm:$0xff]  ;;  %v9483_v10 = vld [vmem:[%s15373_s5 + $0x628] sm:$0xff] }
 0x6bb   : > { %9647 = vmatpush1.bf16.msra.mxu0 %v9434_v29  ;;  %9819 = vmatpush1.bf16.msra.mxu1 %v9436_v9  ;;  %v9485_v29 = vld [vmem:[%s15373_s5 + $0x638] sm:$0xff]  ;;  %v15623_v9 = vpack.c.bf16 %v15615_v25, %v15613_v7 }
 0x6bc   : > { %9648 = vmatprep.subr.bf16.mxu0 %v9439_v52  ;;  %9820 = vmatprep.subr.bf16.mxu1 %v9441_v4  ;;  %v9482_v52 = vld [vmem:[%s15373_s5 + $0x620] sm:$0xff]  ;;  %v9484_v4 = vld [vmem:[%s15373_s5 + $0x630] sm:$0xff] }
 0x6bf   : > { %9649 = vmatpush1.bf16.msra.mxu0 %v9438_v37  ;;  %9821 = vmatpush1.bf16.msra.mxu1 %v9440_v13  ;;  %v9487_v37 = vld [vmem:[%s15373_s5 + $0x648] sm:$0xff]  ;;  %v9489_v13 = vld [vmem:[%s15373_s5 + $0x658] sm:$0xff] }
 0x6c0   : > { %9650 = vmatprep.subr.bf16.mxu0 %v9443_v42  ;;  %9822 = vmatprep.subr.bf16.mxu1 %v9445_v0  ;;  %v9486_v42 = vld [vmem:[%s15373_s5 + $0x640] sm:$0xff]  ;;  %v9488_v0 = vld [vmem:[%s15373_s5 + $0x650] sm:$0xff] }
 0x6c3   : > { %9651 = vmatpush1.bf16.msra.mxu0 %v9442_v12  ;;  %9823 = vmatpush1.bf16.msra.mxu1 %v9444_v21  ;;  %v9491_v12 = vld [vmem:[%s15373_s5 + $0x668] sm:$0xff]  ;;  %v9493_v21 = vld [vmem:[%s15373_s5 + $0x678] sm:$0xff] }
 0x6c4   : > { %9652 = vmatprep.subr.bf16.mxu0 %v9447_v8  ;;  %9824 = vmatprep.subr.bf16.mxu1 %v9449_v30  ;;  %v9490_v8 = vld [vmem:[%s15373_s5 + $0x660] sm:$0xff]  ;;  %v9492_v30 = vld [vmem:[%s15373_s5 + $0x670] sm:$0xff] }
 0x6c7   : > { %9653 = vmatpush1.bf16.msra.mxu0 %v9446_v17  ;;  %9825 = vmatpush1.bf16.msra.mxu1 %v9448_v48  ;;  %v9495_v17 = vld [vmem:[%s15373_s5 + $0x688] sm:$0xff]  ;;  %v9497_v48 = vld [vmem:[%s15373_s5 + $0x698] sm:$0xff] }
 0x6c8   : > { %9654 = vmatprep.subr.bf16.mxu0 %v9451_v59  ;;  %9826 = vmatprep.subr.bf16.mxu1 %v9453_v23  ;;  %v9494_v59 = vld [vmem:[%s15373_s5 + $0x680] sm:$0xff]  ;;  %v9496_v23 = vld [vmem:[%s15373_s5 + $0x690] sm:$0xff] }
 0x6cb   : > { %9655 = vmatpush1.bf16.msra.mxu0 %v9450_v44  ;;  %9827 = vmatpush1.bf16.msra.mxu1 %v9452_v58  ;;  %v9499_v44 = vld [vmem:[%s15373_s5 + $0x6a8] sm:$0xff]  ;;  %v9501_v58 = vld [vmem:[%s15373_s5 + $0x6b8] sm:$0xff] }
 0x6cc   : > { %9656 = vmatprep.subr.bf16.mxu0 %v9455_v60  ;;  %9828 = vmatprep.subr.bf16.mxu1 %v9457_v5  ;;  %v9498_v60 = vld [vmem:[%s15373_s5 + $0x6a0] sm:$0xff]  ;;  %v9500_v5 = vld [vmem:[%s15373_s5 + $0x6b0] sm:$0xff] }
 0x6cf   : > { %9657 = vmatpush1.bf16.msra.mxu0 %v9454_v33  ;;  %9829 = vmatpush1.bf16.msra.mxu1 %v9456_v3  ;;  %v9503_v33 = vld [vmem:[%s15373_s5 + $0x6c8] sm:$0xff]  ;;  %v9505_v3 = vld [vmem:[%s15373_s5 + $0x6d8] sm:$0xff] }
 0x6d0   : > { %9658 = vmatprep.subr.bf16.mxu0 %v9459_v40  ;;  %9830 = vmatprep.subr.bf16.mxu1 %v9461_v1  ;;  %v9502_v40 = vld [vmem:[%s15373_s5 + $0x6c0] sm:$0xff]  ;;  %v9504_v1 = vld [vmem:[%s15373_s5 + $0x6d0] sm:$0xff] }
 0x6d3   : > { %9659 = vmatpush1.bf16.msra.mxu0 %v9458_v26  ;;  %9831 = vmatpush1.bf16.msra.mxu1 %v9460_v47  ;;  %v9507_v26 = vld [vmem:[%s15373_s5 + $0x6e8] sm:$0xff]  ;;  %v9509_v47 = vld [vmem:[%s15373_s5 + $0x6f8] sm:$0xff] }
 0x6d4   : > { %9660 = vmatprep.subr.bf16.mxu0 %v9463_v39  ;;  %9832 = vmatprep.subr.bf16.mxu1 %v9465_v15  ;;  %v9506_v39 = vld [vmem:[%s15373_s5 + $0x6e0] sm:$0xff]  ;;  %v9508_v15 = vld [vmem:[%s15373_s5 + $0x6f0] sm:$0xff] }
 0x6d7   : > { %9661 = vmatpush1.bf16.msra.mxu0 %v9462_v49  ;;  %9833 = vmatpush1.bf16.msra.mxu1 %v9464_v20  ;;  %v9511_v49 = vld [vmem:[%s15373_s5 + $0x708] sm:$0xff]  ;;  %v9513_v20 = vld [vmem:[%s15373_s5 + $0x718] sm:$0xff] }
 0x6d8   : > { %9662 = vmatprep.subr.bf16.mxu0 %v9467_v6  ;;  %9834 = vmatprep.subr.bf16.mxu1 %v9469_v41  ;;  %v9510_v6 = vld [vmem:[%s15373_s5 + $0x700] sm:$0xff]  ;;  %v9512_v41 = vld [vmem:[%s15373_s5 + $0x710] sm:$0xff] }
 0x6db   : > { %9663 = vmatpush1.bf16.msra.mxu0 %v9466_v2  ;;  %9835 = vmatpush1.bf16.msra.mxu1 %v9468_v38  ;;  %v9515_v2 = vld [vmem:[%s15373_s5 + $0x728] sm:$0xff]  ;;  %v9517_v38 = vld [vmem:[%s15373_s5 + $0x738] sm:$0xff] }
 0x6dc   : > { %9664 = vmatprep.subr.bf16.mxu0 %v9471_v27  ;;  %9836 = vmatprep.subr.bf16.mxu1 %v9473_v14  ;;  %v9514_v27 = vld [vmem:[%s15373_s5 + $0x720] sm:$0xff]  ;;  %v9516_v14 = vld [vmem:[%s15373_s5 + $0x730] sm:$0xff] }
 0x6df   : > { %9665 = vmatpush1.bf16.msra.mxu0 %v9470_v24  ;;  %9837 = vmatpush1.bf16.msra.mxu1 %v9472_v19  ;;  %v9519_v24 = vld [vmem:[%s15373_s5 + $0x748] sm:$0xff]  ;;  %v9521_v19 = vld [vmem:[%s15373_s5 + $0x758] sm:$0xff] }
 0x6e0   : > { %9666 = vmatprep.subr.bf16.mxu0 %v9475_v61  ;;  %9838 = vmatprep.subr.bf16.mxu1 %v9477_v31  ;;  %v9518_v61 = vld [vmem:[%s15373_s5 + $0x740] sm:$0xff]  ;;  %v9520_v31 = vld [vmem:[%s15373_s5 + $0x750] sm:$0xff] }
 0x6e3   : > { %9667 = vmatpush1.bf16.msra.mxu0 %v9474_v36  ;;  %9839 = vmatpush1.bf16.msra.mxu1 %v9476_v43  ;;  %v9523_v36 = vld [vmem:[%s15373_s5 + $0x768] sm:$0xff]  ;;  %v9525_v43 = vld [vmem:[%s15373_s5 + $0x778] sm:$0xff] }
 0x6e4   : > { %9679 = vmatprep.subr.bf16.mxu0 %v9479_v51  ;;  %9851 = vmatprep.subr.bf16.mxu1 %v9481_v45  ;;  %v9522_v51 = vld [vmem:[%s15373_s5 + $0x760] sm:$0xff]  ;;  %v9524_v45 = vld [vmem:[%s15373_s5 + $0x770] sm:$0xff] }
 0x6e6   : > { %9669 = vmatmul.mubr.bf16.vlgmr.msra.gmra.mrb[0].mxu0 %v15611_v18  ;;  %9841 = vmatmul.mubr.bf16.vlgmr.msra.gmra.mrb[0].mxu1 %v15611_v18 }
 0x6e7   : > { %9680 = vmatpush1.bf16.msra.mxu0 %v9478_v62  ;;  %9852 = vmatpush1.bf16.msra.mxu1 %v9480_v63  ;;  %v9526_v62 = vld [vmem:[%s15373_s5 + $0x780] sm:$0xff]  ;;  %v9528_v63 = vld [vmem:[%s15373_s5 + $0x790] sm:$0xff] }
 0x6e8   : > { %9681 = vmatprep.subr.bf16.mxu0 %v9483_v10  ;;  %9853 = vmatprep.subr.bf16.mxu1 %v9485_v29  ;;  %v9531_v10 = vld [vmem:[%s15373_s5 + $0x7a8] sm:$0xff]  ;;  %v9533_v29 = vld [vmem:[%s15373_s5 + $0x7b8] sm:$0xff] }
 0x6e9   : > { %9711 = vmatprep.mubr.bf16.mxu0 %v15623_v9  ;;  %9883 = vmatprep.mubr.bf16.mxu1 %v15623_v9 }
 0x6eb   : > { %9682 = vmatpush1.bf16.msra.mxu0 %v9482_v52  ;;  %9854 = vmatpush1.bf16.msra.mxu1 %v9484_v4  ;;  %v9530_v52 = vld [vmem:[%s15373_s5 + $0x7a0] sm:$0xff]  ;;  %v9532_v4 = vld [vmem:[%s15373_s5 + $0x7b0] sm:$0xff] }
 0x6ec   : > { %9683 = vmatprep.subr.bf16.mxu0 %v9487_v37  ;;  %9855 = vmatprep.subr.bf16.mxu1 %v9489_v13  ;;  %v9535_v37 = vld [vmem:[%s15373_s5 + $0x7c8] sm:$0xff]  ;;  %v9537_v13 = vld [vmem:[%s15373_s5 + $0x7d8] sm:$0xff] }
 0x6ef   : > { %9684 = vmatpush1.bf16.msra.mxu0 %v9486_v42  ;;  %9856 = vmatpush1.bf16.msra.mxu1 %v9488_v0  ;;  %v9534_v42 = vld [vmem:[%s15373_s5 + $0x7c0] sm:$0xff]  ;;  %v9536_v0 = vld [vmem:[%s15373_s5 + $0x7d0] sm:$0xff] }
 0x6f0   : > { %9685 = vmatprep.subr.bf16.mxu0 %v9491_v12  ;;  %9857 = vmatprep.subr.bf16.mxu1 %v9493_v21  ;;  %v9539_v12 = vld [vmem:[%s15373_s5 + $0x7e8] sm:$0xff]  ;;  %v9541_v21 = vld [vmem:[%s15373_s5 + $0x7f8] sm:$0xff] }
 0x6f3   : > { %9686 = vmatpush1.bf16.msra.mxu0 %v9490_v8  ;;  %9858 = vmatpush1.bf16.msra.mxu1 %v9492_v30  ;;  %v9538_v8 = vld [vmem:[%s15373_s5 + $0x7e0] sm:$0xff]  ;;  %v15686_v30 = vld [vmem:[#allocation2 + $0x30] sm:$0xff] }
 0x6f4   : > { %9687 = vmatprep.subr.bf16.mxu0 %v9495_v17  ;;  %9859 = vmatprep.subr.bf16.mxu1 %v9497_v48  ;;  %v15688_v17 = vld [vmem:[#allocation2 + $0x70] sm:$0xff] }
 0x6f5   : > { %v9540_v48 = vld [vmem:[%s15373_s5 + $0x7f0] sm:$0xff] }
 0x6f7   : > { %9688 = vmatpush1.bf16.msra.mxu0 %v9494_v59  ;;  %9860 = vmatpush1.bf16.msra.mxu1 %v9496_v23  ;;  %v11782_v59 = vld [vmem:[%s16109_s13 + $0x40] sm:$0xff]  }
 0x6f8   : > { %9689 = vmatprep.subr.bf16.mxu0 %v9499_v44  ;;  %9861 = vmatprep.subr.bf16.mxu1 %v9501_v58  ;;  %v11783_v23 = vld [vmem:[%s16109_s13 + $0xc0] sm:$0xff]   ;;  %v15699_v44 = vpack.c.bf16 %v15688_v17, %v15686_v30 }
 0x6f9   : > { %v11784_v58 = vld [vmem:[%s16109_s13] sm:$0xff]  }
 0x6fb   : > { %9690 = vmatpush1.bf16.msra.mxu0 %v9498_v60  ;;  %9862 = vmatpush1.bf16.msra.mxu1 %v9500_v5  ;;  %v11785_v60 = vld [vmem:[%s16109_s13 + $0x80] sm:$0xff]   ;;  %v11786_v5 = vld [vmem:[%s16109_s13 + $0x48] sm:$0xff]  }
 0x6fc   : > { %9691 = vmatprep.subr.bf16.mxu0 %v9503_v33  ;;  %9863 = vmatprep.subr.bf16.mxu1 %v9505_v3  ;;  %v11787_v33 = vld [vmem:[%s16109_s13 + $0xc8] sm:$0xff]  }
 0x6fd   : > { %v11788_v3 = vld [vmem:[%s16109_s13 + $0x8] sm:$0xff]  }
 0x6ff   : > { %9692 = vmatpush1.bf16.msra.mxu0 %v9502_v40  ;;  %9864 = vmatpush1.bf16.msra.mxu1 %v9504_v1  ;;  %v11789_v40 = vld [vmem:[%s16109_s13 + $0x88] sm:$0xff]   ;;  %v11790_v1 = vld [vmem:[%s16109_s13 + $0x50] sm:$0xff]  }
 0x700   : > { %9693 = vmatprep.subr.bf16.mxu0 %v9507_v26  ;;  %9865 = vmatprep.subr.bf16.mxu1 %v9509_v47  ;;  %v11791_v26 = vld [vmem:[%s16109_s13 + $0xd0] sm:$0xff]  }
 0x701   : > { %v11792_v47 = vld [vmem:[%s16109_s13 + $0x10] sm:$0xff]  }
 0x703   : > { %9694 = vmatpush1.bf16.msra.mxu0 %v9506_v39  ;;  %9866 = vmatpush1.bf16.msra.mxu1 %v9508_v15  ;;  %v11793_v39 = vld [vmem:[%s16109_s13 + $0x90] sm:$0xff]   ;;  %v11794_v15 = vld [vmem:[%s16109_s13 + $0x58] sm:$0xff]  }
 0x704   : > { %9695 = vmatprep.subr.bf16.mxu0 %v9511_v49  ;;  %9867 = vmatprep.subr.bf16.mxu1 %v9513_v20  ;;  %v11797_v49 = vld [vmem:[%s16109_s13 + $0x98] sm:$0xff]   ;;  %v11798_v20 = vld [vmem:[%s16109_s13 + $0x60] sm:$0xff]  }
 0x707   : > { %9696 = vmatpush1.bf16.msra.mxu0 %v9510_v6  ;;  %9868 = vmatpush1.bf16.msra.mxu1 %v9512_v41  ;;  %v11799_v6 = vld [vmem:[%s16109_s13 + $0xe0] sm:$0xff]  }
 0x708   : > { %9697 = vmatprep.subr.bf16.mxu0 %v9515_v2  ;;  %9869 = vmatprep.subr.bf16.mxu1 %v9517_v38  ;;  %v11800_v41 = vld [vmem:[%s16109_s13 + $0x20] sm:$0xff]   ;;  %v11802_v38 = vld [vmem:[%s16109_s13 + $0x68] sm:$0xff]  }
 0x709   : > { %v11801_v2 = vld [vmem:[%s16109_s13 + $0xa0] sm:$0xff]  }
 0x70b   : > { %9698 = vmatpush1.bf16.msra.mxu0 %v9514_v27  ;;  %9870 = vmatpush1.bf16.msra.mxu1 %v9516_v14  ;;  %v11803_v27 = vld [vmem:[%s16109_s13 + $0xe8] sm:$0xff]  }
 0x70c   : > { %9699 = vmatprep.subr.bf16.mxu0 %v9519_v24  ;;  %9871 = vmatprep.subr.bf16.mxu1 %v9521_v19  ;;  %v11804_v14 = vld [vmem:[%s16109_s13 + $0x28] sm:$0xff]   ;;  %v11806_v19 = vld [vmem:[%s16109_s13 + $0x70] sm:$0xff]  }
 0x70d   : > { %v11805_v24 = vld [vmem:[%s16109_s13 + $0xa8] sm:$0xff]  }
 0x70f   : > { %9700 = vmatpush1.bf16.msra.mxu0 %v9518_v61  ;;  %9872 = vmatpush1.bf16.msra.mxu1 %v9520_v31  ;;  %v11807_v61 = vld [vmem:[%s16109_s13 + $0xf0] sm:$0xff]  }
 0x710   : > { %9701 = vmatprep.subr.bf16.mxu0 %v9523_v36  ;;  %9873 = vmatprep.subr.bf16.mxu1 %v9525_v43  ;;  %v11808_v31 = vld [vmem:[%s16109_s13 + $0x30] sm:$0xff]   ;;  %v11810_v43 = vld [vmem:[%s16109_s13 + $0x78] sm:$0xff]  }
 0x711   : > { %v11809_v36 = vld [vmem:[%s16109_s13 + $0xb0] sm:$0xff]  }
 0x713   : > { %9702 = vmatpush1.bf16.msra.mxu0 %v9522_v51  ;;  %9874 = vmatpush1.bf16.msra.mxu1 %v9524_v45  ;;  %v11811_v51 = vld [vmem:[%s16109_s13 + $0xf8] sm:$0xff]  }
 0x714   : > { %9703 = vmatprep.subr.bf16.mxu0 %v9527_v22  ;;  %9875 = vmatprep.subr.bf16.mxu1 %v9529_v16  ;;  %v11812_v45 = vld [vmem:[%s16109_s13 + $0x38] sm:$0xff]   ;;  %v11814_v16 = vld [vmem:[%s16109_s13 + $0x140] sm:$0xff]  }
 0x715   : > { %v11813_v22 = vld [vmem:[%s16109_s13 + $0xb8] sm:$0xff]  }
 0x717   : > { %9704 = vmatpush1.bf16.msra.mxu0 %v9526_v62  ;;  %9876 = vmatpush1.bf16.msra.mxu1 %v9528_v63  ;;  %v11815_v62 = vld [vmem:[%s16109_s13 + $0x1c0] sm:$0xff]  }
 0x718   : > { %9705 = vmatprep.subr.bf16.mxu0 %v9531_v10  ;;  %9877 = vmatprep.subr.bf16.mxu1 %v9533_v29  ;;  %v11816_v63 = vld [vmem:[%s16109_s13 + $0x100] sm:$0xff]   ;;  %v11818_v29 = vld [vmem:[%s16109_s13 + $0x148] sm:$0xff]  }
 0x719   : > { %v11817_v10 = vld [vmem:[%s16109_s13 + $0x180] sm:$0xff]  }
 0x71b   : > { %9706 = vmatpush1.bf16.msra.mxu0 %v9530_v52  ;;  %9878 = vmatpush1.bf16.msra.mxu1 %v9532_v4  ;;  %v11819_v52 = vld [vmem:[%s16109_s13 + $0x1c8] sm:$0xff]  }
 0x71c   : > { %9707 = vmatprep.subr.bf16.mxu0 %v9535_v37  ;;  %9879 = vmatprep.subr.bf16.mxu1 %v9537_v13  ;;  %v11820_v4 = vld [vmem:[%s16109_s13 + $0x108] sm:$0xff]   ;;  %v11822_v13 = vld [vmem:[%s16109_s13 + $0x150] sm:$0xff]  }
 0x71d   : > { %v11821_v37 = vld [vmem:[%s16109_s13 + $0x188] sm:$0xff]  }
 0x71f   : > { %9708 = vmatpush1.bf16.msra.mxu0 %v9534_v42  ;;  %9880 = vmatpush1.bf16.msra.mxu1 %v9536_v0  ;;  %v11825_v42 = vld [vmem:[%s16109_s13 + $0x190] sm:$0xff]   ;;  %v11826_v0 = vld [vmem:[%s16109_s13 + $0x158] sm:$0xff]  }
 0x720   : > { %9709 = vmatprep.subr.bf16.mxu0 %v9539_v12  ;;  %9881 = vmatprep.subr.bf16.mxu1 %v9541_v21  ;;  %v11829_v12 = vld [vmem:[%s16109_s13 + $0x198] sm:$0xff]   ;;  %v11830_v21 = vld [vmem:[%s16109_s13 + $0x160] sm:$0xff]  }
 0x723   : > { %9710 = vmatpush1.bf16.msra.mxu0 %v9538_v8  ;;  %9882 = vmatpush1.bf16.msra.mxu1 %v9540_v48  ;;  %v11831_v8 = vld [vmem:[%s16109_s13 + $0x1e0] sm:$0xff]  }
 0x724   : > { %11345 = vmatprep.subr.bf16.mxu0 %v11782_v59  ;;  %11367 = vmatprep.subr.bf16.mxu1 %v11783_v23  ;;  %v11832_v48 = vld [vmem:[%s16109_s13 + $0x120] sm:$0xff]   ;;  %v11834_v23 = vld [vmem:[%s16109_s13 + $0x168] sm:$0xff]  }
 0x725   : > { %v11833_v59 = vld [vmem:[%s16109_s13 + $0x1a0] sm:$0xff]  }
 0x726   : > { %9712 = vmatmul.mubr.bf16.vlgmr.msra.gmra.mrb[0].mxu0 %v15699_v44  ;;  %9884 = vmatmul.mubr.bf16.vlgmr.msra.gmra.mrb[0].mxu1 %v15699_v44 }
 0x727   : > { %11346 = vmatpush3.bf16.msra.mxu0 %v11784_v58  ;;  %11368 = vmatpush3.bf16.msra.mxu1 %v11785_v60  ;;  %v11835_v58 = vld [vmem:[%s16109_s13 + $0x1e8] sm:$0xff]  }
 0x728   : > { %11347 = vmatprep.subr.bf16.mxu0 %v11786_v5  ;;  %11369 = vmatprep.subr.bf16.mxu1 %v11787_v33  ;;  %v11836_v60 = vld [vmem:[%s16109_s13 + $0x128] sm:$0xff]   ;;  %v11838_v33 = vld [vmem:[%s16109_s13 + $0x170] sm:$0xff]  }
 0x729   : > { %10438 = vmatprep.mubr.bf16.mxu0 %v15378_v56  ;;  %10479 = vmatprep.mubr.bf16.mxu1 %v15473_v53  ;;  %v11795_v56 = vld [vmem:[%s16109_s13 + $0xd8] sm:$0xff]   ;;  %v11837_v5 = vld [vmem:[%s16109_s13 + $0x1a8] sm:$0xff]  }
 0x72a   : > { %v11796_v53 = vld [vmem:[%s16109_s13 + $0x18] sm:$0xff]  }
 0x72b   : > { %11348 = vmatpush3.bf16.msra.mxu0 %v11788_v3  ;;  %11370 = vmatpush3.bf16.msra.mxu1 %v11789_v40  ;;  %v11839_v3 = vld [vmem:[%s16109_s13 + $0x1f0] sm:$0xff]  }
 0x72c   : > { %11349 = vmatprep.subr.bf16.mxu0 %v11790_v1  ;;  %11371 = vmatprep.subr.bf16.mxu1 %v11791_v26  ;;  %v11840_v40 = vld [vmem:[%s16109_s13 + $0x130] sm:$0xff]   ;;  %v11842_v26 = vld [vmem:[%s16109_s13 + $0x178] sm:$0xff]  }
 0x72d   : > { %v11841_v1 = vld [vmem:[%s16109_s13 + $0x1b0] sm:$0xff]  }
 0x72f   : > { %11350 = vmatpush3.bf16.msra.mxu0 %v11792_v47  ;;  %11372 = vmatpush3.bf16.msra.mxu1 %v11793_v39  ;;  %v11843_v47 = vld [vmem:[%s16109_s13 + $0x1f8] sm:$0xff]  }
 0x730   : > { %11351 = vmatprep.subr.bf16.mxu0 %v11794_v15  ;;  %11373 = vmatprep.subr.bf16.mxu1 %v11795_v56  ;;  %v11844_v39 = vld [vmem:[%s16109_s13 + $0x138] sm:$0xff]   ;;  %v10571_v56 = vld [vmem:[%s12368_s30 + $0x8] sm:$0xff] }
 0x731   : > { %v11845_v15 = vld [vmem:[%s16109_s13 + $0x1b8] sm:$0xff]  }
 0x733   : > { %11352 = vmatpush3.bf16.msra.mxu0 %v11796_v53  ;;  %11374 = vmatpush3.bf16.msra.mxu1 %v11797_v49  ;;  %v10575_v53 = vld [vmem:[%s12368_s30 + $0x28] sm:$0xff]  ;;  %v10573_v49 = vld [vmem:[%s12368_s30 + $0x18] sm:$0xff] }
 0x734   : > { %11353 = vmatprep.subr.bf16.mxu0 %v11798_v20  ;;  %11375 = vmatprep.subr.bf16.mxu1 %v11799_v6  ;;  %v11449_v20 = vpack.c.bf16 %v10575_v53, %v10571_v56  ;;  %v10577_v6 = vld [vmem:[%s12368_s30 + $0x38] sm:$0xff] }
 0x737   : > { %11354 = vmatpush3.bf16.msra.mxu0 %v11800_v41  ;;  %11376 = vmatpush3.bf16.msra.mxu1 %v11801_v2  ;;  %v11457_v41 = vpack.c.bf16 %v10577_v6, %v10573_v49  ;;  %v10570_v2 = vld [vmem:[%s12368_s30] sm:$0xff] }
 0x738   : > { %11355 = vmatprep.subr.bf16.mxu0 %v11802_v38  ;;  %11377 = vmatprep.subr.bf16.mxu1 %v11803_v27  ;;  %v10574_v38 = vld [vmem:[%s12368_s30 + $0x20] sm:$0xff]  ;;  %v10576_v27 = vld [vmem:[%s12368_s30 + $0x30] sm:$0xff] }
 0x73b   : > { %11356 = vmatpush3.bf16.msra.mxu0 %v11804_v14  ;;  %11378 = vmatpush3.bf16.msra.mxu1 %v11805_v24  ;;  %v10579_v24 = vld [vmem:[%s12368_s30 + $0x48] sm:$0xff] }
 0x73c   : > { %11357 = vmatprep.subr.bf16.mxu0 %v11806_v19  ;;  %11379 = vmatprep.subr.bf16.mxu1 %v11807_v61  ;;  %v10583_v19 = vld [vmem:[%s12368_s30 + $0x68] sm:$0xff]  ;;  %v10581_v61 = vld [vmem:[%s12368_s30 + $0x58] sm:$0xff] }
 0x73f   : > { %11358 = vmatpush3.bf16.msra.mxu0 %v11808_v31  ;;  %11380 = vmatpush3.bf16.msra.mxu1 %v11809_v36  ;;  %v11453_v31 = vpack.c.bf16 %v10583_v19, %v10579_v24  ;;  %v10585_v36 = vld [vmem:[%s12368_s30 + $0x78] sm:$0xff] }
 0x740   : > { %11359 = vmatprep.subr.bf16.mxu0 %v11810_v43  ;;  %11381 = vmatprep.subr.bf16.mxu1 %v11811_v51  ;;  %v10578_v43 = vld [vmem:[%s12368_s30 + $0x40] sm:$0xff] }
 0x741   : > { %v10582_v51 = vld [vmem:[%s12368_s30 + $0x60] sm:$0xff] }
 0x743   : > { %11360 = vmatpush3.bf16.msra.mxu0 %v11812_v45  ;;  %11382 = vmatpush3.bf16.msra.mxu1 %v11813_v22  ;;  %v11461_v45 = vpack.c.bf16 %v10585_v36, %v10581_v61  ;;  %v11455_v22 = vpack.c.bf16 %v10582_v51, %v10578_v43  ;;  %v10755_v61 = vld [vmem:[%s12362_s3] sm:$0xf] }
 0x744   : > { %11389 = vmatprep.subr.bf16.mxu0 %v11814_v16  ;;  %11411 = vmatprep.subr.bf16.mxu1 %v11815_v62  ;;  %v10580_v16 = vld [vmem:[%s12368_s30 + $0x50] sm:$0xff] }
 0x745   : > { %v10584_v62 = vld [vmem:[%s12368_s30 + $0x70] sm:$0xff] }
 0x746   : > { %10439 = vmatmul.mubr.bf16.vlgmr.msra.gmra.mrb[4].mxu0 %v15467_v34  ;;  %10480 = vmatmul.mubr.bf16.vlgmr.msra.gmra.mrb[4].mxu1 %v15539_v46  ;;  %v11823_v34 = vld [vmem:[%s16109_s13 + $0x1d0] sm:$0xff]  }
 0x747   : > { %11390 = vmatpush3.bf16.msra.mxu0 %v11816_v63  ;;  %11412 = vmatpush3.bf16.msra.mxu1 %v11817_v10  ;;  %v11824_v46 = vld [vmem:[%s16109_s13 + $0x110] sm:$0xff]   ;;  %v11463_v63 = vpack.c.bf16 %v10584_v62, %v10580_v16  ;;  %v11986_v10 = vmov 0.0  }
 0x748   : > { %11391 = vmatprep.subr.bf16.mxu0 %v11818_v29  ;;  %11413 = vmatprep.subr.bf16.mxu1 %v11819_v52 }
 0x749   : > { %10520 = vmatprep.mubr.bf16.mxu0 %v15545_v28  ;;  %10561 = vmatprep.mubr.bf16.mxu1 %v15623_v9  ;;  %v11827_v28 = vld [vmem:[%s16109_s13 + $0x1d8] sm:$0xff]  }
 0x74a   : > { %v11828_v9 = vld [vmem:[%s16109_s13 + $0x118] sm:$0xff]  }
 0x74b   : > { %11392 = vmatpush3.bf16.msra.mxu0 %v11820_v4  ;;  %11414 = vmatpush3.bf16.msra.mxu1 %v11821_v37 }
 0x74c   : > { %11393 = vmatprep.subr.bf16.mxu0 %v11822_v13  ;;  %11415 = vmatprep.subr.bf16.mxu1 %v11823_v34 }
 0x74f   : > { %11394 = vmatpush3.bf16.msra.mxu0 %v11824_v46  ;;  %11416 = vmatpush3.bf16.msra.mxu1 %v11825_v42 }
 0x750   : > { %11395 = vmatprep.subr.bf16.mxu0 %v11826_v0  ;;  %11417 = vmatprep.subr.bf16.mxu1 %v11827_v28 }
 0x753   : > { %11396 = vmatpush3.bf16.msra.mxu0 %v11828_v9  ;;  %11418 = vmatpush3.bf16.msra.mxu1 %v11829_v12 }
 0x754   : > { %11397 = vmatprep.subr.bf16.mxu0 %v11830_v21  ;;  %11419 = vmatprep.subr.bf16.mxu1 %v11831_v8 }
 0x757   : > { %11398 = vmatpush3.bf16.msra.mxu0 %v11832_v48  ;;  %11420 = vmatpush3.bf16.msra.mxu1 %v11833_v59 }
 0x758   : > { %11399 = vmatprep.subr.bf16.mxu0 %v11834_v23  ;;  %11421 = vmatprep.subr.bf16.mxu1 %v11835_v58 }
 0x75b   : > { %11400 = vmatpush3.bf16.msra.mxu0 %v11836_v60  ;;  %11422 = vmatpush3.bf16.msra.mxu1 %v11837_v5 }
 0x75c   : > { %11401 = vmatprep.subr.bf16.mxu0 %v11838_v33  ;;  %11423 = vmatprep.subr.bf16.mxu1 %v11839_v3 }
 0x75f   : > { %11402 = vmatpush3.bf16.msra.mxu0 %v11840_v40  ;;  %11424 = vmatpush3.bf16.msra.mxu1 %v11841_v1 }
 0x760   : > { %11403 = vmatprep.subr.bf16.mxu0 %v11842_v26  ;;  %11425 = vmatprep.subr.bf16.mxu1 %v11843_v47 }
 0x763   : > { %11404 = vmatpush3.bf16.msra.mxu0 %v11844_v39  ;;  %11426 = vmatpush3.bf16.msra.mxu1 %v11845_v15 }
 0x764   : > { %11450 = vmatprep.subr.bf16.mxu0 %v11449_v20  ;;  %11458 = vmatprep.subr.bf16.mxu1 %v11457_v41 }
 0x766   : > { %10521 = vmatmul.mubr.bf16.vlgmr.msra.gmra.mrb[8].mxu0 %v15611_v18  ;;  %10562 = vmatmul.mubr.bf16.vlgmr.msra.gmra.mrb[8].mxu1 %v15699_v44  ;;  %v10572_v18 = vld [vmem:[%s12368_s30 + $0x10] sm:$0xff]  ;;  %v11451_v44 = vpack.c.bf16 %v10574_v38, %v10570_v2 }
 0x767   : > { %v11459_v14 = vpack.c.bf16 %v10576_v27, %v10572_v18  ;;  %10657 = vmatprep.mubr.f32.mxu0 %v11986_v10  ;;  %10734 = vmatprep.mubr.f32.mxu1 %v11986_v10  ;;  %v10757_v27 = vlaneseq }
 0x768   : > { %11452 = vmatpush1.bf16.msra.mxu0 %v11451_v44 }
 0x769   : > { %11460 = vmatpush1.bf16.msra.mxu1 %v11459_v14  ;;  %11454 = vmatprep.subr.bf16.mxu0 %v11453_v31  ;;  %v10758_v14 = vshrl.u32 %v10757_v27, 7  ;;  %v10790_v27 = vld [vmem:[%s12370_s10 + $0x28] sm:$0xff] }
 0x76a   : > { %11462 = vmatprep.subr.bf16.mxu1 %v11461_v45 }
 0x76b   : > { %v10759_v24 = vsub.s32 0, %v10758_v14  ;;  %v10767_v19 = vsub.s32 2, %v10758_v14  ;;  %v10763_v31 = vsub.s32 1, %v10758_v14  ;;  %v10771_v36 = vsub.s32 3, %v10758_v14  ;;  %v10792_v14 = vld [vmem:[%s12370_s10 + $0x38] sm:$0xff] }
 0x76c   : > { %11456 = vmatpush1.bf16.msra.mxu0 %v11455_v22 }
 0x76d   : > { %11464 = vmatpush1.bf16.msra.mxu1 %v11463_v63  ;;  %v10760_v43 = vrot.slane %v10755_v61, %v10759_v24  ;;  %v10768_v51 = vrot.slane %v10755_v61, %v10767_v19  ;;  %v10764_v16 = vrot.slane %v10755_v61, %v10763_v31  ;;  %v10772_v62 = vrot.slane %v10755_v61, %v10771_v36  ;;  %v11854_v31 = vld [vmem:[#allocation2 + $0x68] sm:$0xff] }
 0x7f9   : > { %v15913_v29 = vpop.f32.mrb[0].mxu0  ;;  %v15915_v52 = vpop.f32.mrb[0].mxu1 }
 0x7fa   : > { %v15917_v4 = vpop.f32.mrb[1].mxu0  ;;  %v15919_v37 = vpop.f32.mrb[1].mxu1 }
 0x7fb   : > { %v15921_v13 = vpop.f32.mrb[2].mxu0  ;;  %v15923_v34 = vpop.f32.mrb[2].mxu1 }
 0x7fc   : > { %v15925_v46 = vpop.f32.mrb[3].mxu0  ;;  %v15927_v42 = vpop.f32.mrb[3].mxu1 }
 0x819   : > { %v11361_v0 = vpop.f32.mrb[4].mxu0  ;;  %v11383_v28 = vpop.f32.mrb[4].mxu1 }
 0x81a   : > { %v11362_v9 = vpop.f32.mrb[5].mxu0  ;;  %v11384_v12 = vpop.f32.mrb[5].mxu1 }
 0x81b   : > { %v11363_v21 = vadd.f32 %v11362_v9, %v11361_v0  ;;  %v11385_v8 = vadd.f32 %v11384_v12, %v11383_v28  ;;  %v11364_v48 = vpop.f32.mrb[6].mxu0  ;;  %v11386_v59 = vpop.f32.mrb[6].mxu1  ;;  %v10785_v9 = vld [vmem:[%s12370_s10] sm:$0xff]  ;;  %v10787_v12 = vld [vmem:[%s12370_s10 + $0x10] sm:$0xff] }
 0x81c   : > { %v11365_v23 = vpop.f32.mrb[7].mxu0  ;;  %v11387_v58 = vpop.f32.mrb[7].mxu1 }
 0x81d   : > { %v10482_v60 = vadd.f32 %v11385_v8, %v11363_v21  ;;  %v11366_v5 = vadd.f32 %v11365_v23, %v11364_v48  ;;  %v11388_v33 = vadd.f32 %v11387_v58, %v11386_v59  ;;  %v11848_v48 = vld [vmem:[#allocation2 + $0x8] sm:$0xff]  ;;  %v11850_v58 = vld [vmem:[#allocation2 + $0x18] sm:$0xff] }
 0x81e   : > { %v11849_v59 = vld [vmem:[#allocation2 + $0x28] sm:$0xff] }
 0x81f   : > { %v10485_v3 = vadd.f32 %v11388_v33, %v11366_v5  ;;  %v10806_v23 = vsel %vm15393_vm1, %v11849_v59, %v11848_v48  ;;  %v10786_v5 = vld [vmem:[%s12370_s10 + $0x8] sm:$0xff]  ;;  %v10788_v33 = vld [vmem:[%s12370_s10 + $0x18] sm:$0xff] }
 0x839   : > { %v11405_v40 = vpop.f32.mrb[8].mxu0  ;;  %v11427_v1 = vpop.f32.mrb[8].mxu1 }
 0x83a   : > { %v11406_v26 = vpop.f32.mrb[9].mxu0  ;;  %v11428_v47 = vpop.f32.mrb[9].mxu1 }
 0x83b   : > { %v11407_v39 = vadd.f32 %v11406_v26, %v11405_v40  ;;  %v11429_v15 = vadd.f32 %v11428_v47, %v11427_v1  ;;  %v11408_v56 = vpop.f32.mrb[10].mxu0  ;;  %v11430_v53 = vpop.f32.mrb[10].mxu1  ;;  %v11852_v47 = vld [vmem:[#allocation2 + $0x50] sm:$0xff] }
 0x83c   : > { %v11409_v49 = vpop.f32.mrb[11].mxu0  ;;  %v11431_v20 = vpop.f32.mrb[11].mxu1 }
 0x83d   : > { %v10523_v6 = vadd.f32 %v11407_v39, %v10482_v60  ;;  %v11410_v41 = vadd.f32 %v11409_v49, %v11408_v56  ;;  %v11432_v2 = vadd.f32 %v11431_v20, %v11430_v53 }
 0x83f   : > { %v10564_v38 = vadd.f32 %v11429_v15, %v10523_v6  ;;  %v10526_v18 = vadd.f32 %v11410_v41, %v10485_v3  ;;  %v11851_v3 = vld [vmem:[#allocation2 + $0x10] sm:$0xff]  ;;  %v10789_v41 = vld [vmem:[%s12370_s10 + $0x20] sm:$0xff] }
 0x841   : > { %v10567_v44 = vadd.f32 %v11432_v2, %v10526_v18  ;;  %11240 = vmatmul.mubr.msk.f32.vlgmr.msra.gmra.mrb[12].mxu0 %vm10586_vm2, %v10564_v38  ;;  %11242 = vmatmul.mubr.msk.f32.vlgmr.msra.gmra.mrb[12].mxu1 %vm10586_vm2, %v10564_v38  ;;  %v10791_v2 = vld [vmem:[%s12370_s10 + $0x30] sm:$0xff] }
 0x842   : > { %10663 = vmatprep.mubr.f32.mxu0 %v11986_v10  ;;  %10740 = vmatprep.mubr.f32.mxu1 %v11986_v10 }
 0x845   : > { %11241 = vmatmul.mubr.msk.f32.gmra.mrb[14].mxu0 %vm10586_vm2, %v10567_v44  ;;  %11243 = vmatmul.mubr.msk.f32.gmra.mrb[14].mxu1 %vm10586_vm2, %v10567_v44 }
 0x914   : > { %v10659_v45 = vpop.f32.mrb[12].mxu0  ;;  %v10736_v22 = vpop.f32.mrb[12].mxu1 }
 0x915   : > { %v10747_v63 = vsub.f32 %v15913_v29, %v10659_v45  ;;  %v10749_v10 = vsub.f32 %v15915_v52, %v10736_v22  ;;  %v10661_v0 = vpop.f32.mrb[13].mxu0  ;;  %v10738_v28 = vpop.f32.mrb[13].mxu1  ;;  %v10808_v29 = vsel %vm15393_vm1, %v15613_v7, %v11850_v58  ;;  %v10811_v7 = vsel %vm15393_vm1, %v15688_v17, %v11852_v47 }
 0x916   : > { %v10748_v21 = vsub.f32 %v15917_v4, %v10661_v0  ;;  %v10750_v8 = vsub.f32 %v15919_v37, %v10738_v28  ;;  %v10807_v4 = vsel %vm15393_vm1, %v15686_v30, %v11851_v3 }
 0x917   : > { %v10777_v60 = vadd.f32 %v10760_v43, %v10747_v63  ;;  %v10779_v52 = vadd.f32 %v10768_v51, %v10749_v10 }
 0x918   : > { %v10778_v37 = vadd.f32 %v10764_v16, %v10748_v21  ;;  %v10780_v40 = vadd.f32 %v10772_v62, %v10750_v8  ;;  %v10665_v1 = vpop.f32.mrb[14].mxu0  ;;  %v10742_v26 = vpop.f32.mrb[14].mxu1 }
 0x919   : > { %v10793_v39 = vadd.f32 %v10785_v9, %v10777_v60  ;;  %v10795_v15 = vadd.f32 %v10787_v12, %v10779_v52  ;;  %v10751_v56 = vsub.f32 %v15921_v13, %v10665_v1  ;;  %v10753_v53 = vsub.f32 %v15923_v34, %v10742_v26  ;;  %v10667_v49 = vpop.f32.mrb[15].mxu0  ;;  %v10744_v30 = vpop.f32.mrb[15].mxu1 }
 0x91a   : > { %v10794_v20 = vadd.f32 %v10786_v5, %v10778_v37  ;;  %v10796_v6 = vadd.f32 %v10788_v33, %v10780_v40  ;;  %v10752_v38 = vsub.f32 %v15925_v46, %v10667_v49  ;;  %v10754_v18 = vsub.f32 %v15927_v42, %v10744_v30  ;;  %v11853_v42 = vld [vmem:[#allocation2 + $0x48] sm:$0xff] }
 0x91b   : > { %v10813_v17 = vmul.f32 %v10805_v35, %v10793_v39  ;;  %v10815_v13 = vmul.f32 %v10807_v4, %v10795_v15  ;;  %v10781_v34 = vadd.f32 %v10760_v43, %v10751_v56  ;;  %v10783_v44 = vadd.f32 %v10768_v51, %v10753_v53 }
 0x91c   : > { %v10814_v24 = vmul.f32 %v10806_v23, %v10794_v20  ;;  %v10816_v19 = vmul.f32 %v10808_v29, %v10796_v6  ;;  %v10782_v46 = vadd.f32 %v10764_v16, %v10752_v38  ;;  %v10784_v61 = vadd.f32 %v10772_v62, %v10754_v18 }
 0x91d   : > { %v10810_v54 = vsel %vm15393_vm1, %v11854_v31, %v11853_v42  ;;  %v10812_v35 = vsel %vm15393_vm1, %v15615_v25, %v11855_v50  ;;  %10821 = vst [vmem:[%s12374_s24] sm:$0xff] %v10813_v17  ;;  %10823 = vst [vmem:[%s12374_s24 + $0x10] sm:$0xff] %v10815_v13  ;;  %v10797_v36 = vadd.f32 %v10789_v41, %v10781_v34 }
 0x91e   : > { %v10799_v43 = vadd.f32 %v10791_v2, %v10783_v44  ;;  %10822 = vst [vmem:[%s12374_s24 + $0x8] sm:$0xff] %v10814_v24  ;;  %10824 = vst [vmem:[%s12374_s24 + $0x18] sm:$0xff] %v10816_v19  ;;  %v10798_v51 = vadd.f32 %v10790_v27, %v10782_v46  ;;  %v10800_v45 = vadd.f32 %v10792_v14, %v10784_v61 }
 0x91f   : > { %v10817_v22 = vmul.f32 %v10809_v32, %v10797_v36 }
 0x920   : > { %v10819_v16 = vmul.f32 %v10811_v7, %v10799_v43  ;;  %v10818_v62 = vmul.f32 %v10810_v54, %v10798_v51  ;;  %v10820_v63 = vmul.f32 %v10812_v35, %v10800_v45 }
 0x921   : > { %10825 = vst [vmem:[%s12374_s24 + $0x20] sm:$0xff] %v10817_v22 }
 0x922   : > { %10827 = vst [vmem:[%s12374_s24 + $0x30] sm:$0xff] %v10819_v16  ;;  %10826 = vst [vmem:[%s12374_s24 + $0x28] sm:$0xff] %v10818_v62 }
 0x923   : > { %10828 = vst [vmem:[%s12374_s24 + $0x38] sm:$0xff] %v10820_v63 }
 0x924 PF: > { %s16110_s3 = sld [smem:[#allocation13_spill]]  ;;  %s16111_s30 = sld [smem:[#allocation12_spill]] }
 0x925   : > { %s10847_s13 = sshll.u32 %s12374_s24, 4  ;;  %s16112_s23 = sld [smem:[#allocation24_spill]]  ;;  %s15983_s13 = int_to_ptr.vmem [resolvable:$true] %s10847_s13 }
 0x926   : > { %s16113_s7 = sand.u32 1, %s11942_s28   ;;  %s11856_s21 = scalar_lea.vmem %s15983_s13, 1024 }
 0x927   : > { %s15992_s18 = scalar_lea.sflag [#allocation10], %s16113_s7  ;;  %p11857_p12 = scmp.ne.s32.totalorder %s15983_s13, %s11856_s21 }
 0x928   : > { %s11987_s24 = smov [#allocation9]  }
 0x929   : > { %p11858_p13 = pnand %p11857_p12, %p12157_p0  ;;  %s11860_s12 = sshll.u32 %s11987_s24, 4  ;;  %s11861_s12 = int_to_ptr.vmem [resolvable:$false] %s11860_s12 }
 0x92a   : > { %s10837_s10 = smul.u32 %s16111_s30, %s16110_s3  ;;  %s11862_s22 = scalar_lea.vmem %s11861_s12, 2048 }
 0x92b   : > { %p11859_p2 = pneg %p11858_p13  ;;  %p11863_p3 = scmp.lt.s32.totalorder %s15983_s13, %s11861_s12 }
 0x92c   : > { %s11256_s2 = sshll.u32 %s10837_s10, 9  ;;  %p11864_p4 = scmp.lt.s32.totalorder %s11862_s22, %s11856_s21 }
 0x92d   : > { %s15988_s6 = scalar_lea.hbm %s16112_s23, %s11256_s2 }
 0x92e   : > { %p11865_p5 = por %p11864_p4, %p11863_p3 }
 0x930   : > { %p11866_p6 = pnand %p11865_p5, %p11859_p2 }
 0x932   : > { %11869 = shalt.err (!%p11866_p6)
}
 0x933   : > { %s11870_s20 = scalar_lea.hbm %s15988_s6, 1024  ;;  %s11874_s30 = scalar_lea.hbm %s16112_s23, 2048 }
 0x934   : > { %p11871_p7 = scmp.ne.s32.totalorder %s15988_s6, %s11870_s20  ;;  %p11875_p10 = scmp.lt.u32.totalorder %s15988_s6, %s16112_s23 }
 0x935   : > { %p11876_p11 = scmp.lt.u32.totalorder %s11874_s30, %s11870_s20  ;;  %p11878_p13 = scmp.lt.u32.totalorder %s11870_s20, %s15988_s6 }
 0x936   : > { %p11872_p8 = pnand %p11871_p7, %p12157_p0 }
 0x937   : > { %p11877_p12 = por %p11876_p11, %p11875_p10 }
 0x938   : > { %p11873_p9 = pneg %p11872_p8 }
 0x939   : > { %p11879_p2 = por %p11878_p13, %p11877_p12 }
 0x93b   : > { %p11880_p3 = pnand %p11879_p2, %p11873_p9 }
 0x93d   : > { %11883 = shalt.err (!%p11880_p3)
}
 0x93e   : > { %s11988_s0 = smov 512   ;;  %s11989_s5 = smov 1024  }
 0x93f   : > { %s11990_s7 = smov 32  }
 0x940   : > { %11513 = dma.vmem_to_hbm [thread:$0]  (%p12157_p0), %s15983_s13, 1024, %s15988_s6, %s15992_s18, %s11988_s0, %s11989_s5, %s11990_s7  }
 0x941 PF: > { %p11519_p4 = scmp.ge.s32.totalorder %s11982_s16, 2  ;;  %s10862_s21 = sand.u32 1, %s11938_s27  }
 0x942   : > { %s10863_s24 = scalar_lea.sflag [#allocation10], %s10862_s21 }
 0x943   : > { %p11516_p5 = pnand %p11519_p4, %p12161_p1 }
 0x945   : > { %11933 = dma.done.wait (!%p11516_p5), %s10863_s24, 1024  }
 0x946   : > { %11935 = vsyncadd (!%p11516_p5), %s10863_s24, 4294966272  ;;  %s21_s16 = sadd.s32 1, %s11982_s16   ;;  %s16114_s13 = sld [smem:[#allocation14_spill]] }
 0x947   : > { %p18_p6 = scmp.ge.s32.totalorder %s21_s16, 6   ;;  %s16115_s15 = sld [smem:[#allocation15_spill]] }
 0x948   : > { %s16116_s27 = smov %s11942_s28  ;;  %s16117_s28 = smov %s11946_s29 }
 0x949   : > { %s16118_s29 = smov %s12155_s8  ;;  %s16119_s30 = smov %s11954_s9 }
 0x94a   : > { %s16120_s9 = smov %s12126_s17  ;;  %s16121_s10 = smov %s11962_s11 }
 0x94b   : > { %s16122_s11 = smov %s12144_s25  ;;  %s16123_s12 = smov %s11974_s14 }
 0x94c   : > { %s16124_s14 = smov %s16126_s19  ;;  %20 = sbr.rel (!%p18_p6) target bundleno = 17 (0x11), region = 263 }
 0x953   :  { %10868 = vsyncpa [#allocation10], 1 }
 0x954   :  { %10870 = vsyncpa [#allocation10 + $0x1], 1 }

</bundles_post_ra>
